<compile_context>
chip_gen: v6e
topology: v6e:2x2x1
jax: 0.10.0
libtpu: 0.0.40
codegen_flags: <defaults>
</compile_context>

<pallas_src>
import functools

import jax
import jax.numpy as jnp
from jax.experimental import pallas as pl
from jax.experimental.pallas import tpu as pltpu


# ------------------------------ small helpers --------------------------------

def _round_up(a, m):
    return (a + m - 1) // m * m


def _vmem_capacity_bytes():
    try:
        return int(pltpu.get_tpu_info().vmem_capacity_bytes)
    except Exception:
        return 64 * 1024 * 1024          # conservative (v7x physical VMEM)


def _plan_tiles(H, W, Cin, C, NCP):
    """Pick the largest row band `th` (divisor of H) whose per-step VMEM
    working set fits, and the vmem limit to request from the compiler."""
    cap = _vmem_capacity_bytes()
    limit = int(min(0.75 * cap, 96 * 2 ** 20))   # <= ~48 MiB on v7x, 96 MiB on v5e/v6e
    budget = int(limit * 0.8)                    # headroom for Mosaic internals
    lane, f32 = 128, 4
    W2p = _round_up(W + 2, 8)

    fixed = 0
    # input block (whole padded image), double-buffered by the pipeline
    fixed += 2 * (H + 4) * _round_up(W2p + 2, 8) * _round_up(Cin, lane) * f32
    # output block, double-buffered
    fixed += 2 * _round_up(H * W, 8) * _round_up(NCP, lane) * f32
    # weights / biases (small, resident)
    fixed += (_round_up(9 * Cin, 8) + _round_up(9 * C, 8) + 3 * 8 + 8) * lane * f32

    th = None
    for cand in range(H, 0, -1):
        if H % cand:
            continue
        H2 = cand + 2
        band = 0
        band += H2 * _round_up(W2p, 8) * _round_up(C, lane) * f32            # fbuf
        band += _round_up(cand * W, 8) * _round_up(9 * C, lane) * f32        # conv2 slab
        band += 4 * _round_up(H2 * W2p, 8) * _round_up(C, lane) * f32        # temporaries
        if fixed + band <= budget:
            th = cand
            break
    if th is None:
        th = 1
    return th, H // th, limit


# ------------------------------- fused kernel --------------------------------

def _fused_unet_kernel(x_ref, w1_ref, b1_ref, w2_ref, b2_ref, w3_ref, b3_ref,
                       o_ref, fbuf, slab, *, th, nI, H, W, W2p, Cin, C):
    """Per grid step: one whole padded image (auto-pipelined into VMEM).

    Inside, loop over row bands of `th` output rows:
      conv1 (+ folded prompt mask) on a (th+2, W2p) haloed band -> fbuf,
      conv2 as one K=9*C matmul on an in-VMEM im2col slab, ReLU,
      fused 1x1 projection, store into the per-image output block.
    """
    H2 = th + 2

    @pl.loop(0, nI)
    def _(i):
        r0 = i * th                                   # first output row of band

        # ---- conv1 + ReLU + channel-prompt content mask (mask folded in w1/b1)
        acc = None
        for dy in range(3):
            for dx in range(3):
                tap = x_ref[pl.ds(r0 + dy, H2), pl.ds(dx, W2p), :]
                tap = tap.reshape(H2 * W2p, Cin)
                wk = w1_ref[pl.ds((dy * 3 + dx) * Cin, Cin), :]
                d = jnp.dot(tap, wk, preferred_element_type=jnp.float32)
                acc = d if acc is None else acc + d
        f = jnp.maximum(acc + b1_ref[...], 0.0)       # (H2*W2p, C) == f_content band

        # zero the f_content halo lying outside the real image (conv2 SAME pad)
        f3 = f.reshape(H2, W2p, C)
        row = jax.lax.broadcasted_iota(jnp.int32, (H2, W2p, 1), 0)
        col = jax.lax.broadcasted_iota(jnp.int32, (H2, W2p, 1), 1)
        g = r0 - 1 + row
        valid = (g >= 0) & (g < H) & (col >= 1) & (col <= W)
        fbuf[...] = jnp.where(valid, f3, 0.0)

        # ---- conv2 as a single K=9*C matmul on an in-VMEM im2col slab --------
        for dy in range(3):
            for dx in range(3):
                t = dy * 3 + dx
                slab[:, pl.ds(t * C, C)] = (
                    fbuf[pl.ds(dy, th), pl.ds(dx, W), :].reshape(th * W, C))
        h = jnp.dot(slab[...], w2_ref[...], preferred_element_type=jnp.float32)
        h = jnp.maximum(h + b2_ref[...], 0.0)         # (th*W, C)

        # ---- fused 1x1 projection (classes padded only to 8 lanes) -----------
        out = jnp.dot(h, w3_ref[...], preferred_element_type=jnp.float32) + b3_ref[...]
        start = pl.multiple_of(r0 * W, 8)
        o_ref[pl.ds(start, th * W), :] = out


# ------------------------------- forward pass --------------------------------

def unet_ccsdg_forward(x_nchw, params, tau=0.1):
    N, Cin, H, W = x_nchw.shape
    C = params["w1"].shape[-1]                       # 64 backbone channels
    num_classes = params["w3"].shape[-1]
    assert W % 8 == 0, "kernel assumes W is a multiple of 8"

    NCP = max(8, _round_up(num_classes, 8))          # small-width lane pad only
    th, nI, vmem_limit = _plan_tiles(H, W, Cin, C, NCP)

    x = jnp.transpose(x_nchw, (0, 2, 3, 1)).astype(jnp.float32)      # NHWC
    W2p = _round_up(W + 2, 8)
    # 2-pixel halo for the fused conv1->conv2 receptive field; extra right-hand
    # columns keep in-kernel column slices sublane-aligned.
    xpad = jnp.pad(x, ((0, 0), (2, 2), (2, W2p - W), (0, 0)))
    xpad = xpad.reshape(N * (H + 4), W2p + 2, Cin)

    # channel-prompt content mask, hoisted and FOLDED into conv1's weight/bias
    # (softmax >= 0 so relu(a)*s == relu(a*s)).
    soft0 = jax.nn.softmax(params["channel_prompt"] / tau, axis=0)[0:1, :]   # (1, C)
    w1s = params["w1"].reshape(9 * Cin, C) * soft0
    b1s = params["b1"].reshape(1, C) * soft0
    w2f = params["w2"].reshape(9 * C, C)
    b2f = params["b2"].reshape(1, C)
    w3p = jnp.zeros((C, NCP), jnp.float32).at[:, :num_classes].set(params["w3"])
    b3p = jnp.zeros((1, NCP), jnp.float32).at[:, :num_classes].set(
        params["b3"].reshape(1, -1))

    kern = functools.partial(_fused_unet_kernel, th=th, nI=nI, H=H, W=W,
                             W2p=W2p, Cin=Cin, C=C)

    out_rows = pl.pallas_call(
        kern,
        out_shape=jax.ShapeDtypeStruct((N * H * W, NCP), jnp.float32),
        grid_spec=pltpu.PrefetchScalarGridSpec(
            num_scalar_prefetch=0,
            grid=(N,),
            in_specs=[
                pl.BlockSpec((H + 4, W2p + 2, Cin), lambda b: (b, 0, 0)),
                pl.BlockSpec((9 * Cin, C), lambda b: (0, 0)),
                pl.BlockSpec((1, C), lambda b: (0, 0)),
                pl.BlockSpec((9 * C, C), lambda b: (0, 0)),
                pl.BlockSpec((1, C), lambda b: (0, 0)),
                pl.BlockSpec((C, NCP), lambda b: (0, 0)),
                pl.BlockSpec((1, NCP), lambda b: (0, 0)),
            ],
            out_specs=pl.BlockSpec((H * W, NCP), lambda b: (b, 0)),
            scratch_shapes=[
                pltpu.VMEM((th + 2, W2p, C), jnp.float32),   # f_content band
                pltpu.VMEM((th * W, 9 * C), jnp.float32),    # conv2 im2col slab
            ],
        ),
        compiler_params=pltpu.CompilerParams(
            dimension_semantics=("parallel",),
            vmem_limit_bytes=vmem_limit),
    )(xpad, w1s, b1s, w2f, b2f, w3p, b3p)

    out = out_rows.reshape(N, H, W, NCP)[..., :num_classes]
    return jnp.transpose(out, (0, 3, 1, 2))                          # NCHW


# ------------------------------ pure-JAX reference ---------------------------

def _conv3x3_ref(x, w, b):
    y = jax.lax.conv_general_dilated(
        x, w, window_strides=(1, 1), padding="SAME",
        dimension_numbers=("NHWC", "HWIO", "NHWC"))
    return y + b.reshape(1, 1, 1, -1)


def reference_forward(x_nchw, params, tau=0.1):
    x = jnp.transpose(x_nchw, (0, 2, 3, 1))
    feat = jnp.maximum(_conv3x3_ref(x, params["w1"], params["b1"]), 0.0)
    soft = jax.nn.softmax(params["channel_prompt"] / tau, axis=0)
    f_content = feat * soft[0][None, None, None, :]
    h = jnp.maximum(_conv3x3_ref(f_content, params["w2"], params["b2"]), 0.0)
    out = jnp.einsum("nhwc,cd->nhwd", h, params["w3"]) + params["b3"].reshape(1, 1, 1, -1)
    return jnp.transpose(out, (0, 3, 1, 2))


# ----------------------------------- main -------------------------------------

if __name__ == "__main__":
    key = jax.random.PRNGKey(0)
    ks = jax.random.split(key, 8)

    N, Cin, H, W = 2, 3, 16, 16
    num_classes = 3
    tau = 0.1

    x = jax.random.normal(ks[0], (N, Cin, H, W), jnp.float32)

    params = {
        # forward_first: 3x3 conv Cin -> 64 (HWIO) + bias
        "w1": jax.random.normal(ks[1], (3, 3, Cin, 64), jnp.float32) * 0.1,
        "b1": jax.random.normal(ks[2], (1, 64), jnp.float32) * 0.1,
        # nn.Parameter(torch.randn(2, 64, 1, 1)) stored as (2, 64)
        "channel_prompt": jax.random.normal(ks[3], (2, 64), jnp.float32),
        # forward_rn: 3x3 conv 64 -> 64, then 1x1 conv 64 -> num_classes
        "w2": jax.random.normal(ks[4], (3, 3, 64, 64), jnp.float32) * 0.05,
        "b2": jax.random.normal(ks[5], (1, 64), jnp.float32) * 0.1,
        "w3": jax.random.normal(ks[6], (64, num_classes), jnp.float32) * 0.1,
        "b3": jax.random.normal(ks[7], (1, num_classes), jnp.float32) * 0.1,
    }

    fwd = jax.jit(functools.partial(unet_ccsdg_forward, tau=tau))
    out = jax.block_until_ready(fwd(x, params))

    ref = reference_forward(x, params, tau=tau)
    assert out.shape == (N, num_classes, H, W), out.shape
    assert jnp.allclose(out, ref, rtol=1e-4, atol=1e-4), "mismatch vs reference"

    print("KERNEL_OK")
</pallas_src>

<mosaic_0001>
module attributes {stable_mosaic.version = 11 : i64} {
  func.func @_fused_unet_kernel(%arg0: i32, %arg1: memref<20x26x3xf32, #tpu.memory_space<vmem>>, %arg2: memref<27x64xf32, #tpu.memory_space<vmem>>, %arg3: memref<1x64xf32, #tpu.memory_space<vmem>>, %arg4: memref<576x64xf32, #tpu.memory_space<vmem>>, %arg5: memref<1x64xf32, #tpu.memory_space<vmem>>, %arg6: memref<64x8xf32, #tpu.memory_space<vmem>>, %arg7: memref<1x8xf32, #tpu.memory_space<vmem>>, %arg8: memref<256x8xf32, #tpu.memory_space<vmem>>, %arg9: memref<18x24x64xf32, #tpu.memory_space<vmem>>, %arg10: memref<256x576xf32, #tpu.memory_space<vmem>>) attributes {dimension_semantics = [#tpu.dimension_semantics<parallel>], iteration_bounds = array<i64: 2>, scalar_prefetch = 0 : i64, scratch_operands = 2 : i64, tpu.core_type = #tpu.core_type<tc>, window_params = [{transform_indices = @transform_0, window_bounds = array<i64: 20, 26, 3>}, {pipeline_mode = #tpu.pipeline_mode<synchronous>, transform_indices = @transform_1, window_bounds = array<i64: 27, 64>}, {pipeline_mode = #tpu.pipeline_mode<synchronous>, transform_indices = @transform_2, window_bounds = array<i64: 1, 64>}, {pipeline_mode = #tpu.pipeline_mode<synchronous>, transform_indices = @transform_3, window_bounds = array<i64: 576, 64>}, {pipeline_mode = #tpu.pipeline_mode<synchronous>, transform_indices = @transform_4, window_bounds = array<i64: 1, 64>}, {pipeline_mode = #tpu.pipeline_mode<synchronous>, transform_indices = @transform_5, window_bounds = array<i64: 64, 8>}, {pipeline_mode = #tpu.pipeline_mode<synchronous>, transform_indices = @transform_6, window_bounds = array<i64: 1, 8>}, {transform_indices = @transform_7, window_bounds = array<i64: 256, 8>}]} {
    %c0_i32 = arith.constant 0 : i32
    %c1_i32 = arith.constant 1 : i32
    %0 = arith.muli %c0_i32, %c1_i32 : i32
    %c0_i32_0 = arith.constant 0 : i32
    %1 = arith.addi %c0_i32_0, %0 : i32
    %c16_i32 = arith.constant 16 : i32
    %2 = arith.muli %1, %c16_i32 : i32
    %c0_i32_1 = arith.constant 0 : i32
    %3 = arith.addi %2, %c0_i32_1 : i32
    %4 = arith.index_cast %3 : i32 to index
    %c0 = arith.constant 0 : index
    %c0_2 = arith.constant 0 : index
    %5 = vector.load %arg1[%4, %c0, %c0_2] : memref<20x26x3xf32, #tpu.memory_space<vmem>>, vector<18x24x3xf32>
    %6 = vector.shape_cast %5 : vector<18x24x3xf32> to vector<432x3xf32>
    %c0_3 = arith.constant 0 : index
    %c0_4 = arith.constant 0 : index
    %7 = vector.load %arg2[%c0_3, %c0_4] : memref<27x64xf32, #tpu.memory_space<vmem>>, vector<3x64xf32>
    %cst = arith.constant dense<0.000000e+00> : vector<432x64xf32>
    %8 = tpu.matmul %6, %7, %cst {dimension_numbers = #tpu.dot_dimension_numbers<[1], [0], [0], [1], [0, 0, 1, 1], [], []>} : vector<432x3xf32>, vector<3x64xf32>, vector<432x64xf32> -> vector<432x64xf32>
    %c0_i32_5 = arith.constant 0 : i32
    %9 = arith.addi %2, %c0_i32_5 : i32
    %10 = arith.index_cast %9 : i32 to index
    %c1 = arith.constant 1 : index
    %c0_6 = arith.constant 0 : index
    %11 = vector.load %arg1[%10, %c1, %c0_6] : memref<20x26x3xf32, #tpu.memory_space<vmem>>, vector<18x24x3xf32>
    %12 = vector.shape_cast %11 : vector<18x24x3xf32> to vector<432x3xf32>
    %c3 = arith.constant 3 : index
    %c0_7 = arith.constant 0 : index
    %13 = vector.load %arg2[%c3, %c0_7] : memref<27x64xf32, #tpu.memory_space<vmem>>, vector<3x64xf32>
    %cst_8 = arith.constant dense<0.000000e+00> : vector<432x64xf32>
    %14 = tpu.matmul %12, %13, %cst_8 {dimension_numbers = #tpu.dot_dimension_numbers<[1], [0], [0], [1], [0, 0, 1, 1], [], []>} : vector<432x3xf32>, vector<3x64xf32>, vector<432x64xf32> -> vector<432x64xf32>
    %15 = arith.addf %8, %14 : vector<432x64xf32>
    %c0_i32_9 = arith.constant 0 : i32
    %16 = arith.addi %2, %c0_i32_9 : i32
    %17 = arith.index_cast %16 : i32 to index
    %c2 = arith.constant 2 : index
    %c0_10 = arith.constant 0 : index
    %18 = vector.load %arg1[%17, %c2, %c0_10] : memref<20x26x3xf32, #tpu.memory_space<vmem>>, vector<18x24x3xf32>
    %19 = vector.shape_cast %18 : vector<18x24x3xf32> to vector<432x3xf32>
    %c6 = arith.constant 6 : index
    %c0_11 = arith.constant 0 : index
    %20 = vector.load %arg2[%c6, %c0_11] : memref<27x64xf32, #tpu.memory_space<vmem>>, vector<3x64xf32>
    %cst_12 = arith.constant dense<0.000000e+00> : vector<432x64xf32>
    %21 = tpu.matmul %19, %20, %cst_12 {dimension_numbers = #tpu.dot_dimension_numbers<[1], [0], [0], [1], [0, 0, 1, 1], [], []>} : vector<432x3xf32>, vector<3x64xf32>, vector<432x64xf32> -> vector<432x64xf32>
    %22 = arith.addf %15, %21 : vector<432x64xf32>
    %c1_i32_13 = arith.constant 1 : i32
    %23 = arith.addi %2, %c1_i32_13 : i32
    %24 = arith.index_cast %23 : i32 to index
    %c0_14 = arith.constant 0 : index
    %c0_15 = arith.constant 0 : index
    %25 = vector.load %arg1[%24, %c0_14, %c0_15] : memref<20x26x3xf32, #tpu.memory_space<vmem>>, vector<18x24x3xf32>
    %26 = vector.shape_cast %25 : vector<18x24x3xf32> to vector<432x3xf32>
    %c9 = arith.constant 9 : index
    %c0_16 = arith.constant 0 : index
    %27 = vector.load %arg2[%c9, %c0_16] : memref<27x64xf32, #tpu.memory_space<vmem>>, vector<3x64xf32>
    %cst_17 = arith.constant dense<0.000000e+00> : vector<432x64xf32>
    %28 = tpu.matmul %26, %27, %cst_17 {dimension_numbers = #tpu.dot_dimension_numbers<[1], [0], [0], [1], [0, 0, 1, 1], [], []>} : vector<432x3xf32>, vector<3x64xf32>, vector<432x64xf32> -> vector<432x64xf32>
    %29 = arith.addf %22, %28 : vector<432x64xf32>
    %c1_i32_18 = arith.constant 1 : i32
    %30 = arith.addi %2, %c1_i32_18 : i32
    %31 = arith.index_cast %30 : i32 to index
    %c1_19 = arith.constant 1 : index
    %c0_20 = arith.constant 0 : index
    %32 = vector.load %arg1[%31, %c1_19, %c0_20] : memref<20x26x3xf32, #tpu.memory_space<vmem>>, vector<18x24x3xf32>
    %33 = vector.shape_cast %32 : vector<18x24x3xf32> to vector<432x3xf32>
    %c12 = arith.constant 12 : index
    %c0_21 = arith.constant 0 : index
    %34 = vector.load %arg2[%c12, %c0_21] : memref<27x64xf32, #tpu.memory_space<vmem>>, vector<3x64xf32>
    %cst_22 = arith.constant dense<0.000000e+00> : vector<432x64xf32>
    %35 = tpu.matmul %33, %34, %cst_22 {dimension_numbers = #tpu.dot_dimension_numbers<[1], [0], [0], [1], [0, 0, 1, 1], [], []>} : vector<432x3xf32>, vector<3x64xf32>, vector<432x64xf32> -> vector<432x64xf32>
    %36 = arith.addf %29, %35 : vector<432x64xf32>
    %c1_i32_23 = arith.constant 1 : i32
    %37 = arith.addi %2, %c1_i32_23 : i32
    %38 = arith.index_cast %37 : i32 to index
    %c2_24 = arith.constant 2 : index
    %c0_25 = arith.constant 0 : index
    %39 = vector.load %arg1[%38, %c2_24, %c0_25] : memref<20x26x3xf32, #tpu.memory_space<vmem>>, vector<18x24x3xf32>
    %40 = vector.shape_cast %39 : vector<18x24x3xf32> to vector<432x3xf32>
    %c15 = arith.constant 15 : index
    %c0_26 = arith.constant 0 : index
    %41 = vector.load %arg2[%c15, %c0_26] : memref<27x64xf32, #tpu.memory_space<vmem>>, vector<3x64xf32>
    %cst_27 = arith.constant dense<0.000000e+00> : vector<432x64xf32>
    %42 = tpu.matmul %40, %41, %cst_27 {dimension_numbers = #tpu.dot_dimension_numbers<[1], [0], [0], [1], [0, 0, 1, 1], [], []>} : vector<432x3xf32>, vector<3x64xf32>, vector<432x64xf32> -> vector<432x64xf32>
    %43 = arith.addf %36, %42 : vector<432x64xf32>
    %c2_i32 = arith.constant 2 : i32
    %44 = arith.addi %2, %c2_i32 : i32
    %45 = arith.index_cast %44 : i32 to index
    %c0_28 = arith.constant 0 : index
    %c0_29 = arith.constant 0 : index
    %46 = vector.load %arg1[%45, %c0_28, %c0_29] : memref<20x26x3xf32, #tpu.memory_space<vmem>>, vector<18x24x3xf32>
    %47 = vector.shape_cast %46 : vector<18x24x3xf32> to vector<432x3xf32>
    %c18 = arith.constant 18 : index
    %c0_30 = arith.constant 0 : index
    %48 = vector.load %arg2[%c18, %c0_30] : memref<27x64xf32, #tpu.memory_space<vmem>>, vector<3x64xf32>
    %cst_31 = arith.constant dense<0.000000e+00> : vector<432x64xf32>
    %49 = tpu.matmul %47, %48, %cst_31 {dimension_numbers = #tpu.dot_dimension_numbers<[1], [0], [0], [1], [0, 0, 1, 1], [], []>} : vector<432x3xf32>, vector<3x64xf32>, vector<432x64xf32> -> vector<432x64xf32>
    %50 = arith.addf %43, %49 : vector<432x64xf32>
    %c2_i32_32 = arith.constant 2 : i32
    %51 = arith.addi %2, %c2_i32_32 : i32
    %52 = arith.index_cast %51 : i32 to index
    %c1_33 = arith.constant 1 : index
    %c0_34 = arith.constant 0 : index
    %53 = vector.load %arg1[%52, %c1_33, %c0_34] : memref<20x26x3xf32, #tpu.memory_space<vmem>>, vector<18x24x3xf32>
    %54 = vector.shape_cast %53 : vector<18x24x3xf32> to vector<432x3xf32>
    %c21 = arith.constant 21 : index
    %c0_35 = arith.constant 0 : index
    %55 = vector.load %arg2[%c21, %c0_35] : memref<27x64xf32, #tpu.memory_space<vmem>>, vector<3x64xf32>
    %cst_36 = arith.constant dense<0.000000e+00> : vector<432x64xf32>
    %56 = tpu.matmul %54, %55, %cst_36 {dimension_numbers = #tpu.dot_dimension_numbers<[1], [0], [0], [1], [0, 0, 1, 1], [], []>} : vector<432x3xf32>, vector<3x64xf32>, vector<432x64xf32> -> vector<432x64xf32>
    %57 = arith.addf %50, %56 : vector<432x64xf32>
    %c2_i32_37 = arith.constant 2 : i32
    %58 = arith.addi %2, %c2_i32_37 : i32
    %59 = arith.index_cast %58 : i32 to index
    %c2_38 = arith.constant 2 : index
    %c0_39 = arith.constant 0 : index
    %60 = vector.load %arg1[%59, %c2_38, %c0_39] : memref<20x26x3xf32, #tpu.memory_space<vmem>>, vector<18x24x3xf32>
    %61 = vector.shape_cast %60 : vector<18x24x3xf32> to vector<432x3xf32>
    %c24 = arith.constant 24 : index
    %c0_40 = arith.constant 0 : index
    %62 = vector.load %arg2[%c24, %c0_40] : memref<27x64xf32, #tpu.memory_space<vmem>>, vector<3x64xf32>
    %cst_41 = arith.constant dense<0.000000e+00> : vector<432x64xf32>
    %63 = tpu.matmul %61, %62, %cst_41 {dimension_numbers = #tpu.dot_dimension_numbers<[1], [0], [0], [1], [0, 0, 1, 1], [], []>} : vector<432x3xf32>, vector<3x64xf32>, vector<432x64xf32> -> vector<432x64xf32>
    %64 = arith.addf %57, %63 : vector<432x64xf32>
    %c0_42 = arith.constant 0 : index
    %c0_43 = arith.constant 0 : index
    %65 = vector.load %arg3[%c0_42, %c0_43] : memref<1x64xf32, #tpu.memory_space<vmem>>, vector<1x64xf32>
    %66 = vector.broadcast %65 : vector<1x64xf32> to vector<432x64xf32>
    %67 = arith.addf %64, %66 : vector<432x64xf32>
    %cst_44 = arith.constant 0.000000e+00 : f32
    %68 = vector.broadcast %cst_44 : f32 to vector<432x64xf32>
    %69 = arith.maximumf %67, %68 : vector<432x64xf32>
    %70 = vector.shape_cast %69 : vector<432x64xf32> to vector<18x24x64xf32>
    %71 = tpu.iota {dimensions = array<i32: 0>} : vector<18x24x1xi32>
    %72 = tpu.iota {dimensions = array<i32: 1>} : vector<18x24x1xi32>
    %c1_i32_45 = arith.constant 1 : i32
    %73 = arith.subi %2, %c1_i32_45 : i32
    %74 = vector.broadcast %73 : i32 to vector<18x24x1xi32>
    %75 = arith.addi %74, %71 : vector<18x24x1xi32>
    %c0_i32_46 = arith.constant 0 : i32
    %76 = vector.broadcast %c0_i32_46 : i32 to vector<18x24x1xi32>
    %77 = arith.cmpi sge, %75, %76 : vector<18x24x1xi32>
    %c16_i32_47 = arith.constant 16 : i32
    %78 = vector.broadcast %c16_i32_47 : i32 to vector<18x24x1xi32>
    %79 = arith.cmpi slt, %75, %78 : vector<18x24x1xi32>
    %80 = arith.andi %77, %79 : vector<18x24x1xi1>
    %c1_i32_48 = arith.constant 1 : i32
    %81 = vector.broadcast %c1_i32_48 : i32 to vector<18x24x1xi32>
    %82 = arith.cmpi sge, %72, %81 : vector<18x24x1xi32>
    %83 = arith.andi %80, %82 : vector<18x24x1xi1>
    %c16_i32_49 = arith.constant 16 : i32
    %84 = vector.broadcast %c16_i32_49 : i32 to vector<18x24x1xi32>
    %85 = arith.cmpi sle, %72, %84 : vector<18x24x1xi32>
    %86 = arith.andi %83, %85 : vector<18x24x1xi1>
    %cst_50 = arith.constant 0.000000e+00 : f32
    %87 = vector.shape_cast %86 : vector<18x24x1xi1> to vector<18x24x1xi1>
    %88 = vector.broadcast %87 : vector<18x24x1xi1> to vector<18x24x64xi1>
    %89 = vector.broadcast %cst_50 : f32 to vector<18x24x64xf32>
    %90 = arith.select %88, %70, %89 : vector<18x24x64xi1>, vector<18x24x64xf32>
    %c0_51 = arith.constant 0 : index
    %c0_52 = arith.constant 0 : index
    %c0_53 = arith.constant 0 : index
    %91 = vector.load %arg9[%c0_51, %c0_52, %c0_53] : memref<18x24x64xf32, #tpu.memory_space<vmem>>, vector<18x24x64xf32>
    tpu.vector_store %arg9[%c0_51, %c0_52, %c0_53], %90 {strides = array<i32>} : memref<18x24x64xf32, #tpu.memory_space<vmem>>, vector<18x24x64xf32>,
    %c0_54 = arith.constant 0 : index
    %c0_55 = arith.constant 0 : index
    %c0_56 = arith.constant 0 : index
    %92 = vector.load %arg9[%c0_54, %c0_55, %c0_56] : memref<18x24x64xf32, #tpu.memory_space<vmem>>, vector<16x16x64xf32>
    %93 = vector.shape_cast %92 : vector<16x16x64xf32> to vector<256x64xf32>
    %c0_57 = arith.constant 0 : index
    %c0_58 = arith.constant 0 : index
    %94 = vector.load %arg10[%c0_57, %c0_58] : memref<256x576xf32, #tpu.memory_space<vmem>>, vector<256x64xf32>
    tpu.vector_store %arg10[%c0_57, %c0_58], %93 {strides = array<i32>} : memref<256x576xf32, #tpu.memory_space<vmem>>, vector<256x64xf32>,
    %c0_59 = arith.constant 0 : index
    %c1_60 = arith.constant 1 : index
    %c0_61 = arith.constant 0 : index
    %95 = vector.load %arg9[%c0_59, %c1_60, %c0_61] : memref<18x24x64xf32, #tpu.memory_space<vmem>>, vector<16x16x64xf32>
    %96 = vector.shape_cast %95 : vector<16x16x64xf32> to vector<256x64xf32>
    %c0_62 = arith.constant 0 : index
    %c64 = arith.constant 64 : index
    %97 = vector.load %arg10[%c0_62, %c64] : memref<256x576xf32, #tpu.memory_space<vmem>>, vector<256x64xf32>
    tpu.vector_store %arg10[%c0_62, %c64], %96 {strides = array<i32>} : memref<256x576xf32, #tpu.memory_space<vmem>>, vector<256x64xf32>,
    %c0_63 = arith.constant 0 : index
    %c2_64 = arith.constant 2 : index
    %c0_65 = arith.constant 0 : index
    %98 = vector.load %arg9[%c0_63, %c2_64, %c0_65] : memref<18x24x64xf32, #tpu.memory_space<vmem>>, vector<16x16x64xf32>
    %99 = vector.shape_cast %98 : vector<16x16x64xf32> to vector<256x64xf32>
    %c0_66 = arith.constant 0 : index
    %c128 = arith.constant 128 : index
    %100 = vector.load %arg10[%c0_66, %c128] : memref<256x576xf32, #tpu.memory_space<vmem>>, vector<256x64xf32>
    tpu.vector_store %arg10[%c0_66, %c128], %99 {strides = array<i32>} : memref<256x576xf32, #tpu.memory_space<vmem>>, vector<256x64xf32>,
    %c1_67 = arith.constant 1 : index
    %c0_68 = arith.constant 0 : index
    %c0_69 = arith.constant 0 : index
    %101 = vector.load %arg9[%c1_67, %c0_68, %c0_69] : memref<18x24x64xf32, #tpu.memory_space<vmem>>, vector<16x16x64xf32>
    %102 = vector.shape_cast %101 : vector<16x16x64xf32> to vector<256x64xf32>
    %c0_70 = arith.constant 0 : index
    %c192 = arith.constant 192 : index
    %103 = vector.load %arg10[%c0_70, %c192] : memref<256x576xf32, #tpu.memory_space<vmem>>, vector<256x64xf32>
    tpu.vector_store %arg10[%c0_70, %c192], %102 {strides = array<i32>} : memref<256x576xf32, #tpu.memory_space<vmem>>, vector<256x64xf32>,
    %c1_71 = arith.constant 1 : index
    %c1_72 = arith.constant 1 : index
    %c0_73 = arith.constant 0 : index
    %104 = vector.load %arg9[%c1_71, %c1_72, %c0_73] : memref<18x24x64xf32, #tpu.memory_space<vmem>>, vector<16x16x64xf32>
    %105 = vector.shape_cast %104 : vector<16x16x64xf32> to vector<256x64xf32>
    %c0_74 = arith.constant 0 : index
    %c256 = arith.constant 256 : index
    %106 = vector.load %arg10[%c0_74, %c256] : memref<256x576xf32, #tpu.memory_space<vmem>>, vector<256x64xf32>
    tpu.vector_store %arg10[%c0_74, %c256], %105 {strides = array<i32>} : memref<256x576xf32, #tpu.memory_space<vmem>>, vector<256x64xf32>,
    %c1_75 = arith.constant 1 : index
    %c2_76 = arith.constant 2 : index
    %c0_77 = arith.constant 0 : index
    %107 = vector.load %arg9[%c1_75, %c2_76, %c0_77] : memref<18x24x64xf32, #tpu.memory_space<vmem>>, vector<16x16x64xf32>
    %108 = vector.shape_cast %107 : vector<16x16x64xf32> to vector<256x64xf32>
    %c0_78 = arith.constant 0 : index
    %c320 = arith.constant 320 : index
    %109 = vector.load %arg10[%c0_78, %c320] : memref<256x576xf32, #tpu.memory_space<vmem>>, vector<256x64xf32>
    tpu.vector_store %arg10[%c0_78, %c320], %108 {strides = array<i32>} : memref<256x576xf32, #tpu.memory_space<vmem>>, vector<256x64xf32>,
    %c2_79 = arith.constant 2 : index
    %c0_80 = arith.constant 0 : index
    %c0_81 = arith.constant 0 : index
    %110 = vector.load %arg9[%c2_79, %c0_80, %c0_81] : memref<18x24x64xf32, #tpu.memory_space<vmem>>, vector<16x16x64xf32>
    %111 = vector.shape_cast %110 : vector<16x16x64xf32> to vector<256x64xf32>
    %c0_82 = arith.constant 0 : index
    %c384 = arith.constant 384 : index
    %112 = vector.load %arg10[%c0_82, %c384] : memref<256x576xf32, #tpu.memory_space<vmem>>, vector<256x64xf32>
    tpu.vector_store %arg10[%c0_82, %c384], %111 {strides = array<i32>} : memref<256x576xf32, #tpu.memory_space<vmem>>, vector<256x64xf32>,
    %c2_83 = arith.constant 2 : index
    %c1_84 = arith.constant 1 : index
    %c0_85 = arith.constant 0 : index
    %113 = vector.load %arg9[%c2_83, %c1_84, %c0_85] : memref<18x24x64xf32, #tpu.memory_space<vmem>>, vector<16x16x64xf32>
    %114 = vector.shape_cast %113 : vector<16x16x64xf32> to vector<256x64xf32>
    %c0_86 = arith.constant 0 : index
    %c448 = arith.constant 448 : index
    %115 = vector.load %arg10[%c0_86, %c448] : memref<256x576xf32, #tpu.memory_space<vmem>>, vector<256x64xf32>
    tpu.vector_store %arg10[%c0_86, %c448], %114 {strides = array<i32>} : memref<256x576xf32, #tpu.memory_space<vmem>>, vector<256x64xf32>,
    %c2_87 = arith.constant 2 : index
    %c2_88 = arith.constant 2 : index
    %c0_89 = arith.constant 0 : index
    %116 = vector.load %arg9[%c2_87, %c2_88, %c0_89] : memref<18x24x64xf32, #tpu.memory_space<vmem>>, vector<16x16x64xf32>
    %117 = vector.shape_cast %116 : vector<16x16x64xf32> to vector<256x64xf32>
    %c0_90 = arith.constant 0 : index
    %c512 = arith.constant 512 : index
    %118 = vector.load %arg10[%c0_90, %c512] : memref<256x576xf32, #tpu.memory_space<vmem>>, vector<256x64xf32>
    tpu.vector_store %arg10[%c0_90, %c512], %117 {strides = array<i32>} : memref<256x576xf32, #tpu.memory_space<vmem>>, vector<256x64xf32>,
    %c0_91 = arith.constant 0 : index
    %c0_92 = arith.constant 0 : index
    %119 = vector.load %arg10[%c0_91, %c0_92] : memref<256x576xf32, #tpu.memory_space<vmem>>, vector<256x576xf32>
    %c0_93 = arith.constant 0 : index
    %c0_94 = arith.constant 0 : index
    %120 = vector.load %arg4[%c0_93, %c0_94] : memref<576x64xf32, #tpu.memory_space<vmem>>, vector<576x64xf32>
    %cst_95 = arith.constant dense<0.000000e+00> : vector<256x64xf32>
    %121 = tpu.matmul %119, %120, %cst_95 {dimension_numbers = #tpu.dot_dimension_numbers<[1], [0], [0], [1], [0, 0, 1, 1], [], []>} : vector<256x576xf32>, vector<576x64xf32>, vector<256x64xf32> -> vector<256x64xf32>
    %c0_96 = arith.constant 0 : index
    %c0_97 = arith.constant 0 : index
    %122 = vector.load %arg5[%c0_96, %c0_97] : memref<1x64xf32, #tpu.memory_space<vmem>>, vector<1x64xf32>
    %123 = vector.broadcast %122 : vector<1x64xf32> to vector<256x64xf32>
    %124 = arith.addf %121, %123 : vector<256x64xf32>
    %cst_98 = arith.constant 0.000000e+00 : f32
    %125 = vector.broadcast %cst_98 : f32 to vector<256x64xf32>
    %126 = arith.maximumf %124, %125 : vector<256x64xf32>
    %c0_99 = arith.constant 0 : index
    %c0_100 = arith.constant 0 : index
    %127 = vector.load %arg6[%c0_99, %c0_100] : memref<64x8xf32, #tpu.memory_space<vmem>>, vector<64x8xf32>
    %cst_101 = arith.constant dense<0.000000e+00> : vector<256x8xf32>
    %128 = tpu.matmul %126, %127, %cst_101 {dimension_numbers = #tpu.dot_dimension_numbers<[1], [0], [0], [1], [0, 0, 1, 1], [], []>} : vector<256x64xf32>, vector<64x8xf32>, vector<256x8xf32> -> vector<256x8xf32>
    %c0_102 = arith.constant 0 : index
    %c0_103 = arith.constant 0 : index
    %129 = vector.load %arg7[%c0_102, %c0_103] : memref<1x8xf32, #tpu.memory_space<vmem>>, vector<1x8xf32>
    %130 = vector.broadcast %129 : vector<1x8xf32> to vector<256x8xf32>
    %131 = arith.addf %128, %130 : vector<256x8xf32>
    %c16_i32_104 = arith.constant 16 : i32
    %132 = arith.muli %2, %c16_i32_104 : i32
    %133 = tpu.assume_multiple %132, 8 : i32
    %134 = arith.index_cast %133 : i32 to index
    %c0_105 = arith.constant 0 : index
    %135 = vector.load %arg8[%134, %c0_105] : memref<256x8xf32, #tpu.memory_space<vmem>>, vector<256x8xf32>
    tpu.vector_store %arg8[%134, %c0_105], %131 {strides = array<i32>} : memref<256x8xf32, #tpu.memory_space<vmem>>, vector<256x8xf32>,
    %c1_i32_106 = arith.constant 1 : i32
    return
  }
  func.func @transform_0(%arg0: i32) -> (i32, i32, i32) {
    %c0_i32 = arith.constant 0 : i32
    %c0_i32_0 = arith.constant 0 : i32
    %c0_i32_1 = arith.constant 0 : i32
    return %arg0, %c0_i32, %c0_i32_0 : i32, i32, i32
  }
  func.func @transform_1(%arg0: i32) -> (i32, i32) {
    %c0_i32 = arith.constant 0 : i32
    %c0_i32_0 = arith.constant 0 : i32
    %c0_i32_1 = arith.constant 0 : i32
    return %c0_i32, %c0_i32_0 : i32, i32
  }
  func.func @transform_2(%arg0: i32) -> (i32, i32) {
    %c0_i32 = arith.constant 0 : i32
    %c0_i32_0 = arith.constant 0 : i32
    %c0_i32_1 = arith.constant 0 : i32
    return %c0_i32, %c0_i32_0 : i32, i32
  }
  func.func @transform_3(%arg0: i32) -> (i32, i32) {
    %c0_i32 = arith.constant 0 : i32
    %c0_i32_0 = arith.constant 0 : i32
    %c0_i32_1 = arith.constant 0 : i32
    return %c0_i32, %c0_i32_0 : i32, i32
  }
  func.func @transform_4(%arg0: i32) -> (i32, i32) {
    %c0_i32 = arith.constant 0 : i32
    %c0_i32_0 = arith.constant 0 : i32
    %c0_i32_1 = arith.constant 0 : i32
    return %c0_i32, %c0_i32_0 : i32, i32
  }
  func.func @transform_5(%arg0: i32) -> (i32, i32) {
    %c0_i32 = arith.constant 0 : i32
    %c0_i32_0 = arith.constant 0 : i32
    %c0_i32_1 = arith.constant 0 : i32
    return %c0_i32, %c0_i32_0 : i32, i32
  }
  func.func @transform_6(%arg0: i32) -> (i32, i32) {
    %c0_i32 = arith.constant 0 : i32
    %c0_i32_0 = arith.constant 0 : i32
    %c0_i32_1 = arith.constant 0 : i32
    return %c0_i32, %c0_i32_0 : i32, i32
  }
  func.func @transform_7(%arg0: i32) -> (i32, i32) {
    %c0_i32 = arith.constant 0 : i32
    %c0_i32_0 = arith.constant 0 : i32
    return %arg0, %c0_i32 : i32, i32
  }
}

</mosaic_0001>

<bundles_post_ra>
// kernel: unet_ccsdg_forward.1
= control target key start
LH: loop header
LB: loop body
LE: loop exit
PB: predicated region body
PF: predicated region fallthrough
CT: control target
= control target key end

     0   :  { %s10889_s24 = smov 0   ;;  %s14650_s0 = inlined_call_operand.vmem [shape: f32[40,26,3], index: 0, kind: input, shape index: {}]   ;;  %s14651_s1 = inlined_call_operand.vmem [shape: f32[27,64], index: 1, kind: input, shape index: {}]   ;;  %s14652_s2 = inlined_call_operand.vmem [shape: f32[1,64], index: 2, kind: input, shape index: {}]   ;;  %s14653_s3 = inlined_call_operand.vmem [shape: f32[576,64], index: 3, kind: input, shape index: {}]   ;;  %s14654_s4 = inlined_call_operand.vmem [shape: f32[1,64], index: 4, kind: input, shape index: {}]   ;;  %s14655_s5 = inlined_call_operand.vmem [shape: f32[64,8], index: 5, kind: input, shape index: {}]   ;;  %s14656_s6 = inlined_call_operand.vmem [shape: f32[1,8], index: 6, kind: input, shape index: {}]   ;;  %s14657_s7 = inlined_call_operand.vmem [shape: f32[512,8], index: 7, kind: output, shape index: {}]  }
   0x1 LB: > { %s8478_s25 = sadd.s32 4294967295, %s10845_s24   ;;  %p8482_p0 = scmp.ge.s32.totalorder %s10845_s24, 1  ;;  %s10845_s24 = sphi %s10889_s24, %s17_s24  }
   0x2   : > { %p239_p1 = scmp.lt.s32.totalorder %s10845_s24, 3 }
   0x4   : > { %p240_p2 = pnand %p8482_p0, %p239_p1 }
   0x6   : > { %243 = sbr.rel (%p240_p2) target bundleno = 1461 (0x5b5), region = 48 }
   0xb   : > { %v394_v0 = vld [vmem:[%s14651_s1 + $0x3] sm:$0x7]  ;;  %vm558_vm0 = vcmask 1042432   ;;  %s272_s28 = smul.u32 20, %s8478_s25  ;;  %v339_v1 = vld [vmem:[%s14651_s1] sm:$0x7] }
   0xc   : > { %9951 = vmatprep.subr.msk.mxu0 %vm558_vm0, %v394_v0  ;;  %10826 = vmatprep.subr.msk.mxu1 %vm558_vm0, %v339_v1  ;;  %v2061_v2 = vld [vmem:[%s14651_s1 + $0x9] sm:$0x7]  ;;  %vm395_vm1 = vcmask 23552   ;;  %v10929_v7 = vld [vmem:[%s14651_s1 + $0x6] sm:$0x7]  ;;  %vm5865_vm2 = vcmask 523264  }
   0xd   : > { %9952 = vmatpush3.msk.msra.mxu0 %vm558_vm0, %v394_v0  ;;  %p273_p3 = scmp.lt.s32.totalorder %s272_s28, 39  ;;  %10827 = vmatpush3.msk.msra.mxu1 %vm558_vm0, %v339_v1  ;;  %vm6144_vm3 = vcmask 1048064   ;;  %s8485_s18 = sshll.u32 %s8478_s25, 5  ;;  %vm8389_vm6 = vcmask 64512  }
   0xe   : > { %10034 = vmatprep.subr.msk.mxu0 %vm558_vm0, %v339_v1  ;;  %10200 = vmatprep.subr.msk.mxu1 %vm558_vm0, %v2061_v2  ;;  %p280_p4 = scmp.lt.s32.totalorder %s8485_s18, 63 }
   0xf   : > { %s14961_s28 = smov (!%p273_p3, %s272_s28), 39 }
  0x10   : > { %s9375_s10 = sshll.u32 %s14961_s28, 5  ;;  %s10848_s28 = smov 64  }
  0x11   : > { %s10917_s13 = scalar_lea.vmem %s14650_s0, %s9375_s10  ;;  %s14963_s18 = smov (!%p280_p4, %s8485_s18), 63 }
  0x12   : > { %v340_v3 = vld [vmem:[%s10917_s13 + $0x1] sm:$0xff]  ;;  %v341_v4 = vld [vmem:[%s10917_s13 + $0x9] sm:$0xff]  ;;  %v342_v5 = vld [vmem:[%s10917_s13 + $0x11] sm:$0xff]  ;;  %s8486_s19 = sshll.u32 %s14963_s18, 3 }
  0x13   : > { %9953 = vmatprep.mubr.msk.f32.mxu0 %vm395_vm1, %v340_v3  ;;  %v10924_v6 = vld [vmem:[%s10917_s13 + $0x28] sm:$0xff]  ;;  %v10935_v8 = vld [vmem:[%s10917_s13 + $0x30] sm:$0xff]  ;;  %v10943_v10 = vld [vmem:[%s10917_s13 + $0x40] sm:$0xff]  ;;  %s14549_s22 = scalar_lea.vmem %s14657_s7, %s8486_s19 }
  0x14   : > { %9954 = vmatmul.mubr.msk.f32.vlgmr.msra.gmra.mxu0 %vm395_vm1, %v341_v4  ;;  %10042 = vmatprep.mubr.msk.f32.mxu1 %vm395_vm1, %v10924_v6  ;;  %v10940_v9 = vld [vmem:[%s10917_s13 + $0x21] sm:$0xff]  ;;  %v10946_v11 = vld [vmem:[%s10917_s13 + $0x29] sm:$0xff]  ;;  %v10966_v14 = vld [vmem:[%s10917_s13 + $0x31] sm:$0xff] }
  0x15   : > { %10035 = vmatpush3.msk.msra.mxu0 %vm558_vm0, %v339_v1  ;;  %9956 = vmatprep.mubr.msk.f32.mxu0 %vm395_vm1, %v342_v5  ;;  %v10955_v12 = vld [vmem:[%s10917_s13 + $0x48] sm:$0xff]  ;;  %v10961_v13 = vld [vmem:[%s10917_s13 + $0x50] sm:$0xff]  ;;  %v10976_v16 = vld [vmem:[%s10917_s13 + $0x60] sm:$0xff] }
  0x16   : > { %10043 = vmatmul.mubr.msk.f32.vlgmr.msra.gmra.mxu1 %vm395_vm1, %v10935_v8  ;;  %10117 = vmatprep.subr.msk.mxu0 %vm558_vm0, %v10929_v7  ;;  %v10969_v15 = vld [vmem:[%s10917_s13 + $0x41] sm:$0xff]  ;;  %v10986_v18 = vld [vmem:[%s10917_s13 + $0x49] sm:$0xff]  ;;  %v10989_v19 = vld [vmem:[%s10917_s13 + $0x51] sm:$0xff] }
  0x17   : > { %10045 = vmatprep.mubr.msk.f32.mxu1 %vm395_vm1, %v10943_v10  ;;  %10201 = vmatpush3.msk.msra.mxu1 %vm558_vm0, %v2061_v2  ;;  %v10981_v17 = vld [vmem:[%s10917_s13 + $0x68] sm:$0xff]  ;;  %14687 = vst [vmem:[#allocation4_spill] sm:$0xff] %v10989_v19  ;;  %v10996_v20 = vld [vmem:[%s10917_s13 + $0x70] sm:$0xff]  ;;  %v11001_v21 = vld [vmem:[%s10917_s13 + $0x80] sm:$0xff] }
  0x18   : > { %9957 = vmatmul.mubr.msk.f32.gmra.mxu0 %vm395_vm1, %v10940_v9  ;;  %v11006_v22 = vld [vmem:[%s10917_s13 + $0x61] sm:$0xff]  ;;  %v11009_v23 = vld [vmem:[%s10917_s13 + $0x69] sm:$0xff]  ;;  %v11026_v26 = vld [vmem:[%s10917_s13 + $0x71] sm:$0xff] }
  0x19   : > { %9959 = vmatprep.mubr.msk.f32.mxu0 %vm395_vm1, %v10946_v11  ;;  %14688 = vst [vmem:[#allocation5_spill] sm:$0xff] %v11006_v22  ;;  %14689 = vst [vmem:[#allocation6_spill] sm:$0xff] %v11009_v23  ;;  %v11016_v24 = vld [vmem:[%s10917_s13 + $0x88] sm:$0xff]  ;;  %v11021_v25 = vld [vmem:[%s10917_s13 + $0x90] sm:$0xff] }
  0x1a   : > { %10046 = vmatmul.mubr.msk.f32.gmra.mxu1 %vm395_vm1, %v10955_v12  ;;  %14690 = vst [vmem:[#allocation7_spill] sm:$0xff] %v11026_v26  ;;  %v11029_v27 = vld [vmem:[%s10917_s13 + $0x81] sm:$0xff]  ;;  %v353_v30 = vld [vmem:[%s10917_s13 + $0x89] sm:$0xff]  ;;  %v354_v31 = vld [vmem:[%s10917_s13 + $0x91] sm:$0xff] }
  0x1b   : > { %10048 = vmatprep.mubr.msk.f32.mxu1 %vm395_vm1, %v10961_v13  ;;  %14691 = vst [vmem:[#allocation8_spill] sm:$0xff] %v11029_v27  ;;  %v11036_v28 = vld [vmem:[%s10917_s13 + $0xa0] sm:$0xff]  ;;  %v11041_v29 = vld [vmem:[%s10917_s13 + $0xa8] sm:$0xff]  ;;  %v11052_v32 = vld [vmem:[%s10917_s13 + $0xb0] sm:$0xff] }
  0x1c   : > { %9960 = vmatmul.mubr.msk.f32.gmra.mxu0 %vm395_vm1, %v10966_v14  ;;  %v11056_v33 = vld [vmem:[%s10917_s13 + $0xc0] sm:$0xff]  ;;  %v356_v35 = vld [vmem:[%s10917_s13 + $0xa9] sm:$0xff]  ;;  %v357_v38 = vld [vmem:[%s10917_s13 + $0xb1] sm:$0xff] }
  0x1d   : > { %9962 = vmatprep.mubr.msk.f32.mxu0 %vm395_vm1, %v10969_v15  ;;  %v355_v34 = vld [vmem:[%s10917_s13 + $0xa1] sm:$0xff]  ;;  %v11070_v37 = vld [vmem:[%s10917_s13 + $0xd0] sm:$0xff] }
  0x1e   : > { %10049 = vmatmul.mubr.msk.f32.gmra.mxu1 %vm395_vm1, %v10976_v16  ;;  %v11066_v36 = vld [vmem:[%s10917_s13 + $0xc8] sm:$0xff]  ;;  %v11080_v40 = vld [vmem:[%s10917_s13 + $0xe0] sm:$0xff]  ;;  %v360_v43 = vld [vmem:[%s10917_s13 + $0xd1] sm:$0xff] }
  0x1f   : > { %10051 = vmatprep.mubr.msk.f32.mxu1 %vm395_vm1, %v10981_v17  ;;  %v358_v39 = vld [vmem:[%s10917_s13 + $0xc1] sm:$0xff]  ;;  %v359_v42 = vld [vmem:[%s10917_s13 + $0xc9] sm:$0xff]  ;;  %v363_v50 = vld [vmem:[%s10917_s13 + $0xf1] sm:$0xff] }
  0x20   : > { %9963 = vmatmul.mubr.msk.f32.gmra.mxu0 %vm395_vm1, %v10986_v18  ;;  %v11084_v41 = vld [vmem:[%s10917_s13 + $0xe8] sm:$0xff]  ;;  %v11094_v44 = vld [vmem:[%s10917_s13 + $0xf0] sm:$0xff]  ;;  %v11098_v45 = vld [vmem:[%s10917_s13 + $0x100] sm:$0xff] }
  0x21   : > { %9965 = vmatprep.mubr.msk.f32.mxu0 %vm395_vm1, %v10989_v19  ;;  %v361_v46 = vld [vmem:[%s10917_s13 + $0xe1] sm:$0xff]  ;;  %v362_v47 = vld [vmem:[%s10917_s13 + $0xe9] sm:$0xff]  ;;  %v366_v55 = vld [vmem:[%s10917_s13 + $0x111] sm:$0xff] }
  0x22   : > { %10052 = vmatmul.mubr.msk.f32.gmra.mxu1 %vm395_vm1, %v10996_v20  ;;  %v11108_v48 = vld [vmem:[%s10917_s13 + $0x108] sm:$0xff]  ;;  %v11112_v49 = vld [vmem:[%s10917_s13 + $0x110] sm:$0xff]  ;;  %v11122_v52 = vld [vmem:[%s10917_s13 + $0x120] sm:$0xff] }
  0x23   : > { %10054 = vmatprep.mubr.msk.f32.mxu1 %vm395_vm1, %v11001_v21  ;;  %v364_v51 = vld [vmem:[%s10917_s13 + $0x101] sm:$0xff]  ;;  %v365_v54 = vld [vmem:[%s10917_s13 + $0x109] sm:$0xff]  ;;  %v369_v62 = vld [vmem:[%s10917_s13 + $0x131] sm:$0xff] }
  0x24   : > { %9966 = vmatmul.mubr.msk.f32.gmra.mxu0 %vm395_vm1, %v11006_v22  ;;  %v11126_v53 = vld [vmem:[%s10917_s13 + $0x128] sm:$0xff]  ;;  %v11136_v56 = vld [vmem:[%s10917_s13 + $0x130] sm:$0xff]  ;;  %v11140_v57 = vld [vmem:[%s10917_s13 + $0x140] sm:$0xff] }
  0x25   : > { %9968 = vmatprep.mubr.msk.f32.mxu0 %vm395_vm1, %v11009_v23  ;;  %v367_v58 = vld [vmem:[%s10917_s13 + $0x121] sm:$0xff]  ;;  %v368_v59 = vld [vmem:[%s10917_s13 + $0x129] sm:$0xff]  ;;  %v372_v3 = vld [vmem:[%s10917_s13 + $0x151] sm:$0xff] }
  0x26   : > { %10055 = vmatmul.mubr.msk.f32.gmra.mxu1 %vm395_vm1, %v11016_v24  ;;  %v11150_v60 = vld [vmem:[%s10917_s13 + $0x148] sm:$0xff]  ;;  %v11154_v61 = vld [vmem:[%s10917_s13 + $0x150] sm:$0xff]  ;;  %v11164_v0 = vld [vmem:[%s10917_s13 + $0x160] sm:$0xff] }
  0x27   : > { %10057 = vmatprep.mubr.msk.f32.mxu1 %vm395_vm1, %v11021_v25  ;;  %v370_v63 = vld [vmem:[%s10917_s13 + $0x141] sm:$0xff]  ;;  %v371_v2 = vld [vmem:[%s10917_s13 + $0x149] sm:$0xff]  ;;  %v393_v22 = vld [vmem:[%s10917_s13 + $0x231] sm:$0xff] }
  0x28   : > { %9969 = vmatmul.mubr.msk.f32.gmra.mxu0 %vm395_vm1, %v11026_v26  ;;  %v11168_v1 = vld [vmem:[%s10917_s13 + $0x168] sm:$0xff]  ;;  %v11178_v4 = vld [vmem:[%s10917_s13 + $0x170] sm:$0xff]  ;;  %v11182_v5 = vld [vmem:[%s10917_s13 + $0x180] sm:$0xff] }
  0x29   : > { %9971 = vmatprep.mubr.msk.f32.mxu0 %vm395_vm1, %v11029_v27  ;;  %v390_v27 = vld [vmem:[%s10917_s13 + $0x211] sm:$0xff]  ;;  %v392_v26 = vld [vmem:[%s10917_s13 + $0x229] sm:$0xff]  ;;  %v288_v23 = vld [vmem:[%s10917_s13 + $0x20] sm:$0xff] }
  0x2a   : > { %10058 = vmatmul.mubr.msk.f32.gmra.mxu1 %vm395_vm1, %v11036_v28  ;;  %v285_v19 = vld [vmem:[%s10917_s13] sm:$0xff] }
  0x2b   : > { %10060 = vmatprep.mubr.msk.f32.mxu1 %vm395_vm1, %v11041_v29 }
  0x2c   : > { %9972 = vmatmul.mubr.msk.f32.gmra.mxu0 %vm395_vm1, %v353_v30  ;;  %v373_v30 = vld [vmem:[%s10917_s13 + $0x161] sm:$0xff] }
  0x2d   : > { %9974 = vmatprep.mubr.msk.f32.mxu0 %vm395_vm1, %v354_v31  ;;  %v374_v31 = vld [vmem:[%s10917_s13 + $0x169] sm:$0xff] }
  0x2e   : > { %10061 = vmatmul.mubr.msk.f32.gmra.mxu1 %vm395_vm1, %v11052_v32 }
  0x2f   : > { %10063 = vmatprep.mubr.msk.f32.mxu1 %vm395_vm1, %v11056_v33 }
  0x30   : > { %9975 = vmatmul.mubr.msk.f32.gmra.mxu0 %vm395_vm1, %v355_v34  ;;  %v11192_v34 = vld [vmem:[%s10917_s13 + $0x188] sm:$0xff] }
  0x31   : > { %9977 = vmatprep.mubr.msk.f32.mxu0 %vm395_vm1, %v356_v35  ;;  %v11196_v35 = vld [vmem:[%s10917_s13 + $0x190] sm:$0xff] }
  0x32   : > { %10064 = vmatmul.mubr.msk.f32.gmra.mxu1 %vm395_vm1, %v11066_v36 }
  0x33   : > { %10066 = vmatprep.mubr.msk.f32.mxu1 %vm395_vm1, %v11070_v37 }
  0x34   : > { %9978 = vmatmul.mubr.msk.f32.gmra.mxu0 %vm395_vm1, %v357_v38  ;;  %v375_v38 = vld [vmem:[%s10917_s13 + $0x171] sm:$0xff] }
  0x35   : > { %9980 = vmatprep.mubr.msk.f32.mxu0 %vm395_vm1, %v358_v39  ;;  %v376_v39 = vld [vmem:[%s10917_s13 + $0x181] sm:$0xff] }
  0x36   : > { %10067 = vmatmul.mubr.msk.f32.gmra.mxu1 %vm395_vm1, %v11080_v40 }
  0x37   : > { %10069 = vmatprep.mubr.msk.f32.mxu1 %vm395_vm1, %v11084_v41 }
  0x38   : > { %9981 = vmatmul.mubr.msk.f32.gmra.mxu0 %vm395_vm1, %v359_v42  ;;  %v11206_v42 = vld [vmem:[%s10917_s13 + $0x1a0] sm:$0xff] }
  0x39   : > { %9983 = vmatprep.mubr.msk.f32.mxu0 %vm395_vm1, %v360_v43  ;;  %v11210_v43 = vld [vmem:[%s10917_s13 + $0x1a8] sm:$0xff] }
  0x3a   : > { %10070 = vmatmul.mubr.msk.f32.gmra.mxu1 %vm395_vm1, %v11094_v44 }
  0x3b   : > { %10072 = vmatprep.mubr.msk.f32.mxu1 %vm395_vm1, %v11098_v45 }
  0x3c   : > { %9984 = vmatmul.mubr.msk.f32.gmra.mxu0 %vm395_vm1, %v361_v46  ;;  %v377_v46 = vld [vmem:[%s10917_s13 + $0x189] sm:$0xff] }
  0x3d   : > { %9986 = vmatprep.mubr.msk.f32.mxu0 %vm395_vm1, %v362_v47  ;;  %v378_v47 = vld [vmem:[%s10917_s13 + $0x191] sm:$0xff] }
  0x3e   : > { %10073 = vmatmul.mubr.msk.f32.gmra.mxu1 %vm395_vm1, %v11108_v48 }
  0x3f   : > { %10075 = vmatprep.mubr.msk.f32.mxu1 %vm395_vm1, %v11112_v49 }
  0x40   : > { %9987 = vmatmul.mubr.msk.f32.gmra.mxu0 %vm395_vm1, %v363_v50  ;;  %v11220_v50 = vld [vmem:[%s10917_s13 + $0x1b0] sm:$0xff] }
  0x41   : > { %9989 = vmatprep.mubr.msk.f32.mxu0 %vm395_vm1, %v364_v51  ;;  %v11224_v51 = vld [vmem:[%s10917_s13 + $0x1c0] sm:$0xff] }
  0x42   : > { %10076 = vmatmul.mubr.msk.f32.gmra.mxu1 %vm395_vm1, %v11122_v52 }
  0x43   : > { %10078 = vmatprep.mubr.msk.f32.mxu1 %vm395_vm1, %v11126_v53 }
  0x44   : > { %9990 = vmatmul.mubr.msk.f32.gmra.mxu0 %vm395_vm1, %v365_v54  ;;  %v379_v54 = vld [vmem:[%s10917_s13 + $0x1a1] sm:$0xff] }
  0x45   : > { %9992 = vmatprep.mubr.msk.f32.mxu0 %vm395_vm1, %v366_v55  ;;  %v380_v55 = vld [vmem:[%s10917_s13 + $0x1a9] sm:$0xff] }
  0x46   : > { %10079 = vmatmul.mubr.msk.f32.gmra.mxu1 %vm395_vm1, %v11136_v56 }
  0x47   : > { %10081 = vmatprep.mubr.msk.f32.mxu1 %vm395_vm1, %v11140_v57 }
  0x48   : > { %9993 = vmatmul.mubr.msk.f32.gmra.mxu0 %vm395_vm1, %v367_v58  ;;  %v11234_v58 = vld [vmem:[%s10917_s13 + $0x1c8] sm:$0xff] }
  0x49   : > { %9995 = vmatprep.mubr.msk.f32.mxu0 %vm395_vm1, %v368_v59  ;;  %v11238_v59 = vld [vmem:[%s10917_s13 + $0x1d0] sm:$0xff] }
  0x4a   : > { %10082 = vmatmul.mubr.msk.f32.gmra.mxu1 %vm395_vm1, %v11150_v60 }
  0x4b   : > { %10084 = vmatprep.mubr.msk.f32.mxu1 %vm395_vm1, %v11154_v61 }
  0x4c   : > { %9996 = vmatmul.mubr.msk.f32.gmra.mxu0 %vm395_vm1, %v369_v62  ;;  %v381_v62 = vld [vmem:[%s10917_s13 + $0x1b1] sm:$0xff] }
  0x4d   : > { %9998 = vmatprep.mubr.msk.f32.mxu0 %vm395_vm1, %v370_v63  ;;  %v382_v63 = vld [vmem:[%s10917_s13 + $0x1c1] sm:$0xff] }
  0x4e   : > { %10085 = vmatmul.mubr.msk.f32.gmra.mxu1 %vm395_vm1, %v11164_v0 }
  0x4f   : > { %10087 = vmatprep.mubr.msk.f32.mxu1 %vm395_vm1, %v11168_v1 }
  0x50   : > { %9999 = vmatmul.mubr.msk.f32.gmra.mxu0 %vm395_vm1, %v371_v2  ;;  %v11248_v2 = vld [vmem:[%s10917_s13 + $0x1e0] sm:$0xff] }
  0x51   : > { %10001 = vmatprep.mubr.msk.f32.mxu0 %vm395_vm1, %v372_v3  ;;  %v11252_v3 = vld [vmem:[%s10917_s13 + $0x1e8] sm:$0xff] }
  0x52   : > { %10088 = vmatmul.mubr.msk.f32.gmra.mxu1 %vm395_vm1, %v11178_v4 }
  0x53   : > { %10090 = vmatprep.mubr.msk.f32.mxu1 %vm395_vm1, %v11182_v5 }
  0x54   : > { %10002 = vmatmul.mubr.msk.f32.gmra.mxu0 %vm395_vm1, %v373_v30  ;;  %v383_v30 = vld [vmem:[%s10917_s13 + $0x1c9] sm:$0xff] }
  0x55   : > { %10004 = vmatprep.mubr.msk.f32.mxu0 %vm395_vm1, %v374_v31  ;;  %v384_v31 = vld [vmem:[%s10917_s13 + $0x1d1] sm:$0xff] }
  0x56   : > { %10091 = vmatmul.mubr.msk.f32.gmra.mxu1 %vm395_vm1, %v11192_v34 }
  0x57   : > { %10093 = vmatprep.mubr.msk.f32.mxu1 %vm395_vm1, %v11196_v35 }
  0x58   : > { %10005 = vmatmul.mubr.msk.f32.gmra.mxu0 %vm395_vm1, %v375_v38  ;;  %v11262_v38 = vld [vmem:[%s10917_s13 + $0x1f0] sm:$0xff] }
  0x59   : > { %10007 = vmatprep.mubr.msk.f32.mxu0 %vm395_vm1, %v376_v39  ;;  %v11266_v39 = vld [vmem:[%s10917_s13 + $0x200] sm:$0xff] }
  0x5a   : > { %10094 = vmatmul.mubr.msk.f32.gmra.mxu1 %vm395_vm1, %v11206_v42 }
  0x5b   : > { %10096 = vmatprep.mubr.msk.f32.mxu1 %vm395_vm1, %v11210_v43 }
  0x5c   : > { %10008 = vmatmul.mubr.msk.f32.gmra.mxu0 %vm395_vm1, %v377_v46  ;;  %v385_v46 = vld [vmem:[%s10917_s13 + $0x1e1] sm:$0xff] }
  0x5d   : > { %10010 = vmatprep.mubr.msk.f32.mxu0 %vm395_vm1, %v378_v47  ;;  %v386_v47 = vld [vmem:[%s10917_s13 + $0x1e9] sm:$0xff] }
  0x5e   : > { %10097 = vmatmul.mubr.msk.f32.gmra.mxu1 %vm395_vm1, %v11220_v50 }
  0x5f   : > { %10099 = vmatprep.mubr.msk.f32.mxu1 %vm395_vm1, %v11224_v51 }
  0x60   : > { %10011 = vmatmul.mubr.msk.f32.gmra.mxu0 %vm395_vm1, %v379_v54  ;;  %v11276_v54 = vld [vmem:[%s10917_s13 + $0x208] sm:$0xff] }
  0x61   : > { %10013 = vmatprep.mubr.msk.f32.mxu0 %vm395_vm1, %v380_v55  ;;  %v11280_v55 = vld [vmem:[%s10917_s13 + $0x210] sm:$0xff] }
  0x62   : > { %10100 = vmatmul.mubr.msk.f32.gmra.mxu1 %vm395_vm1, %v11234_v58 }
  0x63   : > { %10102 = vmatprep.mubr.msk.f32.mxu1 %vm395_vm1, %v11238_v59 }
  0x64   : > { %10014 = vmatmul.mubr.msk.f32.gmra.mxu0 %vm395_vm1, %v381_v62  ;;  %v387_v62 = vld [vmem:[%s10917_s13 + $0x1f1] sm:$0xff] }
  0x65   : > { %10016 = vmatprep.mubr.msk.f32.mxu0 %vm395_vm1, %v382_v63  ;;  %v388_v63 = vld [vmem:[%s10917_s13 + $0x201] sm:$0xff] }
  0x66   : > { %10103 = vmatmul.mubr.msk.f32.gmra.mxu1 %vm395_vm1, %v11248_v2 }
  0x67   : > { %10105 = vmatprep.mubr.msk.f32.mxu1 %vm395_vm1, %v11252_v3 }
  0x68   : > { %10017 = vmatmul.mubr.msk.f32.gmra.mxu0 %vm395_vm1, %v383_v30  ;;  %v11290_v30 = vld [vmem:[%s10917_s13 + $0x220] sm:$0xff] }
  0x69   : > { %10019 = vmatprep.mubr.msk.f32.mxu0 %vm395_vm1, %v384_v31  ;;  %v11294_v31 = vld [vmem:[%s10917_s13 + $0x228] sm:$0xff] }
  0x6a   : > { %10106 = vmatmul.mubr.msk.f32.gmra.mxu1 %vm395_vm1, %v11262_v38 }
  0x6b   : > { %10108 = vmatprep.mubr.msk.f32.mxu1 %vm395_vm1, %v11266_v39 }
  0x6c   : > { %10020 = vmatmul.mubr.msk.f32.gmra.mxu0 %vm395_vm1, %v385_v46  ;;  %v389_v46 = vld [vmem:[%s10917_s13 + $0x209] sm:$0xff] }
  0x6d   : > { %10022 = vmatprep.mubr.msk.f32.mxu0 %vm395_vm1, %v386_v47  ;;  %v3279_v47 = vld [vmem:[%s14651_s1 + $0xf] sm:$0x7] }
  0x6e   : > { %10109 = vmatmul.mubr.msk.f32.gmra.mxu1 %vm395_vm1, %v11276_v54  ;;  %10366 = vmatprep.subr.msk.mxu1 %vm558_vm0, %v3279_v47 }
  0x6f   : > { %10111 = vmatprep.mubr.msk.f32.mxu1 %vm395_vm1, %v11280_v55 }
  0x70   : > { %10023 = vmatmul.mubr.msk.f32.gmra.mxu0 %vm395_vm1, %v387_v62  ;;  %v11308_v62 = vld [vmem:[%s10917_s13 + $0x230] sm:$0xff] }
  0x71   : > { %10025 = vmatprep.mubr.msk.f32.mxu0 %vm395_vm1, %v388_v63  ;;  %v391_v63 = vld [vmem:[%s10917_s13 + $0x221] sm:$0xff] }
  0x72   : > { %10112 = vmatmul.mubr.msk.f32.gmra.mxu1 %vm395_vm1, %v11290_v30 }
  0x73   : > { %10114 = vmatprep.mubr.msk.f32.mxu1 %vm395_vm1, %v11294_v31 }
  0x74   : > { %10026 = vmatmul.mubr.msk.f32.gmra.mxu0 %vm395_vm1, %v389_v46  ;;  %v287_v46 = vld [vmem:[%s10917_s13 + $0x10] sm:$0xff] }
  0x75   : > { %10028 = vmatprep.mubr.msk.f32.mxu0 %vm395_vm1, %v390_v27  ;;  %v286_v27 = vld [vmem:[%s10917_s13 + $0x8] sm:$0xff] }
  0x76   : > { %10115 = vmatmul.mubr.msk.f32.gmra.mxu1 %vm395_vm1, %v11308_v62 }
  0x77   : > { %10202 = vmatprep.mubr.msk.f32.mxu1 %vm395_vm1, %v288_v23 }
  0x78   : > { %10029 = vmatmul.mubr.msk.f32.gmra.mxu0 %vm395_vm1, %v391_v63  ;;  %v11652_v63 = vld [vmem:[%s10917_s13 + $0x1d2] sm:$0xff] }
  0x79   : > { %10031 = vmatprep.mubr.msk.f32.mxu0 %vm395_vm1, %v392_v26  ;;  %v11437_v26 = vld [vmem:[%s10917_s13 + $0x8a] sm:$0xff] }
  0x7a   : > { %10203 = vmatmul.mubr.msk.f32.vlgmr.msra.gmra.mxu1 %vm395_vm1, %v10924_v6  ;;  %v2670_v6 = vld [vmem:[%s14651_s1 + $0xc] sm:$0x7] }
  0x7b   : > { %10205 = vmatprep.mubr.msk.f32.mxu1 %vm395_vm1, %v10935_v8  ;;  %10367 = vmatpush3.msk.msra.mxu1 %vm558_vm0, %v3279_v47  ;;  %v1397_v8 = vld [vmem:[%s10917_s13 + $0x2] sm:$0xff] }
  0x7c   : > { %10032 = vmatmul.mubr.msk.f32.gmra.mxu0 %vm395_vm1, %v393_v22  ;;  %v11409_v22 = vld [vmem:[%s10917_s13 + $0x62] sm:$0xff] }
  0x7d   : > { %10036 = vmatprep.mubr.msk.f32.mxu0 %vm395_vm1, %v285_v19  ;;  %v11384_v19 = vld [vmem:[%s10917_s13 + $0x42] sm:$0xff] }
  0x7e   : > { %10206 = vmatmul.mubr.msk.f32.gmra.mxu1 %vm395_vm1, %v10943_v10  ;;  %v1398_v10 = vld [vmem:[%s10917_s13 + $0xa] sm:$0xff] }
  0x7f   : > { %10208 = vmatprep.mubr.msk.f32.mxu1 %vm395_vm1, %v10955_v12  ;;  %v11359_v12 = vld [vmem:[%s14651_s1 + $0x12] sm:$0x7] }
  0x80   : > { %10037 = vmatmul.mubr.msk.f32.vlgmr.msra.gmra.mxu0 %vm395_vm1, %v286_v27 }
  0x81   : > { %10118 = vmatpush3.msk.msra.mxu0 %vm558_vm0, %v10929_v7  ;;  %10039 = vmatprep.mubr.msk.f32.mxu0 %vm395_vm1, %v287_v46  ;;  %v1399_v7 = vld [vmem:[%s10917_s13 + $0x12] sm:$0xff] }
  0x82   : > { %10283 = vmatprep.subr.msk.mxu0 %vm558_vm0, %v2670_v6  ;;  %10209 = vmatmul.mubr.msk.f32.gmra.mxu1 %vm395_vm1, %v10961_v13  ;;  %v11365_v13 = vld [vmem:[%s10917_s13 + $0x22] sm:$0xff] }
  0x83   : > { %10211 = vmatprep.mubr.msk.f32.mxu1 %vm395_vm1, %v10976_v16  ;;  %v11368_v16 = vld [vmem:[%s10917_s13 + $0x2a] sm:$0xff] }
  0x84   : > { %10040 = vmatmul.mubr.msk.f32.gmra.mxu0 %vm395_vm1, %v288_v23  ;;  %v11412_v23 = vld [vmem:[%s10917_s13 + $0x6a] sm:$0xff] }
  0x85   : > { %10119 = vmatprep.mubr.msk.f32.mxu0 %vm395_vm1, %v1397_v8 }
  0x86   : > { %10212 = vmatmul.mubr.msk.f32.gmra.mxu1 %vm395_vm1, %v10981_v17  ;;  %v11381_v17 = vld [vmem:[%s10917_s13 + $0x32] sm:$0xff] }
  0x87   : > { %10214 = vmatprep.mubr.msk.f32.mxu1 %vm395_vm1, %v10996_v20  ;;  %v11395_v20 = vld [vmem:[%s10917_s13 + $0x4a] sm:$0xff] }
  0x88   : > { %10120 = vmatmul.mubr.msk.f32.vlgmr.msra.gmra.mxu0 %vm395_vm1, %v1398_v10  ;;  %v11667_v10 = vld [vmem:[%s10917_s13 + $0x1e2] sm:$0xff] }
  0x89   : > { %10284 = vmatpush3.msk.msra.mxu0 %vm558_vm0, %v2670_v6  ;;  %10122 = vmatprep.mubr.msk.f32.mxu0 %vm395_vm1, %v1399_v7  ;;  %v8704_v6 = vld [vmem:[%s10917_s13 + $0x248] sm:$0xff] }
  0x8a   : > { %10215 = vmatmul.mubr.msk.f32.gmra.mxu1 %vm395_vm1, %v11001_v21  ;;  %10449 = vmatprep.subr.msk.mxu0 %vm558_vm0, %v11359_v12  ;;  %v11398_v21 = vld [vmem:[%s10917_s13 + $0x52] sm:$0xff]  ;;  %v11673_v7 = vld [vmem:[%s10917_s13 + $0x1ea] sm:$0xff] }
  0x8b   : > { %10217 = vmatprep.mubr.msk.f32.mxu1 %vm395_vm1, %v11016_v24  ;;  %v11423_v24 = vld [vmem:[%s10917_s13 + $0x72] sm:$0xff] }
  0x8c   : > { %10123 = vmatmul.mubr.msk.f32.gmra.mxu0 %vm395_vm1, %v11365_v13 }
  0x8d   : > { %10125 = vmatprep.mubr.msk.f32.mxu0 %vm395_vm1, %v11368_v16 }
  0x8e   : > { %10218 = vmatmul.mubr.msk.f32.gmra.mxu1 %vm395_vm1, %v11021_v25  ;;  %v11426_v25 = vld [vmem:[%s10917_s13 + $0x82] sm:$0xff] }
  0x8f   : > { %10220 = vmatprep.mubr.msk.f32.mxu1 %vm395_vm1, %v11036_v28  ;;  %v11440_v28 = vld [vmem:[%s10917_s13 + $0x92] sm:$0xff] }
  0x90   : > { %10126 = vmatmul.mubr.msk.f32.gmra.mxu0 %vm395_vm1, %v11381_v17 }
  0x91   : > { %10128 = vmatprep.mubr.msk.f32.mxu0 %vm395_vm1, %v11384_v19 }
  0x92   : > { %10221 = vmatmul.mubr.msk.f32.gmra.mxu1 %vm395_vm1, %v11041_v29  ;;  %v11451_v29 = vld [vmem:[%s10917_s13 + $0xa2] sm:$0xff] }
  0x93   : > { %10223 = vmatprep.mubr.msk.f32.mxu1 %vm395_vm1, %v11052_v32  ;;  %v11454_v32 = vld [vmem:[%s10917_s13 + $0xaa] sm:$0xff] }
  0x94   : > { %10129 = vmatmul.mubr.msk.f32.gmra.mxu0 %vm395_vm1, %v11395_v20 }
  0x95   : > { %10131 = vmatprep.mubr.msk.f32.mxu0 %vm395_vm1, %v11398_v21 }
  0x96   : > { %10224 = vmatmul.mubr.msk.f32.gmra.mxu1 %vm395_vm1, %v11056_v33  ;;  %v11465_v33 = vld [vmem:[%s10917_s13 + $0xb2] sm:$0xff] }
  0x97   : > { %10226 = vmatprep.mubr.msk.f32.mxu1 %vm395_vm1, %v11066_v36  ;;  %v11468_v36 = vld [vmem:[%s10917_s13 + $0xc2] sm:$0xff] }
  0x98   : > { %10132 = vmatmul.mubr.msk.f32.gmra.mxu0 %vm395_vm1, %v11409_v22 }
  0x99   : > { %10134 = vmatprep.mubr.msk.f32.mxu0 %vm395_vm1, %v11412_v23 }
  0x9a   : > { %10227 = vmatmul.mubr.msk.f32.gmra.mxu1 %vm395_vm1, %v11070_v37  ;;  %v11479_v37 = vld [vmem:[%s10917_s13 + $0xca] sm:$0xff] }
  0x9b   : > { %10229 = vmatprep.mubr.msk.f32.mxu1 %vm395_vm1, %v11080_v40  ;;  %v11482_v40 = vld [vmem:[%s10917_s13 + $0xd2] sm:$0xff] }
  0x9c   : > { %10135 = vmatmul.mubr.msk.f32.gmra.mxu0 %vm395_vm1, %v11423_v24 }
  0x9d   : > { %10137 = vmatprep.mubr.msk.f32.mxu0 %vm395_vm1, %v11426_v25 }
  0x9e   : > { %10230 = vmatmul.mubr.msk.f32.gmra.mxu1 %vm395_vm1, %v11084_v41  ;;  %v11493_v41 = vld [vmem:[%s10917_s13 + $0xe2] sm:$0xff] }
  0x9f   : > { %10232 = vmatprep.mubr.msk.f32.mxu1 %vm395_vm1, %v11094_v44  ;;  %v11496_v44 = vld [vmem:[%s10917_s13 + $0xea] sm:$0xff] }
  0xa0   : > { %10138 = vmatmul.mubr.msk.f32.gmra.mxu0 %vm395_vm1, %v11437_v26 }
  0xa1   : > { %10140 = vmatprep.mubr.msk.f32.mxu0 %vm395_vm1, %v11440_v28 }
  0xa2   : > { %10233 = vmatmul.mubr.msk.f32.gmra.mxu1 %vm395_vm1, %v11098_v45  ;;  %v11507_v45 = vld [vmem:[%s10917_s13 + $0xf2] sm:$0xff] }
  0xa3   : > { %10235 = vmatprep.mubr.msk.f32.mxu1 %vm395_vm1, %v11108_v48  ;;  %v11510_v48 = vld [vmem:[%s10917_s13 + $0x102] sm:$0xff] }
  0xa4   : > { %10141 = vmatmul.mubr.msk.f32.gmra.mxu0 %vm395_vm1, %v11451_v29 }
  0xa5   : > { %10143 = vmatprep.mubr.msk.f32.mxu0 %vm395_vm1, %v11454_v32 }
  0xa6   : > { %10236 = vmatmul.mubr.msk.f32.gmra.mxu1 %vm395_vm1, %v11112_v49  ;;  %v11521_v49 = vld [vmem:[%s10917_s13 + $0x10a] sm:$0xff] }
  0xa7   : > { %10238 = vmatprep.mubr.msk.f32.mxu1 %vm395_vm1, %v11122_v52  ;;  %v11524_v52 = vld [vmem:[%s10917_s13 + $0x112] sm:$0xff] }
  0xa8   : > { %10144 = vmatmul.mubr.msk.f32.gmra.mxu0 %vm395_vm1, %v11465_v33 }
  0xa9   : > { %10146 = vmatprep.mubr.msk.f32.mxu0 %vm395_vm1, %v11468_v36 }
  0xaa   : > { %10239 = vmatmul.mubr.msk.f32.gmra.mxu1 %vm395_vm1, %v11126_v53  ;;  %v11535_v53 = vld [vmem:[%s10917_s13 + $0x122] sm:$0xff] }
  0xab   : > { %10241 = vmatprep.mubr.msk.f32.mxu1 %vm395_vm1, %v11136_v56  ;;  %v11538_v56 = vld [vmem:[%s10917_s13 + $0x12a] sm:$0xff] }
  0xac   : > { %10147 = vmatmul.mubr.msk.f32.gmra.mxu0 %vm395_vm1, %v11479_v37 }
  0xad   : > { %10149 = vmatprep.mubr.msk.f32.mxu0 %vm395_vm1, %v11482_v40 }
  0xae   : > { %10242 = vmatmul.mubr.msk.f32.gmra.mxu1 %vm395_vm1, %v11140_v57  ;;  %v11549_v57 = vld [vmem:[%s10917_s13 + $0x132] sm:$0xff] }
  0xaf   : > { %10244 = vmatprep.mubr.msk.f32.mxu1 %vm395_vm1, %v11150_v60  ;;  %v11552_v60 = vld [vmem:[%s10917_s13 + $0x142] sm:$0xff] }
  0xb0   : > { %10150 = vmatmul.mubr.msk.f32.gmra.mxu0 %vm395_vm1, %v11493_v41 }
  0xb1   : > { %10152 = vmatprep.mubr.msk.f32.mxu0 %vm395_vm1, %v11496_v44 }
  0xb2   : > { %10245 = vmatmul.mubr.msk.f32.gmra.mxu1 %vm395_vm1, %v11154_v61  ;;  %v11563_v61 = vld [vmem:[%s10917_s13 + $0x14a] sm:$0xff] }
  0xb3   : > { %10247 = vmatprep.mubr.msk.f32.mxu1 %vm395_vm1, %v11164_v0  ;;  %v11566_v0 = vld [vmem:[%s10917_s13 + $0x152] sm:$0xff] }
  0xb4   : > { %10153 = vmatmul.mubr.msk.f32.gmra.mxu0 %vm395_vm1, %v11507_v45 }
  0xb5   : > { %10155 = vmatprep.mubr.msk.f32.mxu0 %vm395_vm1, %v11510_v48 }
  0xb6   : > { %10248 = vmatmul.mubr.msk.f32.gmra.mxu1 %vm395_vm1, %v11168_v1  ;;  %v11577_v1 = vld [vmem:[%s10917_s13 + $0x162] sm:$0xff] }
  0xb7   : > { %10250 = vmatprep.mubr.msk.f32.mxu1 %vm395_vm1, %v11178_v4  ;;  %v11580_v4 = vld [vmem:[%s10917_s13 + $0x16a] sm:$0xff] }
  0xb8   : > { %10156 = vmatmul.mubr.msk.f32.gmra.mxu0 %vm395_vm1, %v11521_v49 }
  0xb9   : > { %10158 = vmatprep.mubr.msk.f32.mxu0 %vm395_vm1, %v11524_v52 }
  0xba   : > { %10251 = vmatmul.mubr.msk.f32.gmra.mxu1 %vm395_vm1, %v11182_v5  ;;  %v11591_v5 = vld [vmem:[%s10917_s13 + $0x172] sm:$0xff] }
  0xbb   : > { %10253 = vmatprep.mubr.msk.f32.mxu1 %vm395_vm1, %v11192_v34  ;;  %v11594_v34 = vld [vmem:[%s10917_s13 + $0x182] sm:$0xff] }
  0xbc   : > { %10159 = vmatmul.mubr.msk.f32.gmra.mxu0 %vm395_vm1, %v11535_v53 }
  0xbd   : > { %10161 = vmatprep.mubr.msk.f32.mxu0 %vm395_vm1, %v11538_v56 }
  0xbe   : > { %10254 = vmatmul.mubr.msk.f32.gmra.mxu1 %vm395_vm1, %v11196_v35  ;;  %v11605_v35 = vld [vmem:[%s10917_s13 + $0x18a] sm:$0xff] }
  0xbf   : > { %10256 = vmatprep.mubr.msk.f32.mxu1 %vm395_vm1, %v11206_v42  ;;  %v11608_v42 = vld [vmem:[%s10917_s13 + $0x192] sm:$0xff] }
  0xc0   : > { %10162 = vmatmul.mubr.msk.f32.gmra.mxu0 %vm395_vm1, %v11549_v57 }
  0xc1   : > { %10164 = vmatprep.mubr.msk.f32.mxu0 %vm395_vm1, %v11552_v60 }
  0xc2   : > { %10257 = vmatmul.mubr.msk.f32.gmra.mxu1 %vm395_vm1, %v11210_v43  ;;  %v11619_v43 = vld [vmem:[%s10917_s13 + $0x1a2] sm:$0xff] }
  0xc3   : > { %10259 = vmatprep.mubr.msk.f32.mxu1 %vm395_vm1, %v11220_v50  ;;  %v11622_v50 = vld [vmem:[%s10917_s13 + $0x1aa] sm:$0xff] }
  0xc4   : > { %10165 = vmatmul.mubr.msk.f32.gmra.mxu0 %vm395_vm1, %v11563_v61 }
  0xc5   : > { %10167 = vmatprep.mubr.msk.f32.mxu0 %vm395_vm1, %v11566_v0 }
  0xc6   : > { %10260 = vmatmul.mubr.msk.f32.gmra.mxu1 %vm395_vm1, %v11224_v51 }
  0xc7   : > { %10262 = vmatprep.mubr.msk.f32.mxu1 %vm395_vm1, %v11234_v58  ;;  %v11633_v58 = vld [vmem:[%s10917_s13 + $0x1b2] sm:$0xff] }
  0xc8   : > { %10168 = vmatmul.mubr.msk.f32.gmra.mxu0 %vm395_vm1, %v11577_v1 }
  0xc9   : > { %10170 = vmatprep.mubr.msk.f32.mxu0 %vm395_vm1, %v11580_v4 }
  0xca   : > { %10263 = vmatmul.mubr.msk.f32.gmra.mxu1 %vm395_vm1, %v11238_v59 }
  0xcb   : > { %10265 = vmatprep.mubr.msk.f32.mxu1 %vm395_vm1, %v11248_v2  ;;  %v11636_v2 = vld [vmem:[%s10917_s13 + $0x1c2] sm:$0xff] }
  0xcc   : > { %10171 = vmatmul.mubr.msk.f32.gmra.mxu0 %vm395_vm1, %v11591_v5 }
  0xcd   : > { %10173 = vmatprep.mubr.msk.f32.mxu0 %vm395_vm1, %v11594_v34 }
  0xce   : > { %10266 = vmatmul.mubr.msk.f32.gmra.mxu1 %vm395_vm1, %v11252_v3 }
  0xcf   : > { %10268 = vmatprep.mubr.msk.f32.mxu1 %vm395_vm1, %v11262_v38 }
  0xd0   : > { %10174 = vmatmul.mubr.msk.f32.gmra.mxu0 %vm395_vm1, %v11605_v35 }
  0xd1   : > { %10176 = vmatprep.mubr.msk.f32.mxu0 %vm395_vm1, %v11608_v42 }
  0xd2   : > { %10269 = vmatmul.mubr.msk.f32.gmra.mxu1 %vm395_vm1, %v11266_v39 }
  0xd3   : > { %10271 = vmatprep.mubr.msk.f32.mxu1 %vm395_vm1, %v11276_v54  ;;  %v11649_v54 = vld [vmem:[%s10917_s13 + $0x1ca] sm:$0xff] }
  0xd4   : > { %v9955_v51 = vpop.f32.mrf.mxu0  ;;  %10177 = vmatmul.mubr.msk.f32.gmra.mxu0 %vm395_vm1, %v11619_v43 }
  0xd5   : > { %10179 = vmatprep.mubr.msk.f32.mxu0 %vm395_vm1, %v11622_v50 }
  0xd6   : > { %v628_v59 = vpop.f32.mrf.mxu0  ;;  %v10044_v3 = vpop.f32.mrf.mxu1  ;;  %10272 = vmatmul.mubr.msk.f32.gmra.mxu1 %vm395_vm1, %v11280_v55 }
  0xd7   : > { %10274 = vmatprep.mubr.msk.f32.mxu1 %vm395_vm1, %v11290_v30  ;;  %v8703_v30 = vld [vmem:[%s10917_s13 + $0x240] sm:$0xff] }
  0xd8   : > { %v11642_v38 = vpop.f32.mrf.mxu0  ;;  %10180 = vmatmul.mubr.msk.f32.gmra.mxu0 %vm395_vm1, %v11633_v58  ;;  %v1148_v39 = vpop.f32.mrf.mxu1 }
  0xd9   : > { %14692 = vst [vmem:[#allocation9_spill] sm:$0xff] %v11642_v38  ;;  %10182 = vmatprep.mubr.msk.f32.mxu0 %vm395_vm1, %v11636_v2 }
  0xda   : > { %v638_v47 = vpop.f32.mrf.mxu0  ;;  %v10047_v55 = vpop.f32.mrf.mxu1  ;;  %10275 = vmatmul.mubr.msk.f32.gmra.mxu1 %vm395_vm1, %v11294_v31  ;;  %v4498_v31 = vld [vmem:[%s14651_s1 + $0x15] sm:$0x7] }
  0xdb   : > { %10277 = vmatprep.mubr.msk.f32.mxu1 %vm395_vm1, %v11308_v62  ;;  %10532 = vmatprep.subr.msk.mxu1 %vm558_vm0, %v4498_v31 }
  0xdc   : > { %v9961_v27 = vpop.f32.mrf.mxu0  ;;  %10183 = vmatmul.mubr.msk.f32.gmra.mxu0 %vm395_vm1, %v11649_v54  ;;  %v1158_v46 = vpop.f32.mrf.mxu1 }
  0xdd   : > { %v11662_v8 = vadd.f32 %v10044_v3, %v9961_v27  ;;  %10185 = vmatprep.mubr.msk.f32.mxu0 %vm395_vm1, %v11652_v63  ;;  %v8705_v3 = vld [vmem:[%s10917_s13 + $0x250] sm:$0xff] }
  0xde   : > { %v648_v62 = vpop.f32.mrf.mxu0  ;;  %v10050_v51 = vpop.f32.mrf.mxu1  ;;  %10278 = vmatmul.mubr.msk.f32.gmra.mxu1 %vm395_vm1, %v8703_v30  ;;  %v11688_v30 = vld [vmem:[%s10917_s13 + $0x1f2] sm:$0xff] }
  0xdf   : > { %14693 = vst [vmem:[#allocation10_spill] sm:$0xff] %v11662_v8  ;;  %v11677_v59 = vadd.f32 %v1148_v39, %v648_v62  ;;  %10280 = vmatprep.mubr.msk.f32.mxu1 %vm395_vm1, %v8704_v6  ;;  %v11691_v39 = vld [vmem:[%s10917_s13 + $0x202] sm:$0xff] }
  0xe0   : > { %v9964_v47 = vpop.f32.mrf.mxu0  ;;  %10186 = vmatmul.mubr.msk.f32.gmra.mxu0 %vm395_vm1, %v11667_v10  ;;  %v1168_v27 = vpop.f32.mrf.mxu1 }
  0xe1   : > { %14694 = vst [vmem:[#allocation11_spill] sm:$0xff] %v11677_v59  ;;  %v11683_v8 = vadd.f32 %v10047_v55, %v9964_v47  ;;  %10188 = vmatprep.mubr.msk.f32.mxu0 %vm395_vm1, %v11673_v7 }
  0xe2   : > { %v658_v38 = vpop.f32.mrf.mxu0  ;;  %v10053_v62 = vpop.f32.mrf.mxu1  ;;  %10281 = vmatmul.mubr.msk.f32.gmra.mxu1 %vm395_vm1, %v8705_v3 }
  0xe3   : > { %14695 = vst [vmem:[#allocation12_spill] sm:$0xff] %v11683_v8  ;;  %v11694_v6 = vadd.f32 %v1158_v46, %v658_v38  ;;  %10368 = vmatprep.mubr.msk.f32.mxu1 %vm395_vm1, %v11365_v13  ;;  %v11705_v8 = vld [vmem:[%s10917_s13 + $0x20a] sm:$0xff]  ;;  %v11708_v38 = vld [vmem:[%s10917_s13 + $0x212] sm:$0xff] }
  0xe4   : > { %v9967_v59 = vpop.f32.mrf.mxu0  ;;  %10189 = vmatmul.mubr.msk.f32.gmra.mxu0 %vm395_vm1, %v11688_v30  ;;  %v1178_v55 = vpop.f32.mrf.mxu1  ;;  %14698 = vst [vmem:[#allocation15_spill] sm:$0xff] %v11708_v38 }
  0xe5   : > { %14696 = vst [vmem:[#allocation13_spill] sm:$0xff] %v11694_v6  ;;  %v11700_v47 = vadd.f32 %v10050_v51, %v9967_v59  ;;  %10191 = vmatprep.mubr.msk.f32.mxu0 %vm395_vm1, %v11691_v39  ;;  %v11724_v6 = vld [vmem:[%s10917_s13 + $0x222] sm:$0xff] }
  0xe6   : > { %v668_v3 = vpop.f32.mrf.mxu0  ;;  %v10056_v46 = vpop.f32.mrf.mxu1  ;;  %10369 = vmatmul.mubr.msk.f32.vlgmr.msra.gmra.mxu1 %vm395_vm1, %v11368_v16 }
  0xe7   : > { %14697 = vst [vmem:[#allocation14_spill] sm:$0xff] %v11700_v47  ;;  %v11712_v13 = vadd.f32 %v1168_v27, %v668_v3  ;;  %10371 = vmatprep.mubr.msk.f32.mxu1 %vm395_vm1, %v11381_v17  ;;  %10533 = vmatpush3.msk.msra.mxu1 %vm558_vm0, %v4498_v31  ;;  %v11727_v27 = vld [vmem:[%s10917_s13 + $0x22a] sm:$0xff] }
  0xe8   : > { %v9970_v51 = vpop.f32.mrf.mxu0  ;;  %10192 = vmatmul.mubr.msk.f32.gmra.mxu0 %vm395_vm1, %v11705_v8  ;;  %v1188_v59 = vpop.f32.mrf.mxu1 }
  0xe9   : > { %14699 = vst [vmem:[#allocation16_spill] sm:$0xff] %v11712_v13  ;;  %v11719_v47 = vadd.f32 %v10053_v62, %v9970_v51  ;;  %10194 = vmatprep.mubr.msk.f32.mxu0 %vm395_vm1, %v11708_v38 }
  0xea   : > { %v678_v16 = vpop.f32.mrf.mxu0  ;;  %v10059_v3 = vpop.f32.mrf.mxu1  ;;  %10372 = vmatmul.mubr.msk.f32.gmra.mxu1 %vm395_vm1, %v11384_v19 }
  0xeb   : > { %14700 = vst [vmem:[#allocation17_spill] sm:$0xff] %v11719_v47  ;;  %v11731_v17 = vadd.f32 %v1178_v55, %v678_v16  ;;  %10374 = vmatprep.mubr.msk.f32.mxu1 %vm395_vm1, %v11395_v20  ;;  %v11742_v47 = vld [vmem:[%s10917_s13 + $0x232] sm:$0xff] }
  0xec   : > { %v9973_v31 = vpop.f32.mrf.mxu0  ;;  %10195 = vmatmul.mubr.msk.f32.gmra.mxu0 %vm395_vm1, %v11724_v6  ;;  %v1198_v62 = vpop.f32.mrf.mxu1 }
  0xed   : > { %v11737_v51 = vadd.f32 %v10056_v46, %v9973_v31  ;;  %10197 = vmatprep.mubr.msk.f32.mxu0 %vm395_vm1, %v11727_v27 }
  0xee   : > { %v688_v13 = vpop.f32.mrf.mxu0  ;;  %v10062_v38 = vpop.f32.mrf.mxu1  ;;  %10375 = vmatmul.mubr.msk.f32.gmra.mxu1 %vm395_vm1, %v11398_v21 }
  0xef   : > { %v11746_v19 = vadd.f32 %v1188_v59, %v688_v13  ;;  %10377 = vmatprep.mubr.msk.f32.mxu1 %vm395_vm1, %v11409_v22  ;;  %v11765_v22 = vld [vmem:[%s14651_s1 + $0x18] sm:$0x7] }
  0xf0   : > { %v9976_v20 = vpop.f32.mrf.mxu0  ;;  %10198 = vmatmul.mubr.msk.f32.gmra.mxu0 %vm395_vm1, %v11742_v47  ;;  %v1208_v55 = vpop.f32.mrf.mxu1 }
  0xf1   : > { %v11752_v46 = vadd.f32 %v10059_v3, %v9976_v20  ;;  %10285 = vmatprep.mubr.msk.f32.mxu0 %vm395_vm1, %v10940_v9  ;;  %v14701_v20 = vld [vmem:[#allocation4_spill] sm:$0xff] }
  0xf2   : > { %v698_v16 = vpop.f32.mrf.mxu0  ;;  %v10065_v31 = vpop.f32.mrf.mxu1  ;;  %10378 = vmatmul.mubr.msk.f32.gmra.mxu1 %vm395_vm1, %v11412_v23 }
  0xf3   : > { %v11758_v21 = vadd.f32 %v1198_v62, %v698_v16  ;;  %10380 = vmatprep.mubr.msk.f32.mxu1 %vm395_vm1, %v11423_v24  ;;  %v14702_v16 = vld [vmem:[#allocation5_spill] sm:$0xff] }
  0xf4   : > { %v9979_v13 = vpop.f32.mrf.mxu0  ;;  %10286 = vmatmul.mubr.msk.f32.vlgmr.msra.gmra.mxu0 %vm395_vm1, %v10946_v11  ;;  %v1218_v9 = vpop.f32.mrf.mxu1 }
  0xf5   : > { %v11769_v59 = vadd.f32 %v10062_v38, %v9979_v13  ;;  %10450 = vmatpush3.msk.msra.mxu0 %vm558_vm0, %v11359_v12  ;;  %10288 = vmatprep.mubr.msk.f32.mxu0 %vm395_vm1, %v10966_v14  ;;  %v14703_v13 = vld [vmem:[#allocation6_spill] sm:$0xff] }
  0xf6   : > { %v708_v23 = vpop.f32.mrf.mxu0  ;;  %v10068_v24 = vpop.f32.mrf.mxu1  ;;  %10381 = vmatmul.mubr.msk.f32.gmra.mxu1 %vm395_vm1, %v11426_v25  ;;  %10615 = vmatprep.subr.msk.mxu0 %vm558_vm0, %v11765_v22 }
  0xf7   : > { %v11779_v3 = vadd.f32 %v1208_v55, %v708_v23  ;;  %10383 = vmatprep.mubr.msk.f32.mxu1 %vm395_vm1, %v11437_v26 }
  0xf8   : > { %v9982_v11 = vpop.f32.mrf.mxu0  ;;  %10289 = vmatmul.mubr.msk.f32.gmra.mxu0 %vm395_vm1, %v10969_v15  ;;  %v1228_v12 = vpop.f32.mrf.mxu1 }
  0xf9   : > { %v11785_v38 = vadd.f32 %v10065_v31, %v9982_v11  ;;  %10291 = vmatprep.mubr.msk.f32.mxu0 %vm395_vm1, %v10986_v18 }
  0xfa   : > { %v718_v14 = vpop.f32.mrf.mxu0  ;;  %v10071_v25 = vpop.f32.mrf.mxu1  ;;  %10384 = vmatmul.mubr.msk.f32.gmra.mxu1 %vm395_vm1, %v11440_v28 }
  0xfb   : > { %v11791_v62 = vadd.f32 %v1218_v9, %v718_v14  ;;  %10386 = vmatprep.mubr.msk.f32.mxu1 %vm395_vm1, %v11451_v29  ;;  %v11814_v14 = vld [vmem:[%s10917_s13 + $0x89] sm:$0xff] }
  0xfc   : > { %v9985_v26 = vpop.f32.mrf.mxu0  ;;  %10292 = vmatmul.mubr.msk.f32.gmra.mxu0 %vm395_vm1, %v14701_v20  ;;  %v1238_v15 = vpop.f32.mrf.mxu1 }
  0xfd   : > { %v11797_v55 = vadd.f32 %v10068_v24, %v9985_v26  ;;  %10294 = vmatprep.mubr.msk.f32.mxu0 %vm395_vm1, %v14702_v16  ;;  %v14704_v24 = vld [vmem:[#allocation7_spill] sm:$0xff]  ;;  %v14705_v26 = vld [vmem:[#allocation8_spill] sm:$0xff] }
  0xfe   : > { %v728_v18 = vpop.f32.mrf.mxu0  ;;  %v10074_v31 = vpop.f32.mrf.mxu1  ;;  %10387 = vmatmul.mubr.msk.f32.gmra.mxu1 %vm395_vm1, %v11454_v32  ;;  %v11829_v16 = vld [vmem:[%s10917_s13 + $0x91] sm:$0xff] }
  0xff   : > { %v11803_v28 = vadd.f32 %v1228_v12, %v728_v18  ;;  %10389 = vmatprep.mubr.msk.f32.mxu1 %vm395_vm1, %v11465_v33 }
 0x100   : > { %v9988_v29 = vpop.f32.mrf.mxu0  ;;  %10295 = vmatmul.mubr.msk.f32.gmra.mxu0 %vm395_vm1, %v14703_v13  ;;  %v1248_v9 = vpop.f32.mrf.mxu1 }
 0x101   : > { %v11809_v23 = vadd.f32 %v10071_v25, %v9988_v29  ;;  %10297 = vmatprep.mubr.msk.f32.mxu0 %vm395_vm1, %v14704_v24  ;;  %v11847_v24 = vld [vmem:[%s10917_s13 + $0xa9] sm:$0xff] }
 0x102   : > { %v738_v11 = vpop.f32.mrf.mxu0  ;;  %v10077_v32 = vpop.f32.mrf.mxu1  ;;  %10390 = vmatmul.mubr.msk.f32.gmra.mxu1 %vm395_vm1, %v11468_v36 }
 0x103   : > { %v11818_v33 = vadd.f32 %v1238_v15, %v738_v11  ;;  %10392 = vmatprep.mubr.msk.f32.mxu1 %vm395_vm1, %v11479_v37  ;;  %v11832_v15 = vld [vmem:[%s10917_s13 + $0xa1] sm:$0xff] }
 0x104   : > { %v9991_v12 = vpop.f32.mrf.mxu0  ;;  %10298 = vmatmul.mubr.msk.f32.gmra.mxu0 %vm395_vm1, %v14705_v26  ;;  %v1258_v25 = vpop.f32.mrf.mxu1 }
 0x105   : > { %v11824_v20 = vadd.f32 %v10074_v31, %v9991_v12  ;;  %10300 = vmatprep.mubr.msk.f32.mxu0 %vm395_vm1, %v11814_v14 }
 0x106   : > { %v748_v36 = vpop.f32.mrf.mxu0  ;;  %v10080_v18 = vpop.f32.mrf.mxu1  ;;  %10393 = vmatmul.mubr.msk.f32.gmra.mxu1 %vm395_vm1, %v11482_v40 }
 0x107   : > { %v11836_v37 = vadd.f32 %v1248_v9, %v748_v36  ;;  %10395 = vmatprep.mubr.msk.f32.mxu1 %vm395_vm1, %v11493_v41  ;;  %v11850_v9 = vld [vmem:[%s10917_s13 + $0xb1] sm:$0xff]  ;;  %v11865_v36 = vld [vmem:[%s10917_s13 + $0xc1] sm:$0xff] }
 0x108   : > { %v9994_v31 = vpop.f32.mrf.mxu0  ;;  %10301 = vmatmul.mubr.msk.f32.gmra.mxu0 %vm395_vm1, %v11829_v16  ;;  %v1268_v29 = vpop.f32.mrf.mxu1 }
 0x109   : > { %v11842_v13 = vadd.f32 %v10077_v32, %v9994_v31  ;;  %10303 = vmatprep.mubr.msk.f32.mxu0 %vm395_vm1, %v11832_v15 }
 0x10a   : > { %v758_v40 = vpop.f32.mrf.mxu0  ;;  %v10083_v11 = vpop.f32.mrf.mxu1  ;;  %10396 = vmatmul.mubr.msk.f32.gmra.mxu1 %vm395_vm1, %v11496_v44 }
 0x10b   : > { %v11854_v41 = vadd.f32 %v1258_v25, %v758_v40  ;;  %10398 = vmatprep.mubr.msk.f32.mxu1 %vm395_vm1, %v11507_v45  ;;  %v11868_v25 = vld [vmem:[%s10917_s13 + $0xc9] sm:$0xff] }
 0x10c   : > { %v9997_v32 = vpop.f32.mrf.mxu0  ;;  %10304 = vmatmul.mubr.msk.f32.gmra.mxu0 %vm395_vm1, %v11847_v24  ;;  %v1278_v12 = vpop.f32.mrf.mxu1 }
 0x10d   : > { %v11860_v26 = vadd.f32 %v10080_v18, %v9997_v32  ;;  %10306 = vmatprep.mubr.msk.f32.mxu0 %vm395_vm1, %v11850_v9 }
 0x10e   : > { %v768_v44 = vpop.f32.mrf.mxu0  ;;  %v10086_v31 = vpop.f32.mrf.mxu1  ;;  %10399 = vmatmul.mubr.msk.f32.gmra.mxu1 %vm395_vm1, %v11510_v48 }
 0x10f   : > { %14706 = vst [vmem:[#allocation4_spill] sm:$0xff] %v11860_v26  ;;  %v11872_v45 = vadd.f32 %v1268_v29, %v768_v44  ;;  %10401 = vmatprep.mubr.msk.f32.mxu1 %vm395_vm1, %v11521_v49  ;;  %v11883_v26 = vld [vmem:[%s10917_s13 + $0xd1] sm:$0xff]  ;;  %v11886_v29 = vld [vmem:[%s10917_s13 + $0xe1] sm:$0xff] }
 0x110   : > { %v10000_v18 = vpop.f32.mrf.mxu0  ;;  %10307 = vmatmul.mubr.msk.f32.gmra.mxu0 %vm395_vm1, %v11865_v36  ;;  %v1288_v40 = vpop.f32.mrf.mxu1 }
 0x111   : > { %14707 = vst [vmem:[#allocation5_spill] sm:$0xff] %v11872_v45  ;;  %v11878_v32 = vadd.f32 %v10083_v11, %v10000_v18  ;;  %10309 = vmatprep.mubr.msk.f32.mxu0 %vm395_vm1, %v11868_v25  ;;  %v11901_v45 = vld [vmem:[%s10917_s13 + $0xe9] sm:$0xff] }
 0x112   : > { %v778_v48 = vpop.f32.mrf.mxu0  ;;  %v10089_v44 = vpop.f32.mrf.mxu1  ;;  %10402 = vmatmul.mubr.msk.f32.gmra.mxu1 %vm395_vm1, %v11524_v52 }
 0x113   : > { %14708 = vst [vmem:[#allocation6_spill] sm:$0xff] %v11878_v32  ;;  %v11890_v49 = vadd.f32 %v1278_v12, %v778_v48  ;;  %10404 = vmatprep.mubr.msk.f32.mxu1 %vm395_vm1, %v11535_v53  ;;  %v11904_v12 = vld [vmem:[%s10917_s13 + $0xf1] sm:$0xff] }
 0x114   : > { %v10003_v11 = vpop.f32.mrf.mxu0  ;;  %10310 = vmatmul.mubr.msk.f32.gmra.mxu0 %vm395_vm1, %v11883_v26  ;;  %v1298_v18 = vpop.f32.mrf.mxu1 }
 0x115   : > { %14709 = vst [vmem:[#allocation7_spill] sm:$0xff] %v11890_v49  ;;  %v11896_v32 = vadd.f32 %v10086_v31, %v10003_v11  ;;  %10312 = vmatprep.mubr.msk.f32.mxu0 %vm395_vm1, %v11886_v29  ;;  %v11919_v49 = vld [vmem:[%s10917_s13 + $0x101] sm:$0xff] }
 0x116   : > { %v788_v52 = vpop.f32.mrf.mxu0  ;;  %v10092_v48 = vpop.f32.mrf.mxu1  ;;  %10405 = vmatmul.mubr.msk.f32.gmra.mxu1 %vm395_vm1, %v11538_v56 }
 0x117   : > { %14710 = vst [vmem:[#allocation8_spill] sm:$0xff] %v11896_v32  ;;  %v11908_v53 = vadd.f32 %v1288_v40, %v788_v52  ;;  %10407 = vmatprep.mubr.msk.f32.mxu1 %vm395_vm1, %v11549_v57  ;;  %v11922_v40 = vld [vmem:[%s10917_s13 + $0x109] sm:$0xff] }
 0x118   : > { %v10006_v31 = vpop.f32.mrf.mxu0  ;;  %10313 = vmatmul.mubr.msk.f32.gmra.mxu0 %vm395_vm1, %v11901_v45  ;;  %v1308_v11 = vpop.f32.mrf.mxu1 }
 0x119   : > { %14711 = vst [vmem:[#allocation18_spill] sm:$0xff] %v11908_v53  ;;  %v11914_v32 = vadd.f32 %v10089_v44, %v10006_v31  ;;  %10315 = vmatprep.mubr.msk.f32.mxu0 %vm395_vm1, %v11904_v12  ;;  %v11937_v53 = vld [vmem:[%s10917_s13 + $0x111] sm:$0xff] }
 0x11a   : > { %v798_v56 = vpop.f32.mrf.mxu0  ;;  %v10095_v52 = vpop.f32.mrf.mxu1  ;;  %10408 = vmatmul.mubr.msk.f32.gmra.mxu1 %vm395_vm1, %v11552_v60 }
 0x11b   : > { %14712 = vst [vmem:[#allocation19_spill] sm:$0xff] %v11914_v32  ;;  %v11926_v57 = vadd.f32 %v1298_v18, %v798_v56  ;;  %10410 = vmatprep.mubr.msk.f32.mxu1 %vm395_vm1, %v11563_v61  ;;  %v11940_v18 = vld [vmem:[%s10917_s13 + $0x121] sm:$0xff] }
 0x11c   : > { %v10009_v44 = vpop.f32.mrf.mxu0  ;;  %10316 = vmatmul.mubr.msk.f32.gmra.mxu0 %vm395_vm1, %v11919_v49  ;;  %v1318_v31 = vpop.f32.mrf.mxu1 }
 0x11d   : > { %14713 = vst [vmem:[#allocation20_spill] sm:$0xff] %v11926_v57  ;;  %v11932_v32 = vadd.f32 %v10092_v48, %v10009_v44  ;;  %10318 = vmatprep.mubr.msk.f32.mxu0 %vm395_vm1, %v11922_v40  ;;  %v11955_v57 = vld [vmem:[%s10917_s13 + $0x129] sm:$0xff] }
 0x11e   : > { %v808_v60 = vpop.f32.mrf.mxu0  ;;  %v10098_v56 = vpop.f32.mrf.mxu1  ;;  %10411 = vmatmul.mubr.msk.f32.gmra.mxu1 %vm395_vm1, %v11566_v0 }
 0x11f   : > { %14714 = vst [vmem:[#allocation21_spill] sm:$0xff] %v11932_v32  ;;  %v11944_v61 = vadd.f32 %v1308_v11, %v808_v60  ;;  %10413 = vmatprep.mubr.msk.f32.mxu1 %vm395_vm1, %v11577_v1  ;;  %v11958_v11 = vld [vmem:[%s10917_s13 + $0x131] sm:$0xff] }
 0x120   : > { %v10012_v48 = vpop.f32.mrf.mxu0  ;;  %10319 = vmatmul.mubr.msk.f32.gmra.mxu0 %vm395_vm1, %v11937_v53  ;;  %v1328_v44 = vpop.f32.mrf.mxu1 }
 0x121   : > { %14715 = vst [vmem:[#allocation22_spill] sm:$0xff] %v11944_v61  ;;  %v11950_v32 = vadd.f32 %v10095_v52, %v10012_v48  ;;  %10321 = vmatprep.mubr.msk.f32.mxu0 %vm395_vm1, %v11940_v18  ;;  %v11973_v61 = vld [vmem:[%s10917_s13 + $0x141] sm:$0xff] }
 0x122   : > { %v818_v0 = vpop.f32.mrf.mxu0  ;;  %v10101_v60 = vpop.f32.mrf.mxu1  ;;  %10414 = vmatmul.mubr.msk.f32.gmra.mxu1 %vm395_vm1, %v11580_v4 }
 0x123   : > { %14716 = vst [vmem:[#allocation23_spill] sm:$0xff] %v11950_v32  ;;  %v11962_v1 = vadd.f32 %v1318_v31, %v818_v0  ;;  %10416 = vmatprep.mubr.msk.f32.mxu1 %vm395_vm1, %v11591_v5  ;;  %v11976_v31 = vld [vmem:[%s10917_s13 + $0x149] sm:$0xff] }
 0x124   : > { %v10015_v52 = vpop.f32.mrf.mxu0  ;;  %10322 = vmatmul.mubr.msk.f32.gmra.mxu0 %vm395_vm1, %v11955_v57  ;;  %v1338_v48 = vpop.f32.mrf.mxu1 }
 0x125   : > { %14717 = vst [vmem:[#allocation24_spill] sm:$0xff] %v11962_v1  ;;  %v11968_v32 = vadd.f32 %v10098_v56, %v10015_v52  ;;  %10324 = vmatprep.mubr.msk.f32.mxu0 %vm395_vm1, %v11958_v11  ;;  %v11991_v1 = vld [vmem:[%s10917_s13 + $0x151] sm:$0xff] }
 0x126   : > { %v828_v4 = vpop.f32.mrf.mxu0  ;;  %v10104_v0 = vpop.f32.mrf.mxu1  ;;  %10417 = vmatmul.mubr.msk.f32.gmra.mxu1 %vm395_vm1, %v11594_v34 }
 0x127   : > { %14718 = vst [vmem:[#allocation25_spill] sm:$0xff] %v11968_v32  ;;  %v11980_v5 = vadd.f32 %v1328_v44, %v828_v4  ;;  %10419 = vmatprep.mubr.msk.f32.mxu1 %vm395_vm1, %v11605_v35  ;;  %v11994_v44 = vld [vmem:[%s10917_s13 + $0x161] sm:$0xff] }
 0x128   : > { %v10018_v56 = vpop.f32.mrf.mxu0  ;;  %10325 = vmatmul.mubr.msk.f32.gmra.mxu0 %vm395_vm1, %v11973_v61  ;;  %v1348_v52 = vpop.f32.mrf.mxu1 }
 0x129   : > { %14719 = vst [vmem:[#allocation26_spill] sm:$0xff] %v11980_v5  ;;  %v11986_v32 = vadd.f32 %v10101_v60, %v10018_v56  ;;  %10327 = vmatprep.mubr.msk.f32.mxu0 %vm395_vm1, %v11976_v31  ;;  %v12009_v5 = vld [vmem:[%s10917_s13 + $0x169] sm:$0xff] }
 0x12a   : > { %v838_v34 = vpop.f32.mrf.mxu0  ;;  %v10107_v4 = vpop.f32.mrf.mxu1  ;;  %10420 = vmatmul.mubr.msk.f32.gmra.mxu1 %vm395_vm1, %v11608_v42  ;;  %14723 = vst [vmem:[#allocation30_spill] sm:$0xff] %v12009_v5 }
 0x12b   : > { %14720 = vst [vmem:[#allocation27_spill] sm:$0xff] %v11986_v32  ;;  %v11998_v35 = vadd.f32 %v1338_v48, %v838_v34  ;;  %10422 = vmatprep.mubr.msk.f32.mxu1 %vm395_vm1, %v11619_v43  ;;  %v12012_v48 = vld [vmem:[%s10917_s13 + $0x171] sm:$0xff] }
 0x12c   : > { %v10021_v60 = vpop.f32.mrf.mxu0  ;;  %10328 = vmatmul.mubr.msk.f32.gmra.mxu0 %vm395_vm1, %v11991_v1  ;;  %v1358_v56 = vpop.f32.mrf.mxu1  ;;  %14724 = vst [vmem:[#allocation31_spill] sm:$0xff] %v12012_v48 }
 0x12d   : > { %14721 = vst [vmem:[#allocation28_spill] sm:$0xff] %v11998_v35  ;;  %v12004_v32 = vadd.f32 %v10104_v0, %v10021_v60  ;;  %10330 = vmatprep.mubr.msk.f32.mxu0 %vm395_vm1, %v11994_v44  ;;  %v12027_v35 = vld [vmem:[%s10917_s13 + $0x181] sm:$0xff] }
 0x12e   : > { %v848_v42 = vpop.f32.mrf.mxu0  ;;  %v10110_v34 = vpop.f32.mrf.mxu1  ;;  %10423 = vmatmul.mubr.msk.f32.gmra.mxu1 %vm395_vm1, %v11622_v50  ;;  %14727 = vst [vmem:[#allocation34_spill] sm:$0xff] %v12027_v35 }
 0x12f   : > { %14722 = vst [vmem:[#allocation29_spill] sm:$0xff] %v12004_v32  ;;  %v12016_v43 = vadd.f32 %v1348_v52, %v848_v42  ;;  %10425 = vmatprep.mubr.msk.f32.mxu1 %vm395_vm1, %v11633_v58  ;;  %v12030_v52 = vld [vmem:[%s10917_s13 + $0x189] sm:$0xff] }
 0x130   : > { %v10024_v0 = vpop.f32.mrf.mxu0  ;;  %10331 = vmatmul.mubr.msk.f32.gmra.mxu0 %vm395_vm1, %v12009_v5  ;;  %v1368_v60 = vpop.f32.mrf.mxu1  ;;  %14728 = vst [vmem:[#allocation35_spill] sm:$0xff] %v12030_v52 }
 0x131   : > { %14725 = vst [vmem:[#allocation32_spill] sm:$0xff] %v12016_v43  ;;  %v12022_v32 = vadd.f32 %v10107_v4, %v10024_v0  ;;  %10333 = vmatprep.mubr.msk.f32.mxu0 %vm395_vm1, %v12012_v48 }
 0x132   : > { %v858_v50 = vpop.f32.mrf.mxu0  ;;  %v10113_v42 = vpop.f32.mrf.mxu1  ;;  %10426 = vmatmul.mubr.msk.f32.gmra.mxu1 %vm395_vm1, %v11636_v2 }
 0x133   : > { %14726 = vst [vmem:[#allocation33_spill] sm:$0xff] %v12022_v32  ;;  %v12034_v58 = vadd.f32 %v1358_v56, %v858_v50  ;;  %10428 = vmatprep.mubr.msk.f32.mxu1 %vm395_vm1, %v11649_v54  ;;  %v12045_v42 = vld [vmem:[%s10917_s13 + $0x191] sm:$0xff]  ;;  %v12048_v56 = vld [vmem:[%s10917_s13 + $0x1a1] sm:$0xff] }
 0x134   : > { %v10027_v4 = vpop.f32.mrf.mxu0  ;;  %10334 = vmatmul.mubr.msk.f32.gmra.mxu0 %vm395_vm1, %v12027_v35  ;;  %v1378_v0 = vpop.f32.mrf.mxu1  ;;  %14731 = vst [vmem:[#allocation38_spill] sm:$0xff] %v12045_v42  ;;  %14732 = vst [vmem:[#allocation39_spill] sm:$0xff] %v12048_v56  ;;  %v14755_v35 = vld [vmem:[#allocation12_spill] sm:$0xff] }
 0x135   : > { %14729 = vst [vmem:[#allocation36_spill] sm:$0xff] %v12034_v58  ;;  %v12040_v32 = vadd.f32 %v10110_v34, %v10027_v4  ;;  %10336 = vmatprep.mubr.msk.f32.mxu0 %vm395_vm1, %v12030_v52  ;;  %v12064_v58 = vld [vmem:[%s10917_s13 + $0x1b1] sm:$0xff]  ;;  %v9092_v52 = vld [vmem:[%s10917_s13 + $0x69] sm:$0xff] }
 0x136   : > { %v868_v2 = vpop.f32.mrf.mxu0  ;;  %v10116_v50 = vpop.f32.mrf.mxu1  ;;  %10429 = vmatmul.mubr.msk.f32.gmra.mxu1 %vm395_vm1, %v11652_v63  ;;  %14735 = vst [vmem:[#allocation42_spill] sm:$0xff] %v12064_v58 }
 0x137   : > { %14730 = vst [vmem:[#allocation37_spill] sm:$0xff] %v12040_v32  ;;  %v12052_v54 = vadd.f32 %v1368_v60, %v868_v2  ;;  %10431 = vmatprep.mubr.msk.f32.mxu1 %vm395_vm1, %v11667_v10  ;;  %v12061_v32 = vld [vmem:[%s10917_s13 + $0x1a9] sm:$0xff] }
 0x138   : > { %v10030_v34 = vpop.f32.mrf.mxu0  ;;  %10337 = vmatmul.mubr.msk.f32.gmra.mxu0 %vm395_vm1, %v12045_v42  ;;  %v1388_v4 = vpop.f32.mrf.mxu1  ;;  %14734 = vst [vmem:[#allocation41_spill] sm:$0xff] %v12061_v32  ;;  %v12157_v42 = vld [vmem:[%s10917_s13 + $0x229] sm:$0xff] }
 0x139   : > { %14733 = vst [vmem:[#allocation40_spill] sm:$0xff] %v12052_v54  ;;  %10339 = vmatprep.mubr.msk.f32.mxu0 %vm395_vm1, %v12048_v56  ;;  %v12077_v34 = vld [vmem:[%s10917_s13 + $0x1c1] sm:$0xff] }
 0x13a   : > { %v878_v50 = vpop.f32.mrf.mxu0  ;;  %v10204_v63 = vpop.f32.mrf.mxu1  ;;  %10432 = vmatmul.mubr.msk.f32.gmra.mxu1 %vm395_vm1, %v11673_v7  ;;  %14737 = vst [vmem:[#allocation44_spill] sm:$0xff] %v12077_v34 }
 0x13b   : > { %v12068_v10 = vadd.f32 %v1378_v0, %v878_v50  ;;  %10434 = vmatprep.mubr.msk.f32.mxu1 %vm395_vm1, %v11688_v30  ;;  %v12080_v63 = vld [vmem:[%s10917_s13 + $0x1c9] sm:$0xff]  ;;  %v12091_v50 = vld [vmem:[%s10917_s13 + $0x1d1] sm:$0xff] }
 0x13c   : > { %v10033_v60 = vpop.f32.mrf.mxu0  ;;  %10340 = vmatmul.mubr.msk.f32.gmra.mxu0 %vm395_vm1, %v12061_v32  ;;  %v2293_v2 = vpop.f32.mrf.mxu1  ;;  %14738 = vst [vmem:[#allocation45_spill] sm:$0xff] %v12080_v63  ;;  %14739 = vst [vmem:[#allocation46_spill] sm:$0xff] %v12091_v50  ;;  %v12138_v32 = vld [vmem:[%s10917_s13 + $0x211] sm:$0xff] }
 0x13d   : > { %14736 = vst [vmem:[#allocation43_spill] sm:$0xff] %v12068_v10  ;;  %10342 = vmatprep.mubr.msk.f32.mxu0 %vm395_vm1, %v12064_v58  ;;  %v12094_v2 = vld [vmem:[%s10917_s13 + $0x1e1] sm:$0xff]  ;;  %v12108_v10 = vld [vmem:[%s10917_s13 + $0x1f1] sm:$0xff] }
 0x13e   : > { %v888_v4 = vpop.f32.mrf.mxu0  ;;  %v10207_v7 = vpop.f32.mrf.mxu1  ;;  %10435 = vmatmul.mubr.msk.f32.gmra.mxu1 %vm395_vm1, %v11691_v39  ;;  %14740 = vst [vmem:[#allocation47_spill] sm:$0xff] %v12094_v2  ;;  %14743 = vst [vmem:[#allocation48_spill] sm:$0xff] %v12108_v10  ;;  %v9088_v58 = vld [vmem:[%s10917_s13 + $0x41] sm:$0xff] }
 0x13f   : > { %10437 = vmatprep.mubr.msk.f32.mxu1 %vm395_vm1, %v11705_v8  ;;  %v14741_v4 = vld [vmem:[#allocation15_spill] sm:$0xff] }
 0x140   : > { %v10038_v30 = vpop.f32.mrf.mxu0  ;;  %10343 = vmatmul.mubr.msk.f32.gmra.mxu0 %vm395_vm1, %v12077_v34  ;;  %v2303_v0 = vpop.f32.mrf.mxu1 }
 0x141   : > { %10345 = vmatprep.mubr.msk.f32.mxu0 %vm395_vm1, %v12080_v63  ;;  %v12105_v0 = vld [vmem:[%s10917_s13 + $0x1e9] sm:$0xff] }
 0x142   : > { %v1128_v60 = vpop.f32.mrf.mxu0  ;;  %v10210_v39 = vpop.f32.mrf.mxu1  ;;  %10438 = vmatmul.mubr.msk.f32.gmra.mxu1 %vm395_vm1, %v14741_v4  ;;  %14742 = vst [vmem:[#allocation15_spill] sm:$0xff] %v12105_v0 }
 0x143   : > { %10440 = vmatprep.mubr.msk.f32.mxu1 %vm395_vm1, %v11724_v6  ;;  %v8921_v6 = vld [vmem:[%s10917_s13 + $0x242] sm:$0xff] }
 0x144   : > { %v10041_v8 = vpop.f32.mrf.mxu0  ;;  %10346 = vmatmul.mubr.msk.f32.gmra.mxu0 %vm395_vm1, %v12091_v50  ;;  %v2313_v30 = vpop.f32.mrf.mxu1 }
 0x145   : > { %10348 = vmatprep.mubr.msk.f32.mxu0 %vm395_vm1, %v12094_v2  ;;  %v8922_v2 = vld [vmem:[%s10917_s13 + $0x24a] sm:$0xff] }
 0x146   : > { %v1138_v60 = vpop.f32.mrf.mxu0  ;;  %v10213_v4 = vpop.f32.mrf.mxu1  ;;  %10441 = vmatmul.mubr.msk.f32.gmra.mxu1 %vm395_vm1, %v11727_v27  ;;  %v12124_v27 = vld [vmem:[%s10917_s13 + $0x209] sm:$0xff] }
 0x147   : > { %10443 = vmatprep.mubr.msk.f32.mxu1 %vm395_vm1, %v11742_v47  ;;  %v12121_v60 = vld [vmem:[%s10917_s13 + $0x201] sm:$0xff]  ;;  %14745 = vst [vmem:[#allocation50_spill] sm:$0xff] %v12124_v27  ;;  %v14746_v47 = vld [vmem:[#allocation9_spill] sm:$0xff] }
 0x148   : > { %v10121_v54 = vpop.f32.mrf.mxu0  ;;  %10349 = vmatmul.mubr.msk.f32.gmra.mxu0 %vm395_vm1, %v12105_v0  ;;  %v2323_v43 = vpop.f32.mrf.mxu1  ;;  %14744 = vst [vmem:[#allocation49_spill] sm:$0xff] %v12121_v60  ;;  %v8923_v0 = vld [vmem:[%s10917_s13 + $0x252] sm:$0xff]  ;;  %14747 = vst [vmem:[#allocation9_spill] sm:$0xff] %v12138_v32 }
 0x149   : > { %10351 = vmatprep.mubr.msk.f32.mxu0 %vm395_vm1, %v12108_v10  ;;  %v1144_v54 = vadd.f32 %v10041_v8, %v14746_v47 }
 0x14a   : > { %v1683_v50 = vpop.f32.mrf.mxu0  ;;  %v12126_v63 = vpop.f32.mrf.mxu1  ;;  %10444 = vmatmul.mubr.msk.f32.gmra.mxu1 %vm395_vm1, %v8921_v6  ;;  %v12141_v6 = vld [vmem:[%s10917_s13 + $0x221] sm:$0xff] }
 0x14b   : > { %10446 = vmatprep.mubr.msk.f32.mxu1 %vm395_vm1, %v8922_v2  ;;  %14748 = vst [vmem:[#allocation51_spill] sm:$0xff] %v12141_v6 }
 0x14c   : > { %v10124_v34 = vpop.f32.mrf.mxu0  ;;  %10352 = vmatmul.mubr.msk.f32.gmra.mxu0 %vm395_vm1, %v12121_v60  ;;  %v2333_v10 = vpop.f32.mrf.mxu1  ;;  %v9090_v60 = vld [vmem:[%s10917_s13 + $0x51] sm:$0xff] }
 0x14d   : > { %v1955_v50 = vadd.f32 %v10124_v34, %v1144_v54  ;;  %10354 = vmatprep.mubr.msk.f32.mxu0 %vm395_vm1, %v12124_v27  ;;  %v9089_v34 = vld [vmem:[%s10917_s13 + $0x49] sm:$0xff] }
 0x14e   : > { %v1693_v8 = vpop.f32.mrf.mxu0  ;;  %v12143_v2 = vpop.f32.mrf.mxu1  ;;  %10447 = vmatmul.mubr.msk.f32.gmra.mxu1 %vm395_vm1, %v8923_v0  ;;  %v12160_v0 = vld [vmem:[%s10917_s13 + $0x231] sm:$0xff] }
 0x14f   : > { %v12146_v47 = vadd.f32 %v10207_v7, %v1955_v50  ;;  %10534 = vmatprep.mubr.msk.f32.mxu1 %vm395_vm1, %v9088_v58  ;;  %v14750_v8 = vld [vmem:[#allocation10_spill] sm:$0xff]  ;;  %14752 = vst [vmem:[#allocation53_spill] sm:$0xff] %v12160_v0  ;;  %v14753_v50 = vld [vmem:[#allocation11_spill] sm:$0xff] }
 0x150   : > { %v10127_v54 = vpop.f32.mrf.mxu0  ;;  %10355 = vmatmul.mubr.msk.f32.gmra.mxu0 %vm395_vm1, %v12138_v32  ;;  %v2343_v27 = vpop.f32.mrf.mxu1  ;;  %14751 = vst [vmem:[#allocation10_spill] sm:$0xff] %v12157_v42 }
 0x151   : > { %14749 = vst [vmem:[#allocation52_spill] sm:$0xff] %v12146_v47  ;;  %v1957_v56 = vadd.f32 %v10127_v54, %v14750_v8  ;;  %10357 = vmatprep.mubr.msk.f32.mxu0 %vm395_vm1, %v12141_v6  ;;  %v9091_v54 = vld [vmem:[%s10917_s13 + $0x61] sm:$0xff] }
 0x152   : > { %v1703_v7 = vpop.f32.mrf.mxu0  ;;  %v12162_v58 = vpop.f32.mrf.mxu1  ;;  %10535 = vmatmul.mubr.msk.f32.vlgmr.msra.gmra.mxu1 %vm395_vm1, %v9089_v34 }
 0x153   : > { %v1956_v47 = vadd.f32 %v1703_v7, %v14753_v50  ;;  %v12166_v32 = vadd.f32 %v10210_v39, %v1957_v56  ;;  %10537 = vmatprep.mubr.msk.f32.mxu1 %vm395_vm1, %v9090_v60  ;;  %v12179_v56 = vld [vmem:[%s10917_s13 + $0x241] sm:$0xff]  ;;  %v12182_v60 = vld [vmem:[%s10917_s13 + $0x249] sm:$0xff]  ;;  %v14758_v7 = vld [vmem:[#allocation13_spill] sm:$0xff] }
 0x154   : > { %v10130_v8 = vpop.f32.mrf.mxu0  ;;  %10358 = vmatmul.mubr.msk.f32.gmra.mxu0 %vm395_vm1, %v12157_v42  ;;  %v2353_v6 = vpop.f32.mrf.mxu1  ;;  %14757 = vst [vmem:[#allocation54_spill] sm:$0xff] %v12182_v60 }
 0x155   : > { %14754 = vst [vmem:[#allocation11_spill] sm:$0xff] %v12166_v32  ;;  %v1959_v48 = vadd.f32 %v10130_v8, %v14755_v35  ;;  %v12174_v5 = vadd.f32 %v2313_v30, %v1956_v47  ;;  %10360 = vmatprep.mubr.msk.f32.mxu0 %vm395_vm1, %v12160_v0  ;;  %v9093_v35 = vld [vmem:[%s10917_s13 + $0x71] sm:$0xff]  ;;  %v9094_v8 = vld [vmem:[%s10917_s13 + $0x81] sm:$0xff] }
 0x156   : > { %v1713_v39 = vpop.f32.mrf.mxu0  ;;  %v10225_v34 = vpop.f32.mrf.mxu1  ;;  %10538 = vmatmul.mubr.msk.f32.gmra.mxu1 %vm395_vm1, %v9091_v54  ;;  %v12199_v54 = vld [vmem:[%s10917_s13 + $0x251] sm:$0xff] }
 0x157   : > { %14756 = vst [vmem:[#allocation12_spill] sm:$0xff] %v12174_v5  ;;  %v1958_v50 = vadd.f32 %v1713_v39, %v14758_v7  ;;  %v12186_v32 = vadd.f32 %v10213_v4, %v1959_v48  ;;  %10540 = vmatprep.mubr.msk.f32.mxu1 %vm395_vm1, %v9092_v52  ;;  %v14760_v5 = vld [vmem:[#allocation14_spill] sm:$0xff]  ;;  %v14762_v39 = vld [vmem:[#allocation16_spill] sm:$0xff] }
 0x158   : > { %v10133_v30 = vpop.f32.mrf.mxu0  ;;  %10361 = vmatmul.mubr.msk.f32.gmra.mxu0 %vm395_vm1, %v12179_v56  ;;  %v2363_v47 = vpop.f32.mrf.mxu1  ;;  %v8979_v52 = vld [vmem:[%s10917_s13 + $0x40] sm:$0xff] }
 0x159   : > { %14759 = vst [vmem:[#allocation13_spill] sm:$0xff] %v12186_v32  ;;  %v1961_v0 = vadd.f32 %v10133_v30, %v14760_v5  ;;  %v12194_v42 = vadd.f32 %v2323_v43, %v1958_v50  ;;  %10363 = vmatprep.mubr.msk.f32.mxu0 %vm395_vm1, %v12182_v60  ;;  %v14763_v50 = vld [vmem:[#allocation17_spill] sm:$0xff] }
 0x15a   : > { %v1723_v48 = vpop.f32.mrf.mxu0  ;;  %v10228_v4 = vpop.f32.mrf.mxu1  ;;  %10541 = vmatmul.mubr.msk.f32.gmra.mxu1 %vm395_vm1, %v9093_v35  ;;  %v8980_v35 = vld [vmem:[%s10917_s13 + $0x48] sm:$0xff] }
 0x15b   : > { %14761 = vst [vmem:[#allocation14_spill] sm:$0xff] %v12194_v42  ;;  %v1960_v7 = vadd.f32 %v1723_v48, %v14762_v39  ;;  %v12205_v32 = vadd.f32 %v12126_v63, %v1961_v0  ;;  %10543 = vmatprep.mubr.msk.f32.mxu1 %vm395_vm1, %v9094_v8  ;;  %v8981_v48 = vld [vmem:[%s10917_s13 + $0x50] sm:$0xff] }
 0x15c   : > { %v10136_v5 = vpop.f32.mrf.mxu0  ;;  %10364 = vmatmul.mubr.msk.f32.gmra.mxu0 %vm395_vm1, %v12199_v54  ;;  %v2373_v43 = vpop.f32.mrf.mxu1 }
 0x15d   : > { %v1963_v30 = vadd.f32 %v10136_v5, %v14763_v50  ;;  %v12211_v42 = vadd.f32 %v2333_v10, %v1960_v7  ;;  %10451 = vmatprep.mubr.msk.f32.mxu0 %vm395_vm1, %v8979_v52 }
 0x15e   : > { %v1733_v60 = vpop.f32.mrf.mxu0  ;;  %v10231_v63 = vpop.f32.mrf.mxu1  ;;  %10544 = vmatmul.mubr.msk.f32.gmra.mxu1 %vm395_vm1, %v11814_v14 }
 0x15f   : > { %v1962_v0 = vadd.f32 %v1733_v60, %v11731_v17  ;;  %v12220_v8 = vadd.f32 %v12143_v2, %v1963_v30  ;;  %10546 = vmatprep.mubr.msk.f32.mxu1 %vm395_vm1, %v11829_v16  ;;  %v8982_v17 = vld [vmem:[%s10917_s13 + $0x60] sm:$0xff]  ;;  %v8983_v2 = vld [vmem:[%s10917_s13 + $0x68] sm:$0xff] }
 0x160   : > { %v10139_v10 = vpop.f32.mrf.mxu0  ;;  %10452 = vmatmul.mubr.msk.f32.vlgmr.msra.gmra.mxu0 %vm395_vm1, %v8980_v35  ;;  %v2383_v52 = vpop.f32.mrf.mxu1  ;;  %v8985_v30 = vld [vmem:[%s10917_s13 + $0x80] sm:$0xff] }
 0x161   : > { %v1965_v39 = vadd.f32 %v10139_v10, %v11737_v51  ;;  %v12226_v7 = vadd.f32 %v2343_v27, %v1962_v0  ;;  %10616 = vmatpush3.msk.msra.mxu0 %vm558_vm0, %v11765_v22  ;;  %10454 = vmatprep.mubr.msk.f32.mxu0 %vm395_vm1, %v8981_v48  ;;  %v8986_v10 = vld [vmem:[%s10917_s13 + $0x88] sm:$0xff] }
 0x162   : > { %v1743_v14 = vpop.f32.mrf.mxu0  ;;  %v10234_v60 = vpop.f32.mrf.mxu1  ;;  %10547 = vmatmul.mubr.msk.f32.gmra.mxu1 %vm395_vm1, %v11832_v15  ;;  %v8984_v15 = vld [vmem:[%s10917_s13 + $0x70] sm:$0xff] }
 0x163   : > { %v1964_v16 = vadd.f32 %v1743_v14, %v11746_v19  ;;  %v12237_v51 = vadd.f32 %v12162_v58, %v1965_v39  ;;  %10549 = vmatprep.mubr.msk.f32.mxu1 %vm395_vm1, %v11847_v24 }
 0x164   : > { %v10142_v22 = vpop.f32.mrf.mxu0  ;;  %10455 = vmatmul.mubr.msk.f32.gmra.mxu0 %vm395_vm1, %v8982_v17  ;;  %v2393_v27 = vpop.f32.mrf.mxu1 }
 0x165   : > { %v1967_v5 = vadd.f32 %v10142_v22, %v11752_v46  ;;  %v12243_v50 = vadd.f32 %v2353_v6, %v1964_v16  ;;  %10457 = vmatprep.mubr.msk.f32.mxu0 %vm395_vm1, %v8983_v2  ;;  %v8988_v2 = vld [vmem:[%s10917_s13 + $0xa0] sm:$0xff] }
 0x166   : > { %v1753_v19 = vpop.f32.mrf.mxu0  ;;  %v10237_v58 = vpop.f32.mrf.mxu1  ;;  %10550 = vmatmul.mubr.msk.f32.gmra.mxu1 %vm395_vm1, %v11850_v9 }
 0x167   : > { %v1966_v24 = vadd.f32 %v1753_v19, %v11758_v21  ;;  %v12251_v35 = vadd.f32 %v10225_v34, %v1967_v5  ;;  %10552 = vmatprep.mubr.msk.f32.mxu1 %vm395_vm1, %v11865_v36  ;;  %v8987_v21 = vld [vmem:[%s10917_s13 + $0x90] sm:$0xff] }
 0x168   : > { %v10145_v46 = vpop.f32.mrf.mxu0  ;;  %10458 = vmatmul.mubr.msk.f32.gmra.mxu0 %vm395_vm1, %v8984_v15  ;;  %v2403_v6 = vpop.f32.mrf.mxu1  ;;  %v8990_v15 = vld [vmem:[%s10917_s13 + $0xb0] sm:$0xff] }
 0x169   : > { %v1969_v48 = vadd.f32 %v10145_v46, %v11769_v59  ;;  %v12257_v0 = vadd.f32 %v2363_v47, %v1966_v24  ;;  %10460 = vmatprep.mubr.msk.f32.mxu0 %vm395_vm1, %v8985_v30  ;;  %v8992_v46 = vld [vmem:[%s10917_s13 + $0xc8] sm:$0xff] }
 0x16a   : > { %v1763_v9 = vpop.f32.mrf.mxu0  ;;  %v10240_v34 = vpop.f32.mrf.mxu1  ;;  %10553 = vmatmul.mubr.msk.f32.gmra.mxu1 %vm395_vm1, %v11868_v25 }
 0x16b   : > { %v1968_v36 = vadd.f32 %v1763_v9, %v11779_v3  ;;  %v12265_v39 = vadd.f32 %v10228_v4, %v1969_v48  ;;  %10555 = vmatprep.mubr.msk.f32.mxu1 %vm395_vm1, %v11883_v26  ;;  %v8989_v3 = vld [vmem:[%s10917_s13 + $0xa8] sm:$0xff] }
 0x16c   : > { %v10148_v59 = vpop.f32.mrf.mxu0  ;;  %10461 = vmatmul.mubr.msk.f32.gmra.mxu0 %vm395_vm1, %v8986_v10  ;;  %v2413_v47 = vpop.f32.mrf.mxu1 }
 0x16d   : > { %v1971_v17 = vadd.f32 %v10148_v59, %v11785_v38  ;;  %v12271_v14 = vadd.f32 %v2373_v43, %v1968_v36  ;;  %10463 = vmatprep.mubr.msk.f32.mxu0 %vm395_vm1, %v8987_v21  ;;  %v8994_v21 = vld [vmem:[%s10917_s13 + $0xe0] sm:$0xff] }
 0x16e   : > { %v1773_v25 = vpop.f32.mrf.mxu0  ;;  %v10243_v4 = vpop.f32.mrf.mxu1  ;;  %10556 = vmatmul.mubr.msk.f32.gmra.mxu1 %vm395_vm1, %v11886_v29 }
 0x16f   : > { %v1970_v26 = vadd.f32 %v1773_v25, %v11791_v62  ;;  %v12279_v16 = vadd.f32 %v10231_v63, %v1971_v17  ;;  %10558 = vmatprep.mubr.msk.f32.mxu1 %vm395_vm1, %v11901_v45  ;;  %v8991_v62 = vld [vmem:[%s10917_s13 + $0xc0] sm:$0xff] }
 0x170   : > { %v10151_v38 = vpop.f32.mrf.mxu0  ;;  %10464 = vmatmul.mubr.msk.f32.gmra.mxu0 %vm395_vm1, %v8988_v2  ;;  %v2423_v43 = vpop.f32.mrf.mxu1  ;;  %v8996_v2 = vld [vmem:[%s10917_s13 + $0xf0] sm:$0xff] }
 0x171   : > { %v1973_v22 = vadd.f32 %v10151_v38, %v11797_v55  ;;  %v12285_v5 = vadd.f32 %v2383_v52, %v1970_v26  ;;  %10466 = vmatprep.mubr.msk.f32.mxu0 %vm395_vm1, %v8989_v3  ;;  %v14764_v3 = vld [vmem:[#allocation4_spill] sm:$0xff] }
 0x172   : > { %v1783_v29 = vpop.f32.mrf.mxu0  ;;  %v10246_v63 = vpop.f32.mrf.mxu1  ;;  %10559 = vmatmul.mubr.msk.f32.gmra.mxu1 %vm395_vm1, %v11904_v12 }
 0x173   : > { %v1972_v45 = vadd.f32 %v1783_v29, %v11803_v28  ;;  %v12293_v19 = vadd.f32 %v10234_v60, %v1973_v22  ;;  %10561 = vmatprep.mubr.msk.f32.mxu1 %vm395_vm1, %v11919_v49  ;;  %v8993_v28 = vld [vmem:[%s10917_s13 + $0xd0] sm:$0xff]  ;;  %v8998_v22 = vld [vmem:[%s10917_s13 + $0x108] sm:$0xff] }
 0x174   : > { %v10154_v55 = vpop.f32.mrf.mxu0  ;;  %10467 = vmatmul.mubr.msk.f32.gmra.mxu0 %vm395_vm1, %v8990_v15  ;;  %v2433_v52 = vpop.f32.mrf.mxu1 }
 0x175   : > { %v1975_v30 = vadd.f32 %v10154_v55, %v11809_v23  ;;  %v12299_v24 = vadd.f32 %v2393_v27, %v1972_v45  ;;  %10469 = vmatprep.mubr.msk.f32.mxu0 %vm395_vm1, %v8991_v62  ;;  %v14766_v45 = vld [vmem:[#allocation6_spill] sm:$0xff] }
 0x176   : > { %v1793_v12 = vpop.f32.mrf.mxu0  ;;  %v10249_v60 = vpop.f32.mrf.mxu1  ;;  %10562 = vmatmul.mubr.msk.f32.gmra.mxu1 %vm395_vm1, %v11922_v40 }
 0x177   : > { %v1974_v49 = vadd.f32 %v1793_v12, %v11818_v33  ;;  %v12307_v48 = vadd.f32 %v10237_v58, %v1975_v30  ;;  %10564 = vmatprep.mubr.msk.f32.mxu1 %vm395_vm1, %v11937_v53  ;;  %v8995_v33 = vld [vmem:[%s10917_s13 + $0xe8] sm:$0xff] }
 0x178   : > { %v10157_v23 = vpop.f32.mrf.mxu0  ;;  %10470 = vmatmul.mubr.msk.f32.gmra.mxu0 %vm395_vm1, %v8992_v46  ;;  %v2443_v27 = vpop.f32.mrf.mxu1  ;;  %v9000_v46 = vld [vmem:[%s10917_s13 + $0x120] sm:$0xff]  ;;  %v9001_v12 = vld [vmem:[%s10917_s13 + $0x128] sm:$0xff] }
 0x179   : > { %v1977_v10 = vadd.f32 %v10157_v23, %v11824_v20  ;;  %v12313_v9 = vadd.f32 %v2403_v6, %v1974_v49  ;;  %10472 = vmatprep.mubr.msk.f32.mxu0 %vm395_vm1, %v8993_v28  ;;  %v14768_v23 = vld [vmem:[#allocation30_spill] sm:$0xff] }
 0x17a   : > { %v1803_v40 = vpop.f32.mrf.mxu0  ;;  %v10252_v58 = vpop.f32.mrf.mxu1  ;;  %10565 = vmatmul.mubr.msk.f32.gmra.mxu1 %vm395_vm1, %v11940_v18 }
 0x17b   : > { %v1976_v53 = vadd.f32 %v1803_v40, %v11836_v37  ;;  %v12321_v36 = vadd.f32 %v10240_v34, %v1977_v10  ;;  %10567 = vmatprep.mubr.msk.f32.mxu1 %vm395_vm1, %v11955_v57  ;;  %v8997_v37 = vld [vmem:[%s10917_s13 + $0x100] sm:$0xff] }
 0x17c   : > { %v10160_v20 = vpop.f32.mrf.mxu0  ;;  %10473 = vmatmul.mubr.msk.f32.gmra.mxu0 %vm395_vm1, %v8994_v21  ;;  %v2453_v6 = vpop.f32.mrf.mxu1  ;;  %v14769_v21 = vld [vmem:[#allocation8_spill] sm:$0xff] }
 0x17d   : > { %v1979_v59 = vadd.f32 %v10160_v20, %v11842_v13  ;;  %v12327_v17 = vadd.f32 %v2413_v47, %v1976_v53  ;;  %10475 = vmatprep.mubr.msk.f32.mxu0 %vm395_vm1, %v8995_v33  ;;  %v9002_v53 = vld [vmem:[%s10917_s13 + $0x130] sm:$0xff]  ;;  %v9003_v20 = vld [vmem:[%s10917_s13 + $0x140] sm:$0xff] }
 0x17e   : > { %v1813_v18 = vpop.f32.mrf.mxu0  ;;  %v10255_v34 = vpop.f32.mrf.mxu1  ;;  %10568 = vmatmul.mubr.msk.f32.gmra.mxu1 %vm395_vm1, %v11958_v11 }
 0x17f   : > { %v1978_v57 = vadd.f32 %v1813_v18, %v11854_v41  ;;  %v12335_v25 = vadd.f32 %v10243_v4, %v1979_v59  ;;  %10570 = vmatprep.mubr.msk.f32.mxu1 %vm395_vm1, %v11973_v61  ;;  %v8999_v41 = vld [vmem:[%s10917_s13 + $0x110] sm:$0xff]  ;;  %v14765_v61 = vld [vmem:[#allocation5_spill] sm:$0xff]  ;;  %v14770_v59 = vld [vmem:[#allocation31_spill] sm:$0xff] }
 0x180   : > { %v10163_v13 = vpop.f32.mrf.mxu0  ;;  %10476 = vmatmul.mubr.msk.f32.gmra.mxu0 %vm395_vm1, %v8996_v2  ;;  %v2463_v47 = vpop.f32.mrf.mxu1  ;;  %v14771_v2 = vld [vmem:[#allocation18_spill] sm:$0xff] }
 0x181   : > { %v1981_v26 = vadd.f32 %v10163_v13, %v14764_v3  ;;  %v12341_v38 = vadd.f32 %v2423_v43, %v1978_v57  ;;  %10478 = vmatprep.mubr.msk.f32.mxu0 %vm395_vm1, %v8997_v37  ;;  %v14772_v57 = vld [vmem:[#allocation34_spill] sm:$0xff]  ;;  %v14773_v3 = vld [vmem:[#allocation19_spill] sm:$0xff] }
 0x182   : > { %v1823_v11 = vpop.f32.mrf.mxu0  ;;  %v10258_v4 = vpop.f32.mrf.mxu1  ;;  %10571 = vmatmul.mubr.msk.f32.gmra.mxu1 %vm395_vm1, %v11976_v31 }
 0x183   : > { %v1980_v15 = vadd.f32 %v1823_v11, %v14765_v61  ;;  %v12349_v29 = vadd.f32 %v10246_v63, %v1981_v26  ;;  %10573 = vmatprep.mubr.msk.f32.mxu1 %vm395_vm1, %v11991_v1  ;;  %v14767_v1 = vld [vmem:[#allocation7_spill] sm:$0xff]  ;;  %v9005_v61 = vld [vmem:[%s10917_s13 + $0x150] sm:$0xff] }
 0x184   : > { %v10166_v43 = vpop.f32.mrf.mxu0  ;;  %10479 = vmatmul.mubr.msk.f32.gmra.mxu0 %vm395_vm1, %v8998_v22  ;;  %v2473_v62 = vpop.f32.mrf.mxu1  ;;  %v9004_v11 = vld [vmem:[%s10917_s13 + $0x148] sm:$0xff] }
 0x185   : > { %v1983_v55 = vadd.f32 %v10166_v43, %v14766_v45  ;;  %v12355_v30 = vadd.f32 %v2433_v52, %v1980_v15  ;;  %10481 = vmatprep.mubr.msk.f32.mxu0 %vm395_vm1, %v8999_v41  ;;  %v14774_v15 = vld [vmem:[#allocation35_spill] sm:$0xff]  ;;  %v14775_v43 = vld [vmem:[#allocation20_spill] sm:$0xff] }
 0x186   : > { %v1833_v31 = vpop.f32.mrf.mxu0  ;;  %v10261_v63 = vpop.f32.mrf.mxu1  ;;  %10574 = vmatmul.mubr.msk.f32.gmra.mxu1 %vm395_vm1, %v11994_v44 }
 0x187   : > { %v1982_v28 = vadd.f32 %v1833_v31, %v14767_v1  ;;  %v12363_v49 = vadd.f32 %v10249_v60, %v1983_v55  ;;  %10576 = vmatprep.mubr.msk.f32.mxu1 %vm395_vm1, %v14768_v23  ;;  %v9006_v23 = vld [vmem:[%s10917_s13 + $0x160] sm:$0xff] }
 0x188   : > { %v10169_v52 = vpop.f32.mrf.mxu0  ;;  %10482 = vmatmul.mubr.msk.f32.gmra.mxu0 %vm395_vm1, %v9000_v46  ;;  %v2483_v10 = vpop.f32.mrf.mxu1  ;;  %v14776_v46 = vld [vmem:[#allocation38_spill] sm:$0xff] }
 0x189   : > { %v1985_v40 = vadd.f32 %v10169_v52, %v14769_v21  ;;  %v12369_v33 = vadd.f32 %v2443_v27, %v1982_v28  ;;  %10484 = vmatprep.mubr.msk.f32.mxu0 %vm395_vm1, %v9001_v12  ;;  %v14777_v12 = vld [vmem:[#allocation21_spill] sm:$0xff]  ;;  %v9007_v21 = vld [vmem:[%s10917_s13 + $0x168] sm:$0xff] }
 0x18a   : > { %v1843_v44 = vpop.f32.mrf.mxu0  ;;  %v10264_v60 = vpop.f32.mrf.mxu1  ;;  %10577 = vmatmul.mubr.msk.f32.gmra.mxu1 %vm395_vm1, %v14770_v59  ;;  %v14780_v59 = vld [vmem:[#allocation41_spill] sm:$0xff] }
 0x18b   : > { %v1984_v18 = vadd.f32 %v1843_v44, %v14771_v2  ;;  %v12377_v37 = vadd.f32 %v10252_v58, %v1985_v40  ;;  %10579 = vmatprep.mubr.msk.f32.mxu1 %vm395_vm1, %v14772_v57  ;;  %v14778_v40 = vld [vmem:[#allocation39_spill] sm:$0xff] }
 0x18c   : > { %v10172_v27 = vpop.f32.mrf.mxu0  ;;  %10485 = vmatmul.mubr.msk.f32.gmra.mxu0 %vm395_vm1, %v9002_v53  ;;  %v2493_v13 = vpop.f32.mrf.mxu1  ;;  %v14779_v53 = vld [vmem:[#allocation22_spill] sm:$0xff] }
 0x18d   : > { %v1987_v26 = vadd.f32 %v10172_v27, %v14773_v3  ;;  %v12383_v22 = vadd.f32 %v2453_v6, %v1984_v18  ;;  %10487 = vmatprep.mubr.msk.f32.mxu0 %vm395_vm1, %v9003_v20  ;;  %v14781_v18 = vld [vmem:[#allocation23_spill] sm:$0xff]  ;;  %v9008_v3 = vld [vmem:[%s10917_s13 + $0x170] sm:$0xff] }
 0x18e   : > { %v1853_v41 = vpop.f32.mrf.mxu0  ;;  %v10267_v58 = vpop.f32.mrf.mxu1  ;;  %10580 = vmatmul.mubr.msk.f32.gmra.mxu1 %vm395_vm1, %v14774_v15 }
 0x18f   : > { %v1986_v45 = vadd.f32 %v1853_v41, %v14775_v43  ;;  %v12391_v55 = vadd.f32 %v10255_v34, %v1987_v26  ;;  %10582 = vmatprep.mubr.msk.f32.mxu1 %vm395_vm1, %v14776_v46  ;;  %v14782_v41 = vld [vmem:[#allocation42_spill] sm:$0xff] }
 0x190   : > { %v10175_v6 = vpop.f32.mrf.mxu0  ;;  %10488 = vmatmul.mubr.msk.f32.gmra.mxu0 %vm395_vm1, %v9004_v11  ;;  %v2503_v31 = vpop.f32.mrf.mxu1  ;;  %v9009_v11 = vld [vmem:[%s10917_s13 + $0x180] sm:$0xff] }
 0x191   : > { %v1989_v1 = vadd.f32 %v10175_v6, %v14777_v12  ;;  %v12397_v28 = vadd.f32 %v2463_v47, %v1986_v45  ;;  %10490 = vmatprep.mubr.msk.f32.mxu0 %vm395_vm1, %v9005_v61  ;;  %v14783_v61 = vld [vmem:[#allocation24_spill] sm:$0xff]  ;;  %v14785_v6 = vld [vmem:[#allocation25_spill] sm:$0xff] }
 0x192   : > { %v1863_v52 = vpop.f32.mrf.mxu0  ;;  %v10270_v34 = vpop.f32.mrf.mxu1  ;;  %10583 = vmatmul.mubr.msk.f32.gmra.mxu1 %vm395_vm1, %v14778_v40  ;;  %v14784_v45 = vld [vmem:[#allocation44_spill] sm:$0xff]  ;;  %v14786_v40 = vld [vmem:[#allocation45_spill] sm:$0xff] }
 0x193   : > { %v1988_v44 = vadd.f32 %v1863_v52, %v14779_v53  ;;  %v12405_v20 = vadd.f32 %v10258_v4, %v1989_v1  ;;  %10585 = vmatprep.mubr.msk.f32.mxu1 %vm395_vm1, %v14780_v59  ;;  %v14787_v53 = vld [vmem:[#allocation26_spill] sm:$0xff] }
 0x194   : > { %v10178_v47 = vpop.f32.mrf.mxu0  ;;  %10491 = vmatmul.mubr.msk.f32.gmra.mxu0 %vm395_vm1, %v9006_v23  ;;  %v2513_v2 = vpop.f32.mrf.mxu1  ;;  %v9010_v23 = vld [vmem:[%s10917_s13 + $0x188] sm:$0xff] }
 0x195   : > { %v1991_v57 = vadd.f32 %v10178_v47, %v14781_v18  ;;  %v12411_v27 = vadd.f32 %v2473_v62, %v1988_v44  ;;  %10493 = vmatprep.mubr.msk.f32.mxu0 %vm395_vm1, %v9007_v21  ;;  %v9011_v21 = vld [vmem:[%s10917_s13 + $0x190] sm:$0xff]  ;;  %v14788_v47 = vld [vmem:[#allocation46_spill] sm:$0xff] }
 0x196   : > { %v1873_v26 = vpop.f32.mrf.mxu0  ;;  %v10273_v4 = vpop.f32.mrf.mxu1  ;;  %10586 = vmatmul.mubr.msk.f32.gmra.mxu1 %vm395_vm1, %v14782_v41 }
 0x197   : > { %v1990_v15 = vadd.f32 %v1873_v26, %v14783_v61  ;;  %v12419_v43 = vadd.f32 %v10261_v63, %v1991_v57  ;;  %10588 = vmatprep.mubr.msk.f32.mxu1 %vm395_vm1, %v14784_v45  ;;  %v14790_v57 = vld [vmem:[#allocation27_spill] sm:$0xff]  ;;  %v14792_v45 = vld [vmem:[#allocation28_spill] sm:$0xff] }
 0x198   : > { %v10181_v62 = vpop.f32.mrf.mxu0  ;;  %10494 = vmatmul.mubr.msk.f32.gmra.mxu0 %vm395_vm1, %v9008_v3  ;;  %v2523_v46 = vpop.f32.mrf.mxu1 }
 0x199   : > { %v1993_v12 = vadd.f32 %v10181_v62, %v14785_v6  ;;  %v12425_v1 = vadd.f32 %v2483_v10, %v1990_v15  ;;  %10496 = vmatprep.mubr.msk.f32.mxu0 %vm395_vm1, %v9009_v11  ;;  %v9012_v11 = vld [vmem:[%s10917_s13 + $0x1a0] sm:$0xff]  ;;  %v14791_v15 = vld [vmem:[#allocation47_spill] sm:$0xff] }
 0x19a   : > { %v1883_v52 = vpop.f32.mrf.mxu0  ;;  %v10276_v63 = vpop.f32.mrf.mxu1  ;;  %10589 = vmatmul.mubr.msk.f32.gmra.mxu1 %vm395_vm1, %v14786_v40 }
 0x19b   : > { %v1992_v44 = vadd.f32 %v1883_v52, %v14787_v53  ;;  %v12433_v59 = vadd.f32 %v10264_v60, %v1993_v12  ;;  %10591 = vmatprep.mubr.msk.f32.mxu1 %vm395_vm1, %v14788_v47  ;;  %v9013_v60 = vld [vmem:[%s10917_s13 + $0x1a8] sm:$0xff]  ;;  %v14795_v52 = vld [vmem:[#allocation29_spill] sm:$0xff]  ;;  %v9014_v53 = vld [vmem:[%s10917_s13 + $0x1b0] sm:$0xff] }
 0x19c   : > { %v10184_v10 = vpop.f32.mrf.mxu0  ;;  %10497 = vmatmul.mubr.msk.f32.gmra.mxu0 %vm395_vm1, %v9010_v23  ;;  %v12438_v18 = vpop.f32.mrf.mxu1  ;;  %v14793_v12 = vld [vmem:[#allocation15_spill] sm:$0xff] }
 0x19d   : > { %14789 = vst [vmem:[#allocation16_spill] sm:$0xff] %v12438_v18  ;;  %v1995_v3 = vadd.f32 %v10184_v10, %v14790_v57  ;;  %v12441_v26 = vadd.f32 %v2493_v13, %v1992_v44  ;;  %10499 = vmatprep.mubr.msk.f32.mxu0 %vm395_vm1, %v9011_v21  ;;  %v14796_v10 = vld [vmem:[#allocation48_spill] sm:$0xff] }
 0x19e   : > { %v1893_v41 = vpop.f32.mrf.mxu0  ;;  %v10279_v61 = vpop.f32.mrf.mxu1  ;;  %10592 = vmatmul.mubr.msk.f32.gmra.mxu1 %vm395_vm1, %v14791_v15  ;;  %v14797_v57 = vld [vmem:[#allocation32_spill] sm:$0xff] }
 0x19f   : > { %v1994_v62 = vadd.f32 %v1893_v41, %v14792_v45  ;;  %v12449_v6 = vadd.f32 %v10267_v58, %v1995_v3  ;;  %10594 = vmatprep.mubr.msk.f32.mxu1 %vm395_vm1, %v14793_v12  ;;  %v9015_v58 = vld [vmem:[%s10917_s13 + $0x1c0] sm:$0xff]  ;;  %v14798_v41 = vld [vmem:[#allocation49_spill] sm:$0xff] }
 0x1a0   : > { %v10187_v13 = vpop.f32.mrf.mxu0  ;;  %10500 = vmatmul.mubr.msk.f32.gmra.mxu0 %vm395_vm1, %v9012_v11  ;;  %v12454_v23 = vpop.f32.mrf.mxu1 }
 0x1a1   : > { %14794 = vst [vmem:[#allocation17_spill] sm:$0xff] %v12454_v23  ;;  %v1997_v21 = vadd.f32 %v10187_v13, %v14795_v52  ;;  %v12457_v40 = vadd.f32 %v2503_v31, %v1994_v62  ;;  %10502 = vmatprep.mubr.msk.f32.mxu0 %vm395_vm1, %v9013_v60  ;;  %v14799_v60 = vld [vmem:[#allocation33_spill] sm:$0xff]  ;;  %v9016_v62 = vld [vmem:[%s10917_s13 + $0x1c8] sm:$0xff]  ;;  %v9017_v13 = vld [vmem:[%s10917_s13 + $0x1d0] sm:$0xff] }
 0x1a2   : > { %v1903_v44 = vpop.f32.mrf.mxu0  ;;  %v10282_v47 = vpop.f32.mrf.mxu1  ;;  %10595 = vmatmul.mubr.msk.f32.gmra.mxu1 %vm395_vm1, %v14796_v10  ;;  %v14800_v52 = vld [vmem:[#allocation50_spill] sm:$0xff] }
 0x1a3   : > { %v1996_v3 = vadd.f32 %v1903_v44, %v14797_v57  ;;  %v12465_v11 = vadd.f32 %v10270_v34, %v1997_v21  ;;  %10597 = vmatprep.mubr.msk.f32.mxu1 %vm395_vm1, %v14798_v41  ;;  %v14801_v21 = vld [vmem:[#allocation36_spill] sm:$0xff]  ;;  %v9018_v41 = vld [vmem:[%s10917_s13 + $0x1e0] sm:$0xff] }
 0x1a4   : > { %v10190_v31 = vpop.f32.mrf.mxu0  ;;  %10503 = vmatmul.mubr.msk.f32.gmra.mxu0 %vm395_vm1, %v9014_v53  ;;  %v2553_v61 = vpop.f32.mrf.mxu1  ;;  %v14802_v53 = vld [vmem:[#allocation9_spill] sm:$0xff] }
 0x1a5   : > { %v1999_v15 = vadd.f32 %v10190_v31, %v14799_v60  ;;  %v12471_v45 = vadd.f32 %v2513_v2, %v1996_v3  ;;  %10505 = vmatprep.mubr.msk.f32.mxu0 %vm395_vm1, %v9015_v58  ;;  %v14803_v58 = vld [vmem:[#allocation37_spill] sm:$0xff]  ;;  %v9019_v61 = vld [vmem:[%s10917_s13 + $0x1e8] sm:$0xff] }
 0x1a6   : > { %v1913_v12 = vpop.f32.mrf.mxu0  ;;  %v10370_v34 = vpop.f32.mrf.mxu1  ;;  %10598 = vmatmul.mubr.msk.f32.gmra.mxu1 %vm395_vm1, %v14800_v52  ;;  %v14804_v60 = vld [vmem:[#allocation51_spill] sm:$0xff]  ;;  %v9020_v52 = vld [vmem:[%s10917_s13 + $0x1f0] sm:$0xff] }
 0x1a7   : > { %v1998_v44 = vadd.f32 %v1913_v12, %v14801_v21  ;;  %v12479_v47 = vadd.f32 %v10273_v4, %v1999_v15  ;;  %10600 = vmatprep.mubr.msk.f32.mxu1 %vm395_vm1, %v14802_v53  ;;  %v14805_v15 = vld [vmem:[#allocation40_spill] sm:$0xff]  ;;  %v14807_v34 = vld [vmem:[#allocation10_spill] sm:$0xff] }
 0x1a8   : > { %v10193_v2 = vpop.f32.mrf.mxu0  ;;  %10506 = vmatmul.mubr.msk.f32.gmra.mxu0 %vm395_vm1, %v9016_v62  ;;  %v3511_v10 = vpop.f32.mrf.mxu1 }
 0x1a9   : > { %v2001_v57 = vadd.f32 %v10193_v2, %v14803_v58  ;;  %v12485_v3 = vadd.f32 %v2523_v46, %v1998_v44  ;;  %10508 = vmatprep.mubr.msk.f32.mxu0 %vm395_vm1, %v9017_v13  ;;  %v9021_v44 = vld [vmem:[%s10917_s13 + $0x200] sm:$0xff]  ;;  %v14808_v2 = vld [vmem:[#allocation53_spill] sm:$0xff] }
 0x1aa   : > { %v1923_v31 = vpop.f32.mrf.mxu0  ;;  %v10373_v4 = vpop.f32.mrf.mxu1  ;;  %10601 = vmatmul.mubr.msk.f32.gmra.mxu1 %vm395_vm1, %v14804_v60 }
 0x1ab   : > { %v12493_v12 = vadd.f32 %v1923_v31, %v14805_v15  ;;  %v12495_v62 = vadd.f32 %v10276_v63, %v2001_v57  ;;  %10603 = vmatprep.mubr.msk.f32.mxu1 %vm395_vm1, %v14807_v34  ;;  %v14809_v63 = vld [vmem:[#allocation43_spill] sm:$0xff]  ;;  %v14811_v15 = vld [vmem:[#allocation54_spill] sm:$0xff] }
 0x1ac   : > { %v10196_v46 = vpop.f32.mrf.mxu0  ;;  %10509 = vmatmul.mubr.msk.f32.gmra.mxu0 %vm395_vm1, %v9018_v41  ;;  %v3521_v13 = vpop.f32.mrf.mxu1  ;;  %v9022_v41 = vld [vmem:[%s10917_s13 + $0x208] sm:$0xff] }
 0x1ad   : > { %14806 = vst [vmem:[#allocation4_spill] sm:$0xff] %v12493_v12  ;;  %10511 = vmatprep.mubr.msk.f32.mxu0 %vm395_vm1, %v9019_v61  ;;  %v9023_v61 = vld [vmem:[%s10917_s13 + $0x210] sm:$0xff]  ;;  %v9024_v13 = vld [vmem:[%s10917_s13 + $0x220] sm:$0xff]  ;;  %v14819_v12 = vld [vmem:[#allocation13_spill] sm:$0xff] }
 0x1ae   : > { %v1933_v21 = vpop.f32.mrf.mxu0  ;;  %v10376_v53 = vpop.f32.mrf.mxu1  ;;  %10604 = vmatmul.mubr.msk.f32.gmra.mxu1 %vm395_vm1, %v14808_v2 }
 0x1af   : > { %v12506_v10 = vadd.f32 %v1933_v21, %v14809_v63  ;;  %10606 = vmatprep.mubr.msk.f32.mxu1 %vm395_vm1, %v12179_v56  ;;  %v9139_v56 = vld [vmem:[%s10917_s13 + $0x261] sm:$0xff]  ;;  %v14814_v63 = vld [vmem:[#allocation52_spill] sm:$0xff] }
 0x1b0   : > { %v10199_v58 = vpop.f32.mrf.mxu0  ;;  %10512 = vmatmul.mubr.msk.f32.gmra.mxu0 %vm395_vm1, %v9020_v52  ;;  %v12511_v57 = vpop.f32.mrf.mxu1  ;;  %v9025_v21 = vld [vmem:[%s10917_s13 + $0x228] sm:$0xff] }
 0x1b1   : > { %14810 = vst [vmem:[#allocation5_spill] sm:$0xff] %v12506_v10  ;;  %10514 = vmatprep.mubr.msk.f32.mxu0 %vm395_vm1, %v9021_v44 }
 0x1b2   : > { %v1943_v31 = vpop.f32.mrf.mxu0  ;;  %v10379_v60 = vpop.f32.mrf.mxu1  ;;  %10607 = vmatmul.mubr.msk.f32.gmra.mxu1 %vm395_vm1, %v14811_v15 }
 0x1b3   : > { %10609 = vmatprep.mubr.msk.f32.mxu1 %vm395_vm1, %v12199_v54 }
 0x1b4   : > { %v10287_v34 = vpop.f32.mrf.mxu0  ;;  %10515 = vmatmul.mubr.msk.f32.gmra.mxu0 %vm395_vm1, %v9022_v41  ;;  %v12522_v46 = vpop.f32.mrf.mxu1  ;;  %v9026_v41 = vld [vmem:[%s10917_s13 + $0x230] sm:$0xff] }
 0x1b5   : > { %14812 = vst [vmem:[#allocation6_spill] sm:$0xff] %v12522_v46  ;;  %10517 = vmatprep.mubr.msk.f32.mxu0 %vm395_vm1, %v9023_v61  ;;  %v9027_v61 = vld [vmem:[%s10917_s13 + $0x240] sm:$0xff] }
 0x1b6   : > { %v2902_v52 = vpop.f32.mrf.mxu0  ;;  %v10382_v44 = vpop.f32.mrf.mxu1  ;;  %10610 = vmatmul.mubr.msk.f32.gmra.mxu1 %vm395_vm1, %v9139_v56  ;;  %v14820_v46 = vld [vmem:[#allocation14_spill] sm:$0xff] }
 0x1b8   : > { %v10290_v2 = vpop.f32.mrf.mxu0  ;;  %10518 = vmatmul.mubr.msk.f32.gmra.mxu0 %vm395_vm1, %v9024_v13  ;;  %v12529_v54 = vpop.f32.mrf.mxu1  ;;  %v14816_v13 = vld [vmem:[#allocation11_spill] sm:$0xff] }
 0x1b9   : > { %14813 = vst [vmem:[#allocation7_spill] sm:$0xff] %v12529_v54  ;;  %v3174_v58 = vadd.f32 %v10290_v2, %v14814_v63  ;;  %10520 = vmatprep.mubr.msk.f32.mxu0 %vm395_vm1, %v9025_v21  ;;  %v9028_v2 = vld [vmem:[%s10917_s13 + $0x248] sm:$0xff]  ;;  %v9029_v21 = vld [vmem:[%s10917_s13 + $0x250] sm:$0xff] }
 0x1ba   : > { %v2912_v31 = vpop.f32.mrf.mxu0  ;;  %v10385_v15 = vpop.f32.mrf.mxu1 }
 0x1bb   : > { %v12535_v34 = vadd.f32 %v10373_v4, %v3174_v58  ;;  %v14817_v31 = vld [vmem:[#allocation12_spill] sm:$0xff] }
 0x1bc   : > { %v10293_v52 = vpop.f32.mrf.mxu0  ;;  %10521 = vmatmul.mubr.msk.f32.gmra.mxu0 %vm395_vm1, %v9026_v41  ;;  %v12538_v56 = vpop.f32.mrf.mxu1 }
 0x1bd   : > { %14815 = vst [vmem:[#allocation30_spill] sm:$0xff] %v12538_v56  ;;  %v3176_v23 = vadd.f32 %v10293_v52, %v14816_v13  ;;  %10523 = vmatprep.mubr.msk.f32.mxu0 %vm395_vm1, %v9027_v61  ;;  %v9030_v61 = vld [vmem:[%s10917_s13 + $0x260] sm:$0xff]  ;;  %v9031_v56 = vld [vmem:[%s10917_s13 + $0x268] sm:$0xff] }
 0x1be   : > { %v2922_v63 = vpop.f32.mrf.mxu0  ;;  %v10388_v10 = vpop.f32.mrf.mxu1 }
 0x1bf   : > { %v12545_v18 = vadd.f32 %v2922_v63, %v14817_v31  ;;  %v12547_v4 = vadd.f32 %v10376_v53, %v3176_v23 }
 0x1c0   : > { %v10296_v58 = vpop.f32.mrf.mxu0  ;;  %10524 = vmatmul.mubr.msk.f32.gmra.mxu0 %vm395_vm1, %v9028_v2  ;;  %v12550_v41 = vpop.f32.mrf.mxu1 }
 0x1c1   : > { %14818 = vst [vmem:[#allocation8_spill] sm:$0xff] %v12550_v41  ;;  %v3178_v52 = vadd.f32 %v10296_v58, %v14819_v12  ;;  %10526 = vmatprep.mubr.msk.f32.mxu0 %vm395_vm1, %v9029_v21  ;;  %v9032_v21 = vld [vmem:[%s10917_s13 + $0x270] sm:$0xff]  ;;  %v9197_v58 = vld [vmem:[%s10917_s13 + $0x42] sm:$0xff] }
 0x1c2   : > { %v2932_v13 = vpop.f32.mrf.mxu0  ;;  %v10391_v54 = vpop.f32.mrf.mxu1 }
 0x1c3   : > { %v12557_v63 = vadd.f32 %v2932_v13, %v14820_v46  ;;  %v12559_v23 = vadd.f32 %v10379_v60, %v3178_v52 }
 0x1c4   : > { %v10299_v53 = vpop.f32.mrf.mxu0  ;;  %10527 = vmatmul.mubr.msk.f32.gmra.mxu0 %vm395_vm1, %v9030_v61  ;;  %v12562_v2 = vpop.f32.mrf.mxu1 }
 0x1c5   : > { %14821 = vst [vmem:[#allocation31_spill] sm:$0xff] %v12562_v2  ;;  %v3180_v12 = vadd.f32 %v10299_v53, %v12205_v32  ;;  %10529 = vmatprep.mubr.msk.f32.mxu0 %vm395_vm1, %v9031_v56  ;;  %v9198_v56 = vld [vmem:[%s10917_s13 + $0x4a] sm:$0xff]  ;;  %v9199_v53 = vld [vmem:[%s10917_s13 + $0x52] sm:$0xff] }
 0x1c6   : > { %v2942_v31 = vpop.f32.mrf.mxu0  ;;  %v10394_v41 = vpop.f32.mrf.mxu1 }
 0x1c7   : > { %v12569_v46 = vadd.f32 %v2942_v31, %v12211_v42  ;;  %v12571_v60 = vadd.f32 %v10382_v44, %v3180_v12  ;;  %v9200_v31 = vld [vmem:[%s10917_s13 + $0x62] sm:$0xff] }
 0x1c8   : > { %v10302_v52 = vpop.f32.mrf.mxu0  ;;  %10530 = vmatmul.mubr.msk.f32.gmra.mxu0 %vm395_vm1, %v9032_v21  ;;  %v12574_v61 = vpop.f32.mrf.mxu1 }
 0x1c9   : > { %14822 = vst [vmem:[#allocation18_spill] sm:$0xff] %v12574_v61  ;;  %v3182_v32 = vadd.f32 %v10302_v52, %v12220_v8  ;;  %10617 = vmatprep.mubr.msk.f32.mxu0 %vm395_vm1, %v9197_v58  ;;  %v9201_v52 = vld [vmem:[%s10917_s13 + $0x6a] sm:$0xff] }
 0x1ca   : > { %v2952_v13 = vpop.f32.mrf.mxu0  ;;  %v10397_v2 = vpop.f32.mrf.mxu1 }
 0x1cb   : > { %v12581_v42 = vadd.f32 %v2952_v13, %v12226_v7  ;;  %v12583_v44 = vadd.f32 %v10385_v15, %v3182_v32  ;;  %v9202_v13 = vld [vmem:[%s10917_s13 + $0x72] sm:$0xff] }
 0x1cc   : > { %v10305_v12 = vpop.f32.mrf.mxu0  ;;  %10618 = vmatmul.mubr.msk.f32.vlgmr.msra.gmra.mxu0 %vm395_vm1, %v9198_v56  ;;  %v12586_v21 = vpop.f32.mrf.mxu1 }
 0x1cd   : > { %14823 = vst [vmem:[#allocation34_spill] sm:$0xff] %v12586_v21  ;;  %v3184_v8 = vadd.f32 %v10305_v12, %v12237_v51  ;;  %10620 = vmatprep.mubr.msk.f32.mxu0 %vm395_vm1, %v9199_v53  ;;  %v9203_v12 = vld [vmem:[%s10917_s13 + $0x82] sm:$0xff] }
 0x1ce   : > { %v2962_v58 = vpop.f32.mrf.mxu0  ;;  %v10400_v61 = vpop.f32.mrf.mxu1 }
 0x1cf   : > { %v12593_v7 = vadd.f32 %v2962_v58, %v12243_v50  ;;  %v12595_v15 = vadd.f32 %v10388_v10, %v3184_v8  ;;  %v9204_v58 = vld [vmem:[%s10917_s13 + $0x8a] sm:$0xff] }
 0x1d0   : > { %v10308_v32 = vpop.f32.mrf.mxu0  ;;  %10621 = vmatmul.mubr.msk.f32.gmra.mxu0 %vm395_vm1, %v9200_v31  ;;  %v12598_v56 = vpop.f32.mrf.mxu1 }
 0x1d1   : > { %14824 = vst [vmem:[#allocation19_spill] sm:$0xff] %v12598_v56  ;;  %v3186_v51 = vadd.f32 %v10308_v32, %v12251_v35  ;;  %10623 = vmatprep.mubr.msk.f32.mxu0 %vm395_vm1, %v9201_v52  ;;  %v9205_v32 = vld [vmem:[%s10917_s13 + $0x92] sm:$0xff] }
 0x1d2   : > { %v2972_v53 = vpop.f32.mrf.mxu0  ;;  %v10403_v21 = vpop.f32.mrf.mxu1 }
 0x1d3   : > { %v12605_v50 = vadd.f32 %v2972_v53, %v12257_v0  ;;  %v12607_v10 = vadd.f32 %v10391_v54, %v3186_v51  ;;  %v9206_v53 = vld [vmem:[%s10917_s13 + $0xa2] sm:$0xff] }
 0x1d4   : > { %v10311_v8 = vpop.f32.mrf.mxu0  ;;  %10624 = vmatmul.mubr.msk.f32.gmra.mxu0 %vm395_vm1, %v9202_v13  ;;  %v12610_v31 = vpop.f32.mrf.mxu1 }
 0x1d5   : > { %14825 = vst [vmem:[#allocation35_spill] sm:$0xff] %v12610_v31  ;;  %v3188_v35 = vadd.f32 %v10311_v8, %v12265_v39  ;;  %10626 = vmatprep.mubr.msk.f32.mxu0 %vm395_vm1, %v9203_v12  ;;  %v9207_v8 = vld [vmem:[%s10917_s13 + $0xaa] sm:$0xff] }
 0x1d6   : > { %v2982_v52 = vpop.f32.mrf.mxu0  ;;  %v10406_v56 = vpop.f32.mrf.mxu1 }
 0x1d7   : > { %v12617_v0 = vadd.f32 %v2982_v52, %v12271_v14  ;;  %v12619_v54 = vadd.f32 %v10394_v41, %v3188_v35  ;;  %v9208_v52 = vld [vmem:[%s10917_s13 + $0xb2] sm:$0xff] }
 0x1d8   : > { %v10314_v51 = vpop.f32.mrf.mxu0  ;;  %10627 = vmatmul.mubr.msk.f32.gmra.mxu0 %vm395_vm1, %v9204_v58  ;;  %v12622_v13 = vpop.f32.mrf.mxu1 }
 0x1d9   : > { %14826 = vst [vmem:[#allocation20_spill] sm:$0xff] %v12622_v13  ;;  %v3190_v39 = vadd.f32 %v10314_v51, %v12279_v16  ;;  %10629 = vmatprep.mubr.msk.f32.mxu0 %vm395_vm1, %v9205_v32  ;;  %v9209_v51 = vld [vmem:[%s10917_s13 + $0xc2] sm:$0xff] }
 0x1da   : > { %v2992_v12 = vpop.f32.mrf.mxu0  ;;  %v10409_v31 = vpop.f32.mrf.mxu1 }
 0x1db   : > { %v12629_v14 = vadd.f32 %v2992_v12, %v12285_v5  ;;  %v12631_v41 = vadd.f32 %v10397_v2, %v3190_v39  ;;  %v9210_v12 = vld [vmem:[%s10917_s13 + $0xca] sm:$0xff] }
 0x1dc   : > { %v10317_v35 = vpop.f32.mrf.mxu0  ;;  %10630 = vmatmul.mubr.msk.f32.gmra.mxu0 %vm395_vm1, %v9206_v53  ;;  %v12634_v58 = vpop.f32.mrf.mxu1 }
 0x1dd   : > { %14827 = vst [vmem:[#allocation38_spill] sm:$0xff] %v12634_v58  ;;  %v3192_v16 = vadd.f32 %v10317_v35, %v12293_v19  ;;  %10632 = vmatprep.mubr.msk.f32.mxu0 %vm395_vm1, %v9207_v8  ;;  %v9211_v35 = vld [vmem:[%s10917_s13 + $0xd2] sm:$0xff] }
 0x1de   : > { %v3002_v32 = vpop.f32.mrf.mxu0  ;;  %v10412_v13 = vpop.f32.mrf.mxu1 }
 0x1df   : > { %v12641_v5 = vadd.f32 %v3002_v32, %v12299_v24  ;;  %v12643_v2 = vadd.f32 %v10400_v61, %v3192_v16  ;;  %v9212_v32 = vld [vmem:[%s10917_s13 + $0xe2] sm:$0xff] }
 0x1e0   : > { %v10320_v39 = vpop.f32.mrf.mxu0  ;;  %10633 = vmatmul.mubr.msk.f32.gmra.mxu0 %vm395_vm1, %v9208_v52  ;;  %v12646_v53 = vpop.f32.mrf.mxu1 }
 0x1e1   : > { %14828 = vst [vmem:[#allocation21_spill] sm:$0xff] %v12641_v5  ;;  %14829 = vst [vmem:[#allocation39_spill] sm:$0xff] %v12646_v53  ;;  %v3194_v19 = vadd.f32 %v10320_v39, %v12307_v48  ;;  %10635 = vmatprep.mubr.msk.f32.mxu0 %vm395_vm1, %v9209_v51  ;;  %v9213_v39 = vld [vmem:[%s10917_s13 + $0xea] sm:$0xff] }
 0x1e2   : > { %v3012_v8 = vpop.f32.mrf.mxu0  ;;  %v10415_v58 = vpop.f32.mrf.mxu1 }
 0x1e3   : > { %v12653_v24 = vadd.f32 %v3012_v8, %v12313_v9  ;;  %v12655_v61 = vadd.f32 %v10403_v21, %v3194_v19  ;;  %v9214_v8 = vld [vmem:[%s10917_s13 + $0xf2] sm:$0xff] }
 0x1e4   : > { %v10323_v16 = vpop.f32.mrf.mxu0  ;;  %10636 = vmatmul.mubr.msk.f32.gmra.mxu0 %vm395_vm1, %v9210_v12  ;;  %v12658_v52 = vpop.f32.mrf.mxu1 }
 0x1e5   : > { %14830 = vst [vmem:[#allocation22_spill] sm:$0xff] %v12653_v24  ;;  %14831 = vst [vmem:[#allocation41_spill] sm:$0xff] %v12658_v52  ;;  %v3196_v48 = vadd.f32 %v10323_v16, %v12321_v36  ;;  %10638 = vmatprep.mubr.msk.f32.mxu0 %vm395_vm1, %v9211_v35  ;;  %v9215_v16 = vld [vmem:[%s10917_s13 + $0x102] sm:$0xff] }
 0x1e6   : > { %v3022_v51 = vpop.f32.mrf.mxu0  ;;  %v10418_v53 = vpop.f32.mrf.mxu1 }
 0x1e7   : > { %v12665_v9 = vadd.f32 %v3022_v51, %v12327_v17  ;;  %v12667_v21 = vadd.f32 %v10406_v56, %v3196_v48  ;;  %v9216_v51 = vld [vmem:[%s10917_s13 + $0x10a] sm:$0xff] }
 0x1e8   : > { %v10326_v19 = vpop.f32.mrf.mxu0  ;;  %10639 = vmatmul.mubr.msk.f32.gmra.mxu0 %vm395_vm1, %v9212_v32  ;;  %v12670_v12 = vpop.f32.mrf.mxu1 }
 0x1e9   : > { %14832 = vst [vmem:[#allocation23_spill] sm:$0xff] %v12665_v9  ;;  %14833 = vst [vmem:[#allocation42_spill] sm:$0xff] %v12670_v12  ;;  %v3198_v36 = vadd.f32 %v10326_v19, %v12335_v25  ;;  %10641 = vmatprep.mubr.msk.f32.mxu0 %vm395_vm1, %v9213_v39  ;;  %v9217_v19 = vld [vmem:[%s10917_s13 + $0x112] sm:$0xff] }
 0x1ea   : > { %v3032_v35 = vpop.f32.mrf.mxu0  ;;  %v10421_v52 = vpop.f32.mrf.mxu1 }
 0x1eb   : > { %v12677_v17 = vadd.f32 %v3032_v35, %v12341_v38  ;;  %v12679_v56 = vadd.f32 %v10409_v31, %v3198_v36  ;;  %v9218_v35 = vld [vmem:[%s10917_s13 + $0x122] sm:$0xff] }
 0x1ec   : > { %v10329_v48 = vpop.f32.mrf.mxu0  ;;  %10642 = vmatmul.mubr.msk.f32.gmra.mxu0 %vm395_vm1, %v9214_v8  ;;  %v12682_v32 = vpop.f32.mrf.mxu1 }
 0x1ed   : > { %14834 = vst [vmem:[#allocation24_spill] sm:$0xff] %v12677_v17  ;;  %14835 = vst [vmem:[#allocation44_spill] sm:$0xff] %v12682_v32  ;;  %v3200_v25 = vadd.f32 %v10329_v48, %v12349_v29  ;;  %10644 = vmatprep.mubr.msk.f32.mxu0 %vm395_vm1, %v9215_v16  ;;  %v9219_v48 = vld [vmem:[%s10917_s13 + $0x12a] sm:$0xff] }
 0x1ee   : > { %v3042_v39 = vpop.f32.mrf.mxu0  ;;  %v10424_v12 = vpop.f32.mrf.mxu1 }
 0x1ef   : > { %v12689_v38 = vadd.f32 %v3042_v39, %v12355_v30  ;;  %v12691_v31 = vadd.f32 %v10412_v13, %v3200_v25  ;;  %v9220_v39 = vld [vmem:[%s10917_s13 + $0x132] sm:$0xff] }
 0x1f0   : > { %v10332_v36 = vpop.f32.mrf.mxu0  ;;  %10645 = vmatmul.mubr.msk.f32.gmra.mxu0 %vm395_vm1, %v9216_v51  ;;  %v12694_v8 = vpop.f32.mrf.mxu1 }
 0x1f1   : > { %14836 = vst [vmem:[#allocation25_spill] sm:$0xff] %v12689_v38  ;;  %14837 = vst [vmem:[#allocation45_spill] sm:$0xff] %v12694_v8  ;;  %v3202_v29 = vadd.f32 %v10332_v36, %v12363_v49  ;;  %10647 = vmatprep.mubr.msk.f32.mxu0 %vm395_vm1, %v9217_v19  ;;  %v9221_v36 = vld [vmem:[%s10917_s13 + $0x142] sm:$0xff] }
 0x1f2   : > { %v3052_v16 = vpop.f32.mrf.mxu0  ;;  %v10427_v32 = vpop.f32.mrf.mxu1 }
 0x1f3   : > { %v12701_v30 = vadd.f32 %v3052_v16, %v12369_v33  ;;  %v12703_v13 = vadd.f32 %v10415_v58, %v3202_v29  ;;  %v9222_v16 = vld [vmem:[%s10917_s13 + $0x14a] sm:$0xff] }
 0x1f4   : > { %v10335_v25 = vpop.f32.mrf.mxu0  ;;  %10648 = vmatmul.mubr.msk.f32.gmra.mxu0 %vm395_vm1, %v9218_v35  ;;  %v12706_v51 = vpop.f32.mrf.mxu1 }
 0x1f5   : > { %14838 = vst [vmem:[#allocation26_spill] sm:$0xff] %v12701_v30  ;;  %14839 = vst [vmem:[#allocation46_spill] sm:$0xff] %v12706_v51  ;;  %v3204_v49 = vadd.f32 %v10335_v25, %v12377_v37  ;;  %10650 = vmatprep.mubr.msk.f32.mxu0 %vm395_vm1, %v9219_v48  ;;  %v9223_v25 = vld [vmem:[%s10917_s13 + $0x152] sm:$0xff] }
 0x1f6   : > { %v3062_v19 = vpop.f32.mrf.mxu0  ;;  %v10430_v8 = vpop.f32.mrf.mxu1 }
 0x1f7   : > { %v12713_v33 = vadd.f32 %v3062_v19, %v12383_v22  ;;  %v12715_v58 = vadd.f32 %v10418_v53, %v3204_v49  ;;  %v9224_v19 = vld [vmem:[%s10917_s13 + $0x162] sm:$0xff] }
 0x1f8   : > { %v10338_v29 = vpop.f32.mrf.mxu0  ;;  %10651 = vmatmul.mubr.msk.f32.gmra.mxu0 %vm395_vm1, %v9220_v39  ;;  %v12718_v35 = vpop.f32.mrf.mxu1 }
 0x1f9   : > { %14840 = vst [vmem:[#allocation27_spill] sm:$0xff] %v12713_v33  ;;  %14841 = vst [vmem:[#allocation47_spill] sm:$0xff] %v12718_v35  ;;  %v3206_v37 = vadd.f32 %v10338_v29, %v12391_v55  ;;  %10653 = vmatprep.mubr.msk.f32.mxu0 %vm395_vm1, %v9221_v36  ;;  %v9225_v29 = vld [vmem:[%s10917_s13 + $0x16a] sm:$0xff] }
 0x1fa   : > { %v3072_v48 = vpop.f32.mrf.mxu0  ;;  %v10433_v51 = vpop.f32.mrf.mxu1 }
 0x1fb   : > { %v12725_v22 = vadd.f32 %v3072_v48, %v12397_v28  ;;  %v12727_v53 = vadd.f32 %v10421_v52, %v3206_v37  ;;  %v9226_v48 = vld [vmem:[%s10917_s13 + $0x172] sm:$0xff] }
 0x1fc   : > { %v10341_v49 = vpop.f32.mrf.mxu0  ;;  %10654 = vmatmul.mubr.msk.f32.gmra.mxu0 %vm395_vm1, %v9222_v16  ;;  %v12730_v39 = vpop.f32.mrf.mxu1 }
 0x1fd   : > { %14842 = vst [vmem:[#allocation28_spill] sm:$0xff] %v12725_v22  ;;  %14843 = vst [vmem:[#allocation15_spill] sm:$0xff] %v12730_v39  ;;  %v3208_v55 = vadd.f32 %v10341_v49, %v12405_v20  ;;  %10656 = vmatprep.mubr.msk.f32.mxu0 %vm395_vm1, %v9223_v25  ;;  %v9227_v49 = vld [vmem:[%s10917_s13 + $0x182] sm:$0xff] }
 0x1fe   : > { %v3082_v36 = vpop.f32.mrf.mxu0  ;;  %v10436_v35 = vpop.f32.mrf.mxu1 }
 0x1ff   : > { %v12737_v28 = vadd.f32 %v3082_v36, %v12411_v27  ;;  %v12739_v52 = vadd.f32 %v10424_v12, %v3208_v55  ;;  %v9228_v36 = vld [vmem:[%s10917_s13 + $0x18a] sm:$0xff] }
 0x200   : > { %v10344_v37 = vpop.f32.mrf.mxu0  ;;  %10657 = vmatmul.mubr.msk.f32.gmra.mxu0 %vm395_vm1, %v9224_v19  ;;  %v12742_v16 = vpop.f32.mrf.mxu1 }
 0x201   : > { %14844 = vst [vmem:[#allocation29_spill] sm:$0xff] %v12737_v28  ;;  %14845 = vst [vmem:[#allocation48_spill] sm:$0xff] %v12742_v16  ;;  %v3210_v20 = vadd.f32 %v10344_v37, %v12419_v43  ;;  %10659 = vmatprep.mubr.msk.f32.mxu0 %vm395_vm1, %v9225_v29  ;;  %v9229_v37 = vld [vmem:[%s10917_s13 + $0x192] sm:$0xff] }
 0x202   : > { %v3092_v25 = vpop.f32.mrf.mxu0  ;;  %v10439_v39 = vpop.f32.mrf.mxu1 }
 0x203   : > { %v12749_v27 = vadd.f32 %v3092_v25, %v12425_v1  ;;  %v12751_v12 = vadd.f32 %v10427_v32, %v3210_v20  ;;  %v9230_v25 = vld [vmem:[%s10917_s13 + $0x1a2] sm:$0xff] }
 0x204   : > { %v10347_v55 = vpop.f32.mrf.mxu0  ;;  %10660 = vmatmul.mubr.msk.f32.gmra.mxu0 %vm395_vm1, %v9226_v48  ;;  %v12754_v19 = vpop.f32.mrf.mxu1 }
 0x205   : > { %14846 = vst [vmem:[#allocation32_spill] sm:$0xff] %v12749_v27  ;;  %14847 = vst [vmem:[#allocation49_spill] sm:$0xff] %v12754_v19  ;;  %v3212_v43 = vadd.f32 %v10347_v55, %v12433_v59  ;;  %10662 = vmatprep.mubr.msk.f32.mxu0 %vm395_vm1, %v9227_v49  ;;  %v9231_v55 = vld [vmem:[%s10917_s13 + $0x1aa] sm:$0xff] }
 0x206   : > { %v3102_v29 = vpop.f32.mrf.mxu0  ;;  %v10442_v16 = vpop.f32.mrf.mxu1 }
 0x207   : > { %v12761_v1 = vadd.f32 %v3102_v29, %v12441_v26  ;;  %v12763_v32 = vadd.f32 %v10430_v8, %v3212_v43  ;;  %v9232_v29 = vld [vmem:[%s10917_s13 + $0x1b2] sm:$0xff] }
 0x208   : > { %v10350_v20 = vpop.f32.mrf.mxu0  ;;  %10663 = vmatmul.mubr.msk.f32.gmra.mxu0 %vm395_vm1, %v9228_v36  ;;  %v12766_v48 = vpop.f32.mrf.mxu1 }
 0x209   : > { %14848 = vst [vmem:[#allocation33_spill] sm:$0xff] %v12761_v1  ;;  %14849 = vst [vmem:[#allocation50_spill] sm:$0xff] %v12766_v48  ;;  %v3214_v59 = vadd.f32 %v10350_v20, %v12449_v6  ;;  %10665 = vmatprep.mubr.msk.f32.mxu0 %vm395_vm1, %v9229_v37  ;;  %v9233_v20 = vld [vmem:[%s10917_s13 + $0x1c2] sm:$0xff] }
 0x20a   : > { %v3112_v49 = vpop.f32.mrf.mxu0  ;;  %v10445_v19 = vpop.f32.mrf.mxu1 }
 0x20b   : > { %v12773_v26 = vadd.f32 %v3112_v49, %v12457_v40  ;;  %v12775_v8 = vadd.f32 %v10433_v51, %v3214_v59 }
 0x20c   : > { %v10353_v43 = vpop.f32.mrf.mxu0  ;;  %10666 = vmatmul.mubr.msk.f32.gmra.mxu0 %vm395_vm1, %v9230_v25  ;;  %v12778_v36 = vpop.f32.mrf.mxu1 }
 0x20d   : > { %14850 = vst [vmem:[#allocation36_spill] sm:$0xff] %v12773_v26  ;;  %14851 = vst [vmem:[#allocation9_spill] sm:$0xff] %v12778_v36  ;;  %v3216_v6 = vadd.f32 %v10353_v43, %v12465_v11  ;;  %10668 = vmatprep.mubr.msk.f32.mxu0 %vm395_vm1, %v9231_v55  ;;  %v9234_v11 = vld [vmem:[%s10917_s13 + $0x1ca] sm:$0xff]  ;;  %v9235_v55 = vld [vmem:[%s10917_s13 + $0x1d2] sm:$0xff] }
 0x20e   : > { %v3122_v37 = vpop.f32.mrf.mxu0  ;;  %v10448_v19 = vpop.f32.mrf.mxu1 }
 0x20f   : > { %v12785_v40 = vadd.f32 %v3122_v37, %v12471_v45  ;;  %v12787_v51 = vadd.f32 %v10436_v35, %v3216_v6 }
 0x210   : > { %v10356_v59 = vpop.f32.mrf.mxu0  ;;  %10669 = vmatmul.mubr.msk.f32.gmra.mxu0 %vm395_vm1, %v9232_v29  ;;  %v3771_v25 = vpop.f32.mrf.mxu1  ;;  %v14685_v29 = vmov 0.0  }
 0x211   : > { %14852 = vst [vmem:[#allocation37_spill] sm:$0xff] %v12785_v40  ;;  %v3218_v49 = vadd.f32 %v10356_v59, %v12479_v47  ;;  %10671 = vmatprep.mubr.msk.f32.mxu0 %vm395_vm1, %v9233_v20  ;;  %5866 = vst.msk [vmem:[#allocation2] sm:$0xff] %vm5865_vm2, %v14685_v29  ;;  %7346 = vmatprep.subr.mxu1 %v14685_v29  ;;  %v9246_v40 = vld [vmem:[%s10917_s13 + $0x24a] sm:$0xff] }
 0x212   : > { %v3132_v43 = vpop.f32.mrf.mxu0  ;;  %v10536_v36 = vpop.f32.mrf.mxu1  ;;  %5867 = vst.msk [vmem:[#allocation2 + $0x8] sm:$0xff] %vm5865_vm2, %v14685_v29  ;;  %5868 = vst.msk [vmem:[#allocation2 + $0x10] sm:$0xff] %vm5865_vm2, %v14685_v29  ;;  %7571 = vmatprep.subr.mxu0 %v14685_v29 }
 0x213   : > { %v12795_v48 = vadd.f32 %v3132_v43, %v12485_v3  ;;  %v12797_v45 = vadd.f32 %v10439_v39, %v3218_v49  ;;  %5917 = vst.msk [vmem:[#allocation2 + $0x198] sm:$0xff] %vm5865_vm2, %v14685_v29  ;;  %5918 = vst.msk [vmem:[#allocation2 + $0x1a0] sm:$0xff] %vm5865_vm2, %v14685_v29  ;;  %v9236_v3 = vld [vmem:[%s10917_s13 + $0x1e2] sm:$0xff]  ;;  %v9237_v36 = vld [vmem:[%s10917_s13 + $0x1ea] sm:$0xff] }
 0x214   : > { %v10359_v35 = vpop.f32.mrf.mxu0  ;;  %10672 = vmatmul.mubr.msk.f32.gmra.mxu0 %vm395_vm1, %v9234_v11  ;;  %v4730_v6 = vpop.f32.mrf.mxu1  ;;  %5919 = vst.msk [vmem:[#allocation2 + $0x1a8] sm:$0xff] %vm5865_vm2, %v14685_v29  ;;  %v9239_v49 = vld [vmem:[%s10917_s13 + $0x202] sm:$0xff]  ;;  %v9244_v29 = vld [vmem:[%s10917_s13 + $0x232] sm:$0xff] }
 0x215   : > { %14853 = vst [vmem:[#allocation51_spill] sm:$0xff] %v12795_v48  ;;  %v3220_v47 = vadd.f32 %v10359_v35, %v12495_v62  ;;  %10674 = vmatprep.mubr.msk.f32.mxu0 %vm395_vm1, %v9235_v55  ;;  %v9238_v62 = vld [vmem:[%s10917_s13 + $0x1f2] sm:$0xff]  ;;  %v9240_v35 = vld [vmem:[%s10917_s13 + $0x20a] sm:$0xff] }
 0x216   : > { %v12817_v39 = vpop.f32.mrf.mxu0  ;;  %v10539_v37 = vpop.f32.mrf.mxu1 }
 0x217   : > { %14854 = vst [vmem:[#allocation40_spill] sm:$0xff] %v12817_v39  ;;  %v12820_v20 = vadd.f32 %v10442_v16, %v3220_v47  ;;  %v9241_v47 = vld [vmem:[%s10917_s13 + $0x212] sm:$0xff] }
 0x218   : > { %v10362_v19 = vpop.f32.mrf.mxu0  ;;  %10675 = vmatmul.mubr.msk.f32.gmra.mxu0 %vm395_vm1, %v9236_v3  ;;  %v4740_v59 = vpop.f32.mrf.mxu1 }
 0x219   : > { %10677 = vmatprep.mubr.msk.f32.mxu0 %vm395_vm1, %v9237_v36  ;;  %v5984_v43 = vld [vmem:[#allocation2 + $0x1] sm:$0xff]  ;;  %v5985_v59 = vld [vmem:[#allocation2 + $0x9] sm:$0xff] }
 0x21a   : > { %v12825_v25 = vpop.f32.mrf.mxu0  ;;  %v10542_v11 = vpop.f32.mrf.mxu1  ;;  %6048 = vrot.lane.b32.xlu0 %v5984_v43, %s10848_s28  ;;  %6050 = vrot.lane.b32.xlu1 %v5985_v59, %s10848_s28 }
 0x21b   : > { %14855 = vst [vmem:[#allocation10_spill] sm:$0xff] %v12825_v25 }
 0x21c   : > { %v10365_v55 = vpop.f32.mrf.mxu0  ;;  %10678 = vmatmul.mubr.msk.f32.gmra.mxu0 %vm395_vm1, %v9238_v62  ;;  %v12829_v16 = vpop.f32.mrf.mxu1  ;;  %v9242_v62 = vld [vmem:[%s10917_s13 + $0x222] sm:$0xff] }
 0x21d   : > { %10680 = vmatprep.mubr.msk.f32.mxu0 %vm395_vm1, %v9239_v49  ;;  %v9243_v55 = vld [vmem:[%s10917_s13 + $0x22a] sm:$0xff] }
 0x21e   : > { %v3162_v6 = vpop.f32.mrf.mxu0  ;;  %v10545_v3 = vpop.f32.mrf.mxu1 }
 0x220   : > { %v10453_v36 = vpop.f32.mrf.mxu0  ;;  %10681 = vmatmul.mubr.msk.f32.gmra.mxu0 %vm395_vm1, %v9240_v35  ;;  %v12836_v19 = vpop.f32.mrf.mxu1 }
 0x221   : > { %10683 = vmatprep.mubr.msk.f32.mxu0 %vm395_vm1, %v9241_v47  ;;  %v9245_v47 = vld [vmem:[%s10917_s13 + $0x242] sm:$0xff] }
 0x222   : > { %v4121_v43 = vpop.f32.mrf.mxu0  ;;  %v10548_v49 = vpop.f32.mrf.mxu1 }
 0x224   : > { %v10456_v6 = vpop.f32.mrf.mxu0  ;;  %10684 = vmatmul.mubr.msk.f32.gmra.mxu0 %vm395_vm1, %v9242_v62  ;;  %v12843_v36 = vpop.f32.mrf.mxu1 }
 0x225   : > { %v4393_v35 = vadd.f32 %v10456_v6, %v12535_v34  ;;  %10686 = vmatprep.mubr.msk.f32.mxu0 %vm395_vm1, %v9243_v55  ;;  %v9247_v55 = vld [vmem:[%s10917_s13 + $0x252] sm:$0xff] }
 0x226   : > { %v4131_v25 = vpop.f32.mrf.mxu0  ;;  %v10551_v39 = vpop.f32.mrf.mxu1 }
 0x227   : > { %v12849_v48 = vadd.f32 %v10539_v37, %v4393_v35  ;;  %v9248_v35 = vld [vmem:[%s10917_s13 + $0x262] sm:$0xff] }
 0x228   : > { %v10459_v59 = vpop.f32.mrf.mxu0  ;;  %10687 = vmatmul.mubr.msk.f32.gmra.mxu0 %vm395_vm1, %v9244_v29  ;;  %v12852_v43 = vpop.f32.mrf.mxu1 }
 0x229   : > { %v4395_v62 = vadd.f32 %v10459_v59, %v12547_v4  ;;  %10689 = vmatprep.mubr.msk.f32.mxu0 %vm395_vm1, %v9245_v47 }
 0x22a   : > { %v12857_v34 = vpop.f32.mrf.mxu0  ;;  %v10554_v6 = vpop.f32.mrf.mxu1 }
 0x22b   : > { %v12860_v25 = vadd.f32 %v10542_v11, %v4395_v62 }
 0x22c   : > { %v10462_v26 = vpop.f32.mrf.mxu0  ;;  %10690 = vmatmul.mubr.msk.f32.gmra.mxu0 %vm395_vm1, %v9246_v40  ;;  %v12863_v37 = vpop.f32.mrf.mxu1 }
 0x22d   : > { %v4397_v29 = vadd.f32 %v10462_v26, %v12559_v23  ;;  %10692 = vmatprep.mubr.msk.f32.mxu0 %vm395_vm1, %v9247_v55 }
 0x22e   : > { %v12868_v4 = vpop.f32.mrf.mxu0  ;;  %v10557_v47 = vpop.f32.mrf.mxu1 }
 0x22f   : > { %v12870_v59 = vadd.f32 %v10545_v3, %v4397_v29 }
 0x230   : > { %v10465_v1 = vpop.f32.mrf.mxu0  ;;  %10693 = vmatmul.mubr.msk.f32.gmra.mxu0 %vm395_vm1, %v9248_v35  ;;  %v12873_v11 = vpop.f32.mrf.mxu1 }
 0x231   : > { %v4399_v62 = vadd.f32 %v10465_v1, %v12571_v60 }
 0x232   : > { %v12876_v40 = vpop.f32.mrf.mxu0  ;;  %v10560_v27 = vpop.f32.mrf.mxu1 }
 0x233   : > { %v12878_v28 = vadd.f32 %v10548_v49, %v4399_v62 }
 0x234   : > { %v10468_v23 = vpop.f32.mrf.mxu0  ;;  %v12880_v26 = vpop.f32.mrf.mxu1 }
 0x235   : > { %v4401_v55 = vadd.f32 %v10468_v23, %v12583_v44 }
 0x236   : > { %v12883_v22 = vpop.f32.mrf.mxu0  ;;  %v10563_v3 = vpop.f32.mrf.mxu1 }
 0x237   : > { %v12885_v29 = vadd.f32 %v10551_v39, %v4401_v55 }
 0x238   : > { %v10471_v35 = vpop.f32.mrf.mxu0  ;;  %v12887_v33 = vpop.f32.mrf.mxu1 }
 0x239   : > { %14856 = vst [vmem:[#allocation53_spill] sm:$0xff] %v12887_v33  ;;  %v4403_v60 = vadd.f32 %v10471_v35, %v12595_v15 }
 0x23a   : > { %v12890_v1 = vpop.f32.mrf.mxu0  ;;  %v10566_v30 = vpop.f32.mrf.mxu1 }
 0x23b   : > { %v12892_v49 = vadd.f32 %v10554_v6, %v4403_v60 }
 0x23c   : > { %v10474_v62 = vpop.f32.mrf.mxu0  ;;  %v12894_v38 = vpop.f32.mrf.mxu1 }
 0x23d   : > { %14857 = vst [vmem:[#allocation43_spill] sm:$0xff] %v12894_v38  ;;  %v4405_v44 = vadd.f32 %v10474_v62, %v12607_v10 }
 0x23e   : > { %v12897_v23 = vpop.f32.mrf.mxu0  ;;  %v10569_v17 = vpop.f32.mrf.mxu1 }
 0x23f   : > { %v12899_v39 = vadd.f32 %v10557_v47, %v4405_v44 }
 0x240   : > { %v10477_v55 = vpop.f32.mrf.mxu0  ;;  %v12901_v9 = vpop.f32.mrf.mxu1 }
 0x241   : > { %14858 = vst [vmem:[#allocation54_spill] sm:$0xff] %v12901_v9  ;;  %v4407_v15 = vadd.f32 %v10477_v55, %v12619_v54 }
 0x242   : > { %v12904_v35 = vpop.f32.mrf.mxu0  ;;  %v10572_v24 = vpop.f32.mrf.mxu1 }
 0x243   : > { %v12906_v6 = vadd.f32 %v10560_v27, %v4407_v15 }
 0x244   : > { %v10480_v60 = vpop.f32.mrf.mxu0  ;;  %v12908_v33 = vpop.f32.mrf.mxu1 }
 0x245   : > { %14859 = vst [vmem:[#allocation52_spill] sm:$0xff] %v12906_v6  ;;  %14860 = vst [vmem:[#allocation11_spill] sm:$0xff] %v12908_v33  ;;  %v4409_v10 = vadd.f32 %v10480_v60, %v12631_v41 }
 0x246   : > { %v12911_v62 = vpop.f32.mrf.mxu0  ;;  %v10575_v38 = vpop.f32.mrf.mxu1 }
 0x247   : > { %v12913_v47 = vadd.f32 %v10563_v3, %v4409_v10 }
 0x248   : > { %v10483_v44 = vpop.f32.mrf.mxu0  ;;  %v12915_v5 = vpop.f32.mrf.mxu1 }
 0x249   : > { %14861 = vst [vmem:[#allocation12_spill] sm:$0xff] %v12913_v47  ;;  %14862 = vst [vmem:[#allocation13_spill] sm:$0xff] %v12915_v5  ;;  %v4411_v54 = vadd.f32 %v10483_v44, %v12643_v2 }
 0x24a   : > { %v12918_v55 = vpop.f32.mrf.mxu0  ;;  %v10578_v9 = vpop.f32.mrf.mxu1 }
 0x24b   : > { %v12920_v27 = vadd.f32 %v10566_v30, %v4411_v54 }
 0x24c   : > { %v10486_v15 = vpop.f32.mrf.mxu0  ;;  %v12922_v6 = vpop.f32.mrf.mxu1 }
 0x24d   : > { %14863 = vst [vmem:[#allocation14_spill] sm:$0xff] %v12920_v27  ;;  %14864 = vst [vmem:[#allocation55_spill] sm:$0xff] %v12922_v6  ;;  %v4413_v41 = vadd.f32 %v10486_v15, %v12655_v61 }
 0x24e   : > { %v12925_v60 = vpop.f32.mrf.mxu0  ;;  %v10581_v33 = vpop.f32.mrf.mxu1 }
 0x24f   : > { %v12927_v3 = vadd.f32 %v10569_v17, %v4413_v41 }
 0x250   : > { %v10489_v10 = vpop.f32.mrf.mxu0  ;;  %v12929_v47 = vpop.f32.mrf.mxu1 }
 0x251   : > { %14865 = vst [vmem:[#allocation56_spill] sm:$0xff] %v12927_v3  ;;  %14866 = vst [vmem:[#allocation57_spill] sm:$0xff] %v12929_v47  ;;  %v4415_v2 = vadd.f32 %v10489_v10, %v12667_v21 }
 0x252   : > { %v12932_v44 = vpop.f32.mrf.mxu0  ;;  %v10584_v5 = vpop.f32.mrf.mxu1 }
 0x253   : > { %v12934_v30 = vadd.f32 %v10572_v24, %v4415_v2 }
 0x254   : > { %v10492_v54 = vpop.f32.mrf.mxu0  ;;  %v12936_v27 = vpop.f32.mrf.mxu1 }
 0x255   : > { %14867 = vst [vmem:[#allocation58_spill] sm:$0xff] %v12934_v30  ;;  %v4417_v61 = vadd.f32 %v10492_v54, %v12679_v56 }
 0x256   : > { %v12939_v15 = vpop.f32.mrf.mxu0  ;;  %v10587_v6 = vpop.f32.mrf.mxu1 }
 0x257   : > { %v12941_v17 = vadd.f32 %v10575_v38, %v4417_v61  ;;  %v7186_v38 = vld [vmem:[%s14653_s3 + $0x78] sm:$0xff] }
 0x258   : > { %v10495_v41 = vpop.f32.mrf.mxu0  ;;  %v12943_v3 = vpop.f32.mrf.mxu1  ;;  %7347 = vmatpush1.msra.mxu1 %v7186_v38 }
 0x259   : > { %14868 = vst [vmem:[#allocation59_spill] sm:$0xff] %v12943_v3  ;;  %v4419_v21 = vadd.f32 %v10495_v41, %v12691_v31  ;;  %v14870_v31 = vmov 0.0  }
 0x25a   : > { %v12946_v10 = vpop.f32.mrf.mxu0  ;;  %v10590_v47 = vpop.f32.mrf.mxu1  ;;  %7348 = vmatprep.subr.mxu1 %v14870_v31 }
 0x25b   : > { %v12948_v24 = vadd.f32 %v10578_v9, %v4419_v21  ;;  %v7185_v9 = vld [vmem:[%s14653_s3 + $0x70] sm:$0xff] }
 0x25c   : > { %v10498_v2 = vpop.f32.mrf.mxu0  ;;  %v12950_v30 = vpop.f32.mrf.mxu1  ;;  %7349 = vmatpush1.msra.mxu1 %v7185_v9  ;;  %v7183_v9 = vld [vmem:[%s14653_s3 + $0x60] sm:$0xff] }
 0x25d   : > { %14869 = vst [vmem:[#allocation60_spill] sm:$0xff] %v12950_v30  ;;  %v4421_v56 = vadd.f32 %v10498_v2, %v12703_v13  ;;  %7350 = vmatprep.subr.mxu1 %v14870_v31  ;;  %v7184_v2 = vld [vmem:[%s14653_s3 + $0x68] sm:$0xff] }
 0x25e   : > { %v12956_v54 = vpop.f32.mrf.mxu0  ;;  %v10593_v61 = vpop.f32.mrf.mxu1  ;;  %7351 = vmatpush1.msra.mxu1 %v7184_v2  ;;  %v7182_v2 = vld [vmem:[%s14653_s3 + $0x58] sm:$0xff] }
 0x25f   : > { %v12958_v3 = vadd.f32 %v10581_v33, %v4421_v56  ;;  %7352 = vmatprep.subr.mxu1 %v14870_v31 }
 0x260   : > { %v10501_v41 = vpop.f32.mrf.mxu0  ;;  %v12964_v21 = vpop.f32.mrf.mxu1  ;;  %7353 = vmatpush1.msra.mxu1 %v7183_v9  ;;  %v7181_v9 = vld [vmem:[%s14653_s3 + $0x50] sm:$0xff] }
 0x261   : > { %14871 = vst [vmem:[#allocation61_spill] sm:$0xff] %v12964_v21  ;;  %v4423_v13 = vadd.f32 %v10501_v41, %v12715_v58  ;;  %7354 = vmatprep.subr.mxu1 %v14870_v31 }
 0x262   : > { %v12971_v33 = vpop.f32.mrf.mxu0  ;;  %v10596_v56 = vpop.f32.mrf.mxu1  ;;  %7355 = vmatpush1.msra.mxu1 %v7182_v2  ;;  %v7180_v2 = vld [vmem:[%s14653_s3 + $0x48] sm:$0xff] }
 0x263   : > { %v12973_v38 = vadd.f32 %v10584_v5, %v4423_v13  ;;  %7356 = vmatprep.subr.mxu1 %v14870_v31 }
 0x264   : > { %v10504_v21 = vpop.f32.mrf.mxu0  ;;  %v12979_v58 = vpop.f32.mrf.mxu1  ;;  %7357 = vmatpush1.msra.mxu1 %v7181_v9  ;;  %v7179_v9 = vld [vmem:[%s14653_s3 + $0x40] sm:$0xff] }
 0x265   : > { %14872 = vst [vmem:[#allocation62_spill] sm:$0xff] %v12979_v58  ;;  %v4425_v41 = vadd.f32 %v10504_v21, %v12727_v53  ;;  %7358 = vmatprep.subr.mxu1 %v14870_v31 }
 0x266   : > { %v12986_v5 = vpop.f32.mrf.mxu0  ;;  %v12988_v13 = vpop.f32.mrf.mxu1  ;;  %7359 = vmatpush1.msra.mxu1 %v7180_v2  ;;  %v7178_v2 = vld [vmem:[%s14653_s3 + $0x38] sm:$0xff] }
 0x267   : > { %v12990_v30 = vadd.f32 %v10587_v6, %v4425_v41  ;;  %7360 = vmatprep.subr.mxu1 %v14870_v31 }
 0x268   : > { %v10507_v53 = vpop.f32.mrf.mxu0  ;;  %v12996_v21 = vpop.f32.mrf.mxu1  ;;  %7361 = vmatpush1.msra.mxu1 %v7179_v9  ;;  %v7217_v9 = vld [vmem:[%s14653_s3 + $0x170] sm:$0xff] }
 0x269   : > { %14873 = vst [vmem:[#allocation63_spill] sm:$0xff] %v12990_v30  ;;  %14874 = vst [vmem:[#allocation64_spill] sm:$0xff] %v12996_v21  ;;  %v4427_v58 = vadd.f32 %v10507_v53, %v12739_v52  ;;  %7362 = vmatprep.subr.mxu1 %v14870_v31 }
 0x26a   : > { %v13003_v6 = vpop.f32.mrf.mxu0  ;;  %v13005_v41 = vpop.f32.mrf.mxu1  ;;  %7363 = vmatpush1.msra.mxu1 %v7178_v2  ;;  %v7216_v2 = vld [vmem:[%s14653_s3 + $0x168] sm:$0xff] }
 0x26b   : > { %v13007_v30 = vadd.f32 %v10590_v47, %v4427_v58  ;;  %v7218_v47 = vld [vmem:[%s14653_s3 + $0x178] sm:$0xff]  ;;  %7364 = vmatprep.subr.mxu1 %v14870_v31 }
 0x26c   : > { %v10510_v52 = vpop.f32.mrf.mxu0  ;;  %v13013_v53 = vpop.f32.mrf.mxu1  ;;  %7572 = vmatpush1.msra.mxu0 %v7218_v47 }
 0x26d   : > { %14875 = vst [vmem:[#allocation65_spill] sm:$0xff] %v13007_v30  ;;  %14876 = vst [vmem:[#allocation66_spill] sm:$0xff] %v13013_v53  ;;  %v4429_v21 = vadd.f32 %v10510_v52, %v12751_v12  ;;  %7573 = vmatprep.subr.mxu0 %v14870_v31  ;;  %v7177_v12 = vld [vmem:[%s14653_s3 + $0x30] sm:$0xff] }
 0x26e   : > { %v13023_v58 = vpop.f32.mrf.mxu0  ;;  %v13025_v30 = vpop.f32.mrf.mxu1  ;;  %7365 = vmatpush1.msra.mxu1 %v7177_v12  ;;  %7574 = vmatpush1.msra.mxu0 %v7217_v9  ;;  %v7215_v9 = vld [vmem:[%s14653_s3 + $0x160] sm:$0xff] }
 0x26f   : > { %14877 = vst [vmem:[#allocation67_spill] sm:$0xff] %v13023_v58  ;;  %v13027_v53 = vadd.f32 %v10593_v61, %v4429_v21  ;;  %7366 = vmatprep.subr.mxu1 %v14870_v31  ;;  %7575 = vmatprep.subr.mxu0 %v14870_v31  ;;  %v7176_v21 = vld [vmem:[%s14653_s3 + $0x28] sm:$0xff] }
 0x270   : > { %v10513_v52 = vpop.f32.mrf.mxu0  ;;  %v13037_v58 = vpop.f32.mrf.mxu1  ;;  %7367 = vmatpush1.msra.mxu1 %v7176_v21  ;;  %7576 = vmatpush1.msra.mxu0 %v7216_v2  ;;  %v7214_v21 = vld [vmem:[%s14653_s3 + $0x158] sm:$0xff] }
 0x271   : > { %14878 = vst [vmem:[#allocation68_spill] sm:$0xff] %v13027_v53  ;;  %14879 = vst [vmem:[#allocation69_spill] sm:$0xff] %v13037_v58  ;;  %v4431_v61 = vadd.f32 %v10513_v52, %v12763_v32  ;;  %7368 = vmatprep.subr.mxu1 %v14870_v31  ;;  %7577 = vmatprep.subr.mxu0 %v14870_v31  ;;  %v7175_v32 = vld [vmem:[%s14653_s3 + $0x20] sm:$0xff] }
 0x272   : > { %v13048_v47 = vpop.f32.mrf.mxu0  ;;  %v13050_v53 = vpop.f32.mrf.mxu1  ;;  %7369 = vmatpush1.msra.mxu1 %v7175_v32  ;;  %7578 = vmatpush1.msra.mxu0 %v7215_v9  ;;  %v7213_v9 = vld [vmem:[%s14653_s3 + $0x150] sm:$0xff] }
 0x273   : > { %v13052_v12 = vadd.f32 %v10596_v56, %v4431_v61  ;;  %7370 = vmatprep.subr.mxu1 %v14870_v31  ;;  %7579 = vmatprep.subr.mxu0 %v14870_v31  ;;  %v7174_v61 = vld [vmem:[%s14653_s3 + $0x18] sm:$0xff] }
 0x274   : > { %v10516_v52 = vpop.f32.mrf.mxu0  ;;  %v13062_v58 = vpop.f32.mrf.mxu1  ;;  %7371 = vmatpush1.msra.mxu1 %v7174_v61  ;;  %7580 = vmatpush1.msra.mxu0 %v7214_v21 }
 0x275   : > { %14880 = vst [vmem:[#allocation70_spill] sm:$0xff] %v13052_v12  ;;  %14881 = vst [vmem:[#allocation71_spill] sm:$0xff] %v13062_v58  ;;  %v4433_v56 = vadd.f32 %v10516_v52, %v12775_v8  ;;  %7372 = vmatprep.subr.mxu1 %v14870_v31  ;;  %7581 = vmatprep.subr.mxu0 %v14870_v31  ;;  %v7173_v8 = vld [vmem:[%s14653_s3 + $0x10] sm:$0xff] }
 0x276   : > { %v13073_v2 = vpop.f32.mrf.mxu0  ;;  %v10611_v12 = vpop.f32.mrf.mxu1  ;;  %7373 = vmatpush1.msra.mxu1 %v7173_v8  ;;  %7582 = vmatpush1.msra.mxu0 %v7213_v9  ;;  %v7211_v8 = vld [vmem:[%s14653_s3 + $0x140] sm:$0xff] }
 0x277   : > { %v13076_v32 = vadd.f32 %v12988_v13, %v4433_v56  ;;  %7374 = vmatprep.subr.mxu1 %v14870_v31  ;;  %7583 = vmatprep.subr.mxu0 %v14870_v31  ;;  %v7172_v13 = vld [vmem:[%s14653_s3 + $0x8] sm:$0xff] }
 0x278   : > { %v10519_v52 = vpop.f32.mrf.mxu0  ;;  %v7212_v56 = vld [vmem:[%s14653_s3 + $0x148] sm:$0xff]  ;;  %7375 = vmatpush1.msra.mxu1 %v7172_v13 }
 0x279   : > { %v4435_v12 = vadd.f32 %v10519_v52, %v12787_v51  ;;  %7584 = vmatpush1.msra.mxu0 %v7212_v56  ;;  %7376 = vmatprep.subr.mxu1 %v14870_v31  ;;  %v7171_v51 = vld [vmem:[%s14653_s3] sm:$0xff] }
 0x27a   : > { %v13095_v61 = vpop.f32.mrf.mxu0  ;;  %7585 = vmatprep.subr.mxu0 %v14870_v31  ;;  %7377 = vmatpush1.msra.mxu1 %v7171_v51  ;;  %v7209_v51 = vld [vmem:[%s14653_s3 + $0x130] sm:$0xff] }
 0x27b   : > { %v13098_v21 = vadd.f32 %v13005_v41, %v4435_v12  ;;  %7586 = vmatpush1.msra.mxu0 %v7211_v8  ;;  %7378 = vmatprep.subr.mxu1 %v14870_v31  ;;  %v7202_v41 = vld [vmem:[%s14653_s3 + $0xf8] sm:$0xff] }
 0x27c   : > { %v10522_v9 = vpop.f32.mrf.mxu0  ;;  %7587 = vmatprep.subr.mxu0 %v14870_v31  ;;  %v7210_v12 = vld [vmem:[%s14653_s3 + $0x138] sm:$0xff]  ;;  %7379 = vmatpush2.msra.mxu1 %v7202_v41 }
 0x27d   : > { %14882 = vst [vmem:[#allocation72_spill] sm:$0xff] %v13098_v21  ;;  %v4437_v52 = vadd.f32 %v10522_v9, %v12797_v45  ;;  %7588 = vmatpush1.msra.mxu0 %v7210_v12  ;;  %7380 = vmatprep.subr.mxu1 %v14870_v31  ;;  %v7201_v45 = vld [vmem:[%s14653_s3 + $0xf0] sm:$0xff]  ;;  %v7207_v12 = vld [vmem:[%s14653_s3 + $0x120] sm:$0xff] }
 0x27e   : > { %v13117_v13 = vpop.f32.mrf.mxu0  ;;  %7589 = vmatprep.subr.mxu0 %v14870_v31  ;;  %7381 = vmatpush2.msra.mxu1 %v7201_v45 }
 0x27f   : > { %v13120_v56 = vadd.f32 %v13025_v30, %v4437_v52  ;;  %7590 = vmatpush1.msra.mxu0 %v7209_v51  ;;  %7382 = vmatprep.subr.mxu1 %v14870_v31  ;;  %v7200_v30 = vld [vmem:[%s14653_s3 + $0xe8] sm:$0xff]  ;;  %v7198_v51 = vld [vmem:[%s14653_s3 + $0xd8] sm:$0xff] }
 0x280   : > { %v10525_v8 = vpop.f32.mrf.mxu0  ;;  %7591 = vmatprep.subr.mxu0 %v14870_v31  ;;  %v7208_v52 = vld [vmem:[%s14653_s3 + $0x128] sm:$0xff]  ;;  %7383 = vmatpush2.msra.mxu1 %v7200_v30 }
 0x281   : > { %14883 = vst [vmem:[#allocation73_spill] sm:$0xff] %v13120_v56  ;;  %v4439_v9 = vadd.f32 %v10525_v8, %v12820_v20  ;;  %7592 = vmatpush1.msra.mxu0 %v7208_v52  ;;  %v7199_v20 = vld [vmem:[%s14653_s3 + $0xe0] sm:$0xff]  ;;  %7384 = vmatprep.subr.mxu1 %v14870_v31  ;;  %v7206_v8 = vld [vmem:[%s14653_s3 + $0x118] sm:$0xff] }
 0x282   : > { %v13139_v41 = vpop.f32.mrf.mxu0  ;;  %7593 = vmatprep.subr.mxu0 %v14870_v31  ;;  %7385 = vmatpush2.msra.mxu1 %v7199_v20  ;;  %v7196_v20 = vld [vmem:[%s14653_s3 + $0xc8] sm:$0xff]  ;;  %v14887_v56 = vld [vmem:[#allocation6_spill] sm:$0xff] }
 0x283   : > { %14884 = vst [vmem:[#allocation74_spill] sm:$0xff] %v13139_v41  ;;  %v13148_v45 = vadd.f32 %v13050_v53, %v4439_v9  ;;  %7594 = vmatpush1.msra.mxu0 %v7207_v12  ;;  %7386 = vmatprep.subr.mxu1 %v14870_v31  ;;  %v7197_v53 = vld [vmem:[%s14653_s3 + $0xd0] sm:$0xff]  ;;  %v7204_v12 = vld [vmem:[%s14653_s3 + $0x108] sm:$0xff]  ;;  %v3786_v41 = vadd.f32 %v14887_v56, %v12557_v63  ;;  %v7231_v63 = vld [vmem:[%s14653_s3 + $0x1e0] sm:$0xff] }
 0x284   : > { %v10528_v30 = vpop.f32.mrf.mxu0  ;;  %7595 = vmatprep.subr.mxu0 %v14870_v31  ;;  %v7205_v9 = vld [vmem:[%s14653_s3 + $0x110] sm:$0xff]  ;;  %7387 = vmatpush2.msra.mxu1 %v7198_v51  ;;  %v7195_v51 = vld [vmem:[%s14653_s3 + $0xc0] sm:$0xff] }
 0x285   : > { %14885 = vst [vmem:[#allocation75_spill] sm:$0xff] %v13148_v45  ;;  %7596 = vmatpush1.msra.mxu0 %v7206_v8  ;;  %7388 = vmatprep.subr.mxu1 %v14870_v31  ;;  %v7203_v8 = vld [vmem:[%s14653_s3 + $0x100] sm:$0xff] }
 0x286   : > { %v13166_v52 = vpop.f32.mrf.mxu0  ;;  %7597 = vmatprep.subr.mxu0 %v14870_v31  ;;  %7389 = vmatpush2.msra.mxu1 %v7197_v53  ;;  %v7194_v53 = vld [vmem:[%s14653_s3 + $0xb8] sm:$0xff] }
 0x287   : > { %14886 = vst [vmem:[#allocation76_spill] sm:$0xff] %v13166_v52  ;;  %7598 = vmatpush1.msra.mxu0 %v7205_v9  ;;  %7390 = vmatprep.subr.mxu1 %v14870_v31  ;;  %v7234_v9 = vld [vmem:[%s14653_s3 + $0x1f8] sm:$0xff]  ;;  %v5777_v52 = vlaneseq }
 0x288   : > { %v10531_v30 = vpop.f32.mrf.mxu0  ;;  %7599 = vmatprep.subr.mxu0 %v14870_v31  ;;  %7391 = vmatpush2.msra.mxu1 %v7196_v20  ;;  %v7193_v20 = vld [vmem:[%s14653_s3 + $0xb0] sm:$0xff] }
 0x289   : > { %7600 = vmatpush1.msra.mxu0 %v7204_v12  ;;  %7392 = vmatprep.subr.mxu1 %v14870_v31  ;;  %v7233_v12 = vld [vmem:[%s14653_s3 + $0x1f0] sm:$0xff] }
 0x28a   : > { %v4381_v45 = vpop.f32.mrf.mxu0  ;;  %7601 = vmatprep.subr.mxu0 %v14870_v31  ;;  %7393 = vmatpush2.msra.mxu1 %v7195_v51  ;;  %v3784_v51 = vadd.f32 %v12511_v57, %v12545_v18  ;;  %v13217_v18 = vshrl.u32 %v5777_v52, 7 }
 0x28b   : > { %7602 = vmatpush1.msra.mxu0 %v7203_v8  ;;  %7394 = vmatprep.subr.mxu1 %v14870_v31  ;;  %v5920_v45 = vld [vmem:[#allocation2] sm:$0xff]  ;;  %v7192_v8 = vld [vmem:[%s14653_s3 + $0xa8] sm:$0xff] }
 0x28c   : > { %v10619_v30 = vpop.f32.mrf.mxu0  ;;  %7603 = vmatprep.subr.mxu0 %v14870_v31  ;;  %7395 = vmatpush2.msra.mxu1 %v7194_v53  ;;  %5952 = vst.msk [vmem:[#allocation3] sm:$0xff] %vm5865_vm2, %v5920_v45  ;;  %v4394_v57 = vadd.f32 %v12857_v34, %v3784_v51  ;;  %v5921_v34 = vld [vmem:[#allocation2 + $0x8] sm:$0xff]  ;;  %vm5781_vm4 = vcmp.ge.s32.totalorder %v13217_v18, 1  ;;  %v7190_v51 = vld [vmem:[%s14653_s3 + $0x98] sm:$0xff] }
 0x28d   : > { %7604 = vmatpush2.msra.mxu0 %v7234_v9  ;;  %v6049_v30 = vpop.permute.xlu0 %6048  ;;  %7396 = vmatprep.subr.mxu1 %v14870_v31  ;;  %v13215_v9 = vld [vmem:[%s14652_s2] ss:$0 sm:$0xff]  ;;  %5953 = vst.msk [vmem:[#allocation3 + $0x28] sm:$0xff] %vm5865_vm2, %v5921_v34 }
 0x28e   : > { %v5339_v58 = vpop.f32.mrf.mxu0  ;;  %6145 = vst.msk [vmem:[#allocation3] sm:$0xff] %vm6144_vm3, %v6049_v30  ;;  %7605 = vmatprep.subr.mxu0 %v14870_v31  ;;  %7397 = vmatpush2.msra.mxu1 %v7193_v20  ;;  %v6177_v30 = vld [vmem:[#allocation2 + $0x2] sm:$0xff] }
 0x28f   : > { %v7232_v58 = vld [vmem:[%s14653_s3 + $0x1e8] sm:$0xff]  ;;  %7606 = vmatpush2.msra.mxu0 %v7233_v12  ;;  %7398 = vmatprep.subr.mxu1 %v14870_v31  ;;  %6209 = vst.msk [vmem:[#allocation3 + $0x8] sm:$0xff] %vm5865_vm2, %v6177_v30  ;;  %v7191_v20 = vld [vmem:[%s14653_s3 + $0xa0] sm:$0xff]  ;;  %v13238_v12 = vadd.s32 16, %v13217_v18 }
 0x290   : > { %v10622_v53 = vpop.f32.mrf.mxu0  ;;  %7607 = vmatprep.subr.mxu0 %v14870_v31  ;;  %7399 = vmatpush2.msra.mxu1 %v7192_v8  ;;  %v7230_v8 = vld [vmem:[%s14653_s3 + $0x1d8] sm:$0xff] }
 0x291   : > { %v5611_v45 = vadd.f32 %v10622_v53, %v12849_v48  ;;  %7608 = vmatpush2.msra.mxu0 %v7232_v58  ;;  %7400 = vmatprep.subr.mxu1 %v14870_v31  ;;  %v6051_v48 = vpop.permute.xlu1 %6050  ;;  %v9140_v53 = vld [vmem:[%s10917_s13 + $0x269] sm:$0xff]  ;;  %vm5792_vm5 = vcmp.le.s32.totalorder %v13238_v12, 16 }
 0x292   : > { %v5349_v21 = vpop.f32.mrf.mxu0  ;;  %7609 = vmatprep.subr.mxu0 %v14870_v31  ;;  %7401 = vmatpush2.msra.mxu1 %v7191_v20  ;;  %6146 = vst.msk [vmem:[#allocation3 + $0x28] sm:$0xff] %vm6144_vm3, %v6051_v48 }
 0x293   : > { %v5672_v52 = vadd.f32 %v13215_v9, %v5611_v45  ;;  %v4396_v21 = vadd.f32 %v12868_v4, %v3786_v41  ;;  %7610 = vmatpush2.msra.mxu0 %v7231_v63  ;;  %v5003_v4 = vadd.f32 %v12829_v16, %v4394_v57  ;;  %7402 = vmatprep.subr.mxu1 %v14870_v31  ;;  %v7189_v45 = vld [vmem:[%s14653_s3 + $0x90] sm:$0xff]  ;;  %v14888_v57 = vld [vmem:[#allocation7_spill] sm:$0xff] }
 0x294   : > { %v10625_v56 = vpop.f32.mrf.mxu0  ;;  %7611 = vmatprep.subr.mxu0 %v14870_v31  ;;  %7403 = vmatpush2.msra.mxu1 %v7190_v51  ;;  %v7229_v16 = vld [vmem:[%s14653_s3 + $0x1d0] sm:$0xff]  ;;  %v7188_v51 = vld [vmem:[%s14653_s3 + $0x88] sm:$0xff] }
 0x295   : > { %v5726_v41 = vmax.f32 %v5672_v52, 0.0  ;;  %v5613_v58 = vadd.f32 %v10625_v56, %v12860_v25  ;;  %7612 = vmatpush2.msra.mxu0 %v7230_v8  ;;  %v6178_v25 = vld [vmem:[#allocation2 + $0xa] sm:$0xff]  ;;  %v3788_v52 = vadd.f32 %v14888_v57, %v12569_v46  ;;  %7404 = vmatprep.subr.mxu1 %v14870_v31  ;;  %v5005_v63 = vadd.f32 %v12836_v19, %v4396_v21 }
 0x296   : > { %v5359_v30 = vpop.f32.mrf.mxu0  ;;  %7613 = vmatprep.subr.mxu0 %v14870_v31  ;;  %6210 = vst.msk [vmem:[#allocation3 + $0x30] sm:$0xff] %vm5865_vm2, %v6178_v25  ;;  %10612 = vmatprep.mubr.msk.f32.mxu1 %vm395_vm1, %v9140_v53  ;;  %v9141_v46 = vld [vmem:[%s10917_s13 + $0x271] sm:$0xff]  ;;  %v7228_v8 = vld [vmem:[%s14653_s3 + $0x1c8] sm:$0xff] }
 0x297   : > { %v5814_v48 = vsel %vm5781_vm4, %v5726_v41, 0.0  ;;  %v5674_v34 = vadd.f32 %v13215_v9, %v5613_v58  ;;  %v5612_v20 = vadd.f32 %v5359_v30, %v5003_v4  ;;  %7405 = vmatpush2.msra.mxu1 %v7189_v45  ;;  %v4398_v4 = vadd.f32 %v12876_v40, %v3788_v52  ;;  %7614 = vmatpush2.msra.mxu0 %v7229_v16  ;;  %v14889_v58 = vld [vmem:[#allocation30_spill] sm:$0xff] }
 0x298   : > { %5869 = vst.msk [vmem:[#allocation2 + $0x18] sm:$0xff] %vm5865_vm2, %v5814_v48  ;;  %v10628_v56 = vpop.f32.mrf.mxu0  ;;  %10613 = vmatmul.mubr.msk.f32.gmra.mxu1 %vm395_vm1, %v9141_v46  ;;  %v3790_v53 = vadd.f32 %v14889_v58, %v12581_v42  ;;  %7406 = vmatprep.subr.mxu1 %v14870_v31  ;;  %v7187_v40 = vld [vmem:[%s14653_s3 + $0x80] sm:$0xff]  ;;  %v7226_v48 = vld [vmem:[%s14653_s3 + $0x1b8] sm:$0xff] }
 0x299   : > { %v5728_v19 = vmax.f32 %v5674_v34, 0.0  ;;  %v5673_v21 = vadd.f32 %v13215_v9, %v5612_v20  ;;  %v5615_v41 = vadd.f32 %v10628_v56, %v12870_v59  ;;  %7615 = vmatprep.subr.mxu0 %v14870_v31  ;;  %7407 = vmatpush2.msra.mxu1 %v7188_v51  ;;  %v7227_v42 = vld [vmem:[%s14653_s3 + $0x1c0] sm:$0xff]  ;;  %v5007_v34 = vadd.f32 %v12843_v36, %v4398_v4  ;;  %v14890_v56 = vld [vmem:[#allocation8_spill] sm:$0xff] }
 0x29a   : > { %v5369_v45 = vpop.f32.mrf.mxu0  ;;  %7616 = vmatpush2.msra.mxu0 %v7228_v8  ;;  %v4400_v57 = vadd.f32 %v12883_v22, %v3790_v53  ;;  %7408 = vmatprep.subr.mxu1 %v14870_v31  ;;  %v3792_v46 = vadd.f32 %v14890_v56, %v12593_v7  ;;  %v7225_v8 = vld [vmem:[%s14653_s3 + $0x1b0] sm:$0xff] }
 0x29b   : > { %v5816_v30 = vsel %vm5792_vm5, %v5728_v19, 0.0  ;;  %v5727_v25 = vmax.f32 %v5673_v21, 0.0  ;;  %v5676_v59 = vadd.f32 %v13215_v9, %v5615_v41  ;;  %v5614_v16 = vadd.f32 %v5369_v45, %v5005_v63  ;;  %7617 = vmatprep.subr.mxu0 %v14870_v31  ;;  %7409 = vmatpush2.msra.mxu1 %v7187_v40 }
 0x29c   : > { %5871 = vst.msk [vmem:[#allocation2 + $0x28] sm:$0xff] %vm5865_vm2, %v5816_v30  ;;  %v10631_v52 = vpop.f32.mrf.mxu0  ;;  %7618 = vmatpush2.msra.mxu0 %v7227_v42  ;;  %v5009_v41 = vadd.f32 %v12852_v43, %v4400_v57  ;;  %v4402_v7 = vadd.f32 %v12890_v1, %v3792_v46  ;;  %v7224_v43 = vld [vmem:[%s14653_s3 + $0x1a8] sm:$0xff] }
 0x29d   : > { %5870 = vst.msk [vmem:[#allocation2 + $0x20] sm:$0xff] %vm5865_vm2, %v5727_v25  ;;  %v5730_v20 = vmax.f32 %v5676_v59, 0.0  ;;  %v5675_v63 = vadd.f32 %v13215_v9, %v5614_v16  ;;  %v5617_v22 = vadd.f32 %v10631_v52, %v12878_v28  ;;  %7619 = vmatprep.subr.mxu0 %v14870_v31  ;;  %v14891_v1 = vld [vmem:[#allocation31_spill] sm:$0xff]  ;;  %v7223_v16 = vld [vmem:[%s14653_s3 + $0x1a0] sm:$0xff] }
 0x29e   : > { %v5379_v51 = vpop.f32.mrf.mxu0  ;;  %7620 = vmatpush2.msra.mxu0 %v7226_v48  ;;  %v3794_v25 = vadd.f32 %v14891_v1, %v12605_v50  ;;  %v5011_v48 = vadd.f32 %v12863_v37, %v4402_v7  ;;  %v7222_v7 = vld [vmem:[%s14653_s3 + $0x198] sm:$0xff] }
 0x29f   : > { %5873 = vst.msk [vmem:[#allocation2 + $0x38] sm:$0xff] %vm5865_vm2, %v5730_v20  ;;  %v5729_v36 = vmax.f32 %v5675_v63, 0.0  ;;  %v5678_v4 = vadd.f32 %v13215_v9, %v5617_v22  ;;  %v5616_v19 = vadd.f32 %v5379_v51, %v5007_v34  ;;  %v6242_v21 = vld [vmem:[#allocation2 + $0x18] sm:$0xff]  ;;  %7621 = vmatprep.subr.mxu0 %v14870_v31 }
 0x2a0   : > { %v5922_v28 = vld [vmem:[#allocation2 + $0x18] sm:$0xff]  ;;  %6306 = vrot.lane.b32.xlu0 %v6242_v21, %s10848_s28  ;;  %v10634_v58 = vpop.f32.mrf.mxu0  ;;  %7622 = vmatpush2.msra.mxu0 %v7225_v8  ;;  %v4404_v50 = vadd.f32 %v12897_v23, %v3794_v25  ;;  %v14892_v23 = vld [vmem:[#allocation18_spill] sm:$0xff] }
 0x2a1   : > { %5954 = vst.msk [vmem:[#allocation3 + $0x50] sm:$0xff] %vm5865_vm2, %v5922_v28  ;;  %v5817_v53 = vsel %vm5781_vm4, %v5729_v36, 0.0  ;;  %v5732_v45 = vmax.f32 %v5678_v4, 0.0  ;;  %v5677_v40 = vadd.f32 %v13215_v9, %v5616_v19  ;;  %v5619_v30 = vadd.f32 %v10634_v58, %v12885_v29  ;;  %7623 = vmatprep.subr.mxu0 %v14870_v31  ;;  %v9249_v58 = vld [vmem:[%s10917_s13 + $0x26a] sm:$0xff]  ;;  %v9250_v1 = vld [vmem:[%s10917_s13 + $0x272] sm:$0xff] }
 0x2a2   : > { %5872 = vst.msk [vmem:[#allocation2 + $0x30] sm:$0xff] %vm5865_vm2, %v5817_v53  ;;  %v5389_v59 = vpop.f32.mrf.mxu0  ;;  %7624 = vmatpush2.msra.mxu0 %v7224_v43  ;;  %v3796_v8 = vadd.f32 %v14892_v23, %v12617_v0  ;;  %v7221_v53 = vld [vmem:[%s14653_s3 + $0x190] sm:$0xff]  ;;  %10695 = vmatprep.mubr.msk.f32.mxu0 %vm395_vm1, %v9249_v58  ;;  %v5013_v25 = vadd.f32 %v12873_v11, %v4404_v50  ;;  %v7220_v11 = vld [vmem:[%s14653_s3 + $0x188] sm:$0xff] }
 0x2a3   : > { %v5820_v29 = vsel %vm5781_vm4, %v5732_v45, 0.0  ;;  %v5731_v42 = vmax.f32 %v5677_v40, 0.0  ;;  %v5680_v57 = vadd.f32 %v13215_v9, %v5619_v30  ;;  %v5618_v52 = vadd.f32 %v5389_v59, %v5009_v41  ;;  %7625 = vmatprep.subr.mxu0 %v14870_v31  ;;  %10696 = vmatmul.mubr.msk.f32.gmra.mxu0 %vm395_vm1, %v9250_v1 }
 0x2a4   : > { %5875 = vst.msk [vmem:[#allocation2 + $0x48] sm:$0xff] %vm5865_vm2, %v5820_v29  ;;  %v10637_v34 = vpop.f32.mrf.mxu0  ;;  %v6243_v20 = vld [vmem:[#allocation2 + $0x20] sm:$0xff]  ;;  %7626 = vmatpush2.msra.mxu0 %v7223_v16  ;;  %v4406_v45 = vadd.f32 %v12904_v35, %v3796_v8 }
 0x2a5   : > { %v5819_v63 = vsel %vm5792_vm5, %v5731_v42, 0.0  ;;  %v5734_v22 = vmax.f32 %v5680_v57, 0.0  ;;  %v5679_v56 = vadd.f32 %v13215_v9, %v5618_v52  ;;  %v5621_v46 = vadd.f32 %v10637_v34, %v12892_v49  ;;  %6308 = vrot.lane.b32.xlu1 %v6243_v20, %s10848_s28  ;;  %v13345_v51 = vld [vmem:[#allocation2 + $0x22] sm:$0xff]  ;;  %v6179_v37 = vld [vmem:[#allocation2 + $0x1a] sm:$0xff]  ;;  %7627 = vmatprep.subr.mxu0 %v14870_v31 }
 0x2a6   : > { %5874 = vst.msk [vmem:[#allocation2 + $0x40] sm:$0xff] %vm5865_vm2, %v5819_v63  ;;  %v5399_v36 = vpop.f32.mrf.mxu0  ;;  %v6245_v4 = vld [vmem:[#allocation2 + $0x38] sm:$0xff]  ;;  %6212 = vst.msk [vmem:[#allocation3 + $0x80] sm:$0xff] %vm5865_vm2, %v13345_v51  ;;  %v5923_v49 = vld [vmem:[#allocation2 + $0x20] sm:$0xff]  ;;  %7628 = vmatpush2.msra.mxu0 %v7222_v7 }
 0x2a7   : > { %6211 = vst.msk [vmem:[#allocation3 + $0x58] sm:$0xff] %vm5865_vm2, %v6179_v37  ;;  %v6434_v19 = vld [vmem:[#allocation2 + $0x19] sm:$0xff]  ;;  %v5822_v21 = vsel %vm5792_vm5, %v5734_v22, 0.0  ;;  %v5733_v28 = vmax.f32 %v5679_v56, 0.0  ;;  %v5682_v0 = vadd.f32 %v13215_v9, %v5621_v46  ;;  %v5620_v41 = vadd.f32 %v5399_v36, %v5011_v48  ;;  %6312 = vrot.lane.b32.xlu0 %v6245_v4, %s10848_s28  ;;  %5955 = vst.msk [vmem:[#allocation3 + $0x78] sm:$0xff] %vm5865_vm2, %v5923_v49  ;;  %v6435_v43 = vld [vmem:[#allocation2 + $0x21] sm:$0xff] }
 0x2a8   : > { %6466 = vst.msk [vmem:[#allocation3 + $0x10] sm:$0xff] %vm5865_vm2, %v6434_v19  ;;  %5877 = vst.msk [vmem:[#allocation2 + $0x58] sm:$0xff] %vm5865_vm2, %v5822_v21  ;;  %v10640_v40 = vpop.f32.mrf.mxu0  ;;  %v5986_v30 = vld [vmem:[#allocation2 + $0x19] sm:$0xff]  ;;  %7629 = vmatprep.subr.mxu0 %v14870_v31  ;;  %v5015_v56 = vadd.f32 %v12880_v26, %v4406_v45  ;;  %v5987_v23 = vld [vmem:[#allocation2 + $0x21] sm:$0xff] }
 0x2a9   : > { %5876 = vst.msk [vmem:[#allocation2 + $0x50] sm:$0xff] %vm5865_vm2, %v5733_v28  ;;  %v5736_v59 = vmax.f32 %v5682_v0, 0.0  ;;  %v5681_v16 = vadd.f32 %v13215_v9, %v5620_v41  ;;  %v5623_v29 = vadd.f32 %v10640_v40, %v12899_v39  ;;  %6052 = vrot.lane.b32.xlu1 %v5986_v30, %s10848_s28  ;;  %v6244_v35 = vld [vmem:[#allocation2 + $0x30] sm:$0xff]  ;;  %6467 = vst.msk [vmem:[#allocation3 + $0x38] sm:$0xff] %vm5865_vm2, %v6435_v43  ;;  %v14893_v57 = vld [vmem:[#allocation34_spill] sm:$0xff]  ;;  %7630 = vmatpush2.msra.mxu0 %v7221_v53 }
 0x2aa   : > { %v13376_v42 = vld [vmem:[#allocation2 + $0x32] sm:$0xff]  ;;  %v3798_v52 = vadd.f32 %v14893_v57, %v12629_v14  ;;  %v5409_v48 = vpop.f32.mrf.mxu0  ;;  %7631 = vmatprep.subr.mxu0 %v14870_v31  ;;  %v7219_v8 = vld [vmem:[%s14653_s3 + $0x180] sm:$0xff]  ;;  %v14896_v41 = vld [vmem:[#allocation19_spill] sm:$0xff] }
 0x2ab   : > { %v6691_v50 = vld [vmem:[#allocation2 + $0x30] sm:$0xff]  ;;  %6213 = vst.msk [vmem:[#allocation3 + $0xa8] sm:$0xff] %vm5865_vm2, %v13376_v42  ;;  %v6692_v39 = vld [vmem:[#allocation2 + $0x38] sm:$0xff]  ;;  %5879 = vst.msk [vmem:[#allocation2 + $0x68] sm:$0xff] %vm5865_vm2, %v5736_v59  ;;  %v5735_v20 = vmax.f32 %v5681_v16, 0.0  ;;  %v5684_v63 = vadd.f32 %v13215_v9, %v5623_v29  ;;  %v5622_v22 = vadd.f32 %v5409_v48, %v5013_v25  ;;  %6310 = vrot.lane.b32.xlu0 %v6244_v35, %s10848_s28  ;;  %7632 = vmatpush2.msra.mxu0 %v7220_v11 }
 0x2ac   : > { %v6436_v34 = vld [vmem:[#allocation2 + $0x31] sm:$0xff]  ;;  %6723 = vst.msk [vmem:[#allocation3 + $0x18] sm:$0xff] %vm5865_vm2, %v6691_v50  ;;  %6724 = vst.msk [vmem:[#allocation3 + $0x40] sm:$0xff] %vm5865_vm2, %v6692_v39  ;;  %v6693_v14 = vld [vmem:[#allocation2 + $0x48] sm:$0xff]  ;;  %v4408_v46 = vadd.f32 %v12911_v62, %v3798_v52  ;;  %v10643_v37 = vpop.f32.mrf.mxu0  ;;  %7633 = vmatprep.subr.mxu0 %v14870_v31 }
 0x2ad   : > { %5956 = vst.msk [vmem:[#allocation3 + $0xa0] sm:$0xff] %vm5865_vm2, %v6691_v50  ;;  %6468 = vst.msk [vmem:[#allocation3 + $0x60] sm:$0xff] %vm5865_vm2, %v6436_v34  ;;  %v6947_v36 = vld [vmem:[#allocation2 + $0x32] sm:$0xff]  ;;  %v13404_v4 = vld [vmem:[#allocation2 + $0x3a] sm:$0xff]  ;;  %v5823_v26 = vsel %vm5781_vm4, %v5735_v20, 0.0  ;;  %v5738_v49 = vmax.f32 %v5684_v63, 0.0  ;;  %v5683_v62 = vadd.f32 %v13215_v9, %v5622_v22  ;;  %6054 = vrot.lane.b32.xlu1 %v5987_v23, %s10848_s28  ;;  %7634 = vmatpush2.msra.mxu0 %v7219_v8 }
 0x2ae   : > { %5957 = vst.msk [vmem:[#allocation3 + $0xc8] sm:$0xff] %vm5865_vm2, %v6692_v39  ;;  %6725 = vst.msk [vmem:[#allocation3 + $0x68] sm:$0xff] %vm5865_vm2, %v6693_v14  ;;  %v14894_v19 = vld [vmem:[#allocation52_spill] sm:$0xff]  ;;  %v6182_v28 = vld [vmem:[#allocation2 + $0x3a] sm:$0xff]  ;;  %v5419_v58 = vpop.f32.mrf.mxu0 }
 0x2af   : > { %5958 = vst.msk [vmem:[#allocation3 + $0xf0] sm:$0xff] %vm5865_vm2, %v6693_v14  ;;  %v5625_v21 = vadd.f32 %v10643_v37, %v14894_v19  ;;  %6979 = vst.msk [vmem:[#allocation3 + $0x20] sm:$0xff] %vm5865_vm2, %v6947_v36  ;;  %v14895_v0 = vld [vmem:[#allocation21_spill] sm:$0xff]  ;;  %v5826_v40 = vsel %vm5781_vm4, %v5738_v49, 0.0  ;;  %v5737_v30 = vmax.f32 %v5683_v62, 0.0  ;;  %v5624_v1 = vadd.f32 %v5419_v58, %v5015_v56  ;;  %v14898_v48 = vld [vmem:[#allocation12_spill] sm:$0xff] }
 0x2b0   : > { %v3800_v7 = vadd.f32 %v14896_v41, %v14895_v0  ;;  %6980 = vst.msk [vmem:[#allocation3 + $0x48] sm:$0xff] %vm5865_vm2, %v13404_v4  ;;  %5878 = vst.msk [vmem:[#allocation2 + $0x60] sm:$0xff] %vm5865_vm2, %v5823_v26  ;;  %v13417_v53 = vld [vmem:[#allocation2 + $0x31] sm:$0xff]  ;;  %v6437_v45 = vld [vmem:[#allocation2 + $0x39] sm:$0xff]  ;;  %v10646_v29 = vpop.f32.mrf.mxu0 }
 0x2b1   : > { %6214 = vst.msk [vmem:[#allocation3 + $0xd0] sm:$0xff] %vm5865_vm2, %v6182_v28  ;;  %v5686_v43 = vadd.f32 %v13215_v9, %v5625_v21  ;;  %6819 = vrot.lane.b32.xlu0 %v13417_v53, %s10848_s28  ;;  %6469 = vst.msk [vmem:[#allocation3 + $0x88] sm:$0xff] %vm5865_vm2, %v6437_v45  ;;  %v14897_v25 = vld [vmem:[#allocation53_spill] sm:$0xff]  ;;  %v5825_v11 = vsel %vm5792_vm5, %v5737_v30, 0.0  ;;  %v5685_v52 = vadd.f32 %v13215_v9, %v5624_v1  ;;  %v14899_v39 = vld [vmem:[#allocation22_spill] sm:$0xff] }
 0x2b2   : > { %v5017_v59 = vadd.f32 %v14897_v25, %v4408_v46  ;;  %v4410_v31 = vadd.f32 %v12918_v55, %v3800_v7  ;;  %v13429_v16 = vld [vmem:[#allocation2 + $0x52] sm:$0xff]  ;;  %5881 = vst.msk [vmem:[#allocation2 + $0x78] sm:$0xff] %vm5865_vm2, %v5826_v40  ;;  %v6498_v35 = vld [vmem:[#allocation2 + $0x1a] sm:$0xff]  ;;  %v5627_v50 = vadd.f32 %v10646_v29, %v14898_v48  ;;  %v14900_v34 = vld [vmem:[#allocation35_spill] sm:$0xff]  ;;  %v5429_v63 = vpop.f32.mrf.mxu0 }
 0x2b3   : > { %6982 = vst.msk [vmem:[#allocation3 + $0x98] sm:$0xff] %vm5865_vm2, %v13429_v16  ;;  %v5740_v57 = vmax.f32 %v5686_v43, 0.0  ;;  %6562 = vrot.lane.b32.xlu1 %v6498_v35, %s10848_s28  ;;  %v6694_v55 = vld [vmem:[#allocation2 + $0x50] sm:$0xff]  ;;  %v3802_v20 = vadd.f32 %v14900_v34, %v14899_v39  ;;  %5880 = vst.msk [vmem:[#allocation2 + $0x70] sm:$0xff] %vm5865_vm2, %v5825_v11  ;;  %v6246_v22 = vld [vmem:[#allocation2 + $0x48] sm:$0xff]  ;;  %v5739_v37 = vmax.f32 %v5685_v52, 0.0 }
 0x2b4   : > { %6726 = vst.msk [vmem:[#allocation3 + $0x90] sm:$0xff] %vm5865_vm2, %v6694_v55  ;;  %v6184_v14 = vld [vmem:[#allocation2 + $0x52] sm:$0xff]  ;;  %v6183_v56 = vld [vmem:[#allocation2 + $0x4a] sm:$0xff]  ;;  %5959 = vst.msk [vmem:[#allocation3 + $0x118] sm:$0xff] %vm5865_vm2, %v6694_v55  ;;  %v5688_v23 = vadd.f32 %v13215_v9, %v5627_v50  ;;  %v5626_v8 = vadd.f32 %v5429_v63, %v5017_v59  ;;  %v10649_v19 = vpop.f32.mrf.mxu0 }
 0x2b5   : > { %v5828_v46 = vsel %vm5792_vm5, %v5740_v57, 0.0  ;;  %6314 = vrot.lane.b32.xlu0 %v6246_v22, %s10848_s28  ;;  %6216 = vst.msk [vmem:[#allocation3 + $0x120] sm:$0xff] %vm5865_vm2, %v6184_v14  ;;  %6215 = vst.msk [vmem:[#allocation3 + $0xf8] sm:$0xff] %vm5865_vm2, %v6183_v56  ;;  %v6438_v36 = vld [vmem:[#allocation2 + $0x49] sm:$0xff]  ;;  %v6439_v26 = vld [vmem:[#allocation2 + $0x51] sm:$0xff]  ;;  %v4412_v62 = vadd.f32 %v12925_v60, %v3802_v20 }
 0x2b6   : > { %v6696_v49 = vld [vmem:[#allocation2 + $0x68] sm:$0xff]  ;;  %5883 = vst.msk [vmem:[#allocation2 + $0x88] sm:$0xff] %vm5865_vm2, %v5828_v46  ;;  %6470 = vst.msk [vmem:[#allocation3 + $0xb0] sm:$0xff] %vm5865_vm2, %v6438_v36  ;;  %v5742_v41 = vmax.f32 %v5688_v23, 0.0  ;;  %v5687_v7 = vadd.f32 %v13215_v9, %v5626_v8  ;;  %v14902_v60 = vld [vmem:[#allocation14_spill] sm:$0xff]  ;;  %v5439_v1 = vpop.f32.mrf.mxu0 }
 0x2b7   : > { %6471 = vst.msk [vmem:[#allocation3 + $0xd8] sm:$0xff] %vm5865_vm2, %v6439_v26  ;;  %6728 = vst.msk [vmem:[#allocation3 + $0xe0] sm:$0xff] %vm5865_vm2, %v6696_v49  ;;  %v6949_v21 = vld [vmem:[#allocation2 + $0x4a] sm:$0xff]  ;;  %v5629_v58 = vadd.f32 %v10649_v19, %v14902_v60  ;;  %6564 = vrot.lane.b32.xlu1 %v13345_v51, %s10848_s28  ;;  %v13462_v45 = vld [vmem:[#allocation2 + $0x62] sm:$0xff] }
 0x2b8   : > { %5961 = vst.msk [vmem:[#allocation3 + $0x168] sm:$0xff] %vm5865_vm2, %v6696_v49  ;;  %v14901_v28 = vld [vmem:[#allocation43_spill] sm:$0xff]  ;;  %5882 = vst.msk [vmem:[#allocation2 + $0x80] sm:$0xff] %vm5865_vm2, %v5739_v37  ;;  %v14904_v30 = vld [vmem:[#allocation20_spill] sm:$0xff]  ;;  %v5741_v29 = vmax.f32 %v5687_v7, 0.0  ;;  %v10652_v55 = vpop.f32.mrf.mxu0 }
 0x2b9   : > { %v5019_v0 = vadd.f32 %v14901_v28, %v4410_v31  ;;  %6981 = vst.msk [vmem:[#allocation3 + $0x70] sm:$0xff] %vm5865_vm2, %v6949_v21  ;;  %v14903_v40 = vld [vmem:[#allocation23_spill] sm:$0xff]  ;;  %v13467_v25 = vld [vmem:[#allocation2 + $0x39] sm:$0xff]  ;;  %6217 = vst.msk [vmem:[#allocation3 + $0x148] sm:$0xff] %vm5865_vm2, %v13462_v45  ;;  %v5690_v51 = vadd.f32 %v13215_v9, %v5629_v58 }
 0x2ba   : > { %v3804_v43 = vadd.f32 %v14904_v30, %v14903_v40  ;;  %v6695_v59 = vld [vmem:[#allocation2 + $0x60] sm:$0xff]  ;;  %5885 = vst.msk [vmem:[#allocation2 + $0x98] sm:$0xff] %vm5865_vm2, %v5742_v41  ;;  %6821 = vrot.lane.b32.xlu0 %v13467_v25, %s10848_s28  ;;  %v6697_v11 = vld [vmem:[#allocation2 + $0x78] sm:$0xff]  ;;  %v13483_v39 = vld [vmem:[#allocation2 + $0x6a] sm:$0xff]  ;;  %v5829_v34 = vsel %vm5781_vm4, %v5741_v29, 0.0  ;;  %v5449_v23 = vpop.f32.mrf.mxu0 }
 0x2bb   : > { %v6440_v31 = vld [vmem:[#allocation2 + $0x61] sm:$0xff]  ;;  %v5628_v35 = vadd.f32 %v5439_v1, %v5019_v0  ;;  %6727 = vst.msk [vmem:[#allocation3 + $0xb8] sm:$0xff] %vm5865_vm2, %v6695_v59  ;;  %5960 = vst.msk [vmem:[#allocation3 + $0x140] sm:$0xff] %vm5865_vm2, %v6695_v59  ;;  %v5744_v20 = vmax.f32 %v5690_v51, 0.0  ;;  %v14906_v22 = vld [vmem:[#allocation56_spill] sm:$0xff]  ;;  %6056 = vrot.lane.b32.xlu1 %v13417_v53, %s10848_s28 }
 0x2bc   : > { %6472 = vst.msk [vmem:[#allocation3 + $0x100] sm:$0xff] %vm5865_vm2, %v6440_v31  ;;  %v6951_v57 = vld [vmem:[#allocation2 + $0x62] sm:$0xff]  ;;  %v4414_v50 = vadd.f32 %v12932_v44, %v3804_v43  ;;  %6729 = vst.msk [vmem:[#allocation3 + $0x108] sm:$0xff] %vm5865_vm2, %v6697_v11  ;;  %v5631_v14 = vadd.f32 %v10652_v55, %v14906_v22  ;;  %v6186_v44 = vld [vmem:[#allocation2 + $0x6a] sm:$0xff]  ;;  %v10655_v41 = vpop.f32.mrf.mxu0 }
 0x2bd   : > { %v14905_v52 = vld [vmem:[#allocation54_spill] sm:$0xff]  ;;  %5962 = vst.msk [vmem:[#allocation3 + $0x190] sm:$0xff] %vm5865_vm2, %v6697_v11  ;;  %6983 = vst.msk [vmem:[#allocation3 + $0xc0] sm:$0xff] %vm5865_vm2, %v6951_v57  ;;  %v5689_v63 = vadd.f32 %v13215_v9, %v5628_v35  ;;  %v14907_v56 = vld [vmem:[#allocation24_spill] sm:$0xff]  ;;  %v5832_v26 = vsel %vm5781_vm4, %v5744_v20, 0.0 }
 0x2be   : > { %v5021_v48 = vadd.f32 %v14905_v52, %v4412_v62  ;;  %v14908_v46 = vld [vmem:[#allocation38_spill] sm:$0xff]  ;;  %6984 = vst.msk [vmem:[#allocation3 + $0xe8] sm:$0xff] %vm5865_vm2, %v13483_v39  ;;  %5884 = vst.msk [vmem:[#allocation2 + $0x90] sm:$0xff] %vm5865_vm2, %v5829_v34  ;;  %v6247_v8 = vld [vmem:[#allocation2 + $0x50] sm:$0xff]  ;;  %v5692_v53 = vadd.f32 %v13215_v9, %v5631_v14  ;;  %v5459_v29 = vpop.f32.mrf.mxu0 }
 0x2bf   : > { %v3806_v37 = vadd.f32 %v14908_v46, %v14907_v56  ;;  %6218 = vst.msk [vmem:[#allocation3 + $0x170] sm:$0xff] %vm5865_vm2, %v6186_v44  ;;  %v6441_v36 = vld [vmem:[#allocation2 + $0x69] sm:$0xff]  ;;  %v5743_v49 = vmax.f32 %v5689_v63, 0.0  ;;  %6316 = vrot.lane.b32.xlu0 %v6247_v8, %s10848_s28  ;;  %5887 = vst.msk [vmem:[#allocation2 + $0xa8] sm:$0xff] %vm5865_vm2, %v5832_v26  ;;  %v14910_v40 = vld [vmem:[#allocation58_spill] sm:$0xff]  ;;  %6566 = vrot.lane.b32.xlu1 %v13376_v42, %s10848_s28 }
 0x2c0   : > { %v5630_v62 = vadd.f32 %v5449_v23, %v5021_v48  ;;  %6473 = vst.msk [vmem:[#allocation3 + $0x128] sm:$0xff] %vm5865_vm2, %v6441_v36  ;;  %v14909_v19 = vld [vmem:[#allocation11_spill] sm:$0xff]  ;;  %v5746_v60 = vmax.f32 %v5692_v53, 0.0  ;;  %v5633_v30 = vadd.f32 %v10655_v41, %v14910_v40  ;;  %v6698_v43 = vld [vmem:[#allocation2 + $0x80] sm:$0xff]  ;;  %v14911_v1 = vld [vmem:[#allocation25_spill] sm:$0xff]  ;;  %v10658_v20 = vpop.f32.mrf.mxu0 }
 0x2c1   : > { %v5023_v21 = vadd.f32 %v14909_v19, %v4414_v50  ;;  %v4416_v28 = vadd.f32 %v12939_v15, %v3806_v37  ;;  %v13504_v0 = vld [vmem:[#allocation2 + $0x82] sm:$0xff]  ;;  %v5831_v7 = vsel %vm5792_vm5, %v5743_v49, 0.0  ;;  %v13515_v15 = vld [vmem:[#allocation2 + $0x7a] sm:$0xff]  ;;  %6730 = vst.msk [vmem:[#allocation3 + $0x130] sm:$0xff] %vm5865_vm2, %v6698_v43  ;;  %5963 = vst.msk [vmem:[#allocation3 + $0x1b8] sm:$0xff] %vm5865_vm2, %v6698_v43  ;;  %v5635_v46 = vadd.f32 %v10658_v20, %v12941_v17 }
 0x2c2   : > { %6986 = vst.msk [vmem:[#allocation3 + $0x138] sm:$0xff] %vm5865_vm2, %v13504_v0  ;;  %v5691_v58 = vadd.f32 %v13215_v9, %v5630_v62  ;;  %v14912_v59 = vld [vmem:[#allocation39_spill] sm:$0xff]  ;;  %5886 = vst.msk [vmem:[#allocation2 + $0xa0] sm:$0xff] %vm5865_vm2, %v5831_v7  ;;  %v6442_v42 = vld [vmem:[#allocation2 + $0x79] sm:$0xff]  ;;  %v5834_v11 = vsel %vm5792_vm5, %v5746_v60, 0.0  ;;  %v5694_v52 = vadd.f32 %v13215_v9, %v5633_v30  ;;  %v5469_v36 = vpop.f32.mrf.mxu0 }
 0x2c3   : > { %v3808_v31 = vadd.f32 %v14912_v59, %v14911_v1  ;;  %v13520_v51 = vld [vmem:[#allocation2 + $0x49] sm:$0xff]  ;;  %6219 = vst.msk [vmem:[#allocation3 + $0x198] sm:$0xff] %vm5865_vm2, %v13515_v15  ;;  %v5632_v48 = vadd.f32 %v5459_v29, %v5023_v21  ;;  %6474 = vst.msk [vmem:[#allocation3 + $0x150] sm:$0xff] %vm5865_vm2, %v6442_v42  ;;  %v6443_v50 = vld [vmem:[#allocation2 + $0x81] sm:$0xff]  ;;  %6058 = vrot.lane.b32.xlu1 %v13467_v25, %s10848_s28  ;;  %v5696_v25 = vadd.f32 %v13215_v9, %v5635_v46 }
 0x2c4   : > { %v6188_v35 = vld [vmem:[#allocation2 + $0x82] sm:$0xff]  ;;  %v5745_v57 = vmax.f32 %v5691_v58, 0.0  ;;  %6823 = vrot.lane.b32.xlu0 %v13520_v51, %s10848_s28  ;;  %v6700_v55 = vld [vmem:[#allocation2 + $0x98] sm:$0xff]  ;;  %5889 = vst.msk [vmem:[#allocation2 + $0xb8] sm:$0xff] %vm5865_vm2, %v5834_v11  ;;  %6475 = vst.msk [vmem:[#allocation3 + $0x178] sm:$0xff] %vm5865_vm2, %v6443_v50  ;;  %v5748_v44 = vmax.f32 %v5694_v52, 0.0  ;;  %v10661_v60 = vpop.f32.mrf.mxu0 }
 0x2c5   : > { %6220 = vst.msk [vmem:[#allocation3 + $0x1c0] sm:$0xff] %vm5865_vm2, %v6188_v35  ;;  %v4418_v34 = vadd.f32 %v12946_v10, %v3808_v31  ;;  %6732 = vst.msk [vmem:[#allocation3 + $0x180] sm:$0xff] %vm5865_vm2, %v6700_v55  ;;  %v6953_v63 = vld [vmem:[#allocation2 + $0x7a] sm:$0xff]  ;;  %v5693_v56 = vadd.f32 %v13215_v9, %v5632_v48  ;;  %v13544_v10 = vld [vmem:[#allocation2 + $0x92] sm:$0xff]  ;;  %v5750_v30 = vmax.f32 %v5696_v25, 0.0  ;;  %v5637_v1 = vadd.f32 %v10661_v60, %v12948_v24 }
 0x2c6   : > { %5965 = vst.msk [vmem:[#allocation3 + $0x208] sm:$0xff] %vm5865_vm2, %v6700_v55  ;;  %v14913_v22 = vld [vmem:[#allocation13_spill] sm:$0xff]  ;;  %5888 = vst.msk [vmem:[#allocation2 + $0xb0] sm:$0xff] %vm5865_vm2, %v5745_v57  ;;  %v14914_v37 = vld [vmem:[#allocation26_spill] sm:$0xff]  ;;  %v5479_v35 = vpop.f32.mrf.mxu0 }
 0x2c7   : > { %v5025_v14 = vadd.f32 %v14913_v22, %v4416_v28  ;;  %6985 = vst.msk [vmem:[#allocation3 + $0x110] sm:$0xff] %vm5865_vm2, %v6953_v63  ;;  %v14915_v23 = vld [vmem:[#allocation41_spill] sm:$0xff]  ;;  %v6699_v49 = vld [vmem:[#allocation2 + $0x90] sm:$0xff]  ;;  %6221 = vst.msk [vmem:[#allocation3 + $0x1e8] sm:$0xff] %vm5865_vm2, %v13544_v10  ;;  %v5747_v17 = vmax.f32 %v5693_v56, 0.0  ;;  %6568 = vrot.lane.b32.xlu1 %v13404_v4, %s10848_s28  ;;  %v5838_v24 = vsel %vm5781_vm4, %v5750_v30, 0.0  ;;  %v5698_v4 = vadd.f32 %v13215_v9, %v5637_v1 }
 0x2c8   : > { %v3810_v8 = vadd.f32 %v14915_v23, %v14914_v37  ;;  %v13549_v26 = vld [vmem:[#allocation2 + $0x51] sm:$0xff]  ;;  %5891 = vst.msk [vmem:[#allocation2 + $0xc8] sm:$0xff] %vm5865_vm2, %v5748_v44  ;;  %6731 = vst.msk [vmem:[#allocation3 + $0x158] sm:$0xff] %vm5865_vm2, %v6699_v49  ;;  %v6701_v19 = vld [vmem:[#allocation2 + $0xa8] sm:$0xff]  ;;  %v10664_v20 = vpop.f32.mrf.mxu0 }
 0x2c9   : > { %v6444_v53 = vld [vmem:[#allocation2 + $0x91] sm:$0xff]  ;;  %v5634_v62 = vadd.f32 %v5469_v36, %v5025_v14  ;;  %6825 = vrot.lane.b32.xlu0 %v13549_v26, %s10848_s28  ;;  %5964 = vst.msk [vmem:[#allocation3 + $0x1e0] sm:$0xff] %vm5865_vm2, %v6699_v49  ;;  %v14916_v28 = vld [vmem:[#allocation55_spill] sm:$0xff]  ;;  %6733 = vst.msk [vmem:[#allocation3 + $0x1a8] sm:$0xff] %vm5865_vm2, %v6701_v19  ;;  %v5835_v40 = vsel %vm5781_vm4, %v5747_v17, 0.0  ;;  %v5752_v22 = vmax.f32 %v5698_v4, 0.0  ;;  %v5639_v44 = vadd.f32 %v10664_v20, %v12958_v3 }
 0x2ca   : > { %6476 = vst.msk [vmem:[#allocation3 + $0x1a0] sm:$0xff] %vm5865_vm2, %v6444_v53  ;;  %v6955_v21 = vld [vmem:[#allocation2 + $0x92] sm:$0xff]  ;;  %v5027_v41 = vadd.f32 %v14916_v28, %v4418_v34  ;;  %v4420_v7 = vadd.f32 %v12956_v54, %v3810_v8  ;;  %5966 = vst.msk [vmem:[#allocation3 + $0x230] sm:$0xff] %vm5865_vm2, %v6701_v19  ;;  %v13565_v58 = vld [vmem:[#allocation2 + $0x9a] sm:$0xff]  ;;  %v5489_v8 = vpop.f32.mrf.mxu0 }
 0x2cb   : > { %6987 = vst.msk [vmem:[#allocation3 + $0x160] sm:$0xff] %vm5865_vm2, %v6955_v21  ;;  %v5695_v43 = vadd.f32 %v13215_v9, %v5634_v62  ;;  %v6190_v54 = vld [vmem:[#allocation2 + $0x9a] sm:$0xff]  ;;  %v14917_v59 = vld [vmem:[#allocation27_spill] sm:$0xff]  ;;  %6988 = vst.msk [vmem:[#allocation3 + $0x188] sm:$0xff] %vm5865_vm2, %v13565_v58  ;;  %6060 = vrot.lane.b32.xlu1 %v13520_v51, %s10848_s28  ;;  %v5840_v51 = vsel %vm5792_vm5, %v5752_v22, 0.0  ;;  %v5700_v17 = vadd.f32 %v13215_v9, %v5639_v44 }
 0x2cc   : > { %v14918_v31 = vld [vmem:[#allocation42_spill] sm:$0xff]  ;;  %5890 = vst.msk [vmem:[#allocation2 + $0xc0] sm:$0xff] %vm5865_vm2, %v5835_v40  ;;  %v6249_v42 = vld [vmem:[#allocation2 + $0x68] sm:$0xff]  ;;  %6222 = vst.msk [vmem:[#allocation3 + $0x210] sm:$0xff] %vm5865_vm2, %v6190_v54  ;;  %v5636_v52 = vadd.f32 %v5479_v35, %v5027_v41  ;;  %v10667_v28 = vpop.f32.mrf.mxu0 }
 0x2cd   : > { %v3812_v29 = vadd.f32 %v14918_v31, %v14917_v59  ;;  %v6445_v11 = vld [vmem:[#allocation2 + $0x99] sm:$0xff]  ;;  %v5749_v57 = vmax.f32 %v5695_v43, 0.0  ;;  %6320 = vrot.lane.b32.xlu0 %v6249_v42, %s10848_s28  ;;  %5893 = vst.msk [vmem:[#allocation2 + $0xd8] sm:$0xff] %vm5865_vm2, %v5838_v24  ;;  %v6702_v56 = vld [vmem:[#allocation2 + $0xb0] sm:$0xff]  ;;  %5895 = vst.msk [vmem:[#allocation2 + $0xe8] sm:$0xff] %vm5865_vm2, %v5840_v51  ;;  %v5754_v60 = vmax.f32 %v5700_v17, 0.0  ;;  %v5641_v30 = vadd.f32 %v10667_v28, %v12973_v38 }
 0x2ce   : > { %6477 = vst.msk [vmem:[#allocation3 + $0x1c8] sm:$0xff] %vm5865_vm2, %v6445_v11  ;;  %v14919_v48 = vld [vmem:[#allocation57_spill] sm:$0xff]  ;;  %v5697_v14 = vadd.f32 %v13215_v9, %v5636_v52  ;;  %v14920_v46 = vld [vmem:[#allocation28_spill] sm:$0xff]  ;;  %v6248_v36 = vld [vmem:[#allocation2 + $0x60] sm:$0xff]  ;;  %v5499_v59 = vpop.f32.mrf.mxu0 }
 0x2cf   : > { %v5029_v50 = vadd.f32 %v14919_v48, %v4420_v7  ;;  %v4422_v55 = vadd.f32 %v12971_v33, %v3812_v29  ;;  %v13586_v34 = vld [vmem:[#allocation2 + $0xb2] sm:$0xff]  ;;  %v5837_v63 = vsel %vm5792_vm5, %v5749_v57, 0.0  ;;  %v13597_v33 = vld [vmem:[#allocation2 + $0xaa] sm:$0xff]  ;;  %6734 = vst.msk [vmem:[#allocation3 + $0x1d0] sm:$0xff] %vm5865_vm2, %v6702_v56  ;;  %5967 = vst.msk [vmem:[#allocation3 + $0x258] sm:$0xff] %vm5865_vm2, %v6702_v56  ;;  %6062 = vrot.lane.b32.xlu1 %v13549_v26, %s10848_s28 }
 0x2d0   : > { %6990 = vst.msk [vmem:[#allocation3 + $0x1d8] sm:$0xff] %vm5865_vm2, %v13586_v34  ;;  %v14921_v37 = vld [vmem:[#allocation44_spill] sm:$0xff]  ;;  %5892 = vst.msk [vmem:[#allocation2 + $0xd0] sm:$0xff] %vm5865_vm2, %v5837_v63  ;;  %v5751_v53 = vmax.f32 %v5697_v14, 0.0  ;;  %v6704_v19 = vld [vmem:[#allocation2 + $0xc8] sm:$0xff]  ;;  %v5702_v26 = vadd.f32 %v13215_v9, %v5641_v30  ;;  %v10670_v52 = vpop.f32.mrf.mxu0 }
 0x2d1   : > { %v3814_v23 = vadd.f32 %v14921_v37, %v14920_v46  ;;  %v6192_v49 = vld [vmem:[#allocation2 + $0xb2] sm:$0xff]  ;;  %6223 = vst.msk [vmem:[#allocation3 + $0x238] sm:$0xff] %vm5865_vm2, %v13597_v33  ;;  %v6446_v3 = vld [vmem:[#allocation2 + $0xa9] sm:$0xff]  ;;  %v5638_v25 = vadd.f32 %v5489_v8, %v5029_v50  ;;  %6318 = vrot.lane.b32.xlu0 %v6248_v36, %s10848_s28  ;;  %6736 = vst.msk [vmem:[#allocation3 + $0x220] sm:$0xff] %vm5865_vm2, %v6704_v19  ;;  %v5031_v7 = vadd.f32 %v12936_v27, %v4422_v55 }
 0x2d2   : > { %6224 = vst.msk [vmem:[#allocation3 + $0x260] sm:$0xff] %vm5865_vm2, %v6192_v49  ;;  %6478 = vst.msk [vmem:[#allocation3 + $0x1f0] sm:$0xff] %vm5865_vm2, %v6446_v3  ;;  %v6447_v62 = vld [vmem:[#allocation2 + $0xb1] sm:$0xff]  ;;  %v13628_v31 = vld [vmem:[#allocation2 + $0x61] sm:$0xff]  ;;  %v5756_v20 = vmax.f32 %v5702_v26, 0.0  ;;  %v5509_v37 = vpop.f32.mrf.mxu0 }
 0x2d3   : > { %v4424_v21 = vadd.f32 %v12986_v5, %v3814_v23  ;;  %6479 = vst.msk [vmem:[#allocation3 + $0x218] sm:$0xff] %vm5865_vm2, %v6447_v62  ;;  %5969 = vst.msk [vmem:[#allocation3 + $0x2a8] sm:$0xff] %vm5865_vm2, %v6704_v19  ;;  %v6957_v41 = vld [vmem:[#allocation2 + $0xaa] sm:$0xff]  ;;  %v5699_v40 = vadd.f32 %v13215_v9, %v5638_v25  ;;  %v13623_v5 = vld [vmem:[#allocation2 + $0xc2] sm:$0xff]  ;;  %v5640_v35 = vadd.f32 %v5499_v59, %v5031_v7 }
 0x2d4   : > { %5894 = vst.msk [vmem:[#allocation2 + $0xe0] sm:$0xff] %vm5865_vm2, %v5751_v53  ;;  %6989 = vst.msk [vmem:[#allocation3 + $0x1b0] sm:$0xff] %vm5865_vm2, %v6957_v41  ;;  %v14922_v43 = vld [vmem:[#allocation29_spill] sm:$0xff]  ;;  %v6703_v27 = vld [vmem:[#allocation2 + $0xc0] sm:$0xff]  ;;  %v5844_v36 = vsel %vm5781_vm4, %v5756_v20, 0.0 }
 0x2d5   : > { %v14923_v1 = vld [vmem:[#allocation45_spill] sm:$0xff]  ;;  %6225 = vst.msk [vmem:[#allocation3 + $0x288] sm:$0xff] %vm5865_vm2, %v13623_v5  ;;  %v6448_v29 = vld [vmem:[#allocation2 + $0xc1] sm:$0xff]  ;;  %5897 = vst.msk [vmem:[#allocation2 + $0xf8] sm:$0xff] %vm5865_vm2, %v5754_v60  ;;  %v5753_v38 = vmax.f32 %v5699_v40, 0.0  ;;  %6827 = vrot.lane.b32.xlu0 %v13628_v31, %s10848_s28  ;;  %v5701_v63 = vadd.f32 %v13215_v9, %v5640_v35 }
 0x2d6   : > { %v3816_v54 = vadd.f32 %v14923_v1, %v14922_v43  ;;  %6735 = vst.msk [vmem:[#allocation3 + $0x1f8] sm:$0xff] %vm5865_vm2, %v6703_v27  ;;  %5968 = vst.msk [vmem:[#allocation3 + $0x280] sm:$0xff] %vm5865_vm2, %v6703_v27  ;;  %v5938_v42 = vld [vmem:[#allocation2 + $0xd8] sm:$0xff]  ;;  %v6959_v11 = vld [vmem:[#allocation2 + $0xc2] sm:$0xff] }
 0x2d7   : > { %6480 = vst.msk [vmem:[#allocation3 + $0x240] sm:$0xff] %vm5865_vm2, %v6448_v29  ;;  %v14924_v24 = vld [vmem:[#allocation59_spill] sm:$0xff]  ;;  %5970 = vst.msk [vmem:[#allocation3 + $0x2d0] sm:$0xff] %vm5865_vm2, %v5938_v42  ;;  %v5841_v55 = vsel %vm5781_vm4, %v5753_v38, 0.0  ;;  %v14926_v44 = vld [vmem:[#allocation32_spill] sm:$0xff]  ;;  %v5755_v49 = vmax.f32 %v5701_v63, 0.0 }
 0x2d8   : > { %v5033_v57 = vadd.f32 %v14924_v24, %v4424_v21  ;;  %v4426_v4 = vadd.f32 %v13003_v6, %v3816_v54  ;;  %v6502_v48 = vld [vmem:[#allocation2 + $0x4a] sm:$0xff]  ;;  %6737 = vst.msk [vmem:[#allocation3 + $0x248] sm:$0xff] %vm5865_vm2, %v5938_v42  ;;  %6991 = vst.msk [vmem:[#allocation3 + $0x200] sm:$0xff] %vm5865_vm2, %v6959_v11  ;;  %v14927_v56 = vld [vmem:[#allocation46_spill] sm:$0xff]  ;;  %v10673_v21 = vpop.f32.mrf.mxu0 }
 0x2d9   : > { %v6960_v50 = vld [vmem:[#allocation2 + $0xca] sm:$0xff]  ;;  %6570 = vrot.lane.b32.xlu1 %v6502_v48, %s10848_s28  ;;  %v3818_v46 = vadd.f32 %v14927_v56, %v14926_v44  ;;  %5896 = vst.msk [vmem:[#allocation2 + $0xf0] sm:$0xff] %vm5865_vm2, %v5841_v55  ;;  %v6250_v23 = vld [vmem:[#allocation2 + $0x78] sm:$0xff]  ;;  %5899 = vst.msk [vmem:[#allocation2 + $0x108] sm:$0xff] %vm5865_vm2, %v5844_v36  ;;  %v5843_v28 = vsel %vm5792_vm5, %v5755_v49, 0.0 }
 0x2da   : > { %v14925_v22 = vld [vmem:[#allocation63_spill] sm:$0xff]  ;;  %6992 = vst.msk [vmem:[#allocation3 + $0x228] sm:$0xff] %vm5865_vm2, %v6960_v50  ;;  %v5642_v51 = vadd.f32 %v5509_v37, %v5033_v57  ;;  %6322 = vrot.lane.b32.xlu0 %v6250_v23, %s10848_s28  ;;  %v14928_v53 = vld [vmem:[#allocation60_spill] sm:$0xff]  ;;  %v14930_v60 = vld [vmem:[#allocation65_spill] sm:$0xff]  ;;  %v5519_v27 = vpop.f32.mrf.mxu0 }
 0x2db   : > { %v5643_v14 = vadd.f32 %v10670_v52, %v14925_v22  ;;  %v13649_v6 = vld [vmem:[#allocation2 + $0xca] sm:$0xff]  ;;  %v5035_v17 = vadd.f32 %v14928_v53, %v4426_v4  ;;  %v6962_v19 = vld [vmem:[#allocation2 + $0xe2] sm:$0xff]  ;;  %v5645_v40 = vadd.f32 %v10673_v21, %v14930_v60  ;;  %v13672_v30 = vld [vmem:[#allocation2 + $0xda] sm:$0xff]  ;;  %5898 = vst.msk [vmem:[#allocation2 + $0x100] sm:$0xff] %vm5865_vm2, %v5843_v28 }
 0x2dc   : > { %6226 = vst.msk [vmem:[#allocation3 + $0x2b0] sm:$0xff] %vm5865_vm2, %v13649_v6  ;;  %v6449_v8 = vld [vmem:[#allocation2 + $0xc9] sm:$0xff]  ;;  %6994 = vst.msk [vmem:[#allocation3 + $0x278] sm:$0xff] %vm5865_vm2, %v6962_v19  ;;  %v5703_v7 = vadd.f32 %v13215_v9, %v5642_v51  ;;  %v14931_v1 = vld [vmem:[#allocation33_spill] sm:$0xff]  ;;  %v10676_v52 = vpop.f32.mrf.mxu0 }
 0x2dd   : > { %v5704_v3 = vadd.f32 %v13215_v9, %v5643_v14  ;;  %6481 = vst.msk [vmem:[#allocation3 + $0x268] sm:$0xff] %vm5865_vm2, %v6449_v8  ;;  %v14929_v25 = vld [vmem:[#allocation67_spill] sm:$0xff]  ;;  %6572 = vrot.lane.b32.xlu1 %v13429_v16, %s10848_s28  ;;  %6227 = vst.msk [vmem:[#allocation3 + $0x2d8] sm:$0xff] %vm5865_vm2, %v13672_v30  ;;  %v5939_v9 = vld [vmem:[#allocation2 + $0xe0] sm:$0xff]  ;;  %v5644_v11 = vadd.f32 %v5519_v27, %v5035_v17 }
 0x2de   : > { %v4428_v62 = vadd.f32 %v14929_v25, %v3818_v46  ;;  %v13674_v43 = vld [vmem:[#allocation2 + $0xe2] sm:$0xff]  ;;  %v5941_v16 = vld [vmem:[#allocation2 + $0xf8] sm:$0xff]  ;;  %v5757_v26 = vmax.f32 %v5703_v7, 0.0  ;;  %v13690_v35 = vld [vmem:[%s14652_s2] ss:$0 sm:$0xff]  ;;  %5971 = vst.msk [vmem:[#allocation3 + $0x2f8] sm:$0xff] %vm5865_vm2, %v5939_v9  ;;  %v5529_v8 = vpop.f32.mrf.mxu0 }
 0x2df   : > { %v5758_v41 = vmax.f32 %v5704_v3, 0.0  ;;  %v14932_v54 = vld [vmem:[#allocation47_spill] sm:$0xff]  ;;  %6228 = vst.msk [vmem:[#allocation3 + $0x300] sm:$0xff] %vm5865_vm2, %v13674_v43  ;;  %v5706_v42 = vadd.f32 %v13690_v35, %v5645_v40  ;;  %5973 = vst.msk [vmem:[#allocation3 + $0x348] sm:$0xff] %vm5865_vm2, %v5941_v16  ;;  %v6450_v24 = vld [vmem:[#allocation2 + $0xd9] sm:$0xff]  ;;  %v5705_v63 = vadd.f32 %v13690_v35, %v5644_v11 }
 0x2e0   : > { %v3820_v59 = vadd.f32 %v14932_v54, %v14931_v1  ;;  %v13679_v29 = vld [vmem:[#allocation2 + $0x69] sm:$0xff]  ;;  %6738 = vst.msk [vmem:[#allocation3 + $0x270] sm:$0xff] %vm5865_vm2, %v5939_v9  ;;  %6740 = vst.msk [vmem:[#allocation3 + $0x2c0] sm:$0xff] %vm5865_vm2, %v5941_v16  ;;  %v6451_v57 = vld [vmem:[#allocation2 + $0xe1] sm:$0xff]  ;;  %v10679_v28 = vpop.f32.mrf.mxu0 }
 0x2e1   : > { %v5846_v38 = vsel %vm5792_vm5, %v5758_v41, 0.0  ;;  %6829 = vrot.lane.b32.xlu0 %v13679_v29, %s10848_s28  ;;  %6482 = vst.msk [vmem:[#allocation3 + $0x290] sm:$0xff] %vm5865_vm2, %v6450_v24  ;;  %6483 = vst.msk [vmem:[#allocation3 + $0x2b8] sm:$0xff] %vm5865_vm2, %v6451_v57  ;;  %v6961_v48 = vld [vmem:[#allocation2 + $0xda] sm:$0xff]  ;;  %v5760_v20 = vmax.f32 %v5706_v42, 0.0  ;;  %v14934_v22 = vld [vmem:[#allocation68_spill] sm:$0xff]  ;;  %6064 = vrot.lane.b32.xlu1 %v13628_v31, %s10848_s28 }
 0x2e2   : > { %v4430_v4 = vadd.f32 %v13048_v47, %v3820_v59  ;;  %5901 = vst.msk [vmem:[#allocation2 + $0x118] sm:$0xff] %vm5865_vm2, %v5846_v38  ;;  %v14933_v50 = vld [vmem:[#allocation61_spill] sm:$0xff]  ;;  %5900 = vst.msk [vmem:[#allocation2 + $0x110] sm:$0xff] %vm5865_vm2, %v5757_v26  ;;  %v5647_v14 = vadd.f32 %v10676_v52, %v14934_v22  ;;  %v6251_v47 = vld [vmem:[#allocation2 + $0x80] sm:$0xff]  ;;  %v5759_v3 = vmax.f32 %v5705_v63, 0.0  ;;  %v5539_v38 = vpop.f32.mrf.mxu0 }
 0x2e3   : > { %v5037_v55 = vadd.f32 %v14933_v50, %v4428_v62  ;;  %v13709_v44 = vld [vmem:[#allocation2 + $0xf0] sm:$0xff]  ;;  %6993 = vst.msk [vmem:[#allocation3 + $0x250] sm:$0xff] %vm5865_vm2, %v6961_v48  ;;  %v14936_v37 = vld [vmem:[#allocation15_spill] sm:$0xff]  ;;  %v13719_v36 = vld [vmem:[%s14653_s3 + $0x238] sm:$0xff] }
 0x2e4   : > { %v13711_v56 = vld [vmem:[#allocation2 + $0xf2] sm:$0xff]  ;;  %5972 = vst.msk [vmem:[#allocation3 + $0x320] sm:$0xff] %vm5865_vm2, %v13709_v44  ;;  %5903 = vst.msk [vmem:[#allocation2 + $0x128] sm:$0xff] %vm5865_vm2, %v5760_v20  ;;  %v5708_v51 = vadd.f32 %v13690_v35, %v5647_v14  ;;  %v13728_v17 = vld [vmem:[#allocation2 + $0x108] sm:$0xff]  ;;  %10698 = vmatprep.subr.mxu1 %v13719_v36  ;;  %v5847_v60 = vsel %vm5781_vm4, %v5759_v3, 0.0  ;;  %v10682_v22 = vpop.f32.mrf.mxu0 }
 0x2e5   : > { %v14935_v46 = vld [vmem:[#allocation36_spill] sm:$0xff]  ;;  %6229 = vst.msk [vmem:[#allocation3 + $0x328] sm:$0xff] %vm5865_vm2, %v13711_v56  ;;  %v5646_v53 = vadd.f32 %v5529_v8, %v5037_v55  ;;  %6324 = vrot.lane.b32.xlu0 %v6251_v47, %s10848_s28  ;;  %v6709_v25 = vld [vmem:[#allocation2 + $0x108] sm:$0xff]  ;;  %v14937_v62 = vld [vmem:[#allocation62_spill] sm:$0xff]  ;;  %6574 = vrot.lane.b32.xlu1 %v13462_v45, %s10848_s28 }
 0x2e6   : > { %v3822_v23 = vadd.f32 %v14936_v37, %v14935_v46  ;;  %v6707_v31 = vld [vmem:[#allocation2 + $0xf0] sm:$0xff]  ;;  %v5039_v19 = vadd.f32 %v14937_v62, %v4430_v4  ;;  %5974 = vst.msk [vmem:[#allocation3 + $0x370] sm:$0xff] %vm5865_vm2, %v13728_v17  ;;  %6741 = vst.msk [vmem:[#allocation3 + $0x2e8] sm:$0xff] %vm5865_vm2, %v6709_v25  ;;  %v6964_v7 = vld [vmem:[#allocation2 + $0xfa] sm:$0xff]  ;;  %v5762_v40 = vmax.f32 %v5708_v51, 0.0 }
 0x2e7   : > { %v6452_v49 = vld [vmem:[#allocation2 + $0xf1] sm:$0xff]  ;;  %6739 = vst.msk [vmem:[#allocation3 + $0x298] sm:$0xff] %vm5865_vm2, %v6707_v31  ;;  %v5707_v1 = vadd.f32 %v13690_v35, %v5646_v53  ;;  %v14938_v54 = vld [vmem:[#allocation70_spill] sm:$0xff]  ;;  %6996 = vst.msk [vmem:[#allocation3 + $0x2c8] sm:$0xff] %vm5865_vm2, %v6964_v7 }
 0x2e8   : > { %6484 = vst.msk [vmem:[#allocation3 + $0x2e0] sm:$0xff] %vm5865_vm2, %v6452_v49  ;;  %v4432_v21 = vadd.f32 %v13073_v2, %v3822_v23  ;;  %v6963_v41 = vld [vmem:[#allocation2 + $0xf2] sm:$0xff]  ;;  %v5649_v59 = vadd.f32 %v10679_v28, %v14938_v54  ;;  %v13744_v2 = vld [vmem:[#allocation2 + $0xfa] sm:$0xff]  ;;  %5902 = vst.msk [vmem:[#allocation2 + $0x120] sm:$0xff] %vm5865_vm2, %v5847_v60  ;;  %v5850_v45 = vsel %vm5781_vm4, %v5762_v40, 0.0  ;;  %v5648_v57 = vadd.f32 %v5539_v38, %v5039_v19 }
 0x2e9   : > { %6995 = vst.msk [vmem:[#allocation3 + $0x2a0] sm:$0xff] %vm5865_vm2, %v6963_v41  ;;  %v14939_v27 = vld [vmem:[#allocation37_spill] sm:$0xff]  ;;  %v14940_v9 = vld [vmem:[#allocation48_spill] sm:$0xff]  ;;  %6230 = vst.msk [vmem:[#allocation3 + $0x350] sm:$0xff] %vm5865_vm2, %v13744_v2  ;;  %v5761_v11 = vmax.f32 %v5707_v1, 0.0  ;;  %v5651_v23 = vadd.f32 %v10682_v22, %v13076_v32  ;;  %6066 = vrot.lane.b32.xlu1 %v13679_v29, %s10848_s28  ;;  %v5549_v32 = vpop.f32.mrf.mxu0 }
 0x2ea   : > { %v3824_v16 = vadd.f32 %v14940_v9, %v14939_v27  ;;  %v13751_v26 = vld [vmem:[#allocation2 + $0x79] sm:$0xff]  ;;  %v5710_v24 = vadd.f32 %v13690_v35, %v5649_v59  ;;  %v14941_v4 = vld [vmem:[#allocation4_spill] sm:$0xff]  ;;  %5905 = vst.msk [vmem:[#allocation2 + $0x138] sm:$0xff] %vm5865_vm2, %v5850_v45  ;;  %v5709_v37 = vadd.f32 %v13690_v35, %v5648_v57  ;;  %v14944_v49 = vld [vmem:[#allocation51_spill] sm:$0xff] }
 0x2eb   : > { %v6453_v42 = vld [vmem:[#allocation2 + $0xf9] sm:$0xff]  ;;  %6831 = vrot.lane.b32.xlu0 %v13751_v26, %s10848_s28  ;;  %v14942_v52 = vld [vmem:[#allocation16_spill] sm:$0xff]  ;;  %v5849_v47 = vsel %vm5792_vm5, %v5761_v11, 0.0  ;;  %v13787_v62 = vld [vmem:[#allocation2 + $0x128] sm:$0xff]  ;;  %v5712_v41 = vadd.f32 %v13690_v35, %v5651_v23  ;;  %v10685_v9 = vpop.f32.mrf.mxu0 }
 0x2ec   : > { %6485 = vst.msk [vmem:[#allocation3 + $0x308] sm:$0xff] %vm5865_vm2, %v6453_v42  ;;  %v2610_v48 = vadd.f32 %v14942_v52, %v14941_v4  ;;  %v14943_v50 = vld [vmem:[#allocation64_spill] sm:$0xff]  ;;  %v4434_v20 = vadd.f32 %v13095_v61, %v3824_v16  ;;  %v5764_v46 = vmax.f32 %v5710_v24, 0.0  ;;  %v13775_v61 = vld [vmem:[#allocation2 + $0x81] sm:$0xff]  ;;  %v14945_v3 = vld [vmem:[#allocation49_spill] sm:$0xff]  ;;  %v5763_v28 = vmax.f32 %v5709_v37, 0.0 }
 0x2ed   : > { %v5041_v55 = vadd.f32 %v14943_v50, %v4432_v21  ;;  %v6966_v63 = vld [vmem:[#allocation2 + $0x112] sm:$0xff]  ;;  %v13777_v8 = vld [vmem:[#allocation2 + $0x10a] sm:$0xff]  ;;  %v3826_v51 = vadd.f32 %v14945_v3, %v14944_v49  ;;  %5904 = vst.msk [vmem:[#allocation2 + $0x130] sm:$0xff] %vm5865_vm2, %v5849_v47  ;;  %5977 = vst.msk [vmem:[#allocation3 + $0x3e8] sm:$0xff] %vm5865_vm2, %v13787_v62  ;;  %v5766_v45 = vmax.f32 %v5712_v41, 0.0  ;;  %6576 = vrot.lane.b32.xlu1 %v13483_v39, %s10848_s28 }
 0x2ee   : > { %v13766_v14 = vld [vmem:[#allocation2 + $0x110] sm:$0xff]  ;;  %6998 = vst.msk [vmem:[#allocation3 + $0x318] sm:$0xff] %vm5865_vm2, %v6966_v63  ;;  %6231 = vst.msk [vmem:[#allocation3 + $0x378] sm:$0xff] %vm5865_vm2, %v13777_v8  ;;  %v5852_v21 = vsel %vm5792_vm5, %v5764_v46, 0.0  ;;  %v6712_v60 = vld [vmem:[#allocation2 + $0x128] sm:$0xff] }
 0x2ef   : > { %v13779_v31 = vld [vmem:[#allocation2 + $0x112] sm:$0xff]  ;;  %5975 = vst.msk [vmem:[#allocation3 + $0x398] sm:$0xff] %vm5865_vm2, %v13766_v14  ;;  %v6454_v19 = vld [vmem:[#allocation2 + $0x109] sm:$0xff]  ;;  %v5650_v7 = vadd.f32 %v5549_v32, %v5041_v55  ;;  %6833 = vrot.lane.b32.xlu0 %v13775_v61, %s10848_s28  ;;  %v4436_v27 = vadd.f32 %v13117_v13, %v3826_v51  ;;  %5907 = vst.msk [vmem:[#allocation2 + $0x148] sm:$0xff] %vm5865_vm2, %v5852_v21 }
 0x2f0   : > { %v14946_v53 = vld [vmem:[#allocation40_spill] sm:$0xff]  ;;  %6232 = vst.msk [vmem:[#allocation3 + $0x3a0] sm:$0xff] %vm5865_vm2, %v13779_v31  ;;  %6486 = vst.msk [vmem:[#allocation3 + $0x330] sm:$0xff] %vm5865_vm2, %v6454_v19  ;;  %v14947_v1 = vld [vmem:[#allocation5_spill] sm:$0xff] }
 0x2f1   : > { %v3219_v25 = vadd.f32 %v14946_v53, %v2610_v48  ;;  %v6710_v29 = vld [vmem:[#allocation2 + $0x110] sm:$0xff]  ;;  %v14948_v54 = vld [vmem:[#allocation17_spill] sm:$0xff]  ;;  %6744 = vst.msk [vmem:[#allocation3 + $0x360] sm:$0xff] %vm5865_vm2, %v6712_v60  ;;  %v14949_v38 = vld [vmem:[#allocation66_spill] sm:$0xff]  ;;  %v5711_v11 = vadd.f32 %v13690_v35, %v5650_v7  ;;  %6068 = vrot.lane.b32.xlu1 %v13751_v26, %s10848_s28 }
 0x2f2   : > { %6742 = vst.msk [vmem:[#allocation3 + $0x310] sm:$0xff] %vm5865_vm2, %v6710_v29  ;;  %v6455_v40 = vld [vmem:[#allocation2 + $0x111] sm:$0xff]  ;;  %v2612_v59 = vadd.f32 %v14948_v54, %v14947_v1  ;;  %v5043_v42 = vadd.f32 %v14949_v38, %v4434_v20  ;;  %5906 = vst.msk [vmem:[#allocation2 + $0x140] sm:$0xff] %vm5865_vm2, %v5763_v28  ;;  %v13814_v13 = vld [vmem:[#allocation2 + $0x120] sm:$0xff]  ;;  %v5559_v20 = vpop.f32.mrf.mxu0 }
 0x2f3   : > { %6487 = vst.msk [vmem:[#allocation3 + $0x358] sm:$0xff] %vm5865_vm2, %v6455_v40  ;;  %v6965_v16 = vld [vmem:[#allocation2 + $0x10a] sm:$0xff]  ;;  %v13816_v4 = vld [vmem:[#allocation2 + $0x122] sm:$0xff]  ;;  %v6253_v63 = vld [vmem:[#allocation2 + $0x98] sm:$0xff]  ;;  %v5765_v47 = vmax.f32 %v5711_v11, 0.0 }
 0x2f4   : > { %v14950_v24 = vld [vmem:[#allocation72_spill] sm:$0xff]  ;;  %6997 = vst.msk [vmem:[#allocation3 + $0x2f0] sm:$0xff] %vm5865_vm2, %v6965_v16  ;;  %v14951_v52 = vld [vmem:[#allocation50_spill] sm:$0xff]  ;;  %6233 = vst.msk [vmem:[#allocation3 + $0x3c8] sm:$0xff] %vm5865_vm2, %v13816_v4  ;;  %v5652_v37 = vadd.f32 %v5559_v20, %v5043_v42  ;;  %6328 = vrot.lane.b32.xlu0 %v6253_v63, %s10848_s28  ;;  %v10688_v29 = vpop.f32.mrf.mxu0 }
 0x2f5   : > { %v5653_v57 = vadd.f32 %v10685_v9, %v14950_v24  ;;  %v3828_v48 = vadd.f32 %v14951_v52, %v3219_v25  ;;  %v14952_v50 = vld [vmem:[#allocation10_spill] sm:$0xff]  ;;  %5976 = vst.msk [vmem:[#allocation3 + $0x3c0] sm:$0xff] %vm5865_vm2, %v13814_v13  ;;  %5909 = vst.msk [vmem:[#allocation2 + $0x158] sm:$0xff] %vm5865_vm2, %v5766_v45  ;;  %v13828_v23 = vld [vmem:[#allocation2 + $0x138] sm:$0xff]  ;;  %v5853_v21 = vsel %vm5781_vm4, %v5765_v47, 0.0  ;;  %6070 = vrot.lane.b32.xlu1 %v13775_v61, %s10848_s28 }
 0x2f6   : > { %v3221_v55 = vadd.f32 %v14952_v50, %v2612_v59  ;;  %v6711_v22 = vld [vmem:[#allocation2 + $0x120] sm:$0xff]  ;;  %v6713_v49 = vld [vmem:[#allocation2 + $0x138] sm:$0xff]  ;;  %5978 = vst.msk [vmem:[#allocation3 + $0x410] sm:$0xff] %vm5865_vm2, %v13828_v23  ;;  %v6968_v19 = vld [vmem:[#allocation2 + $0x12a] sm:$0xff]  ;;  %v5713_v41 = vadd.f32 %v13690_v35, %v5652_v37  ;;  %v5569_v59 = vpop.f32.mrf.mxu0 }
 0x2f7   : > { %v6456_v39 = vld [vmem:[#allocation2 + $0x121] sm:$0xff]  ;;  %v5714_v46 = vadd.f32 %v13690_v35, %v5653_v57  ;;  %6743 = vst.msk [vmem:[#allocation3 + $0x338] sm:$0xff] %vm5865_vm2, %v6711_v22  ;;  %v14953_v51 = vld [vmem:[#allocation69_spill] sm:$0xff]  ;;  %6745 = vst.msk [vmem:[#allocation3 + $0x388] sm:$0xff] %vm5865_vm2, %v6713_v49  ;;  %v4980_v49 = vpop.f32.mrf.mxu1 }
 0x2f8   : > { %6488 = vst.msk [vmem:[#allocation3 + $0x380] sm:$0xff] %vm5865_vm2, %v6456_v39  ;;  %v6967_v3 = vld [vmem:[#allocation2 + $0x122] sm:$0xff]  ;;  %v5045_v53 = vadd.f32 %v14953_v51, %v4436_v27  ;;  %v14955_v7 = vld [vmem:[#allocation73_spill] sm:$0xff]  ;;  %v13844_v40 = vld [vmem:[#allocation2 + $0x12a] sm:$0xff]  ;;  %v5767_v38 = vmax.f32 %v5713_v41, 0.0 }
 0x2f9   : > { %v14954_v25 = vld [vmem:[#allocation74_spill] sm:$0xff]  ;;  %6999 = vst.msk [vmem:[#allocation3 + $0x340] sm:$0xff] %vm5865_vm2, %v6967_v3  ;;  %v5768_v28 = vmax.f32 %v5714_v46, 0.0  ;;  %v5655_v60 = vadd.f32 %v10688_v29, %v14955_v7  ;;  %v14956_v1 = vld [vmem:[#allocation9_spill] sm:$0xff]  ;;  %7000 = vst.msk [vmem:[#allocation3 + $0x368] sm:$0xff] %vm5865_vm2, %v6968_v19  ;;  %6578 = vrot.lane.b32.xlu1 %v13515_v15, %s10848_s28 }
 0x2fa   : > { %v4438_v32 = vadd.f32 %v14954_v25, %v3828_v48  ;;  %v3830_v54 = vadd.f32 %v14956_v1, %v3221_v55  ;;  %5908 = vst.msk [vmem:[#allocation2 + $0x150] sm:$0xff] %vm5865_vm2, %v5853_v21  ;;  %v6252_v27 = vld [vmem:[#allocation2 + $0x90] sm:$0xff]  ;;  %6234 = vst.msk [vmem:[#allocation3 + $0x3f0] sm:$0xff] %vm5865_vm2, %v13844_v40  ;;  %v5654_v42 = vadd.f32 %v5569_v59, %v5045_v53  ;;  %v14957_v45 = vld [vmem:[#allocation71_spill] sm:$0xff]  ;;  %v10691_v48 = vpop.f32.mrf.mxu0  ;;  %v5855_v55 = vsel %vm5792_vm5, %v5767_v38, 0.0 }
 0x2fb   : > { %v6457_v9 = vld [vmem:[#allocation2 + $0x129] sm:$0xff]  ;;  %v5856_v16 = vsel %vm5781_vm4, %v5768_v28, 0.0  ;;  %v5716_v26 = vadd.f32 %v13690_v35, %v5655_v60  ;;  %6326 = vrot.lane.b32.xlu0 %v6252_v27, %s10848_s28  ;;  %v13859_v50 = vld [vmem:[#allocation2 + $0x140] sm:$0xff]  ;;  %v13868_v47 = vld [vmem:[#allocation2 + $0x91] sm:$0xff]  ;;  %5910 = vst.msk [vmem:[#allocation2 + $0x160] sm:$0xff] %vm5865_vm2, %v5855_v55 }
 0x2fc   : > { %6489 = vst.msk [vmem:[#allocation3 + $0x3a8] sm:$0xff] %vm5865_vm2, %v6457_v9  ;;  %v5047_v11 = vadd.f32 %v14957_v45, %v4438_v32  ;;  %v14958_v24 = vld [vmem:[#allocation76_spill] sm:$0xff]  ;;  %v6970_v52 = vld [vmem:[#allocation2 + $0x142] sm:$0xff]  ;;  %5911 = vst.msk [vmem:[#allocation2 + $0x168] sm:$0xff] %vm5865_vm2, %v5856_v16  ;;  %v5715_v63 = vadd.f32 %v13690_v35, %v5654_v42  ;;  %v5579_v3 = vpop.f32.mrf.mxu0 }
 0x2fd   : > { %v4440_v57 = vadd.f32 %v14958_v24, %v3830_v54  ;;  %7002 = vst.msk [vmem:[#allocation3 + $0x3b8] sm:$0xff] %vm5865_vm2, %v6970_v52  ;;  %v5770_v20 = vmax.f32 %v5716_v26, 0.0  ;;  %v14959_v22 = vld [vmem:[#allocation75_spill] sm:$0xff]  ;;  %v13870_v46 = vld [vmem:[#allocation2 + $0x13a] sm:$0xff]  ;;  %5979 = vst.msk [vmem:[#allocation3 + $0x438] sm:$0xff] %vm5865_vm2, %v13859_v50  ;;  %6580 = vrot.lane.b32.xlu1 %v13504_v0, %s10848_s28 }
 0x2fe   : > { %v5657_v39 = vadd.f32 %v10691_v48, %v14959_v22  ;;  %v13872_v37 = vld [vmem:[#allocation2 + $0x142] sm:$0xff]  ;;  %v13877_v51 = vld [vmem:[#allocation2 + $0x158] sm:$0xff]  ;;  %6235 = vst.msk [vmem:[#allocation3 + $0x418] sm:$0xff] %vm5865_vm2, %v13870_v46  ;;  %v5769_v32 = vmax.f32 %v5715_v63, 0.0  ;;  %v5656_v19 = vadd.f32 %v5579_v3, %v5047_v11  ;;  %v10694_v41 = vpop.f32.mrf.mxu0  ;;  %v6255_v3 = vld [vmem:[#allocation2 + $0xb0] sm:$0xff] }
 0x2ff   : > { %6236 = vst.msk [vmem:[#allocation3 + $0x440] sm:$0xff] %vm5865_vm2, %v13872_v37  ;;  %v6714_v61 = vld [vmem:[#allocation2 + $0x140] sm:$0xff]  ;;  %v5858_v25 = vsel %vm5792_vm5, %v5770_v20, 0.0  ;;  %6835 = vrot.lane.b32.xlu0 %v13868_v47, %s10848_s28  ;;  %5981 = vst.msk [vmem:[#allocation3 + $0x488] sm:$0xff] %vm5865_vm2, %v13877_v51  ;;  %v6716_v21 = vld [vmem:[#allocation2 + $0x158] sm:$0xff]  ;;  %v5049_v60 = vadd.f32 %v4980_v49, %v4440_v57 }
 0x300   : > { %v6458_v53 = vld [vmem:[#allocation2 + $0x139] sm:$0xff]  ;;  %v5718_v29 = vadd.f32 %v13690_v35, %v5657_v39  ;;  %6746 = vst.msk [vmem:[#allocation3 + $0x3b0] sm:$0xff] %vm5865_vm2, %v6714_v61  ;;  %v6459_v28 = vld [vmem:[#allocation2 + $0x141] sm:$0xff]  ;;  %5913 = vst.msk [vmem:[#allocation2 + $0x178] sm:$0xff] %vm5865_vm2, %v5858_v25  ;;  %v5717_v54 = vadd.f32 %v13690_v35, %v5656_v19  ;;  %v5589_v9 = vpop.f32.mrf.mxu0 }
 0x301   : > { %6490 = vst.msk [vmem:[#allocation3 + $0x3d0] sm:$0xff] %vm5865_vm2, %v6458_v53  ;;  %6748 = vst.msk [vmem:[#allocation3 + $0x400] sm:$0xff] %vm5865_vm2, %v6716_v21  ;;  %v6969_v7 = vld [vmem:[#allocation2 + $0x13a] sm:$0xff]  ;;  %v13899_v59 = vld [vmem:[#allocation2 + $0x150] sm:$0xff]  ;;  %v5658_v15 = vadd.f32 %v5589_v9, %v5049_v60  ;;  %6072 = vrot.lane.b32.xlu1 %v13868_v47, %s10848_s28 }
 0x302   : > { %6491 = vst.msk [vmem:[#allocation3 + $0x3f8] sm:$0xff] %vm5865_vm2, %v6459_v28  ;;  %5912 = vst.msk [vmem:[#allocation2 + $0x170] sm:$0xff] %vm5865_vm2, %v5769_v32  ;;  %v5772_v1 = vmax.f32 %v5718_v29, 0.0  ;;  %v13901_v27 = vld [vmem:[#allocation2 + $0x152] sm:$0xff]  ;;  %v6254_v16 = vld [vmem:[#allocation2 + $0xa8] sm:$0xff]  ;;  %v5771_v42 = vmax.f32 %v5717_v54, 0.0 }
 0x303   : > { %7001 = vst.msk [vmem:[#allocation3 + $0x390] sm:$0xff] %vm5865_vm2, %v6969_v7  ;;  %6237 = vst.msk [vmem:[#allocation3 + $0x468] sm:$0xff] %vm5865_vm2, %v13901_v27  ;;  %v6715_v38 = vld [vmem:[#allocation2 + $0x150] sm:$0xff]  ;;  %6330 = vrot.lane.b32.xlu0 %v6254_v16, %s10848_s28  ;;  %v13910_v45 = vld [vmem:[#allocation2 + $0x168] sm:$0xff]  ;;  %v5719_v48 = vadd.f32 %v13690_v35, %v5658_v15 }
 0x304   : > { %5980 = vst.msk [vmem:[#allocation3 + $0x460] sm:$0xff] %vm5865_vm2, %v13899_v59  ;;  %v6460_v26 = vld [vmem:[#allocation2 + $0x151] sm:$0xff]  ;;  %5915 = vst.msk [vmem:[#allocation2 + $0x188] sm:$0xff] %vm5865_vm2, %v5772_v1  ;;  %v6717_v11 = vld [vmem:[#allocation2 + $0x168] sm:$0xff]  ;;  %v5859_v52 = vsel %vm5781_vm4, %v5771_v42, 0.0 }
 0x305   : > { %6747 = vst.msk [vmem:[#allocation3 + $0x3d8] sm:$0xff] %vm5865_vm2, %v6715_v38  ;;  %6492 = vst.msk [vmem:[#allocation3 + $0x420] sm:$0xff] %vm5865_vm2, %v6460_v26  ;;  %v6971_v24 = vld [vmem:[#allocation2 + $0x152] sm:$0xff]  ;;  %v6972_v57 = vld [vmem:[#allocation2 + $0x15a] sm:$0xff]  ;;  %v5773_v22 = vmax.f32 %v5719_v48, 0.0  ;;  %6582 = vrot.lane.b32.xlu1 %v13544_v10, %s10848_s28 }
 0x306   : > { %5982 = vst.msk [vmem:[#allocation3 + $0x4b0] sm:$0xff] %vm5865_vm2, %v13910_v45  ;;  %6749 = vst.msk [vmem:[#allocation3 + $0x428] sm:$0xff] %vm5865_vm2, %v6717_v11  ;;  %v13923_v55 = vld [vmem:[#allocation2 + $0x15a] sm:$0xff]  ;;  %v6765_v32 = vld [vmem:[#allocation2 + $0xa9] sm:$0xff] }
 0x307   : > { %7003 = vst.msk [vmem:[#allocation3 + $0x3e0] sm:$0xff] %vm5865_vm2, %v6971_v24  ;;  %7004 = vst.msk [vmem:[#allocation3 + $0x408] sm:$0xff] %vm5865_vm2, %v6972_v57  ;;  %v6764_v20 = vld [vmem:[#allocation2 + $0x99] sm:$0xff]  ;;  %v5861_v0 = vsel %vm5792_vm5, %v5773_v22, 0.0  ;;  %v6766_v10 = vld [vmem:[#allocation2 + $0xb1] sm:$0xff] }
 0x308   : > { %5914 = vst.msk [vmem:[#allocation2 + $0x180] sm:$0xff] %vm5865_vm2, %v5859_v52  ;;  %6238 = vst.msk [vmem:[#allocation3 + $0x490] sm:$0xff] %vm5865_vm2, %v13923_v55  ;;  %v6461_v63 = vld [vmem:[#allocation2 + $0x159] sm:$0xff]  ;;  %6837 = vrot.lane.b32.xlu0 %v6764_v20, %s10848_s28  ;;  %v6257_v41 = vld [vmem:[#allocation2 + $0xc8] sm:$0xff] }
 0x309   : > { %6493 = vst.msk [vmem:[#allocation3 + $0x448] sm:$0xff] %vm5865_vm2, %v6461_v63  ;;  %v6974_v18 = vld [vmem:[#allocation2 + $0x172] sm:$0xff]  ;;  %v13938_v39 = vld [vmem:[#allocation2 + $0x16a] sm:$0xff]  ;;  %5916 = vst.msk [vmem:[#allocation2 + $0x190] sm:$0xff] %vm5865_vm2, %v5861_v0  ;;  %6074 = vrot.lane.b32.xlu1 %v6764_v20, %s10848_s28 }
 0x30a   : > { %v13931_v35 = vld [vmem:[#allocation2 + $0x170] sm:$0xff]  ;;  %7006 = vst.msk [vmem:[#allocation3 + $0x458] sm:$0xff] %vm5865_vm2, %v6974_v18  ;;  %6239 = vst.msk [vmem:[#allocation3 + $0x4b8] sm:$0xff] %vm5865_vm2, %v13938_v39  ;;  %v6256_v7 = vld [vmem:[#allocation2 + $0xc0] sm:$0xff] }
 0x30b   : > { %v13940_v49 = vld [vmem:[#allocation2 + $0x172] sm:$0xff]  ;;  %5983 = vst.msk [vmem:[#allocation3 + $0x4d8] sm:$0xff] %vm5865_vm2, %v13931_v35  ;;  %7005 = vst.msk [vmem:[#allocation3 + $0x430] sm:$0xff] %vm5865_vm2, %v13938_v39  ;;  %v6462_v47 = vld [vmem:[#allocation2 + $0x169] sm:$0xff] }
 0x30c   : > { %6240 = vst.msk [vmem:[#allocation3 + $0x4e0] sm:$0xff] %vm5865_vm2, %v13940_v49  ;;  %v6718_v12 = vld [vmem:[#allocation2 + $0x170] sm:$0xff]  ;;  %6332 = vrot.lane.b32.xlu0 %v6255_v3, %s10848_s28  ;;  %6494 = vst.msk [vmem:[#allocation3 + $0x470] sm:$0xff] %vm5865_vm2, %v6462_v47  ;;  %v6720_v61 = vld [vmem:[#allocation2 + $0x188] sm:$0xff] }
 0x30d   : > { %6750 = vst.msk [vmem:[#allocation3 + $0x450] sm:$0xff] %vm5865_vm2, %v6718_v12  ;;  %v6463_v53 = vld [vmem:[#allocation2 + $0x171] sm:$0xff]  ;;  %6752 = vst.msk [vmem:[#allocation3 + $0x4a0] sm:$0xff] %vm5865_vm2, %v6720_v61  ;;  %6584 = vrot.lane.b32.xlu1 %v13565_v58, %s10848_s28  ;;  %v6767_v60 = vld [vmem:[#allocation2 + $0xc1] sm:$0xff] }
 0x30e   : > { %6495 = vst.msk [vmem:[#allocation3 + $0x498] sm:$0xff] %vm5865_vm2, %v6463_v53  ;;  %v6258_v54 = vld [vmem:[#allocation2 + $0xd8] sm:$0xff]  ;;  %v6768_v58 = vld [vmem:[#allocation2 + $0xc9] sm:$0xff]  ;;  %v6259_v26 = vld [vmem:[#allocation2 + $0xe0] sm:$0xff] }
 0x30f   : > { %v13956_v25 = vld [vmem:[#allocation2 + $0x182] sm:$0xff]  ;;  %v7011_v38 = vld [vmem:[#allocation3] sm:$0xff]  ;;  %v6261_v24 = vld [vmem:[#allocation2 + $0xf8] sm:$0xff] }
 0x310   : > { %v6719_v29 = vld [vmem:[#allocation2 + $0x180] sm:$0xff]  ;;  %7007 = vst.msk [vmem:[#allocation3 + $0x480] sm:$0xff] %vm5865_vm2, %v13956_v25  ;;  %6839 = vrot.lane.b32.xlu0 %v6765_v32, %s10848_s28  ;;  %v6976_v21 = vld [vmem:[#allocation2 + $0x18a] sm:$0xff]  ;;  %v7016_v48 = vld [vmem:[#allocation3 + $0x28] sm:$0xff] }
 0x311   : > { %v6464_v19 = vld [vmem:[#allocation2 + $0x181] sm:$0xff]  ;;  %6751 = vst.msk [vmem:[#allocation3 + $0x478] sm:$0xff] %vm5865_vm2, %v6719_v29  ;;  %7008 = vst.msk [vmem:[#allocation3 + $0x4a8] sm:$0xff] %vm5865_vm2, %v6976_v21  ;;  %v6465_v28 = vld [vmem:[#allocation2 + $0x189] sm:$0xff]  ;;  %6076 = vrot.lane.b32.xlu1 %v6765_v32, %s10848_s28 }
 0x312   : > { %6496 = vst.msk [vmem:[#allocation3 + $0x4c0] sm:$0xff] %vm5865_vm2, %v6464_v19  ;;  %6497 = vst.msk [vmem:[#allocation3 + $0x4e8] sm:$0xff] %vm5865_vm2, %v6465_v28  ;;  %v6307_v1 = vpop.permute.xlu0 %6306  ;;  %v7240_v11 = vld [vmem:[%s14653_s3 + $0x228] sm:$0xff]  ;;  %v13999_v20 = vld [vmem:[#allocation2 + $0xd9] sm:$0xff] }
 0x313   : > { %6402 = vst.msk [vmem:[#allocation3 + $0x8] sm:$0xff] %vm6144_vm3, %v6307_v1  ;;  %v7238_v22 = vld [vmem:[%s14653_s3 + $0x218] sm:$0xff]  ;;  %v14013_v0 = vld [vmem:[#allocation2 + $0xe1] sm:$0xff]  ;;  %v7237_v21 = vld [vmem:[%s14653_s3 + $0x210] sm:$0xff] }
 0x314   : > { %6841 = vrot.lane.b32.xlu0 %v6766_v10, %s10848_s28  ;;  %v14021_v53 = vld [vmem:[#allocation2 + $0xf1] sm:$0xff]  ;;  %v14032_v28 = vld [vmem:[#allocation2 + $0xf9] sm:$0xff] }
 0x315   : > { %6078 = vrot.lane.b32.xlu1 %v6766_v10, %s10848_s28 }
 0x317   : > { %v6309_v9 = vpop.permute.xlu1 %6308 }
 0x318   : > { %6336 = vrot.lane.b32.xlu0 %v6257_v41, %s10848_s28  ;;  %6403 = vst.msk [vmem:[#allocation3 + $0x30] sm:$0xff] %vm6144_vm3, %v6309_v9 }
 0x319   : > { %6586 = vrot.lane.b32.xlu1 %v13597_v33, %s10848_s28  ;;  %v6313_v16 = vpop.permute.xlu0 %6312 }
 0x31a   : > { %6405 = vst.msk [vmem:[#allocation3 + $0x80] sm:$0xff] %vm6144_vm3, %v6313_v16  ;;  %v7012_v33 = vld [vmem:[#allocation3 + $0x8] sm:$0xff] }
 0x31b   : > { %7410 = vmatprep.mubr.f32.mxu1 %v7012_v33  ;;  %v6053_v42 = vpop.permute.xlu1 %6052 }
 0x31c   : > { %6334 = vrot.lane.b32.xlu0 %v6256_v7, %s10848_s28  ;;  %6147 = vst.msk [vmem:[#allocation3 + $0x50] sm:$0xff] %vm6144_vm3, %v6053_v42  ;;  %7411 = vmatmul.mubr.f32.vlgmr.msra.gmra.mxu1 %v7011_v38 }
 0x31d   : > { %6588 = vrot.lane.b32.xlu1 %v13586_v34, %s10848_s28  ;;  %v7241_v34 = vld [vmem:[%s14653_s3 + $0x230] sm:$0xff]  ;;  %v6311_v15 = vpop.permute.xlu0 %6310  ;;  %10699 = vmatpush3.msra.mxu1 %v13719_v36  ;;  %v7239_v36 = vld [vmem:[%s14653_s3 + $0x220] sm:$0xff] }
 0x31e   : > { %6404 = vst.msk [vmem:[#allocation3 + $0x58] sm:$0xff] %vm6144_vm3, %v6311_v15  ;;  %10700 = vmatprep.subr.mxu1 %v7241_v34 }
 0x31f   : > { %v6055_v57 = vpop.permute.xlu1 %6054  ;;  %v7017_v52 = vld [vmem:[#allocation3 + $0x30] sm:$0xff]  ;;  %10701 = vmatpush3.msra.mxu1 %v7241_v34 }
 0x320   : > { %6843 = vrot.lane.b32.xlu0 %v6767_v60, %s10848_s28  ;;  %6148 = vst.msk [vmem:[#allocation3 + $0x78] sm:$0xff] %vm6144_vm3, %v6055_v57  ;;  %7415 = vmatprep.mubr.f32.mxu1 %v7017_v52  ;;  %v14067_v57 = vld [vmem:[#allocation2 + $0x129] sm:$0xff] }
 0x321   : > { %6080 = vrot.lane.b32.xlu1 %v6767_v60, %s10848_s28  ;;  %10702 = vmatprep.subr.mxu1 %v7240_v11 }
 0x322   : > { %7416 = vmatmul.mubr.f32.gmra.mxu1 %v7016_v48 }
 0x323   : > { %v6820_v63 = vpop.permute.xlu0 %6819  ;;  %10703 = vmatpush3.msra.mxu1 %v7240_v11  ;;  %v7021_v47 = vld [vmem:[#allocation3 + $0x50] sm:$0xff]  ;;  %v7236_v11 = vld [vmem:[%s14653_s3 + $0x208] sm:$0xff] }
 0x324   : > { %6338 = vrot.lane.b32.xlu0 %v6258_v54, %s10848_s28  ;;  %6915 = vst.msk [vmem:[#allocation3 + $0x18] sm:$0xff] %vm6144_vm3, %v6820_v63  ;;  %10704 = vmatprep.subr.mxu1 %v7239_v36  ;;  %v14075_v63 = vld [vmem:[#allocation2 + $0x139] sm:$0xff] }
 0x325   : > { %6082 = vrot.lane.b32.xlu1 %v6768_v58, %s10848_s28  ;;  %v6563_v18 = vpop.permute.xlu1 %6562  ;;  %10705 = vmatpush3.msra.mxu1 %v7239_v36  ;;  %v7022_v12 = vld [vmem:[#allocation3 + $0x58] sm:$0xff] }
 0x326   : > { %6658 = vst.msk [vmem:[#allocation3 + $0x10] sm:$0xff] %vm6144_vm3, %v6563_v18  ;;  %10706 = vmatprep.subr.mxu1 %v7238_v22  ;;  %7420 = vmatprep.mubr.f32.mxu1 %v7022_v12 }
 0x327   : > { %v6315_v3 = vpop.permute.xlu0 %6314  ;;  %10707 = vmatpush3.msra.mxu1 %v7238_v22  ;;  %v7026_v19 = vld [vmem:[#allocation3 + $0x78] sm:$0xff] }
 0x328   : > { %6845 = vrot.lane.b32.xlu0 %v6768_v58, %s10848_s28  ;;  %6406 = vst.msk [vmem:[#allocation3 + $0xa8] sm:$0xff] %vm6144_vm3, %v6315_v3  ;;  %7421 = vmatmul.mubr.f32.gmra.mxu1 %v7021_v47  ;;  %v14083_v3 = vld [vmem:[#allocation2 + $0x141] sm:$0xff] }
 0x329   : > { %6084 = vrot.lane.b32.xlu1 %v13999_v20, %s10848_s28  ;;  %v6565_v61 = vpop.permute.xlu1 %6564  ;;  %10708 = vmatprep.subr.mxu1 %v7237_v21 }
 0x32a   : > { %6659 = vst.msk [vmem:[#allocation3 + $0x38] sm:$0xff] %vm6144_vm3, %v6565_v61  ;;  %10709 = vmatpush3.msra.mxu1 %v7237_v21 }
 0x32b   : > { %v7014_v29 = vld [vmem:[#allocation3 + $0x18] sm:$0xff]  ;;  %10710 = vmatprep.subr.mxu1 %v7236_v11 }
 0x32c   : > { %6340 = vrot.lane.b32.xlu0 %v6259_v26, %s10848_s28  ;;  %v6822_v32 = vpop.permute.xlu0 %6821  ;;  %7635 = vmatprep.mubr.f32.mxu0 %v7014_v29 }
 0x32d   : > { %6086 = vrot.lane.b32.xlu1 %v14013_v0, %s10848_s28  ;;  %6916 = vst.msk [vmem:[#allocation3 + $0x40] sm:$0xff] %vm6144_vm3, %v6822_v32  ;;  %v7013_v10 = vld [vmem:[#allocation3 + $0x10] sm:$0xff]  ;;  %10711 = vmatpush3.msra.mxu1 %v7236_v11 }
 0x32e   : > { %7636 = vmatmul.mubr.f32.vlgmr.msra.gmra.mxu0 %v7013_v10 }
 0x32f   : > { %v7032_v7 = vld [vmem:[#allocation3 + $0xa8] sm:$0xff] }
 0x330   : > { %6344 = vrot.lane.b32.xlu0 %v6261_v24, %s10848_s28 }
 0x331   : > { %6088 = vrot.lane.b32.xlu1 %v14021_v53, %s10848_s28  ;;  %v6317_v41 = vpop.permute.xlu0 %6316  ;;  %v7018_v58 = vld [vmem:[#allocation3 + $0x38] sm:$0xff] }
 0x332   : > { %6407 = vst.msk [vmem:[#allocation3 + $0xd0] sm:$0xff] %vm6144_vm3, %v6317_v41 }
 0x334   : > { %6342 = vrot.lane.b32.xlu0 %v13709_v44, %s10848_s28  ;;  %v7027_v44 = vld [vmem:[#allocation3 + $0x80] sm:$0xff] }
 0x335   : > { %7425 = vmatprep.mubr.f32.mxu1 %v7027_v44  ;;  %6090 = vrot.lane.b32.xlu1 %v14032_v28, %s10848_s28  ;;  %v7019_v54 = vld [vmem:[#allocation3 + $0x40] sm:$0xff] }
 0x336   : > { %7426 = vmatmul.mubr.f32.gmra.mxu1 %v7026_v19  ;;  %v6824_v1 = vpop.permute.xlu0 %6823  ;;  %7640 = vmatprep.mubr.f32.mxu0 %v7019_v54  ;;  %v7235_v19 = vld [vmem:[%s14653_s3 + $0x200] sm:$0xff] }
 0x337   : > { %7430 = vmatprep.mubr.f32.mxu1 %v7032_v7  ;;  %6917 = vst.msk [vmem:[#allocation3 + $0x68] sm:$0xff] %vm6144_vm3, %v6824_v1  ;;  %7641 = vmatmul.mubr.f32.gmra.mxu0 %v7018_v58  ;;  %v6272_v54 = vld [vmem:[#allocation2 + $0x180] sm:$0xff] }
 0x338   : > { %6346 = vrot.lane.b32.xlu0 %v13728_v17, %s10848_s28  ;;  %v6057_v17 = vpop.permute.xlu1 %6056  ;;  %10712 = vmatprep.subr.mxu1 %v7235_v19 }
 0x339   : > { %6149 = vst.msk [vmem:[#allocation3 + $0xa0] sm:$0xff] %vm6144_vm3, %v6057_v17  ;;  %v7037_v33 = vld [vmem:[#allocation3 + $0xd0] sm:$0xff]  ;;  %v14100_v17 = vld [vmem:[#allocation2 + $0x151] sm:$0xff]  ;;  %10713 = vmatpush3.msra.mxu1 %v7235_v19 }
 0x33b   : > { %v6826_v38 = vpop.permute.xlu0 %6825 }
 0x33c   : > { %6348 = vrot.lane.b32.xlu0 %v13766_v14, %s10848_s28  ;;  %v6567_v60 = vpop.permute.xlu1 %6566  ;;  %v14040_v14 = vld [vmem:[#allocation2 + $0x109] sm:$0xff]  ;;  %6918 = vst.msk [vmem:[#allocation3 + $0x90] sm:$0xff] %vm6144_vm3, %v6826_v38 }
 0x33d   : > { %6660 = vst.msk [vmem:[#allocation3 + $0x60] sm:$0xff] %vm6144_vm3, %v6567_v60  ;;  %6092 = vrot.lane.b32.xlu1 %v14040_v14, %s10848_s28 }
 0x33e   : > { %v7024_v34 = vld [vmem:[#allocation3 + $0x68] sm:$0xff] }
 0x33f   : > { %v6321_v42 = vpop.permute.xlu0 %6320  ;;  %7645 = vmatprep.mubr.f32.mxu0 %v7024_v34 }
 0x340   : > { %6352 = vrot.lane.b32.xlu0 %v13787_v62, %s10848_s28  ;;  %v6059_v9 = vpop.permute.xlu1 %6058  ;;  %v7031_v16 = vld [vmem:[#allocation3 + $0xa0] sm:$0xff]  ;;  %6409 = vst.msk [vmem:[#allocation3 + $0x120] sm:$0xff] %vm6144_vm3, %v6321_v42 }
 0x341   : > { %6150 = vst.msk [vmem:[#allocation3 + $0xc8] sm:$0xff] %vm6144_vm3, %v6059_v9  ;;  %7431 = vmatmul.mubr.f32.gmra.mxu1 %v7031_v16  ;;  %v14048_v62 = vld [vmem:[#allocation2 + $0x111] sm:$0xff] }
 0x342   : > { %6094 = vrot.lane.b32.xlu1 %v14048_v62, %s10848_s28  ;;  %7435 = vmatprep.mubr.f32.mxu1 %v7037_v33  ;;  %v6273_v33 = vld [vmem:[#allocation2 + $0x188] sm:$0xff]  ;;  %v14122_v42 = vld [vmem:[#allocation2 + $0x171] sm:$0xff] }
 0x343   : > { %v6319_v52 = vpop.permute.xlu0 %6318  ;;  %v7029_v48 = vld [vmem:[#allocation3 + $0x90] sm:$0xff] }
 0x344   : > { %6350 = vrot.lane.b32.xlu0 %v13814_v13, %s10848_s28  ;;  %v6569_v26 = vpop.permute.xlu1 %6568  ;;  %v14056_v13 = vld [vmem:[#allocation2 + $0x121] sm:$0xff]  ;;  %v7023_v15 = vld [vmem:[#allocation3 + $0x60] sm:$0xff]  ;;  %6408 = vst.msk [vmem:[#allocation3 + $0xf8] sm:$0xff] %vm6144_vm3, %v6319_v52 }
 0x345   : > { %6661 = vst.msk [vmem:[#allocation3 + $0x88] sm:$0xff] %vm6144_vm3, %v6569_v26  ;;  %7646 = vmatmul.mubr.f32.gmra.mxu0 %v7023_v15 }
 0x346   : > { %6096 = vrot.lane.b32.xlu1 %v14056_v13, %s10848_s28  ;;  %7650 = vmatprep.mubr.f32.mxu0 %v7029_v48 }
 0x347   : > { %v6828_v22 = vpop.permute.xlu0 %6827  ;;  %v7047_v44 = vld [vmem:[#allocation3 + $0x120] sm:$0xff] }
 0x348   : > { %6354 = vrot.lane.b32.xlu0 %v13828_v23, %s10848_s28  ;;  %v6061_v24 = vpop.permute.xlu1 %6060  ;;  %v7036_v23 = vld [vmem:[#allocation3 + $0xc8] sm:$0xff]  ;;  %6919 = vst.msk [vmem:[#allocation3 + $0xb8] sm:$0xff] %vm6144_vm3, %v6828_v22 }
 0x349   : > { %6151 = vst.msk [vmem:[#allocation3 + $0xf0] sm:$0xff] %vm6144_vm3, %v6061_v24  ;;  %7436 = vmatmul.mubr.f32.gmra.mxu1 %v7036_v23 }
 0x34a   : > { %6098 = vrot.lane.b32.xlu1 %v14067_v57, %s10848_s28 }
 0x34b   : > { %v7042_v12 = vld [vmem:[#allocation3 + $0xf8] sm:$0xff] }
 0x34c   : > { %6356 = vrot.lane.b32.xlu0 %v13859_v50, %s10848_s28  ;;  %v6063_v36 = vpop.permute.xlu1 %6062  ;;  %v7028_v50 = vld [vmem:[#allocation3 + $0x88] sm:$0xff]  ;;  %7440 = vmatprep.mubr.f32.mxu1 %v7042_v12 }
 0x34d   : > { %6152 = vst.msk [vmem:[#allocation3 + $0x118] sm:$0xff] %vm6144_vm3, %v6063_v36  ;;  %7651 = vmatmul.mubr.f32.gmra.mxu0 %v7028_v50 }
 0x34e   : > { %6100 = vrot.lane.b32.xlu1 %v14075_v63, %s10848_s28 }
 0x34f   : > { %v7034_v32 = vld [vmem:[#allocation3 + $0xb8] sm:$0xff] }
 0x350   : > { %6360 = vrot.lane.b32.xlu0 %v13877_v51, %s10848_s28  ;;  %v6571_v18 = vpop.permute.xlu1 %6570  ;;  %v6323_v51 = vpop.permute.xlu0 %6322  ;;  %v7041_v47 = vld [vmem:[#allocation3 + $0xf0] sm:$0xff]  ;;  %7655 = vmatprep.mubr.f32.mxu0 %v7034_v32 }
 0x351   : > { %6662 = vst.msk [vmem:[#allocation3 + $0xb0] sm:$0xff] %vm6144_vm3, %v6571_v18  ;;  %6410 = vst.msk [vmem:[#allocation3 + $0x148] sm:$0xff] %vm6144_vm3, %v6323_v51  ;;  %7441 = vmatmul.mubr.f32.gmra.mxu1 %v7041_v47 }
 0x352   : > { %6102 = vrot.lane.b32.xlu1 %v14083_v3, %s10848_s28  ;;  %7445 = vmatprep.mubr.f32.mxu1 %v7047_v44 }
 0x354   : > { %6358 = vrot.lane.b32.xlu0 %v13899_v59, %s10848_s28  ;;  %v6573_v61 = vpop.permute.xlu1 %6572  ;;  %v6830_v59 = vpop.permute.xlu0 %6829  ;;  %v7046_v29 = vld [vmem:[#allocation3 + $0x118] sm:$0xff] }
 0x355   : > { %6663 = vst.msk [vmem:[#allocation3 + $0xd8] sm:$0xff] %vm6144_vm3, %v6573_v61  ;;  %6920 = vst.msk [vmem:[#allocation3 + $0xe0] sm:$0xff] %vm6144_vm3, %v6830_v59  ;;  %7446 = vmatmul.mubr.f32.gmra.mxu1 %v7046_v29 }
 0x356   : > { %6590 = vrot.lane.b32.xlu1 %v13623_v5, %s10848_s28 }
 0x358   : > { %6847 = vrot.lane.b32.xlu0 %v13999_v20, %s10848_s28  ;;  %v6065_v21 = vpop.permute.xlu1 %6064  ;;  %v7033_v20 = vld [vmem:[#allocation3 + $0xb0] sm:$0xff]  ;;  %v6325_v5 = vpop.permute.xlu0 %6324  ;;  %v7052_v10 = vld [vmem:[#allocation3 + $0x148] sm:$0xff] }
 0x359   : > { %6153 = vst.msk [vmem:[#allocation3 + $0x140] sm:$0xff] %vm6144_vm3, %v6065_v21  ;;  %7656 = vmatmul.mubr.f32.gmra.mxu0 %v7033_v20  ;;  %6411 = vst.msk [vmem:[#allocation3 + $0x170] sm:$0xff] %vm6144_vm3, %v6325_v5  ;;  %7450 = vmatprep.mubr.f32.mxu1 %v7052_v10  ;;  %v10614_v11 = vpop.f32.mrf.mxu1 }
 0x35a   : > { %6104 = vrot.lane.b32.xlu1 %v14100_v17, %s10848_s28  ;;  %v6722_v11 = vld [vmem:[#allocation2 + $0x1a0] sm:$0xff] }
 0x35b   : > { %v4990_v48 = vpop.f32.mrf.mxu1  ;;  %6754 = vst.msk [vmem:[#allocation3 + $0x4f0] sm:$0xff] %vm5865_vm2, %v6722_v11 }
 0x35c   : > { %6362 = vrot.lane.b32.xlu0 %v13910_v45, %s10848_s28  ;;  %v6575_v41 = vpop.permute.xlu1 %6574  ;;  %v14108_v45 = vld [vmem:[#allocation2 + $0x159] sm:$0xff]  ;;  %v7039_v60 = vld [vmem:[#allocation3 + $0xe0] sm:$0xff]  ;;  %v7038_v1 = vld [vmem:[#allocation3 + $0xd8] sm:$0xff] }
 0x35d   : > { %6664 = vst.msk [vmem:[#allocation3 + $0x100] sm:$0xff] %vm6144_vm3, %v6575_v41  ;;  %v6832_v7 = vpop.permute.xlu0 %6831  ;;  %7660 = vmatprep.mubr.f32.mxu0 %v7039_v60  ;;  %v6784_v48 = vld [vmem:[#allocation2 + $0x189] sm:$0xff] }
 0x35e   : > { %6106 = vrot.lane.b32.xlu1 %v14108_v45, %s10848_s28  ;;  %6921 = vst.msk [vmem:[#allocation3 + $0x108] sm:$0xff] %vm6144_vm3, %v6832_v7  ;;  %7661 = vmatmul.mubr.f32.gmra.mxu0 %v7038_v1 }
 0x360   : > { %6364 = vrot.lane.b32.xlu0 %v13931_v35, %s10848_s28  ;;  %v6067_v58 = vpop.permute.xlu1 %6066  ;;  %v7051_v9 = vld [vmem:[#allocation3 + $0x140] sm:$0xff]  ;;  %v7057_v38 = vld [vmem:[#allocation3 + $0x170] sm:$0xff] }
 0x361   : > { %6154 = vst.msk [vmem:[#allocation3 + $0x168] sm:$0xff] %vm6144_vm3, %v6067_v58  ;;  %7451 = vmatmul.mubr.f32.gmra.mxu1 %v7051_v9  ;;  %v14115_v35 = vld [vmem:[#allocation2 + $0x169] sm:$0xff]  ;;  %v6834_v16 = vpop.permute.xlu0 %6833 }
 0x362   : > { %6108 = vrot.lane.b32.xlu1 %v14115_v35, %s10848_s28  ;;  %6922 = vst.msk [vmem:[#allocation3 + $0x130] sm:$0xff] %vm6144_vm3, %v6834_v16  ;;  %7455 = vmatprep.mubr.f32.mxu1 %v7057_v38 }
 0x364   : > { %6366 = vrot.lane.b32.xlu0 %v6272_v54, %s10848_s28  ;;  %v6577_v26 = vpop.permute.xlu1 %6576  ;;  %v7043_v24 = vld [vmem:[#allocation3 + $0x100] sm:$0xff] }
 0x365   : > { %6665 = vst.msk [vmem:[#allocation3 + $0x128] sm:$0xff] %vm6144_vm3, %v6577_v26  ;;  %v7044_v15 = vld [vmem:[#allocation3 + $0x108] sm:$0xff] }
 0x366   : > { %v6329_v34 = vpop.permute.xlu0 %6328  ;;  %6110 = vrot.lane.b32.xlu1 %v14122_v42, %s10848_s28  ;;  %7665 = vmatprep.mubr.f32.mxu0 %v7044_v15  ;;  %v6783_v15 = vld [vmem:[#allocation2 + $0x181] sm:$0xff] }
 0x367   : > { %6413 = vst.msk [vmem:[#allocation3 + $0x1c0] sm:$0xff] %vm6144_vm3, %v6329_v34  ;;  %7666 = vmatmul.mubr.f32.gmra.mxu0 %v7043_v24 }
 0x368   : > { %6368 = vrot.lane.b32.xlu0 %v6273_v33, %s10848_s28  ;;  %v6069_v23 = vpop.permute.xlu1 %6068  ;;  %v7056_v52 = vld [vmem:[#allocation3 + $0x168] sm:$0xff] }
 0x369   : > { %6155 = vst.msk [vmem:[#allocation3 + $0x190] sm:$0xff] %vm6144_vm3, %v6069_v23  ;;  %7456 = vmatmul.mubr.f32.gmra.mxu1 %v7056_v52  ;;  %v7049_v50 = vld [vmem:[#allocation3 + $0x130] sm:$0xff]  ;;  %v6721_v33 = vld [vmem:[#allocation2 + $0x198] sm:$0xff] }
 0x36a   : > { %6592 = vrot.lane.b32.xlu1 %v13649_v6, %s10848_s28  ;;  %7670 = vmatprep.mubr.f32.mxu0 %v7049_v50  ;;  %6753 = vst.msk [vmem:[#allocation3 + $0x4c8] sm:$0xff] %vm5865_vm2, %v6721_v33  ;;  %v6977_v52 = vld [vmem:[#allocation2 + $0x19a] sm:$0xff] }
 0x36b   : > { %7009 = vst.msk [vmem:[#allocation3 + $0x4d0] sm:$0xff] %vm5865_vm2, %v6977_v52 }
 0x36c   : > { %6849 = vrot.lane.b32.xlu0 %v14013_v0, %s10848_s28  ;;  %v6071_v22 = vpop.permute.xlu1 %6070  ;;  %v7048_v18 = vld [vmem:[#allocation3 + $0x128] sm:$0xff] }
 0x36d   : > { %v6327_v36 = vpop.permute.xlu0 %6326  ;;  %6156 = vst.msk [vmem:[#allocation3 + $0x1b8] sm:$0xff] %vm6144_vm3, %v6071_v22  ;;  %7671 = vmatmul.mubr.f32.gmra.mxu0 %v7048_v18 }
 0x36e   : > { %6412 = vst.msk [vmem:[#allocation3 + $0x198] sm:$0xff] %vm6144_vm3, %v6327_v36  ;;  %6594 = vrot.lane.b32.xlu1 %v13672_v30, %s10848_s28  ;;  %v7067_v30 = vld [vmem:[#allocation3 + $0x1c0] sm:$0xff]  ;;  %v6978_v36 = vld [vmem:[#allocation2 + $0x1a2] sm:$0xff] }
 0x36f   : > { %7010 = vst.msk [vmem:[#allocation3 + $0x4f8] sm:$0xff] %vm5865_vm2, %v6978_v36 }
 0x370   : > { %6851 = vrot.lane.b32.xlu0 %v14021_v53, %s10848_s28  ;;  %v6579_v51 = vpop.permute.xlu1 %6578  ;;  %v7061_v12 = vld [vmem:[#allocation3 + $0x190] sm:$0xff] }
 0x371   : > { %v6836_v0 = vpop.permute.xlu0 %6835  ;;  %6666 = vst.msk [vmem:[#allocation3 + $0x150] sm:$0xff] %vm6144_vm3, %v6579_v51 }
 0x372   : > { %6923 = vst.msk [vmem:[#allocation3 + $0x158] sm:$0xff] %vm6144_vm3, %v6836_v0  ;;  %6596 = vrot.lane.b32.xlu1 %v13674_v43, %s10848_s28 }
 0x374   : > { %6853 = vrot.lane.b32.xlu0 %v14032_v28, %s10848_s28  ;;  %v6581_v47 = vpop.permute.xlu1 %6580  ;;  %v7066_v43 = vld [vmem:[#allocation3 + $0x1b8] sm:$0xff] }
 0x375   : > { %v6331_v6 = vpop.permute.xlu0 %6330  ;;  %v7062_v53 = vld [vmem:[#allocation3 + $0x198] sm:$0xff]  ;;  %6667 = vst.msk [vmem:[#allocation3 + $0x178] sm:$0xff] %vm6144_vm3, %v6581_v47 }
 0x376   : > { %6414 = vst.msk [vmem:[#allocation3 + $0x1e8] sm:$0xff] %vm6144_vm3, %v6331_v6  ;;  %7460 = vmatprep.mubr.f32.mxu1 %v7062_v53  ;;  %6598 = vrot.lane.b32.xlu1 %v13711_v56, %s10848_s28  ;;  %v6786_v53 = vld [vmem:[#allocation2 + $0x1a1] sm:$0xff] }
 0x377   : > { %7461 = vmatmul.mubr.f32.gmra.mxu1 %v7061_v12 }
 0x378   : > { %6855 = vrot.lane.b32.xlu0 %v14040_v14, %s10848_s28  ;;  %7465 = vmatprep.mubr.f32.mxu1 %v7067_v30  ;;  %v6073_v44 = vpop.permute.xlu1 %6072  ;;  %v7053_v59 = vld [vmem:[#allocation3 + $0x150] sm:$0xff]  ;;  %v10697_v14 = vpop.f32.mrf.mxu0 }
 0x379   : > { %v7054_v61 = vld [vmem:[#allocation3 + $0x158] sm:$0xff]  ;;  %6157 = vst.msk [vmem:[#allocation3 + $0x1e0] sm:$0xff] %vm6144_vm3, %v6073_v44 }
 0x37a   : > { %v6838_v28 = vpop.permute.xlu0 %6837  ;;  %7675 = vmatprep.mubr.f32.mxu0 %v7054_v61  ;;  %6600 = vrot.lane.b32.xlu1 %v13744_v2, %s10848_s28  ;;  %v5599_v29 = vpop.f32.mrf.mxu0 }
 0x37b   : > { %6924 = vst.msk [vmem:[#allocation3 + $0x180] sm:$0xff] %vm6144_vm3, %v6838_v28  ;;  %7466 = vmatmul.mubr.f32.gmra.mxu1 %v7066_v43  ;;  %7676 = vmatmul.mubr.f32.gmra.mxu0 %v7053_v59 }
 0x37c   : > { %6857 = vrot.lane.b32.xlu0 %v14048_v62, %s10848_s28  ;;  %v6583_v19 = vpop.permute.xlu1 %6582  ;;  %v7058_v2 = vld [vmem:[#allocation3 + $0x178] sm:$0xff] }
 0x37d   : > { %v7072_v56 = vld [vmem:[#allocation3 + $0x1e8] sm:$0xff]  ;;  %6668 = vst.msk [vmem:[#allocation3 + $0x1a0] sm:$0xff] %vm6144_vm3, %v6583_v19 }
 0x37e   : > { %v6333_v32 = vpop.permute.xlu0 %6332  ;;  %7470 = vmatprep.mubr.f32.mxu1 %v7072_v56  ;;  %6602 = vrot.lane.b32.xlu1 %v13777_v8, %s10848_s28 }
 0x37f   : > { %6415 = vst.msk [vmem:[#allocation3 + $0x210] sm:$0xff] %vm6144_vm3, %v6333_v32 }
 0x380   : > { %6859 = vrot.lane.b32.xlu0 %v14056_v13, %s10848_s28  ;;  %v6075_v20 = vpop.permute.xlu1 %6074  ;;  %v7071_v5 = vld [vmem:[#allocation3 + $0x1e0] sm:$0xff] }
 0x381   : > { %6158 = vst.msk [vmem:[#allocation3 + $0x208] sm:$0xff] %vm6144_vm3, %v6075_v20  ;;  %7471 = vmatmul.mubr.f32.gmra.mxu1 %v7071_v5 }
 0x382   : > { %v6840_v62 = vpop.permute.xlu0 %6839  ;;  %v7059_v21 = vld [vmem:[#allocation3 + $0x180] sm:$0xff]  ;;  %6604 = vrot.lane.b32.xlu1 %v13779_v31, %s10848_s28 }
 0x383   : > { %6925 = vst.msk [vmem:[#allocation3 + $0x1a8] sm:$0xff] %vm6144_vm3, %v6840_v62  ;;  %7680 = vmatprep.mubr.f32.mxu0 %v7059_v21 }
 0x384   : > { %7681 = vmatmul.mubr.f32.gmra.mxu0 %v7058_v2  ;;  %6861 = vrot.lane.b32.xlu0 %v14067_v57, %s10848_s28  ;;  %v6585_v8 = vpop.permute.xlu1 %6584  ;;  %v7063_v7 = vld [vmem:[#allocation3 + $0x1a0] sm:$0xff] }
 0x385   : > { %6669 = vst.msk [vmem:[#allocation3 + $0x1c8] sm:$0xff] %vm6144_vm3, %v6585_v8 }
 0x386   : > { %v6842_v13 = vpop.permute.xlu0 %6841  ;;  %v7077_v10 = vld [vmem:[#allocation3 + $0x210] sm:$0xff]  ;;  %6606 = vrot.lane.b32.xlu1 %v13816_v4, %s10848_s28 }
 0x387   : > { %6926 = vst.msk [vmem:[#allocation3 + $0x1d0] sm:$0xff] %vm6144_vm3, %v6842_v13  ;;  %7475 = vmatprep.mubr.f32.mxu1 %v7077_v10 }
 0x388   : > { %6863 = vrot.lane.b32.xlu0 %v14075_v63, %s10848_s28  ;;  %v6077_v31 = vpop.permute.xlu1 %6076  ;;  %v7076_v60 = vld [vmem:[#allocation3 + $0x208] sm:$0xff] }
 0x389   : > { %6159 = vst.msk [vmem:[#allocation3 + $0x230] sm:$0xff] %vm6144_vm3, %v6077_v31  ;;  %7476 = vmatmul.mubr.f32.gmra.mxu1 %v7076_v60 }
 0x38a   : > { %v6337_v41 = vpop.permute.xlu0 %6336  ;;  %v7064_v57 = vld [vmem:[#allocation3 + $0x1a8] sm:$0xff]  ;;  %6608 = vrot.lane.b32.xlu1 %v13844_v40, %s10848_s28 }
 0x38b   : > { %6417 = vst.msk [vmem:[#allocation3 + $0x260] sm:$0xff] %vm6144_vm3, %v6337_v41  ;;  %7685 = vmatprep.mubr.f32.mxu0 %v7064_v57 }
 0x38c   : > { %7686 = vmatmul.mubr.f32.gmra.mxu0 %v7063_v7  ;;  %6865 = vrot.lane.b32.xlu0 %v14083_v3, %s10848_s28  ;;  %v6079_v4 = vpop.permute.xlu1 %6078  ;;  %v7068_v54 = vld [vmem:[#allocation3 + $0x1c8] sm:$0xff] }
 0x38d   : > { %6160 = vst.msk [vmem:[#allocation3 + $0x258] sm:$0xff] %vm6144_vm3, %v6079_v4 }
 0x38e   : > { %v6335_v63 = vpop.permute.xlu0 %6334  ;;  %v7069_v1 = vld [vmem:[#allocation3 + $0x1d0] sm:$0xff]  ;;  %6610 = vrot.lane.b32.xlu1 %v13870_v46, %s10848_s28 }
 0x38f   : > { %6416 = vst.msk [vmem:[#allocation3 + $0x238] sm:$0xff] %vm6144_vm3, %v6335_v63  ;;  %7690 = vmatprep.mubr.f32.mxu0 %v7069_v1 }
 0x390   : > { %6867 = vrot.lane.b32.xlu0 %v14100_v17, %s10848_s28  ;;  %7691 = vmatmul.mubr.f32.gmra.mxu0 %v7068_v54  ;;  %v6587_v58 = vpop.permute.xlu1 %6586  ;;  %v7081_v9 = vld [vmem:[#allocation3 + $0x230] sm:$0xff] }
 0x391   : > { %6670 = vst.msk [vmem:[#allocation3 + $0x1f0] sm:$0xff] %vm6144_vm3, %v6587_v58 }
 0x392   : > { %v6844_v3 = vpop.permute.xlu0 %6843  ;;  %6612 = vrot.lane.b32.xlu1 %v13872_v37, %s10848_s28  ;;  %v7087_v46 = vld [vmem:[#allocation3 + $0x260] sm:$0xff] }
 0x393   : > { %6927 = vst.msk [vmem:[#allocation3 + $0x1f8] sm:$0xff] %vm6144_vm3, %v6844_v3 }
 0x394   : > { %6869 = vrot.lane.b32.xlu0 %v14108_v45, %s10848_s28  ;;  %v6589_v16 = vpop.permute.xlu1 %6588  ;;  %v7086_v37 = vld [vmem:[#allocation3 + $0x258] sm:$0xff] }
 0x395   : > { %6671 = vst.msk [vmem:[#allocation3 + $0x218] sm:$0xff] %vm6144_vm3, %v6589_v16 }
 0x396   : > { %v6339_v40 = vpop.permute.xlu0 %6338  ;;  %v7082_v17 = vld [vmem:[#allocation3 + $0x238] sm:$0xff]  ;;  %6614 = vrot.lane.b32.xlu1 %v13901_v27, %s10848_s28 }
 0x397   : > { %6418 = vst.msk [vmem:[#allocation3 + $0x288] sm:$0xff] %vm6144_vm3, %v6339_v40  ;;  %7480 = vmatprep.mubr.f32.mxu1 %v7082_v17 }
 0x398   : > { %7481 = vmatmul.mubr.f32.gmra.mxu1 %v7081_v9  ;;  %6871 = vrot.lane.b32.xlu0 %v14115_v35, %s10848_s28  ;;  %v6081_v26 = vpop.permute.xlu1 %6080  ;;  %v7073_v35 = vld [vmem:[#allocation3 + $0x1f0] sm:$0xff] }
 0x399   : > { %7485 = vmatprep.mubr.f32.mxu1 %v7087_v46  ;;  %6161 = vst.msk [vmem:[#allocation3 + $0x280] sm:$0xff] %vm6144_vm3, %v6081_v26 }
 0x39a   : > { %v6846_v45 = vpop.permute.xlu0 %6845  ;;  %v7074_v38 = vld [vmem:[#allocation3 + $0x1f8] sm:$0xff]  ;;  %6616 = vrot.lane.b32.xlu1 %v13923_v55, %s10848_s28 }
 0x39b   : > { %6928 = vst.msk [vmem:[#allocation3 + $0x220] sm:$0xff] %vm6144_vm3, %v6846_v45  ;;  %7695 = vmatprep.mubr.f32.mxu0 %v7074_v38 }
 0x39c   : > { %7486 = vmatmul.mubr.f32.gmra.mxu1 %v7086_v37  ;;  %6873 = vrot.lane.b32.xlu0 %v14122_v42, %s10848_s28  ;;  %v6083_v24 = vpop.permute.xlu1 %6082  ;;  %v7078_v55 = vld [vmem:[#allocation3 + $0x218] sm:$0xff] }
 0x39d   : > { %7696 = vmatmul.mubr.f32.gmra.mxu0 %v7073_v35  ;;  %6162 = vst.msk [vmem:[#allocation3 + $0x2a8] sm:$0xff] %vm6144_vm3, %v6083_v24 }
 0x39e   : > { %v6341_v34 = vpop.permute.xlu0 %6340  ;;  %v7092_v27 = vld [vmem:[#allocation3 + $0x288] sm:$0xff]  ;;  %6618 = vrot.lane.b32.xlu1 %v13938_v39, %s10848_s28 }
 0x39f   : > { %6419 = vst.msk [vmem:[#allocation3 + $0x2b0] sm:$0xff] %vm6144_vm3, %v6341_v34  ;;  %7490 = vmatprep.mubr.f32.mxu1 %v7092_v27  ;;  %v6785_v39 = vld [vmem:[#allocation2 + $0x199] sm:$0xff] }
 0x3a0   : > { %6875 = vrot.lane.b32.xlu0 %v6783_v15, %s10848_s28  ;;  %v6085_v50 = vpop.permute.xlu1 %6084  ;;  %v7091_v22 = vld [vmem:[#allocation3 + $0x280] sm:$0xff] }
 0x3a1   : > { %6163 = vst.msk [vmem:[#allocation3 + $0x2d0] sm:$0xff] %vm6144_vm3, %v6085_v50  ;;  %7491 = vmatmul.mubr.f32.gmra.mxu1 %v7091_v22 }
 0x3a2   : > { %v6345_v42 = vpop.permute.xlu0 %6344  ;;  %v7079_v23 = vld [vmem:[#allocation3 + $0x220] sm:$0xff]  ;;  %6620 = vrot.lane.b32.xlu1 %v13940_v49, %s10848_s28 }
 0x3a3   : > { %6421 = vst.msk [vmem:[#allocation3 + $0x300] sm:$0xff] %vm6144_vm3, %v6345_v42  ;;  %7700 = vmatprep.mubr.f32.mxu0 %v7079_v23  ;;  %v6529_v49 = vld [vmem:[#allocation2 + $0x18a] sm:$0xff] }
 0x3a4   : > { %7701 = vmatmul.mubr.f32.gmra.mxu0 %v7078_v55  ;;  %6877 = vrot.lane.b32.xlu0 %v6784_v48, %s10848_s28  ;;  %v6087_v51 = vpop.permute.xlu1 %6086  ;;  %v7096_v6 = vld [vmem:[#allocation3 + $0x2a8] sm:$0xff] }
 0x3a5   : > { %6164 = vst.msk [vmem:[#allocation3 + $0x2f8] sm:$0xff] %vm6144_vm3, %v6087_v51  ;;  %v7015_v51 = vld [vmem:[#allocation3 + $0x20] sm:$0xff] }
 0x3a6   : > { %v6343_v18 = vpop.permute.xlu0 %6342  ;;  %v7097_v0 = vld [vmem:[#allocation3 + $0x2b0] sm:$0xff]  ;;  %6622 = vrot.lane.b32.xlu1 %v13956_v25, %s10848_s28 }
 0x3a7   : > { %6420 = vst.msk [vmem:[#allocation3 + $0x2d8] sm:$0xff] %vm6144_vm3, %v6343_v18  ;;  %7495 = vmatprep.mubr.f32.mxu1 %v7097_v0 }
 0x3a8   : > { %6879 = vrot.lane.b32.xlu0 %v6785_v39, %s10848_s28  ;;  %7496 = vmatmul.mubr.f32.gmra.mxu1 %v7096_v6  ;;  %v6089_v47 = vpop.permute.xlu1 %6088  ;;  %v7101_v61 = vld [vmem:[#allocation3 + $0x2d0] sm:$0xff] }
 0x3a9   : > { %6165 = vst.msk [vmem:[#allocation3 + $0x320] sm:$0xff] %vm6144_vm3, %v6089_v47 }
 0x3aa   : > { %v6347_v12 = vpop.permute.xlu0 %6346  ;;  %6624 = vrot.lane.b32.xlu1 %v6529_v49, %s10848_s28  ;;  %v7107_v44 = vld [vmem:[#allocation3 + $0x300] sm:$0xff]  ;;  %v7020_v49 = vld [vmem:[#allocation3 + $0x48] sm:$0xff] }
 0x3ab   : > { %6422 = vst.msk [vmem:[#allocation3 + $0x328] sm:$0xff] %vm6144_vm3, %v6347_v12 }
 0x3ac   : > { %6881 = vrot.lane.b32.xlu0 %v6786_v53, %s10848_s28  ;;  %v6091_v43 = vpop.permute.xlu1 %6090  ;;  %v7106_v59 = vld [vmem:[#allocation3 + $0x2f8] sm:$0xff] }
 0x3ad   : > { %6166 = vst.msk [vmem:[#allocation3 + $0x348] sm:$0xff] %vm6144_vm3, %v6091_v43 }
 0x3ae   : > { %v6349_v30 = vpop.permute.xlu0 %6348  ;;  %v7102_v28 = vld [vmem:[#allocation3 + $0x2d8] sm:$0xff] }
 0x3af   : > { %6423 = vst.msk [vmem:[#allocation3 + $0x350] sm:$0xff] %vm6144_vm3, %v6349_v30  ;;  %7500 = vmatprep.mubr.f32.mxu1 %v7102_v28  ;;  %v7025_v30 = vld [vmem:[#allocation3 + $0x70] sm:$0xff] }
 0x3b0   : > { %7501 = vmatmul.mubr.f32.gmra.mxu1 %v7101_v61  ;;  %v6093_v14 = vpop.permute.xlu1 %6092  ;;  %v7111_v29 = vld [vmem:[#allocation3 + $0x320] sm:$0xff] }
 0x3b1   : > { %7505 = vmatprep.mubr.f32.mxu1 %v7107_v44  ;;  %6167 = vst.msk [vmem:[#allocation3 + $0x370] sm:$0xff] %vm6144_vm3, %v6093_v14  ;;  %v7035_v14 = vld [vmem:[#allocation3 + $0xc0] sm:$0xff] }
 0x3b2   : > { %v6353_v25 = vpop.permute.xlu0 %6352  ;;  %v7112_v32 = vld [vmem:[#allocation3 + $0x328] sm:$0xff] }
 0x3b3   : > { %6425 = vst.msk [vmem:[#allocation3 + $0x3a0] sm:$0xff] %vm6144_vm3, %v6353_v25  ;;  %v7030_v25 = vld [vmem:[#allocation3 + $0x98] sm:$0xff] }
 0x3b4   : > { %7506 = vmatmul.mubr.f32.gmra.mxu1 %v7106_v59  ;;  %v6095_v19 = vpop.permute.xlu1 %6094  ;;  %v7116_v2 = vld [vmem:[#allocation3 + $0x348] sm:$0xff] }
 0x3b5   : > { %7510 = vmatprep.mubr.f32.mxu1 %v7112_v32  ;;  %6168 = vst.msk [vmem:[#allocation3 + $0x398] sm:$0xff] %vm6144_vm3, %v6095_v19 }
 0x3b6   : > { %v6351_v56 = vpop.permute.xlu0 %6350  ;;  %v7117_v62 = vld [vmem:[#allocation3 + $0x350] sm:$0xff] }
 0x3b7   : > { %6424 = vst.msk [vmem:[#allocation3 + $0x378] sm:$0xff] %vm6144_vm3, %v6351_v56 }
 0x3b8   : > { %7511 = vmatmul.mubr.f32.gmra.mxu1 %v7111_v29  ;;  %v6097_v20 = vpop.permute.xlu1 %6096  ;;  %v7121_v10 = vld [vmem:[#allocation3 + $0x370] sm:$0xff] }
 0x3b9   : > { %7515 = vmatprep.mubr.f32.mxu1 %v7117_v62  ;;  %6169 = vst.msk [vmem:[#allocation3 + $0x3c0] sm:$0xff] %vm6144_vm3, %v6097_v20 }
 0x3ba   : > { %v6355_v21 = vpop.permute.xlu0 %6354  ;;  %v7127_v41 = vld [vmem:[#allocation3 + $0x3a0] sm:$0xff] }
 0x3bb   : > { %6426 = vst.msk [vmem:[#allocation3 + $0x3c8] sm:$0xff] %vm6144_vm3, %v6355_v21  ;;  %v7040_v21 = vld [vmem:[#allocation3 + $0xe8] sm:$0xff] }
 0x3bc   : > { %7516 = vmatmul.mubr.f32.gmra.mxu1 %v7116_v2  ;;  %v6099_v8 = vpop.permute.xlu1 %6098  ;;  %v7126_v7 = vld [vmem:[#allocation3 + $0x398] sm:$0xff]  ;;  %v7045_v2 = vld [vmem:[#allocation3 + $0x110] sm:$0xff] }
 0x3bd   : > { %6170 = vst.msk [vmem:[#allocation3 + $0x3e8] sm:$0xff] %vm6144_vm3, %v6099_v8 }
 0x3be   : > { %v6357_v5 = vpop.permute.xlu0 %6356  ;;  %v7122_v13 = vld [vmem:[#allocation3 + $0x378] sm:$0xff] }
 0x3bf   : > { %6427 = vst.msk [vmem:[#allocation3 + $0x3f0] sm:$0xff] %vm6144_vm3, %v6357_v5  ;;  %7520 = vmatprep.mubr.f32.mxu1 %v7122_v13 }
 0x3c0   : > { %7521 = vmatmul.mubr.f32.gmra.mxu1 %v7121_v10  ;;  %v6101_v31 = vpop.permute.xlu1 %6100  ;;  %v7131_v1 = vld [vmem:[#allocation3 + $0x3c0] sm:$0xff]  ;;  %v8060_v10 = vld [vmem:[%s14655_s5 + $0x38] sm:$0xff] }
 0x3c1   : > { %7525 = vmatprep.mubr.f32.mxu1 %v7127_v41  ;;  %6171 = vst.msk [vmem:[#allocation3 + $0x410] sm:$0xff] %vm6144_vm3, %v6101_v31  ;;  %10762 = vmatprep.subr.mxu1 %v8060_v10  ;;  %v7055_v31 = vld [vmem:[#allocation3 + $0x160] sm:$0xff] }
 0x3c2   : > { %v6361_v57 = vpop.permute.xlu0 %6360  ;;  %v7132_v60 = vld [vmem:[#allocation3 + $0x3c8] sm:$0xff] }
 0x3c3   : > { %6429 = vst.msk [vmem:[#allocation3 + $0x440] sm:$0xff] %vm6144_vm3, %v6361_v57 }
 0x3c4   : > { %7526 = vmatmul.mubr.f32.gmra.mxu1 %v7126_v7  ;;  %v6103_v4 = vpop.permute.xlu1 %6102  ;;  %v7136_v58 = vld [vmem:[#allocation3 + $0x3e8] sm:$0xff]  ;;  %v7050_v7 = vld [vmem:[#allocation3 + $0x138] sm:$0xff] }
 0x3c5   : > { %7530 = vmatprep.mubr.f32.mxu1 %v7132_v60  ;;  %6172 = vst.msk [vmem:[#allocation3 + $0x438] sm:$0xff] %vm6144_vm3, %v6103_v4 }
 0x3c6   : > { %v6359_v63 = vpop.permute.xlu0 %6358  ;;  %v7137_v54 = vld [vmem:[#allocation3 + $0x3f0] sm:$0xff] }
 0x3c7   : > { %6428 = vst.msk [vmem:[#allocation3 + $0x418] sm:$0xff] %vm6144_vm3, %v6359_v63 }
 0x3c8   : > { %7531 = vmatmul.mubr.f32.gmra.mxu1 %v7131_v1  ;;  %v6591_v40 = vpop.permute.xlu1 %6590  ;;  %v7141_v16 = vld [vmem:[#allocation3 + $0x410] sm:$0xff] }
 0x3c9   : > { %7535 = vmatprep.mubr.f32.mxu1 %v7137_v54  ;;  %6672 = vst.msk [vmem:[#allocation3 + $0x240] sm:$0xff] %vm6144_vm3, %v6591_v40  ;;  %v7065_v40 = vld [vmem:[#allocation3 + $0x1b0] sm:$0xff] }
 0x3ca   : > { %v6848_v3 = vpop.permute.xlu0 %6847  ;;  %v7147_v45 = vld [vmem:[#allocation3 + $0x440] sm:$0xff] }
 0x3cb   : > { %6929 = vst.msk [vmem:[#allocation3 + $0x248] sm:$0xff] %vm6144_vm3, %v6848_v3  ;;  %v7060_v3 = vld [vmem:[#allocation3 + $0x188] sm:$0xff] }
 0x3cc   : > { %7536 = vmatmul.mubr.f32.gmra.mxu1 %v7136_v58  ;;  %v6105_v46 = vpop.permute.xlu1 %6104  ;;  %v7146_v33 = vld [vmem:[#allocation3 + $0x438] sm:$0xff]  ;;  %v14283_v58 = vld [vmem:[%s14654_s4] ss:$0 sm:$0xff] }
 0x3cd   : > { %6173 = vst.msk [vmem:[#allocation3 + $0x460] sm:$0xff] %vm6144_vm3, %v6105_v46  ;;  %v8059_v46 = vld [vmem:[%s14655_s5 + $0x30] sm:$0xff] }
 0x3ce   : > { %v6363_v17 = vpop.permute.xlu0 %6362  ;;  %v7142_v9 = vld [vmem:[#allocation3 + $0x418] sm:$0xff] }
 0x3cf   : > { %6430 = vst.msk [vmem:[#allocation3 + $0x468] sm:$0xff] %vm6144_vm3, %v6363_v17  ;;  %7540 = vmatprep.mubr.f32.mxu1 %v7142_v9 }
 0x3d0   : > { %7541 = vmatmul.mubr.f32.gmra.mxu1 %v7141_v16  ;;  %v6107_v26 = vpop.permute.xlu1 %6106  ;;  %v7083_v35 = vld [vmem:[#allocation3 + $0x240] sm:$0xff] }
 0x3d1   : > { %7545 = vmatprep.mubr.f32.mxu1 %v7147_v45  ;;  %6174 = vst.msk [vmem:[#allocation3 + $0x488] sm:$0xff] %vm6144_vm3, %v6107_v26  ;;  %v7070_v26 = vld [vmem:[#allocation3 + $0x1d8] sm:$0xff] }
 0x3d2   : > { %v6365_v38 = vpop.permute.xlu0 %6364  ;;  %v7084_v37 = vld [vmem:[#allocation3 + $0x248] sm:$0xff] }
 0x3d3   : > { %6431 = vst.msk [vmem:[#allocation3 + $0x490] sm:$0xff] %vm6144_vm3, %v6365_v38  ;;  %7705 = vmatprep.mubr.f32.mxu0 %v7084_v37 }
 0x3d4   : > { %7546 = vmatmul.mubr.f32.gmra.mxu1 %v7146_v33  ;;  %7706 = vmatmul.mubr.f32.gmra.mxu0 %v7083_v35  ;;  %v6109_v15 = vpop.permute.xlu1 %6108  ;;  %v7151_v11 = vld [vmem:[#allocation3 + $0x460] sm:$0xff] }
 0x3d5   : > { %6175 = vst.msk [vmem:[#allocation3 + $0x4b0] sm:$0xff] %vm6144_vm3, %v6109_v15 }
 0x3d6   : > { %v6367_v34 = vpop.permute.xlu0 %6366  ;;  %v7152_v27 = vld [vmem:[#allocation3 + $0x468] sm:$0xff] }
 0x3d7   : > { %6432 = vst.msk [vmem:[#allocation3 + $0x4b8] sm:$0xff] %vm6144_vm3, %v6367_v34  ;;  %7550 = vmatprep.mubr.f32.mxu1 %v7152_v27  ;;  %v7075_v34 = vld [vmem:[#allocation3 + $0x200] sm:$0xff] }
 0x3d8   : > { %7551 = vmatmul.mubr.f32.gmra.mxu1 %v7151_v11  ;;  %v6111_v23 = vpop.permute.xlu1 %6110  ;;  %v7156_v52 = vld [vmem:[#allocation3 + $0x488] sm:$0xff] }
 0x3d9   : > { %6176 = vst.msk [vmem:[#allocation3 + $0x4d8] sm:$0xff] %vm6144_vm3, %v6111_v23 }
 0x3da   : > { %v6369_v24 = vpop.permute.xlu0 %6368  ;;  %v7157_v42 = vld [vmem:[#allocation3 + $0x490] sm:$0xff] }
 0x3db   : > { %6433 = vst.msk [vmem:[#allocation3 + $0x4e0] sm:$0xff] %vm6144_vm3, %v6369_v24  ;;  %7555 = vmatprep.mubr.f32.mxu1 %v7157_v42 }
 0x3dc   : > { %7556 = vmatmul.mubr.f32.gmra.mxu1 %v7156_v52  ;;  %v6593_v36 = vpop.permute.xlu1 %6592  ;;  %v7161_v50 = vld [vmem:[#allocation3 + $0x4b0] sm:$0xff]  ;;  %v7412_v59 = vpop.f32.mrf.mxu1 }
 0x3dd   : > { %6673 = vst.msk [vmem:[#allocation3 + $0x268] sm:$0xff] %vm6144_vm3, %v6593_v36  ;;  %v7413_v45 = vadd.f32 %v14283_v58, %v7412_v59  ;;  %v7105_v59 = vld [vmem:[#allocation3 + $0x2f0] sm:$0xff] }
 0x3de   : > { %v6850_v55 = vpop.permute.xlu0 %6849  ;;  %v7162_v48 = vld [vmem:[#allocation3 + $0x4b8] sm:$0xff]  ;;  %v7414_v29 = vpop.f32.mrf.mxu1 }
 0x3df   : > { %6930 = vst.msk [vmem:[#allocation3 + $0x270] sm:$0xff] %vm6144_vm3, %v6850_v55  ;;  %7560 = vmatprep.mubr.f32.mxu1 %v7162_v48  ;;  %v7080_v55 = vld [vmem:[#allocation3 + $0x228] sm:$0xff]  ;;  %v7085_v48 = vld [vmem:[#allocation3 + $0x250] sm:$0xff] }
 0x3e0   : > { %7561 = vmatmul.mubr.f32.gmra.mxu1 %v7161_v50  ;;  %v6595_v18 = vpop.permute.xlu1 %6594  ;;  %v7166_v0 = vld [vmem:[#allocation3 + $0x4d8] sm:$0xff] }
 0x3e1   : > { %6674 = vst.msk [vmem:[#allocation3 + $0x290] sm:$0xff] %vm6144_vm3, %v6595_v18 }
 0x3e2   : > { %v6852_v22 = vpop.permute.xlu0 %6851  ;;  %v7167_v39 = vld [vmem:[#allocation3 + $0x4e0] sm:$0xff]  ;;  %v14267_v20 = vpop.f32.mrf.mxu1 }
 0x3e3   : > { %6931 = vst.msk [vmem:[#allocation3 + $0x298] sm:$0xff] %vm6144_vm3, %v6852_v22  ;;  %7565 = vmatprep.mubr.f32.mxu1 %v7167_v39  ;;  %v8058_v22 = vld [vmem:[%s14655_s5 + $0x28] sm:$0xff]  ;;  %v7418_v39 = vadd.f32 %v14283_v58, %v14267_v20 }
 0x3e4   : > { %7566 = vmatmul.mubr.f32.gmra.mxu1 %v7166_v0  ;;  %v6597_v12 = vpop.permute.xlu1 %6596  ;;  %v7088_v47 = vld [vmem:[#allocation3 + $0x268] sm:$0xff]  ;;  %v7419_v8 = vpop.f32.mrf.mxu1 }
 0x3e5   : > { %10714 = vmatprep.mubr.msk.f32.mxu1 %vm5865_vm2, %v7015_v51  ;;  %6675 = vst.msk [vmem:[#allocation3 + $0x2b8] sm:$0xff] %vm6144_vm3, %v6597_v12 }
 0x3e6   : > { %v6854_v6 = vpop.permute.xlu0 %6853  ;;  %v7089_v53 = vld [vmem:[#allocation3 + $0x270] sm:$0xff] }
 0x3e7   : > { %6932 = vst.msk [vmem:[#allocation3 + $0x2c0] sm:$0xff] %vm6144_vm3, %v6854_v6  ;;  %7710 = vmatprep.mubr.f32.mxu0 %v7089_v53  ;;  %v7090_v6 = vld [vmem:[#allocation3 + $0x278] sm:$0xff] }
 0x3e8   : > { %7711 = vmatmul.mubr.f32.gmra.mxu0 %v7088_v47  ;;  %10715 = vmatmul.mubr.msk.f32.vlgmr.msra.gmra.mxu1 %vm5865_vm2, %v7020_v49  ;;  %v6599_v43 = vpop.permute.xlu1 %6598  ;;  %v7093_v44 = vld [vmem:[#allocation3 + $0x290] sm:$0xff]  ;;  %v14278_v1 = vpop.f32.mrf.mxu1  ;;  %v7095_v47 = vld [vmem:[#allocation3 + $0x2a0] sm:$0xff] }
 0x3e9   : > { %10717 = vmatprep.mubr.msk.f32.mxu1 %vm5865_vm2, %v7025_v30  ;;  %6676 = vst.msk [vmem:[#allocation3 + $0x2e0] sm:$0xff] %vm6144_vm3, %v6599_v43  ;;  %10763 = vmatpush3.msra.mxu1 %v8060_v10  ;;  %v7423_v29 = vadd.f32 %v14283_v58, %v14278_v1 }
 0x3ea   : > { %v6856_v28 = vpop.permute.xlu0 %6855  ;;  %v7094_v61 = vld [vmem:[#allocation3 + $0x298] sm:$0xff]  ;;  %v7424_v17 = vpop.f32.mrf.mxu1  ;;  %10764 = vmatprep.subr.mxu1 %v8059_v46 }
 0x3eb   : > { %6933 = vst.msk [vmem:[#allocation3 + $0x2e8] sm:$0xff] %vm6144_vm3, %v6856_v28  ;;  %7715 = vmatprep.mubr.f32.mxu0 %v7094_v61  ;;  %10765 = vmatpush3.msra.mxu1 %v8059_v46  ;;  %v8056_v17 = vld [vmem:[%s14655_s5 + $0x18] sm:$0xff] }
 0x3ec   : > { %7716 = vmatmul.mubr.f32.gmra.mxu0 %v7093_v44  ;;  %10718 = vmatmul.mubr.msk.f32.gmra.mxu1 %vm5865_vm2, %v7030_v25  ;;  %v6601_v19 = vpop.permute.xlu1 %6600  ;;  %v7098_v62 = vld [vmem:[#allocation3 + $0x2b8] sm:$0xff]  ;;  %v7100_v25 = vld [vmem:[#allocation3 + $0x2c8] sm:$0xff] }
 0x3ed   : > { %10720 = vmatprep.mubr.msk.f32.mxu1 %vm5865_vm2, %v7035_v14  ;;  %6677 = vst.msk [vmem:[#allocation3 + $0x308] sm:$0xff] %vm6144_vm3, %v6601_v19  ;;  %10766 = vmatprep.subr.mxu1 %v8058_v22 }
 0x3ee   : > { %v6858_v32 = vpop.permute.xlu0 %6857  ;;  %v7099_v56 = vld [vmem:[#allocation3 + $0x2c0] sm:$0xff]  ;;  %v7637_v35 = vpop.f32.mrf.mxu0  ;;  %10767 = vmatpush3.msra.mxu1 %v8058_v22  ;;  %v7150_v22 = vld [vmem:[#allocation3 + $0x458] sm:$0xff] }
 0x3ef   : > { %6934 = vst.msk [vmem:[#allocation3 + $0x310] sm:$0xff] %vm6144_vm3, %v6858_v32  ;;  %7720 = vmatprep.mubr.f32.mxu0 %v7099_v56  ;;  %v14297_v27 = vadd.f32 %v7637_v35, %v7413_v45  ;;  %v8057_v56 = vld [vmem:[%s14655_s5 + $0x20] sm:$0xff]  ;;  %v7130_v45 = vld [vmem:[#allocation3 + $0x3b8] sm:$0xff] }
 0x3f0   : > { %7721 = vmatmul.mubr.f32.gmra.mxu0 %v7098_v62  ;;  %10721 = vmatmul.mubr.msk.f32.gmra.mxu1 %vm5865_vm2, %v7040_v21  ;;  %v6603_v41 = vpop.permute.xlu1 %6602  ;;  %v7103_v57 = vld [vmem:[#allocation3 + $0x2e0] sm:$0xff]  ;;  %v7639_v42 = vpop.f32.mrf.mxu0 }
 0x3f1   : > { %10723 = vmatprep.mubr.msk.f32.mxu1 %vm5865_vm2, %v7045_v2  ;;  %6678 = vst.msk [vmem:[#allocation3 + $0x330] sm:$0xff] %vm6144_vm3, %v6603_v41  ;;  %10768 = vmatprep.subr.mxu1 %v8057_v56  ;;  %v7110_v2 = vld [vmem:[#allocation3 + $0x318] sm:$0xff] }
 0x3f2   : > { %v6860_v5 = vpop.permute.xlu0 %6859  ;;  %v7104_v13 = vld [vmem:[#allocation3 + $0x2e8] sm:$0xff]  ;;  %10769 = vmatpush3.msra.mxu1 %v8057_v56 }
 0x3f3   : > { %6935 = vst.msk [vmem:[#allocation3 + $0x338] sm:$0xff] %vm6144_vm3, %v6860_v5  ;;  %7725 = vmatprep.mubr.f32.mxu0 %v7104_v13  ;;  %v7115_v13 = vld [vmem:[#allocation3 + $0x340] sm:$0xff]  ;;  %10770 = vmatprep.subr.mxu1 %v8056_v17 }
 0x3f4   : > { %7726 = vmatmul.mubr.f32.gmra.mxu0 %v7103_v57  ;;  %10724 = vmatmul.mubr.msk.f32.gmra.mxu1 %vm5865_vm2, %v7050_v7  ;;  %v6605_v4 = vpop.permute.xlu1 %6604  ;;  %v7108_v54 = vld [vmem:[#allocation3 + $0x308] sm:$0xff] }
 0x3f5   : > { %10726 = vmatprep.mubr.msk.f32.mxu1 %vm5865_vm2, %v7055_v31  ;;  %6679 = vst.msk [vmem:[#allocation3 + $0x358] sm:$0xff] %vm6144_vm3, %v6605_v4  ;;  %v7125_v4 = vld [vmem:[#allocation3 + $0x390] sm:$0xff]  ;;  %10771 = vmatpush3.msra.mxu1 %v8056_v17 }
 0x3f6   : > { %v6862_v60 = vpop.permute.xlu0 %6861  ;;  %v7109_v63 = vld [vmem:[#allocation3 + $0x310] sm:$0xff]  ;;  %v14293_v38 = vpop.f32.mrf.mxu1 }
 0x3f7   : > { %6936 = vst.msk [vmem:[#allocation3 + $0x360] sm:$0xff] %vm6144_vm3, %v6862_v60  ;;  %7730 = vmatprep.mubr.f32.mxu0 %v7109_v63  ;;  %v7642_v0 = vpop.f32.mrf.mxu0  ;;  %v7428_v7 = vadd.f32 %v14283_v58, %v14293_v38  ;;  %v7120_v63 = vld [vmem:[#allocation3 + $0x368] sm:$0xff]  ;;  %v7135_v38 = vld [vmem:[#allocation3 + $0x3e0] sm:$0xff] }
 0x3f8   : > { %7731 = vmatmul.mubr.f32.gmra.mxu0 %v7108_v54  ;;  %10727 = vmatmul.mubr.msk.f32.gmra.mxu1 %vm5865_vm2, %v7060_v3  ;;  %v6607_v37 = vpop.permute.xlu1 %6606  ;;  %v7113_v33 = vld [vmem:[#allocation3 + $0x330] sm:$0xff]  ;;  %v7429_v15 = vpop.f32.mrf.mxu1  ;;  %v14311_v53 = vadd.f32 %v7642_v0, %v7418_v39 }
 0x3f9   : > { %10729 = vmatprep.mubr.msk.f32.mxu1 %vm5865_vm2, %v7065_v40  ;;  %6680 = vst.msk [vmem:[#allocation3 + $0x380] sm:$0xff] %vm6144_vm3, %v6607_v37  ;;  %v7644_v30 = vpop.f32.mrf.mxu0  ;;  %v7140_v15 = vld [vmem:[#allocation3 + $0x408] sm:$0xff] }
 0x3fa   : > { %v6864_v9 = vpop.permute.xlu0 %6863  ;;  %v7114_v16 = vld [vmem:[#allocation3 + $0x338] sm:$0xff] }
 0x3fb   : > { %6937 = vst.msk [vmem:[#allocation3 + $0x388] sm:$0xff] %vm6144_vm3, %v6864_v9  ;;  %7735 = vmatprep.mubr.f32.mxu0 %v7114_v16 }
 0x3fc   : > { %7736 = vmatmul.mubr.f32.gmra.mxu0 %v7113_v33  ;;  %10730 = vmatmul.mubr.msk.f32.gmra.mxu1 %vm5865_vm2, %v7070_v26  ;;  %v6609_v23 = vpop.permute.xlu1 %6608  ;;  %v7118_v52 = vld [vmem:[#allocation3 + $0x358] sm:$0xff] }
 0x3fd   : > { %10732 = vmatprep.mubr.msk.f32.mxu1 %vm5865_vm2, %v7075_v34  ;;  %6681 = vst.msk [vmem:[#allocation3 + $0x3a8] sm:$0xff] %vm6144_vm3, %v6609_v23 }
 0x3fe   : > { %v6866_v11 = vpop.permute.xlu0 %6865  ;;  %v7119_v24 = vld [vmem:[#allocation3 + $0x360] sm:$0xff] }
 0x3ff   : > { %6938 = vst.msk [vmem:[#allocation3 + $0x3b0] sm:$0xff] %vm6144_vm3, %v6866_v11  ;;  %7740 = vmatprep.mubr.f32.mxu0 %v7119_v24  ;;  %v7145_v11 = vld [vmem:[#allocation3 + $0x430] sm:$0xff] }
 0x400   : > { %7741 = vmatmul.mubr.f32.gmra.mxu0 %v7118_v52  ;;  %10733 = vmatmul.mubr.msk.f32.gmra.mxu1 %vm5865_vm2, %v7080_v55  ;;  %v6611_v18 = vpop.permute.xlu1 %6610  ;;  %v7123_v51 = vld [vmem:[#allocation3 + $0x380] sm:$0xff] }
 0x401   : > { %10735 = vmatprep.mubr.msk.f32.mxu1 %vm5865_vm2, %v7085_v48  ;;  %6682 = vst.msk [vmem:[#allocation3 + $0x3d0] sm:$0xff] %vm6144_vm3, %v6611_v18  ;;  %v14313_v12 = vpop.f32.mrf.mxu1  ;;  %v8055_v52 = vld [vmem:[%s14655_s5 + $0x10] sm:$0xff] }
 0x402   : > { %v6868_v36 = vpop.permute.xlu0 %6867  ;;  %v7124_v50 = vld [vmem:[#allocation3 + $0x388] sm:$0xff]  ;;  %v7433_v55 = vadd.f32 %v14283_v58, %v14313_v12  ;;  %10772 = vmatprep.subr.mxu1 %v8055_v52  ;;  %v7155_v18 = vld [vmem:[#allocation3 + $0x480] sm:$0xff] }
 0x403   : > { %6939 = vst.msk [vmem:[#allocation3 + $0x3d8] sm:$0xff] %vm6144_vm3, %v6868_v36  ;;  %7745 = vmatprep.mubr.f32.mxu0 %v7124_v50  ;;  %v7434_v61 = vpop.f32.mrf.mxu1  ;;  %10773 = vmatpush3.msra.mxu1 %v8055_v52 }
 0x404   : > { %7746 = vmatmul.mubr.f32.gmra.mxu0 %v7123_v51  ;;  %10736 = vmatmul.mubr.msk.f32.gmra.mxu1 %vm5865_vm2, %v7090_v6  ;;  %v6613_v43 = vpop.permute.xlu1 %6612  ;;  %v7128_v44 = vld [vmem:[#allocation3 + $0x3a8] sm:$0xff] }
 0x405   : > { %10738 = vmatprep.mubr.msk.f32.mxu1 %vm5865_vm2, %v7095_v47  ;;  %6683 = vst.msk [vmem:[#allocation3 + $0x3f8] sm:$0xff] %vm6144_vm3, %v6613_v43  ;;  %v7647_v62 = vpop.f32.mrf.mxu0  ;;  %v7160_v61 = vld [vmem:[#allocation3 + $0x4a8] sm:$0xff] }
 0x406   : > { %v6870_v49 = vpop.permute.xlu0 %6869  ;;  %v7129_v28 = vld [vmem:[#allocation3 + $0x3b0] sm:$0xff]  ;;  %v14328_v20 = vadd.f32 %v7647_v62, %v7423_v29 }
 0x407   : > { %6940 = vst.msk [vmem:[#allocation3 + $0x400] sm:$0xff] %vm6144_vm3, %v6870_v49  ;;  %7750 = vmatprep.mubr.f32.mxu0 %v7129_v28  ;;  %v7649_v8 = vpop.f32.mrf.mxu0  ;;  %v7165_v49 = vld [vmem:[#allocation3 + $0x4d0] sm:$0xff] }
 0x408   : > { %7751 = vmatmul.mubr.f32.gmra.mxu0 %v7128_v44  ;;  %10739 = vmatmul.mubr.msk.f32.gmra.mxu1 %vm5865_vm2, %v7100_v25  ;;  %v6615_v19 = vpop.permute.xlu1 %6614  ;;  %v7133_v21 = vld [vmem:[#allocation3 + $0x3d0] sm:$0xff]  ;;  %v7170_v44 = vld [vmem:[#allocation3 + $0x4f8] sm:$0xff] }
 0x409   : > { %10741 = vmatprep.mubr.msk.f32.mxu1 %vm5865_vm2, %v7105_v59  ;;  %6684 = vst.msk [vmem:[#allocation3 + $0x420] sm:$0xff] %vm6144_vm3, %v6615_v19  ;;  %v14330_v5 = vpop.f32.mrf.mxu1  ;;  %v8054_v59 = vld [vmem:[%s14655_s5 + $0x8] sm:$0xff] }
 0x40a   : > { %v6872_v14 = vpop.permute.xlu0 %6871  ;;  %v7134_v32 = vld [vmem:[#allocation3 + $0x3d8] sm:$0xff]  ;;  %v7438_v25 = vadd.f32 %v14283_v58, %v14330_v5  ;;  %10774 = vmatprep.subr.mxu1 %v8054_v59 }
 0x40b   : > { %6941 = vst.msk [vmem:[#allocation3 + $0x428] sm:$0xff] %vm6144_vm3, %v6872_v14  ;;  %7755 = vmatprep.mubr.f32.mxu0 %v7134_v32  ;;  %v7439_v57 = vpop.f32.mrf.mxu1  ;;  %10775 = vmatpush3.msra.mxu1 %v8054_v59 }
 0x40c   : > { %7756 = vmatmul.mubr.f32.gmra.mxu0 %v7133_v21  ;;  %10742 = vmatmul.mubr.msk.f32.gmra.mxu1 %vm5865_vm2, %v7110_v2  ;;  %v6617_v31 = vpop.permute.xlu1 %6616  ;;  %v7138_v60 = vld [vmem:[#allocation3 + $0x3f8] sm:$0xff]  ;;  %v8053_v57 = vld [vmem:[%s14655_s5] sm:$0xff] }
 0x40d   : > { %10744 = vmatprep.mubr.msk.f32.mxu1 %vm5865_vm2, %v7115_v13  ;;  %6685 = vst.msk [vmem:[#allocation3 + $0x448] sm:$0xff] %vm6144_vm3, %v6617_v31  ;;  %v7652_v1 = vpop.f32.mrf.mxu0  ;;  %10776 = vmatprep.subr.mxu1 %v8053_v57 }
 0x40e   : > { %v6874_v10 = vpop.permute.xlu0 %6873  ;;  %v7139_v41 = vld [vmem:[#allocation3 + $0x400] sm:$0xff]  ;;  %v14339_v54 = vadd.f32 %v7652_v1, %v7428_v7  ;;  %10777 = vmatpush3.msra.mxu1 %v8053_v57 }
 0x40f   : > { %6942 = vst.msk [vmem:[#allocation3 + $0x450] sm:$0xff] %vm6144_vm3, %v6874_v10  ;;  %7760 = vmatprep.mubr.f32.mxu0 %v7139_v41  ;;  %v7654_v9 = vpop.f32.mrf.mxu0 }
 0x410   : > { %7761 = vmatmul.mubr.f32.gmra.mxu0 %v7138_v60  ;;  %10745 = vmatmul.mubr.msk.f32.gmra.mxu1 %vm5865_vm2, %v7120_v63  ;;  %v6619_v16 = vpop.permute.xlu1 %6618  ;;  %v7143_v46 = vld [vmem:[#allocation3 + $0x420] sm:$0xff] }
 0x411   : > { %10747 = vmatprep.mubr.msk.f32.mxu1 %vm5865_vm2, %v7125_v4  ;;  %6686 = vst.msk [vmem:[#allocation3 + $0x470] sm:$0xff] %vm6144_vm3, %v6619_v16  ;;  %v7442_v26 = vpop.f32.mrf.mxu1 }
 0x412   : > { %v6876_v3 = vpop.permute.xlu0 %6875  ;;  %v7144_v40 = vld [vmem:[#allocation3 + $0x428] sm:$0xff]  ;;  %v7443_v5 = vadd.f32 %v14283_v58, %v7442_v26 }
 0x413   : > { %6943 = vst.msk [vmem:[#allocation3 + $0x478] sm:$0xff] %vm6144_vm3, %v6876_v3  ;;  %7765 = vmatprep.mubr.f32.mxu0 %v7144_v40  ;;  %v7444_v24 = vpop.f32.mrf.mxu1 }
 0x414   : > { %7766 = vmatmul.mubr.f32.gmra.mxu0 %v7143_v46  ;;  %10748 = vmatmul.mubr.msk.f32.gmra.mxu1 %vm5865_vm2, %v7130_v45  ;;  %v6621_v35 = vpop.permute.xlu1 %6620  ;;  %v7148_v34 = vld [vmem:[#allocation3 + $0x448] sm:$0xff] }
 0x415   : > { %10750 = vmatprep.mubr.msk.f32.mxu1 %vm5865_vm2, %v7135_v38  ;;  %6687 = vst.msk [vmem:[#allocation3 + $0x498] sm:$0xff] %vm6144_vm3, %v6621_v35  ;;  %v7447_v48 = vpop.f32.mrf.mxu1 }
 0x416   : > { %v6878_v37 = vpop.permute.xlu0 %6877  ;;  %v7149_v33 = vld [vmem:[#allocation3 + $0x450] sm:$0xff]  ;;  %v7448_v31 = vadd.f32 %v14283_v58, %v7447_v48 }
 0x417   : > { %6944 = vst.msk [vmem:[#allocation3 + $0x4a0] sm:$0xff] %vm6144_vm3, %v6878_v37  ;;  %7770 = vmatprep.mubr.f32.mxu0 %v7149_v33  ;;  %v7449_v51 = vpop.f32.mrf.mxu1 }
 0x418   : > { %7771 = vmatmul.mubr.f32.gmra.mxu0 %v7148_v34  ;;  %10751 = vmatmul.mubr.msk.f32.gmra.mxu1 %vm5865_vm2, %v7140_v15  ;;  %v6623_v36 = vpop.permute.xlu1 %6622  ;;  %v7153_v50 = vld [vmem:[#allocation3 + $0x470] sm:$0xff] }
 0x419   : > { %10753 = vmatprep.mubr.msk.f32.mxu1 %vm5865_vm2, %v7145_v11  ;;  %6688 = vst.msk [vmem:[#allocation3 + $0x4c0] sm:$0xff] %vm6144_vm3, %v6623_v36  ;;  %v7657_v39 = vpop.f32.mrf.mxu0 }
 0x41a   : > { %v7154_v42 = vld [vmem:[#allocation3 + $0x478] sm:$0xff]  ;;  %v6880_v23 = vpop.permute.xlu0 %6879  ;;  %v14361_v0 = vadd.f32 %v7657_v39, %v7433_v55 }
 0x41b   : > { %7775 = vmatprep.mubr.f32.mxu0 %v7154_v42  ;;  %6945 = vst.msk [vmem:[#allocation3 + $0x4c8] sm:$0xff] %vm6144_vm3, %v6880_v23  ;;  %v7659_v12 = vpop.f32.mrf.mxu0 }
 0x41c   : > { %7776 = vmatmul.mubr.f32.gmra.mxu0 %v7153_v50  ;;  %10754 = vmatmul.mubr.msk.f32.gmra.mxu1 %vm5865_vm2, %v7150_v22  ;;  %v6625_v30 = vpop.permute.xlu1 %6624  ;;  %v7158_v28 = vld [vmem:[#allocation3 + $0x498] sm:$0xff] }
 0x41d   : > { %10756 = vmatprep.mubr.msk.f32.mxu1 %vm5865_vm2, %v7155_v18  ;;  %6689 = vst.msk [vmem:[#allocation3 + $0x4e8] sm:$0xff] %vm6144_vm3, %v6625_v30 }
 0x41e   : > { %v7159_v6 = vld [vmem:[#allocation3 + $0x4a0] sm:$0xff]  ;;  %v6882_v47 = vpop.permute.xlu0 %6881  ;;  %v7662_v14 = vpop.f32.mrf.mxu0 }
 0x41f   : > { %7780 = vmatprep.mubr.f32.mxu0 %v7159_v6  ;;  %6946 = vst.msk [vmem:[#allocation3 + $0x4f0] sm:$0xff] %vm6144_vm3, %v6882_v47  ;;  %v14373_v56 = vadd.f32 %v7662_v14, %v7438_v25 }
 0x420   : > { %7781 = vmatmul.mubr.f32.gmra.mxu0 %v7158_v28  ;;  %10757 = vmatmul.mubr.msk.f32.gmra.mxu1 %vm5865_vm2, %v7160_v61  ;;  %v7163_v32 = vld [vmem:[#allocation3 + $0x4c0] sm:$0xff]  ;;  %v7664_v19 = vpop.f32.mrf.mxu0 }
 0x421   : > { %10759 = vmatprep.mubr.msk.f32.mxu1 %vm5865_vm2, %v7165_v49  ;;  %v7452_v29 = vpop.f32.mrf.mxu1 }
 0x422   : > { %v7164_v43 = vld [vmem:[#allocation3 + $0x4c8] sm:$0xff]  ;;  %v7453_v40 = vadd.f32 %v14283_v58, %v7452_v29 }
 0x423   : > { %7785 = vmatprep.mubr.f32.mxu0 %v7164_v43  ;;  %v7454_v21 = vpop.f32.mrf.mxu1 }
 0x424   : > { %7786 = vmatmul.mubr.f32.gmra.mxu0 %v7163_v32  ;;  %10760 = vmatmul.mubr.msk.f32.gmra.mxu1 %vm5865_vm2, %v7170_v44  ;;  %v7168_v2 = vld [vmem:[#allocation3 + $0x4e8] sm:$0xff] }
 0x426   : > { %v7169_v62 = vld [vmem:[#allocation3 + $0x4f0] sm:$0xff] }
 0x427   : > { %7790 = vmatprep.mubr.f32.mxu0 %v7169_v62  ;;  %v7667_v13 = vpop.f32.mrf.mxu0 }
 0x428   : > { %7791 = vmatmul.mubr.f32.gmra.mxu0 %v7168_v2  ;;  %v14377_v10 = vadd.f32 %v7667_v13, %v7443_v5 }
 0x429   : > { %v7457_v8 = vpop.f32.mrf.mxu1  ;;  %v7669_v41 = vpop.f32.mrf.mxu0 }
 0x42a   : > { %v7458_v38 = vadd.f32 %v14283_v58, %v7457_v8 }
 0x42b   : > { %v7459_v7 = vpop.f32.mrf.mxu1 }
 0x42d   : > { %v7672_v60 = vpop.f32.mrf.mxu0 }
 0x42e   : > { %v14383_v63 = vadd.f32 %v7672_v60, %v7448_v31 }
 0x42f   : > { %v7674_v1 = vpop.f32.mrf.mxu0 }
 0x437   : > { %v7462_v4 = vpop.f32.mrf.mxu1 }
 0x438   : > { %v7463_v15 = vadd.f32 %v14283_v58, %v7462_v4 }
 0x439   : > { %v7464_v3 = vpop.f32.mrf.mxu1 }
 0x43b   : > { %v7467_v17 = vpop.f32.mrf.mxu1  ;;  %v7677_v9 = vpop.f32.mrf.mxu0 }
 0x43c   : > { %v14386_v16 = vadd.f32 %v7677_v9, %v7453_v40  ;;  %v7468_v55 = vadd.f32 %v14283_v58, %v7467_v17 }
 0x43d   : > { %v7469_v46 = vpop.f32.mrf.mxu1  ;;  %v7679_v45 = vpop.f32.mrf.mxu0 }
 0x441   : > { %v7472_v26 = vpop.f32.mrf.mxu1 }
 0x442   : > { %v7473_v18 = vadd.f32 %v14283_v58, %v7472_v26 }
 0x443   : > { %v7474_v34 = vpop.f32.mrf.mxu1 }
 0x444   : > { %v7682_v37 = vpop.f32.mrf.mxu0 }
 0x445   : > { %v14389_v33 = vadd.f32 %v7682_v37, %v7458_v38 }
 0x446   : > { %v7684_v35 = vpop.f32.mrf.mxu0 }
 0x449   : > { %v7477_v42 = vpop.f32.mrf.mxu1 }
 0x44a   : > { %v7478_v30 = vadd.f32 %v14283_v58, %v7477_v42 }
 0x44b   : > { %v7479_v52 = vpop.f32.mrf.mxu1 }
 0x44c   : > { %v7687_v11 = vpop.f32.mrf.mxu0 }
 0x44d   : > { %v14392_v24 = vadd.f32 %v7687_v11, %v7463_v15 }
 0x44e   : > { %v7689_v23 = vpop.f32.mrf.mxu0 }
 0x450   : > { %v7692_v48 = vpop.f32.mrf.mxu0 }
 0x451   : > { %v14395_v36 = vadd.f32 %v7692_v48, %v7468_v55 }
 0x452   : > { %v7694_v50 = vpop.f32.mrf.mxu0 }
 0x458   : > { %v14397_v22 = vpop.f32.mrf.mxu1 }
 0x45a   : > { %v7484_v39 = vpop.f32.mrf.mxu1 }
 0x45c   : > { %v14400_v51 = vpop.f32.mrf.mxu1 }
 0x45d   : > { %v7697_v6 = vpop.f32.mrf.mxu0 }
 0x45e   : > { %v14402_v47 = vadd.f32 %v7697_v6, %v7473_v18  ;;  %v7489_v12 = vpop.f32.mrf.mxu1 }
 0x45f   : > { %v7699_v49 = vpop.f32.mrf.mxu0 }
 0x461   : > { %v14407_v43 = vpop.f32.mrf.mxu1 }
 0x463   : > { %v7494_v25 = vpop.f32.mrf.mxu1 }
 0x464   : > { %v7702_v28 = vpop.f32.mrf.mxu0 }
 0x465   : > { %v14405_v61 = vadd.f32 %v7702_v28, %v7478_v30 }
 0x466   : > { %v7704_v44 = vpop.f32.mrf.mxu0 }
 0x468   : > { %v14409_v59 = vpop.f32.mrf.mxu1 }
 0x46a   : > { %v7499_v14 = vpop.f32.mrf.mxu1 }
 0x470   : > { %v14411_v32 = vpop.f32.mrf.mxu1 }
 0x472   : > { %v7504_v29 = vpop.f32.mrf.mxu1 }
 0x474   : > { %v14413_v19 = vpop.f32.mrf.mxu1 }
 0x476   : > { %v7509_v62 = vpop.f32.mrf.mxu1 }
 0x478   : > { %v14415_v21 = vpop.f32.mrf.mxu1 }
 0x47a   : > { %v7514_v2 = vpop.f32.mrf.mxu1 }
 0x47c   : > { %v14417_v5 = vpop.f32.mrf.mxu1 }
 0x47e   : > { %v7519_v13 = vpop.f32.mrf.mxu1 }
 0x480   : > { %v14419_v8 = vpop.f32.mrf.mxu1 }
 0x482   : > { %v7524_v41 = vpop.f32.mrf.mxu1 }
 0x484   : > { %v14421_v57 = vpop.f32.mrf.mxu1 }
 0x486   : > { %v7529_v7 = vpop.f32.mrf.mxu1 }
 0x488   : > { %v14423_v31 = vpop.f32.mrf.mxu1 }
 0x48a   : > { %v7534_v60 = vpop.f32.mrf.mxu1 }
 0x48c   : > { %v14425_v1 = vpop.f32.mrf.mxu1 }
 0x48e   : > { %v7539_v4 = vpop.f32.mrf.mxu1 }
 0x490   : > { %v14427_v3 = vpop.f32.mrf.mxu1 }
 0x492   : > { %v7544_v40 = vpop.f32.mrf.mxu1 }
 0x494   : > { %v14429_v17 = vpop.f32.mrf.mxu1  ;;  %v14431_v9 = vpop.f32.mrf.mxu0 }
 0x496   : > { %v7549_v46 = vpop.f32.mrf.mxu1  ;;  %v7709_v45 = vpop.f32.mrf.mxu0 }
 0x498   : > { %v14433_v38 = vpop.f32.mrf.mxu1 }
 0x49a   : > { %v7554_v37 = vpop.f32.mrf.mxu1 }
 0x49c   : > { %v14435_v26 = vpop.f32.mrf.mxu1 }
 0x49e   : > { %v7559_v35 = vpop.f32.mrf.mxu1 }
 0x4a0   : > { %v14437_v34 = vpop.f32.mrf.mxu1 }
 0x4a2   : > { %v7564_v15 = vpop.f32.mrf.mxu1 }
 0x4a4   : > { %v7567_v11 = vpop.f32.mrf.mxu1 }
 0x4a5   : > { %v14440_v42 = vadd.f32 %v14283_v58, %v7567_v11 }
 0x4a6   : > { %v7569_v23 = vpop.f32.mrf.mxu1 }
 0x4a8   : > { %v14442_v52 = vpop.f32.mrf.mxu0  ;;  %v10716_v55 = vpop.f32.mrf.mxu1 }
 0x4a9   : > { %v7868_v48 = vadd.f32 %v10716_v55, %v14311_v53 }
 0x4aa   : > { %v7714_v50 = vpop.f32.mrf.mxu0  ;;  %v7862_v39 = vpop.f32.mrf.mxu1 }
 0x4ab   : > { %v7863_v18 = vadd.f32 %v7862_v39, %v14297_v27  ;;  %v8022_v30 = vmax.f32 %v7868_v48, 0.0 }
 0x4ac   : > { %v14446_v6 = vpop.f32.mrf.mxu0  ;;  %v10719_v12 = vpop.f32.mrf.mxu1 }
 0x4ad   : > { %v8021_v49 = vmax.f32 %v7863_v18, 0.0  ;;  %v7878_v28 = vadd.f32 %v10719_v12, %v14339_v54 }
 0x4ae   : > { %v7719_v44 = vpop.f32.mrf.mxu0  ;;  %v7872_v25 = vpop.f32.mrf.mxu1 }
 0x4af   : > { %v7873_v14 = vadd.f32 %v7872_v25, %v14328_v20  ;;  %10778 = vmatprep.mubr.msk.f32.mxu1 %vm5865_vm2, %v8021_v49  ;;  %v8024_v27 = vmax.f32 %v7878_v28, 0.0  ;;  %v7488_v44 = vadd.f32 %v14283_v58, %v14400_v51 }
 0x4b0   : > { %v14451_v29 = vpop.f32.mrf.mxu0  ;;  %v10722_v53 = vpop.f32.mrf.mxu1  ;;  %10779 = vmatmul.mubr.msk.f32.vlgmr.msra.gmra.mxu1 %vm5865_vm2, %v8022_v30 }
 0x4b1   : > { %v8023_v62 = vmax.f32 %v7873_v14, 0.0  ;;  %v7888_v2 = vadd.f32 %v10722_v53, %v14373_v56 }
 0x4b2   : > { %v7724_v13 = vpop.f32.mrf.mxu0  ;;  %v7882_v41 = vpop.f32.mrf.mxu1 }
 0x4b3   : > { %v7883_v7 = vadd.f32 %v7882_v41, %v14361_v0  ;;  %10781 = vmatprep.mubr.msk.f32.mxu1 %vm5865_vm2, %v8023_v62  ;;  %v8026_v4 = vmax.f32 %v7888_v2, 0.0 }
 0x4b4   : > { %v14457_v54 = vpop.f32.mrf.mxu0  ;;  %v10725_v20 = vpop.f32.mrf.mxu1  ;;  %10782 = vmatmul.mubr.msk.f32.gmra.mxu1 %vm5865_vm2, %v8024_v27  ;;  %v7713_v27 = vadd.f32 %v14442_v52, %v7488_v44 }
 0x4b5   : > { %v8025_v60 = vmax.f32 %v7883_v7, 0.0  ;;  %v7898_v40 = vadd.f32 %v10725_v20, %v14383_v63 }
 0x4b6   : > { %v7729_v46 = vpop.f32.mrf.mxu0  ;;  %v7892_v45 = vpop.f32.mrf.mxu1 }
 0x4b7   : > { %v7893_v37 = vadd.f32 %v7892_v45, %v14377_v10  ;;  %10784 = vmatprep.mubr.msk.f32.mxu1 %vm5865_vm2, %v8025_v60  ;;  %v8028_v15 = vmax.f32 %v7898_v40, 0.0 }
 0x4b8   : > { %v7732_v56 = vpop.f32.mrf.mxu0  ;;  %v10728_v35 = vpop.f32.mrf.mxu1  ;;  %10785 = vmatmul.mubr.msk.f32.gmra.mxu1 %vm5865_vm2, %v8026_v4 }
 0x4b9   : > { %v8027_v0 = vmax.f32 %v7893_v37, 0.0  ;;  %v7908_v11 = vadd.f32 %v10728_v35, %v14389_v33 }
 0x4ba   : > { %v7734_v23 = vpop.f32.mrf.mxu0  ;;  %v7902_v55 = vpop.f32.mrf.mxu1 }
 0x4bb   : > { %v7903_v48 = vadd.f32 %v7902_v55, %v14386_v16  ;;  %10787 = vmatprep.mubr.msk.f32.mxu1 %vm5865_vm2, %v8027_v0  ;;  %v8030_v39 = vmax.f32 %v7908_v11, 0.0 }
 0x4bc   : > { %v14467_v63 = vpop.f32.mrf.mxu0  ;;  %v10731_v50 = vpop.f32.mrf.mxu1  ;;  %10788 = vmatmul.mubr.msk.f32.gmra.mxu1 %vm5865_vm2, %v8028_v15 }
 0x4bd   : > { %v8029_v10 = vmax.f32 %v7903_v48, 0.0  ;;  %v7918_v18 = vadd.f32 %v10731_v50, %v14395_v36  ;;  %v7483_v36 = vadd.f32 %v14283_v58, %v14397_v22 }
 0x4be   : > { %v7739_v12 = vpop.f32.mrf.mxu0  ;;  %v7912_v49 = vpop.f32.mrf.mxu1 }
 0x4bf   : > { %v7913_v30 = vadd.f32 %v7912_v49, %v14392_v24  ;;  %10790 = vmatprep.mubr.msk.f32.mxu1 %vm5865_vm2, %v8029_v10  ;;  %v8032_v25 = vmax.f32 %v7918_v18, 0.0  ;;  %v7708_v51 = vadd.f32 %v14431_v9, %v7483_v36 }
 0x4c0   : > { %v7742_v33 = vpop.f32.mrf.mxu0  ;;  %v10734_v28 = vpop.f32.mrf.mxu1  ;;  %10791 = vmatmul.mubr.msk.f32.gmra.mxu1 %vm5865_vm2, %v8030_v39 }
 0x4c1   : > { %v8031_v16 = vmax.f32 %v7913_v30, 0.0  ;;  %v7928_v14 = vadd.f32 %v10734_v28, %v14405_v61  ;;  %v7498_v61 = vadd.f32 %v14283_v58, %v14409_v59  ;;  %v7508_v59 = vadd.f32 %v14283_v58, %v14413_v19 }
 0x4c2   : > { %v7744_v53 = vpop.f32.mrf.mxu0  ;;  %v7922_v62 = vpop.f32.mrf.mxu1  ;;  %v7518_v19 = vadd.f32 %v14283_v58, %v14417_v5  ;;  %v7528_v5 = vadd.f32 %v14283_v58, %v14421_v57  ;;  %v7538_v57 = vadd.f32 %v14283_v58, %v14425_v1  ;;  %v7548_v1 = vadd.f32 %v14283_v58, %v14429_v17 }
 0x4c3   : > { %v7923_v24 = vadd.f32 %v7922_v62, %v14402_v47  ;;  %10793 = vmatprep.mubr.msk.f32.mxu1 %vm5865_vm2, %v8031_v16  ;;  %v8034_v7 = vmax.f32 %v7928_v14, 0.0  ;;  %v7493_v47 = vadd.f32 %v14283_v58, %v14407_v43  ;;  %v7723_v52 = vadd.f32 %v14451_v29, %v7498_v61 }
 0x4c4   : > { %v7747_v2 = vpop.f32.mrf.mxu0  ;;  %v10737_v13 = vpop.f32.mrf.mxu1  ;;  %10794 = vmatmul.mubr.msk.f32.gmra.mxu1 %vm5865_vm2, %v8032_v25  ;;  %v7503_v43 = vadd.f32 %v14283_v58, %v14411_v32  ;;  %v7733_v29 = vadd.f32 %v7732_v56, %v7508_v59  ;;  %v7513_v32 = vadd.f32 %v14283_v58, %v14415_v21  ;;  %v7743_v56 = vadd.f32 %v7742_v33, %v7518_v19 }
 0x4c5   : > { %v8033_v41 = vmax.f32 %v7923_v24, 0.0  ;;  %v7938_v20 = vadd.f32 %v10737_v13, %v7713_v27  ;;  %v7718_v9 = vadd.f32 %v14446_v6, %v7493_v47  ;;  %v7523_v21 = vadd.f32 %v14283_v58, %v14419_v8 }
 0x4c6   : > { %v7749_v60 = vpop.f32.mrf.mxu0  ;;  %v7932_v22 = vpop.f32.mrf.mxu1  ;;  %v7728_v6 = vadd.f32 %v14457_v54, %v7503_v43  ;;  %v7738_v54 = vadd.f32 %v14467_v63, %v7513_v32  ;;  %v7533_v8 = vadd.f32 %v14283_v58, %v14423_v31  ;;  %v7543_v31 = vadd.f32 %v14283_v58, %v14427_v3 }
 0x4c7   : > { %v7933_v4 = vadd.f32 %v7932_v22, %v7708_v51  ;;  %10796 = vmatprep.mubr.msk.f32.mxu1 %vm5865_vm2, %v8033_v41  ;;  %v8036_v37 = vmax.f32 %v7938_v20, 0.0  ;;  %v7748_v63 = vadd.f32 %v7747_v2, %v7523_v21  ;;  %v7558_v3 = vadd.f32 %v14283_v58, %v14435_v26  ;;  %v14544_v21 = vld [vmem:[%s14656_s6] ss:$0 sm:$0xff] }
 0x4c8   : > { %v7752_v40 = vpop.f32.mrf.mxu0  ;;  %v10740_v46 = vpop.f32.mrf.mxu1  ;;  %10797 = vmatmul.mubr.msk.f32.gmra.mxu1 %vm5865_vm2, %v8034_v7 }
 0x4c9   : > { %v8035_v45 = vmax.f32 %v7933_v4, 0.0  ;;  %v7948_v35 = vadd.f32 %v10740_v46, %v7723_v52  ;;  %v7753_v33 = vadd.f32 %v7752_v40, %v7528_v5 }
 0x4ca   : > { %v7754_v0 = vpop.f32.mrf.mxu0  ;;  %v7942_v15 = vpop.f32.mrf.mxu1 }
 0x4cb   : > { %v7943_v11 = vadd.f32 %v7942_v15, %v7718_v9  ;;  %10799 = vmatprep.mubr.msk.f32.mxu1 %vm5865_vm2, %v8035_v45  ;;  %v8038_v50 = vmax.f32 %v7948_v35, 0.0 }
 0x4cc   : > { %v7757_v23 = vpop.f32.mrf.mxu0  ;;  %v10743_v55 = vpop.f32.mrf.mxu1  ;;  %10800 = vmatmul.mubr.msk.f32.gmra.mxu1 %vm5865_vm2, %v8036_v37 }
 0x4cd   : > { %v8037_v48 = vmax.f32 %v7943_v11, 0.0  ;;  %v7958_v10 = vadd.f32 %v10743_v55, %v7733_v29  ;;  %v7758_v2 = vadd.f32 %v7757_v23, %v7533_v8  ;;  %v7553_v11 = vadd.f32 %v14283_v58, %v14433_v38 }
 0x4ce   : > { %v7759_v39 = vpop.f32.mrf.mxu0  ;;  %v7952_v18 = vpop.f32.mrf.mxu1 }
 0x4cf   : > { %v7953_v12 = vadd.f32 %v7952_v18, %v7728_v6  ;;  %10802 = vmatprep.mubr.msk.f32.mxu1 %vm5865_vm2, %v8037_v48  ;;  %v8040_v16 = vmax.f32 %v7958_v10, 0.0  ;;  %v7563_v18 = vadd.f32 %v14283_v58, %v14437_v34 }
 0x4d0   : > { %v7762_v49 = vpop.f32.mrf.mxu0  ;;  %v10746_v30 = vpop.f32.mrf.mxu1  ;;  %10803 = vmatmul.mubr.msk.f32.gmra.mxu1 %vm5865_vm2, %v8038_v50 }
 0x4d1   : > { %v8039_v28 = vmax.f32 %v7953_v12, 0.0  ;;  %v7968_v44 = vadd.f32 %v10746_v30, %v7743_v56  ;;  %v7763_v7 = vadd.f32 %v7762_v49, %v7538_v57 }
 0x4d2   : > { %v7764_v25 = vpop.f32.mrf.mxu0  ;;  %v7962_v14 = vpop.f32.mrf.mxu1 }
 0x4d3   : > { %v7963_v53 = vadd.f32 %v7962_v14, %v7738_v54  ;;  %10805 = vmatprep.mubr.msk.f32.mxu1 %vm5865_vm2, %v8039_v28  ;;  %v8042_v27 = vmax.f32 %v7968_v44, 0.0 }
 0x4d4   : > { %v7767_v62 = vpop.f32.mrf.mxu0  ;;  %v10749_v36 = vpop.f32.mrf.mxu1  ;;  %10806 = vmatmul.mubr.msk.f32.gmra.mxu1 %vm5865_vm2, %v8040_v16 }
 0x4d5   : > { %v8041_v24 = vmax.f32 %v7963_v53, 0.0  ;;  %v7978_v13 = vadd.f32 %v10749_v36, %v7753_v33  ;;  %v7768_v37 = vadd.f32 %v7767_v62, %v7543_v31 }
 0x4d6   : > { %v7769_v51 = vpop.f32.mrf.mxu0  ;;  %v7972_v41 = vpop.f32.mrf.mxu1 }
 0x4d7   : > { %v7973_v61 = vadd.f32 %v7972_v41, %v7748_v63  ;;  %10808 = vmatprep.mubr.msk.f32.mxu1 %vm5865_vm2, %v8041_v24  ;;  %v8044_v47 = vmax.f32 %v7978_v13, 0.0 }
 0x4d8   : > { %v7772_v20 = vpop.f32.mrf.mxu0  ;;  %v10752_v60 = vpop.f32.mrf.mxu1  ;;  %10809 = vmatmul.mubr.msk.f32.gmra.mxu1 %vm5865_vm2, %v8042_v27 }
 0x4d9   : > { %v8043_v22 = vmax.f32 %v7973_v61, 0.0  ;;  %v7988_v4 = vadd.f32 %v10752_v60, %v7763_v7  ;;  %v7773_v9 = vadd.f32 %v7772_v20, %v7548_v1 }
 0x4da   : > { %v7774_v52 = vpop.f32.mrf.mxu0  ;;  %v7982_v40 = vpop.f32.mrf.mxu1 }
 0x4db   : > { %v7983_v46 = vadd.f32 %v7982_v40, %v7758_v2  ;;  %10811 = vmatprep.mubr.msk.f32.mxu1 %vm5865_vm2, %v8043_v22  ;;  %v8046_v0 = vmax.f32 %v7988_v4, 0.0 }
 0x4dc   : > { %v7777_v45 = vpop.f32.mrf.mxu0  ;;  %v10755_v59 = vpop.f32.mrf.mxu1  ;;  %10812 = vmatmul.mubr.msk.f32.gmra.mxu1 %vm5865_vm2, %v8044_v47 }
 0x4dd   : > { %v8045_v35 = vmax.f32 %v7983_v46, 0.0  ;;  %v7998_v15 = vadd.f32 %v10755_v59, %v7773_v9  ;;  %v7778_v6 = vadd.f32 %v7777_v45, %v7553_v11 }
 0x4de   : > { %v7779_v17 = vpop.f32.mrf.mxu0  ;;  %v7992_v43 = vpop.f32.mrf.mxu1 }
 0x4df   : > { %v7993_v29 = vadd.f32 %v7992_v43, %v7768_v37  ;;  %10814 = vmatprep.mubr.msk.f32.mxu1 %vm5865_vm2, %v8045_v35  ;;  %v8048_v50 = vmax.f32 %v7998_v15, 0.0 }
 0x4e0   : > { %v7782_v23 = vpop.f32.mrf.mxu0  ;;  %v10758_v55 = vpop.f32.mrf.mxu1  ;;  %10815 = vmatmul.mubr.msk.f32.gmra.mxu1 %vm5865_vm2, %v8046_v0 }
 0x4e1   : > { %v8047_v48 = vmax.f32 %v7993_v29, 0.0  ;;  %v7783_v19 = vadd.f32 %v7782_v23, %v7558_v3 }
 0x4e2   : > { %v7784_v10 = vpop.f32.mrf.mxu0  ;;  %v8002_v39 = vpop.f32.mrf.mxu1 }
 0x4e3   : > { %v8008_v38 = vadd.f32 %v10758_v55, %v7783_v19  ;;  %v8003_v32 = vadd.f32 %v8002_v39, %v7778_v6  ;;  %10817 = vmatprep.mubr.msk.f32.mxu1 %vm5865_vm2, %v8047_v48 }
 0x4e4   : > { %v7787_v26 = vpop.f32.mrf.mxu0  ;;  %v10761_v12 = vpop.f32.mrf.mxu1  ;;  %10818 = vmatmul.mubr.msk.f32.gmra.mxu1 %vm5865_vm2, %v8048_v50 }
 0x4e5   : > { %v8050_v56 = vmax.f32 %v8008_v38, 0.0  ;;  %v8049_v49 = vmax.f32 %v8003_v32, 0.0  ;;  %v7788_v30 = vadd.f32 %v7787_v26, %v7563_v18 }
 0x4e6   : > { %v7789_v54 = vpop.f32.mrf.mxu0  ;;  %v8012_v28 = vpop.f32.mrf.mxu1 }
 0x4e7   : > { %v8013_v5 = vadd.f32 %v8012_v28, %v7788_v30  ;;  %10820 = vmatprep.mubr.msk.f32.mxu1 %vm5865_vm2, %v8049_v49 }
 0x4e8   : > { %v7792_v16 = vpop.f32.mrf.mxu0  ;;  %10821 = vmatmul.mubr.msk.f32.gmra.mxu1 %vm5865_vm2, %v8050_v56 }
 0x4e9   : > { %v8051_v58 = vmax.f32 %v8013_v5, 0.0  ;;  %v7793_v34 = vadd.f32 %v7792_v16, %v14440_v42 }
 0x4ea   : > { %v7794_v44 = vpop.f32.mrf.mxu0 }
 0x4eb   : > { %v8018_v25 = vadd.f32 %v10761_v12, %v7793_v34  ;;  %10823 = vmatprep.mubr.msk.f32.mxu1 %vm5865_vm2, %v8051_v58 }
 0x4ed   : > { %v8052_v14 = vmax.f32 %v8018_v25, 0.0 }
 0x4ef   : > { %10824 = vmatmul.mubr.msk.f32.gmra.mxu1 %vm5865_vm2, %v8052_v14 }
 0x570   : > { %v10780_v42 = vpop.f32.mrf.mxu1 }
 0x571   : > { %v8236_v53 = vadd.f32 %v10780_v42, %v14544_v21 }
 0x572   : > { %v8230_v33 = vpop.f32.mrf.mxu1 }
 0x573   : > { %8391 = vst.msk [vmem:[%s14549_s22 + $0x8] sm:$0xff] %vm8389_vm6, %v8236_v53  ;;  %v8231_v62 = vadd.f32 %v14544_v21, %v8230_v33 }
 0x574   : > { %v10783_v36 = vpop.f32.mrf.mxu1 }
 0x575   : > { %8390 = vst.msk [vmem:[%s14549_s22] sm:$0xff] %vm8389_vm6, %v8231_v62  ;;  %v8246_v63 = vadd.f32 %v10783_v36, %v14544_v21 }
 0x576   : > { %v8240_v24 = vpop.f32.mrf.mxu1 }
 0x577   : > { %8393 = vst.msk [vmem:[%s14549_s22 + $0x18] sm:$0xff] %vm8389_vm6, %v8246_v63  ;;  %v8241_v57 = vadd.f32 %v14544_v21, %v8240_v24 }
 0x578   : > { %v10786_v27 = vpop.f32.mrf.mxu1 }
 0x579   : > { %8392 = vst.msk [vmem:[%s14549_s22 + $0x10] sm:$0xff] %vm8389_vm6, %v8241_v57  ;;  %v8256_v13 = vadd.f32 %v10786_v27, %v14544_v21 }
 0x57a   : > { %v8250_v51 = vpop.f32.mrf.mxu1 }
 0x57b   : > { %8395 = vst.msk [vmem:[%s14549_s22 + $0x28] sm:$0xff] %vm8389_vm6, %v8256_v13  ;;  %v8251_v41 = vadd.f32 %v14544_v21, %v8250_v51 }
 0x57c   : > { %v10789_v8 = vpop.f32.mrf.mxu1 }
 0x57d   : > { %8394 = vst.msk [vmem:[%s14549_s22 + $0x20] sm:$0xff] %vm8389_vm6, %v8251_v41  ;;  %v8266_v61 = vadd.f32 %v10789_v8, %v14544_v21 }
 0x57e   : > { %v8260_v7 = vpop.f32.mrf.mxu1 }
 0x57f   : > { %8397 = vst.msk [vmem:[%s14549_s22 + $0x38] sm:$0xff] %vm8389_vm6, %v8266_v61  ;;  %v8261_v20 = vadd.f32 %v14544_v21, %v8260_v7 }
 0x580   : > { %v10792_v60 = vpop.f32.mrf.mxu1 }
 0x581   : > { %8396 = vst.msk [vmem:[%s14549_s22 + $0x30] sm:$0xff] %vm8389_vm6, %v8261_v20  ;;  %v8276_v2 = vadd.f32 %v10792_v60, %v14544_v21 }
 0x582   : > { %v8270_v22 = vpop.f32.mrf.mxu1 }
 0x583   : > { %8399 = vst.msk [vmem:[%s14549_s22 + $0x48] sm:$0xff] %vm8389_vm6, %v8276_v2  ;;  %v8271_v1 = vadd.f32 %v14544_v21, %v8270_v22 }
 0x584   : > { %v10795_v47 = vpop.f32.mrf.mxu1 }
 0x585   : > { %8398 = vst.msk [vmem:[%s14549_s22 + $0x40] sm:$0xff] %vm8389_vm6, %v8271_v1  ;;  %v8286_v4 = vadd.f32 %v10795_v47, %v14544_v21 }
 0x586   : > { %v8280_v52 = vpop.f32.mrf.mxu1 }
 0x587   : > { %8401 = vst.msk [vmem:[%s14549_s22 + $0x58] sm:$0xff] %vm8389_vm6, %v8286_v4  ;;  %v8281_v40 = vadd.f32 %v14544_v21, %v8280_v52 }
 0x588   : > { %v10798_v31 = vpop.f32.mrf.mxu1 }
 0x589   : > { %8400 = vst.msk [vmem:[%s14549_s22 + $0x50] sm:$0xff] %vm8389_vm6, %v8281_v40  ;;  %v8296_v46 = vadd.f32 %v10798_v31, %v14544_v21 }
 0x58a   : > { %v8290_v9 = vpop.f32.mrf.mxu1 }
 0x58b   : > { %8403 = vst.msk [vmem:[%s14549_s22 + $0x68] sm:$0xff] %vm8389_vm6, %v8296_v46  ;;  %v8291_v45 = vadd.f32 %v14544_v21, %v8290_v9 }
 0x58c   : > { %v10801_v59 = vpop.f32.mrf.mxu1 }
 0x58d   : > { %8402 = vst.msk [vmem:[%s14549_s22 + $0x60] sm:$0xff] %vm8389_vm6, %v8291_v45  ;;  %v8306_v37 = vadd.f32 %v10801_v59, %v14544_v21 }
 0x58e   : > { %v8300_v35 = vpop.f32.mrf.mxu1 }
 0x58f   : > { %8405 = vst.msk [vmem:[%s14549_s22 + $0x78] sm:$0xff] %vm8389_vm6, %v8306_v37  ;;  %v8301_v0 = vadd.f32 %v14544_v21, %v8300_v35 }
 0x590   : > { %v10804_v15 = vpop.f32.mrf.mxu1 }
 0x591   : > { %8404 = vst.msk [vmem:[%s14549_s22 + $0x70] sm:$0xff] %vm8389_vm6, %v8301_v0  ;;  %v8316_v17 = vadd.f32 %v10804_v15, %v14544_v21 }
 0x592   : > { %v8310_v43 = vpop.f32.mrf.mxu1 }
 0x593   : > { %8407 = vst.msk [vmem:[%s14549_s22 + $0x88] sm:$0xff] %vm8389_vm6, %v8316_v17  ;;  %v8311_v11 = vadd.f32 %v14544_v21, %v8310_v43 }
 0x594   : > { %v10807_v3 = vpop.f32.mrf.mxu1 }
 0x595   : > { %8406 = vst.msk [vmem:[%s14549_s22 + $0x80] sm:$0xff] %vm8389_vm6, %v8311_v11  ;;  %v8326_v29 = vadd.f32 %v10807_v3, %v14544_v21 }
 0x596   : > { %v8320_v23 = vpop.f32.mrf.mxu1 }
 0x597   : > { %8409 = vst.msk [vmem:[%s14549_s22 + $0x98] sm:$0xff] %vm8389_vm6, %v8326_v29  ;;  %v8321_v55 = vadd.f32 %v14544_v21, %v8320_v23 }
 0x598   : > { %v10810_v6 = vpop.f32.mrf.mxu1 }
 0x599   : > { %8408 = vst.msk [vmem:[%s14549_s22 + $0x90] sm:$0xff] %vm8389_vm6, %v8321_v55  ;;  %v8336_v48 = vadd.f32 %v10810_v6, %v14544_v21 }
 0x59a   : > { %v8330_v19 = vpop.f32.mrf.mxu1 }
 0x59b   : > { %8411 = vst.msk [vmem:[%s14549_s22 + $0xa8] sm:$0xff] %vm8389_vm6, %v8336_v48  ;;  %v8331_v50 = vadd.f32 %v14544_v21, %v8330_v19 }
 0x59c   : > { %v10813_v10 = vpop.f32.mrf.mxu1 }
 0x59d   : > { %8410 = vst.msk [vmem:[%s14549_s22 + $0xa0] sm:$0xff] %vm8389_vm6, %v8331_v50  ;;  %v8346_v39 = vadd.f32 %v10813_v10, %v14544_v21 }
 0x59e   : > { %v8340_v18 = vpop.f32.mrf.mxu1 }
 0x59f   : > { %8413 = vst.msk [vmem:[%s14549_s22 + $0xb8] sm:$0xff] %vm8389_vm6, %v8346_v39  ;;  %v8341_v38 = vadd.f32 %v14544_v21, %v8340_v18 }
 0x5a0   : > { %v10816_v32 = vpop.f32.mrf.mxu1 }
 0x5a1   : > { %8412 = vst.msk [vmem:[%s14549_s22 + $0xb0] sm:$0xff] %vm8389_vm6, %v8341_v38  ;;  %v8356_v26 = vadd.f32 %v10816_v32, %v14544_v21 }
 0x5a2   : > { %v8350_v12 = vpop.f32.mrf.mxu1 }
 0x5a3   : > { %8415 = vst.msk [vmem:[%s14549_s22 + $0xc8] sm:$0xff] %vm8389_vm6, %v8356_v26  ;;  %v8351_v56 = vadd.f32 %v14544_v21, %v8350_v12 }
 0x5a4   : > { %v10819_v49 = vpop.f32.mrf.mxu1 }
 0x5a5   : > { %8414 = vst.msk [vmem:[%s14549_s22 + $0xc0] sm:$0xff] %vm8389_vm6, %v8351_v56  ;;  %v8366_v30 = vadd.f32 %v10819_v49, %v14544_v21 }
 0x5a6   : > { %v8360_v54 = vpop.f32.mrf.mxu1 }
 0x5a7   : > { %8417 = vst.msk [vmem:[%s14549_s22 + $0xd8] sm:$0xff] %vm8389_vm6, %v8366_v30  ;;  %v8361_v28 = vadd.f32 %v14544_v21, %v8360_v54 }
 0x5a8   : > { %v10822_v5 = vpop.f32.mrf.mxu1 }
 0x5a9   : > { %8416 = vst.msk [vmem:[%s14549_s22 + $0xd0] sm:$0xff] %vm8389_vm6, %v8361_v28  ;;  %v8376_v16 = vadd.f32 %v10822_v5, %v14544_v21 }
 0x5aa   : > { %v8370_v58 = vpop.f32.mrf.mxu1 }
 0x5ab   : > { %8419 = vst.msk [vmem:[%s14549_s22 + $0xe8] sm:$0xff] %vm8389_vm6, %v8376_v16  ;;  %v8371_v34 = vadd.f32 %v14544_v21, %v8370_v58 }
 0x5ad   : > { %8418 = vst.msk [vmem:[%s14549_s22 + $0xe0] sm:$0xff] %vm8389_vm6, %v8371_v34 }
 0x5af   : > { %v10825_v44 = vpop.f32.mrf.mxu1 }
 0x5b0   : > { %v8386_v25 = vadd.f32 %v10825_v44, %v14544_v21 }
 0x5b1   : > { %v8380_v14 = vpop.f32.mrf.mxu1 }
 0x5b2   : > { %8421 = vst.msk [vmem:[%s14549_s22 + $0xf8] sm:$0xff] %vm8389_vm6, %v8386_v25  ;;  %v8381_v42 = vadd.f32 %v14544_v21, %v8380_v14 }
 0x5b4   : > { %8420 = vst.msk [vmem:[%s14549_s22 + $0xf0] sm:$0xff] %vm8389_vm6, %v8381_v42 }
 0x5b5 PF: > { %s17_s24 = sadd.s32 1, %s10845_s24  }
 0x5b6   : > { %p14_p5 = scmp.ge.s32.totalorder %s17_s24, 4  }
 0x5b8   :  { %16 = sbr.rel (!%p14_p5) target bundleno = 1 (0x1), region = 82 }

</bundles_post_ra>
